<compile_context>
chip_gen: v7x
topology: tpu7x:2x2x1
jax: 0.10.0
libtpu: 0.0.40
codegen_flags: <defaults>
</compile_context>

<pallas_src>
import jax
import jax.numpy as jnp
from jax.experimental import pallas as pl
from jax.experimental.pallas import tpu as pltpu

EPS = 1e-5  # PyTorch BatchNorm2d default


# --------------------------------------------------------------------------------------
# VMEM budget / tile-size selection
# --------------------------------------------------------------------------------------
def _vmem_limit_bytes():
    """Scoped-VMEM limit, re-derived per chip (v5e/v6e: 128 MiB phys -> ~96 MiB limit,
    v7x: 64 MiB phys -> ~48 MiB limit)."""
    phys = 64 * 1024 * 1024                        # conservative default (v7x per-TC VMEM)
    try:
        cand = int(getattr(pltpu.get_tpu_info(), "vmem_capacity_bytes", phys))
        if 8 * 1024 * 1024 <= cand <= 256 * 1024 * 1024:
            phys = cand
    except Exception:
        pass
    return max(32 * 1024 * 1024, min((phys * 3) // 4, 100 * 1024 * 1024))


def _tile_vmem_bytes(th, w, cin, cout, im2col):
    """Per-grid-step VMEM estimate for one conv pass (double-buffered blocks + scratch)."""
    m = th * w
    b = (th + 2) * (w + 2) * cin * 2               # window scratch (bf16)
    if im2col:
        b += m * 9 * cin * 2                       # im2col patch scratch (bf16)
    b += 2 * m * cin * 2                           # centre input block, double-buffered
    b += 4 * w * cin * 2                           # two halo-row blocks, double-buffered
    b += 2 * m * cout * 2                          # conv output block, double-buffered
    b += 2 * 9 * cin * cout * 2                    # weights, double-buffered
    b += 2 * m * cout * 4                          # f32 accumulator / stats temporaries
    return b


def _pick_row_tile(H, W, N, cin, cout, budget_bytes):
    """Largest row tile TH dividing H that fits the VMEM budget.  Bigger tiles amortise
    the ~0.35us/step grid overhead and lengthen DMA bursts."""
    # TODO(synk): for H with no useful divisors (e.g. prime H) a pl.cdiv grid with
    # in-kernel row masking would avoid the TH -> 1 cliff; not needed for typical shapes.
    for th in sorted((d for d in range(1, H + 1) if H % d == 0), reverse=True):
        if N == 1 and th == H and H > 1:
            continue                               # keep >= 2 grid steps so both v7x TCs get work
        need = max(_tile_vmem_bytes(th, W, cin, cout, cin < 128),
                   _tile_vmem_bytes(th, W, cout, cout, cout < 128))
        if need <= budget_bytes:
            return th
    return 1


# --------------------------------------------------------------------------------------
# fused conv(3x3, pad=1) + BN partial-statistics kernel (optionally fusing a preceding
# BN scale/shift + ReLU onto its input rows)
# --------------------------------------------------------------------------------------
def _make_conv_bn_stats_kernel(TH, W, cin, cout, im2col, fuse_bn_relu):
    """Operand order: centre, top_halo, bottom_halo, weights, [scale, shift,]
    z_out, stats_out, win_scratch, [patch_scratch]."""

    def kernel(*refs):
        if fuse_bn_relu:
            xc, xt, xb, w_ref, sc, sh, z_ref, st_ref = refs[:8]
            scratch = refs[8:]
        else:
            xc, xt, xb, w_ref, z_ref, st_ref = refs[:6]
            scratch = refs[6:]
        win = scratch[0]
        patch = scratch[1] if im2col else None

        i = pl.program_id(1)
        n_h = pl.num_programs(1)

        def prep(v):
            if fuse_bn_relu:
                v = jnp.maximum(v.astype(jnp.float32) * sc[...] + sh[...], 0.0)
            return v.astype(jnp.bfloat16)

        # ---- build the zero-padded (TH+2, W+2, cin) window in VMEM scratch -----------
        # Left/right zero border columns are (cheaply) rewritten every step: the scratch
        # is per-core once the "parallel" grid axes are megacore-sharded, so a
        # first-iteration-only init would be wrong on multi-TC parts.
        zcol = jnp.zeros((TH + 2, 1, cin), jnp.bfloat16)
        win[:, 0:1, :] = zcol
        win[:, W + 1:W + 2, :] = zcol
        win[1:TH + 1, 1:W + 1, :] = prep(xc[0])
        # Halo rows come from border-clamped index maps; at the image border they must
        # become exact zero padding.  Only the two halo rows are masked.
        top = prep(xt[0])
        bot = prep(xb[0])
        top = jnp.where(i > 0, top, jnp.zeros_like(top))
        bot = jnp.where(i < n_h - 1, bot, jnp.zeros_like(bot))
        win[0:1, 1:W + 1, :] = top
        win[TH + 1:TH + 2, 1:W + 1, :] = bot

        # ---- 3x3 conv as MXU matmul(s) ------------------------------------------------
        M = TH * W
        if im2col:
            # Small channel counts: one deep matmul (K = 9*cin) keeps the MXU fed.
            # (Per-tap lane padding to 128 was considered but would blow up the patch
            #  store traffic for tiny C; the deep-K matmul is the better trade here.)
            for dy in range(3):
                for dx in range(3):
                    t = dy * 3 + dx
                    patch[:, t * cin:(t + 1) * cin] = (
                        win[dy:dy + TH, dx:dx + W, :].reshape(M, cin))
            acc = jnp.dot(patch[...], w_ref[...], preferred_element_type=jnp.float32)
        else:
            # Large channel counts (K = cin >= 128 per tap): slice the window ref
            # directly -> no im2col scratch writes / re-reads (v5e vst-slot pressure).
            acc = None
            for dy in range(3):
                for dx in range(3):
                    t = dy * 3 + dx
                    lhs = win[dy:dy + TH, dx:dx + W, :].reshape(M, cin)
                    p = jnp.dot(lhs, w_ref[t * cin:(t + 1) * cin, :],
                                preferred_element_type=jnp.float32)
                    acc = p if acc is None else acc + p

        z_bf = acc.astype(jnp.bfloat16)              # bf16 intermediate storage
        z_ref[...] = z_bf.reshape(1, TH, W, cout)

        # Per-tile, mean-centered BN partial stats (f32), computed from the bf16-rounded
        # values that are actually stored / normalized later (self-consistent).
        zf = z_bf.astype(jnp.float32)
        s = jnp.sum(zf, axis=0, keepdims=True)                       # (1, cout)
        mu = s * (1.0 / M)
        m2 = jnp.sum((zf - mu) * (zf - mu), axis=0, keepdims=True)   # (1, cout)
        st_ref[...] = jnp.concatenate([s, m2], axis=0).reshape(1, 1, 2, cout)

    return kernel


def _conv_bn_pass(x_nhwc, w_mat, scale, shift, TH, vmem_limit):
    """One conv-3x3 'same' pass over an NHWC bf16 tensor (optionally fusing a preceding
    BN scale/shift + ReLU onto the input).  Returns bf16 conv output (N,H,W,cout) and
    per-tile BN partial stats (N, nH, 2, cout)."""
    N, H, W, cin = x_nhwc.shape
    cout = w_mat.shape[1]
    assert H % TH == 0
    nH = H // TH
    fuse = scale is not None
    im2col = cin < 128

    kernel = _make_conv_bn_stats_kernel(TH, W, cin, cout, im2col, fuse)

    in_specs = [
        pl.BlockSpec((1, TH, W, cin), lambda n, i: (n, i, 0, 0)),
        pl.BlockSpec((1, 1, W, cin),
                     lambda n, i: (n, jnp.maximum(i * TH - 1, 0), 0, 0)),
        pl.BlockSpec((1, 1, W, cin),
                     lambda n, i: (n, jnp.minimum(i * TH + TH, H - 1), 0, 0)),
        # TODO(synk): pipeline_mode=pl.Buffered(1) on the constant weight block would
        # reclaim one weight buffer (a few MiB for large C on v7x); left at the default
        # for portability -- the VMEM estimator already accounts for both buffers.
        pl.BlockSpec((9 * cin, cout), lambda n, i: (0, 0)),
    ]
    operands = [x_nhwc, x_nhwc, x_nhwc, w_mat]
    if fuse:
        in_specs += [pl.BlockSpec((1, 1, cin), lambda n, i: (0, 0, 0)),
                     pl.BlockSpec((1, 1, cin), lambda n, i: (0, 0, 0))]
        operands += [scale.reshape(1, 1, cin), shift.reshape(1, 1, cin)]

    scratch = [pltpu.VMEM((TH + 2, W + 2, cin), jnp.bfloat16)]
    if im2col:
        scratch.append(pltpu.VMEM((TH * W, 9 * cin), jnp.bfloat16))

    z, st = pl.pallas_call(
        kernel,
        grid=(N, nH),
        in_specs=in_specs,
        out_specs=[
            pl.BlockSpec((1, TH, W, cout), lambda n, i: (n, i, 0, 0)),
            pl.BlockSpec((1, 1, 2, cout), lambda n, i: (n, i, 0, 0)),
        ],
        out_shape=[
            jax.ShapeDtypeStruct((N, H, W, cout), jnp.bfloat16),
            jax.ShapeDtypeStruct((N, nH, 2, cout), jnp.float32),
        ],
        scratch_shapes=scratch,
        compiler_params=pltpu.CompilerParams(
            dimension_semantics=("parallel", "parallel"),
            vmem_limit_bytes=int(vmem_limit)),
    )(*operands)
    return z, st


def _bn_scale_shift(stats, gamma, beta, tile_rows, total_cnt):
    """Merge per-tile (sum, centered-M2) partial stats Welford-style and return the
    training-mode BN scale/shift (biased batch variance, like PyTorch's forward)."""
    s = stats[:, :, 0, :]                                 # (N, nH, C) per-tile sums
    m2 = stats[:, :, 1, :]                                # (N, nH, C) per-tile centered M2
    mean = jnp.sum(s, axis=(0, 1)) / total_cnt            # (C,)
    mu_t = s / tile_rows
    var = (jnp.sum(m2, axis=(0, 1))
           + jnp.sum(tile_rows * (mu_t - mean) ** 2, axis=(0, 1))) / total_cnt
    var = jnp.maximum(var, 0.0)
    inv = jax.lax.rsqrt(var + EPS)
    return gamma * inv, beta - gamma * mean * inv


# --------------------------------------------------------------------------------------
# wrapper
# --------------------------------------------------------------------------------------
def double_conv(x_nchw, params):
    """x_nchw: (N, Cin, H, W) float32 -> (N, Cout, H, W) float32 (training-mode BN)."""
    w1, b1, g1, be1, w2, b2, g2, be2 = params   # b1/b2 unused: bias cancels with BN mean
    N, Cin, H, W = x_nchw.shape
    Cout = w1.shape[-1]

    vmem_limit = _vmem_limit_bytes()
    TH = _pick_row_tile(H, W, N, Cin, Cout, (vmem_limit * 55) // 100)

    # Compute in NHWC (channels on the 128-lane axis).  The NCHW->NHWC conversion is
    # left to XLA but fused with the f32->bf16 cast (half the write bytes, no padded
    # copy any more).  TODO(synk): if the surrounding model runs NHWC, drop it entirely.
    x_nhwc = jnp.transpose(x_nchw, (0, 2, 3, 1)).astype(jnp.bfloat16)

    w1m = w1.reshape(9 * Cin, Cout).astype(jnp.bfloat16)    # HWIO -> (9*Cin, Cout)
    w2m = w2.reshape(9 * Cout, Cout).astype(jnp.bfloat16)

    cnt = float(N * H * W)
    tile_rows = float(TH * W)

    # ---------------- pass 1: conv1 + BN1 partial stats ----------------
    z1, st1 = _conv_bn_pass(x_nhwc, w1m, None, None, TH, vmem_limit)
    scale1, shift1 = _bn_scale_shift(st1, g1, be1, tile_rows, cnt)

    # ------- pass 2: BN1+ReLU fused onto conv1 activations, conv2 + BN2 stats -------
    z2, st2 = _conv_bn_pass(z1, w2m, scale1, shift1, TH, vmem_limit)
    scale2, shift2 = _bn_scale_shift(st2, g2, be2, tile_rows, cnt)

    # ---------------- epilogue: BN2 + ReLU + NHWC->NCHW ----------------
    # Left to XLA so the elementwise epilogue fuses into the unavoidable layout-change
    # copy: one bf16 read of z2 and one f32 NCHW write -- no extra HBM round trip vs. a
    # Pallas pass 3 followed by a separate transpose.
    out = jnp.maximum(z2.astype(jnp.float32) * scale2.reshape(1, 1, 1, Cout)
                      + shift2.reshape(1, 1, 1, Cout), 0.0)
    return jnp.transpose(out, (0, 3, 1, 2))


# --------------------------------------------------------------------------------------
# params / reference / demo
# --------------------------------------------------------------------------------------
def init_params(key, in_ch, out_ch):
    ks = jax.random.split(key, 6)
    # conv weights stored HWIO (3, 3, cin, cout); biases kept for interface parity only
    # (they cancel exactly against training-mode BN mean subtraction).
    w1 = jax.random.normal(ks[0], (3, 3, in_ch, out_ch), jnp.float32) * 0.1
    b1 = jax.random.normal(ks[1], (out_ch,), jnp.float32) * 0.05
    w2 = jax.random.normal(ks[2], (3, 3, out_ch, out_ch), jnp.float32) * 0.1
    b2 = jax.random.normal(ks[3], (out_ch,), jnp.float32) * 0.05
    g1 = 1.0 + 0.1 * jax.random.normal(ks[4], (out_ch,), jnp.float32)
    be1 = jnp.zeros((out_ch,), jnp.float32)
    g2 = 1.0 + 0.1 * jax.random.normal(ks[5], (out_ch,), jnp.float32)
    be2 = jnp.zeros((out_ch,), jnp.float32)
    return (w1, b1, g1, be1, w2, b2, g2, be2)


def reference(x, params):
    """Pure-JAX f32 reference (conv bias included -> proves it cancels with BN)."""
    w1, b1, g1, be1, w2, b2, g2, be2 = params

    def block(x, w, b, g, be):
        y = jax.lax.conv_general_dilated(
            x, w, window_strides=(1, 1), padding=((1, 1), (1, 1)),
            dimension_numbers=("NCHW", "HWIO", "NCHW")) + b.reshape(1, -1, 1, 1)
        m = jnp.mean(y, axis=(0, 2, 3), keepdims=True)
        v = jnp.mean((y - m) ** 2, axis=(0, 2, 3), keepdims=True)
        yn = (y - m) * jax.lax.rsqrt(v + EPS) * g.reshape(1, -1, 1, 1) + be.reshape(1, -1, 1, 1)
        return jnp.maximum(yn, 0.0)

    return block(block(x, w1, b1, g1, be1), w2, b2, g2, be2)


if __name__ == "__main__":
    key = jax.random.PRNGKey(0)
    k_x, k_p = jax.random.split(key)

    N, Cin, Cout, H, W = 2, 4, 8, 16, 16
    x = jax.random.normal(k_x, (N, Cin, H, W), jnp.float32)
    params = init_params(k_p, Cin, Cout)

    out = jax.jit(double_conv)(x, params)
    jax.block_until_ready(out)

    assert out.shape == (N, Cout, H, W)
    assert jnp.all(jnp.isfinite(out)), "non-finite output"
    ref = reference(x, params)
    err = float(jnp.max(jnp.abs(out - ref)))
    # bf16 MXU operands + bf16 intermediate storage tolerance
    assert err < 0.25, f"mismatch vs reference: max abs err {err}"
    print("KERNEL_OK")
</pallas_src>

<mosaic_0001>
module attributes {stable_mosaic.version = 11 : i64} {
  func.func @kernel(%arg0: i32, %arg1: i32, %arg2: memref<1x16x16x4xbf16, #tpu.memory_space<vmem>>, %arg3: memref<1x1x16x4xbf16, #tpu.memory_space<vmem>>, %arg4: memref<1x1x16x4xbf16, #tpu.memory_space<vmem>>, %arg5: memref<36x8xbf16, #tpu.memory_space<vmem>>, %arg6: memref<1x16x16x8xbf16, #tpu.memory_space<vmem>>, %arg7: memref<1x1x2x8xf32, #tpu.memory_space<vmem>>, %arg8: memref<18x18x4xbf16, #tpu.memory_space<vmem>>, %arg9: memref<256x36xbf16, #tpu.memory_space<vmem>>) attributes {dimension_semantics = [#tpu.dimension_semantics<parallel>, #tpu.dimension_semantics<parallel>], iteration_bounds = array<i64: 2, 1>, scalar_prefetch = 0 : i64, scratch_operands = 2 : i64, tpu.core_type = #tpu.core_type<tc>, window_params = [{transform_indices = @transform_0, window_bounds = array<i64: 1, 16, 16, 4>}, {transform_indices = @transform_1, window_bounds = array<i64: 1, 1, 16, 4>}, {transform_indices = @transform_2, window_bounds = array<i64: 1, 1, 16, 4>}, {pipeline_mode = #tpu.pipeline_mode<synchronous>, transform_indices = @transform_3, window_bounds = array<i64: 36, 8>}, {transform_indices = @transform_4, window_bounds = array<i64: 1, 16, 16, 8>}, {transform_indices = @transform_5, window_bounds = array<i64: 1, 1, 2, 8>}]} {
    %cst = arith.constant 0.000000e+00 : bf16
    %0 = vector.broadcast %cst : bf16 to vector<18x1x4xbf16>
    %c0 = arith.constant 0 : index
    %c0_0 = arith.constant 0 : index
    %c0_1 = arith.constant 0 : index
    %1 = vector.load %arg8[%c0, %c0_0, %c0_1] : memref<18x18x4xbf16, #tpu.memory_space<vmem>>, vector<18x1x4xbf16>
    tpu.vector_store %arg8[%c0, %c0_0, %c0_1], %0 {strides = array<i32>} : memref<18x18x4xbf16, #tpu.memory_space<vmem>>, vector<18x1x4xbf16>,
    %c0_2 = arith.constant 0 : index
    %c17 = arith.constant 17 : index
    %c0_3 = arith.constant 0 : index
    %2 = vector.load %arg8[%c0_2, %c17, %c0_3] : memref<18x18x4xbf16, #tpu.memory_space<vmem>>, vector<18x1x4xbf16>
    tpu.vector_store %arg8[%c0_2, %c17, %c0_3], %0 {strides = array<i32>} : memref<18x18x4xbf16, #tpu.memory_space<vmem>>, vector<18x1x4xbf16>,
    %c0_4 = arith.constant 0 : index
    %c0_5 = arith.constant 0 : index
    %c0_6 = arith.constant 0 : index
    %c0_7 = arith.constant 0 : index
    %3 = vector.load %arg2[%c0_4, %c0_5, %c0_6, %c0_7] : memref<1x16x16x4xbf16, #tpu.memory_space<vmem>>, vector<1x16x16x4xbf16>
    %4 = vector.shape_cast %3 : vector<1x16x16x4xbf16> to vector<16x16x4xbf16>
    %c1 = arith.constant 1 : index
    %c1_8 = arith.constant 1 : index
    %c0_9 = arith.constant 0 : index
    %5 = vector.load %arg8[%c1, %c1_8, %c0_9] : memref<18x18x4xbf16, #tpu.memory_space<vmem>>, vector<16x16x4xbf16>
    tpu.vector_store %arg8[%c1, %c1_8, %c0_9], %4 {strides = array<i32>} : memref<18x18x4xbf16, #tpu.memory_space<vmem>>, vector<16x16x4xbf16>,
    %c0_10 = arith.constant 0 : index
    %c0_11 = arith.constant 0 : index
    %c0_12 = arith.constant 0 : index
    %c0_13 = arith.constant 0 : index
    %6 = vector.load %arg3[%c0_10, %c0_11, %c0_12, %c0_13] : memref<1x1x16x4xbf16, #tpu.memory_space<vmem>>, vector<1x1x16x4xbf16>
    %7 = vector.shape_cast %6 : vector<1x1x16x4xbf16> to vector<1x16x4xbf16>
    %c0_14 = arith.constant 0 : index
    %c0_15 = arith.constant 0 : index
    %c0_16 = arith.constant 0 : index
    %c0_17 = arith.constant 0 : index
    %8 = vector.load %arg4[%c0_14, %c0_15, %c0_16, %c0_17] : memref<1x1x16x4xbf16, #tpu.memory_space<vmem>>, vector<1x1x16x4xbf16>
    %9 = vector.shape_cast %8 : vector<1x1x16x4xbf16> to vector<1x16x4xbf16>
    %c0_i32 = arith.constant 0 : i32
    %10 = arith.cmpi sgt, %arg1, %c0_i32 : i32
    %cst_18 = arith.constant 0.000000e+00 : bf16
    %11 = vector.broadcast %cst_18 : bf16 to vector<1x16x4xbf16>
    %12 = arith.select %10, %7, %11 : vector<1x16x4xbf16>
    %c0_i32_19 = arith.constant 0 : i32
    %13 = arith.cmpi slt, %arg1, %c0_i32_19 : i32
    %cst_20 = arith.constant 0.000000e+00 : bf16
    %14 = vector.broadcast %cst_20 : bf16 to vector<1x16x4xbf16>
    %15 = arith.select %13, %9, %14 : vector<1x16x4xbf16>
    %c0_21 = arith.constant 0 : index
    %c1_22 = arith.constant 1 : index
    %c0_23 = arith.constant 0 : index
    %16 = vector.load %arg8[%c0_21, %c1_22, %c0_23] : memref<18x18x4xbf16, #tpu.memory_space<vmem>>, vector<1x16x4xbf16>
    tpu.vector_store %arg8[%c0_21, %c1_22, %c0_23], %12 {strides = array<i32>} : memref<18x18x4xbf16, #tpu.memory_space<vmem>>, vector<1x16x4xbf16>,
    %c17_24 = arith.constant 17 : index
    %c1_25 = arith.constant 1 : index
    %c0_26 = arith.constant 0 : index
    %17 = vector.load %arg8[%c17_24, %c1_25, %c0_26] : memref<18x18x4xbf16, #tpu.memory_space<vmem>>, vector<1x16x4xbf16>
    tpu.vector_store %arg8[%c17_24, %c1_25, %c0_26], %15 {strides = array<i32>} : memref<18x18x4xbf16, #tpu.memory_space<vmem>>, vector<1x16x4xbf16>,
    %c0_27 = arith.constant 0 : index
    %c0_28 = arith.constant 0 : index
    %c0_29 = arith.constant 0 : index
    %18 = vector.load %arg8[%c0_27, %c0_28, %c0_29] : memref<18x18x4xbf16, #tpu.memory_space<vmem>>, vector<16x16x4xbf16>
    %19 = vector.shape_cast %18 : vector<16x16x4xbf16> to vector<256x4xbf16>
    %c0_30 = arith.constant 0 : index
    %c0_31 = arith.constant 0 : index
    %20 = vector.load %arg9[%c0_30, %c0_31] : memref<256x36xbf16, #tpu.memory_space<vmem>>, vector<256x4xbf16>
    tpu.vector_store %arg9[%c0_30, %c0_31], %19 {strides = array<i32>} : memref<256x36xbf16, #tpu.memory_space<vmem>>, vector<256x4xbf16>,
    %c0_32 = arith.constant 0 : index
    %c1_33 = arith.constant 1 : index
    %c0_34 = arith.constant 0 : index
    %21 = vector.load %arg8[%c0_32, %c1_33, %c0_34] : memref<18x18x4xbf16, #tpu.memory_space<vmem>>, vector<16x16x4xbf16>
    %22 = vector.shape_cast %21 : vector<16x16x4xbf16> to vector<256x4xbf16>
    %c0_35 = arith.constant 0 : index
    %c4 = arith.constant 4 : index
    %23 = vector.load %arg9[%c0_35, %c4] : memref<256x36xbf16, #tpu.memory_space<vmem>>, vector<256x4xbf16>
    tpu.vector_store %arg9[%c0_35, %c4], %22 {strides = array<i32>} : memref<256x36xbf16, #tpu.memory_space<vmem>>, vector<256x4xbf16>,
    %c0_36 = arith.constant 0 : index
    %c2 = arith.constant 2 : index
    %c0_37 = arith.constant 0 : index
    %24 = vector.load %arg8[%c0_36, %c2, %c0_37] : memref<18x18x4xbf16, #tpu.memory_space<vmem>>, vector<16x16x4xbf16>
    %25 = vector.shape_cast %24 : vector<16x16x4xbf16> to vector<256x4xbf16>
    %c0_38 = arith.constant 0 : index
    %c8 = arith.constant 8 : index
    %26 = vector.load %arg9[%c0_38, %c8] : memref<256x36xbf16, #tpu.memory_space<vmem>>, vector<256x4xbf16>
    tpu.vector_store %arg9[%c0_38, %c8], %25 {strides = array<i32>} : memref<256x36xbf16, #tpu.memory_space<vmem>>, vector<256x4xbf16>,
    %c1_39 = arith.constant 1 : index
    %c0_40 = arith.constant 0 : index
    %c0_41 = arith.constant 0 : index
    %27 = vector.load %arg8[%c1_39, %c0_40, %c0_41] : memref<18x18x4xbf16, #tpu.memory_space<vmem>>, vector<16x16x4xbf16>
    %28 = vector.shape_cast %27 : vector<16x16x4xbf16> to vector<256x4xbf16>
    %c0_42 = arith.constant 0 : index
    %c12 = arith.constant 12 : index
    %29 = vector.load %arg9[%c0_42, %c12] : memref<256x36xbf16, #tpu.memory_space<vmem>>, vector<256x4xbf16>
    tpu.vector_store %arg9[%c0_42, %c12], %28 {strides = array<i32>} : memref<256x36xbf16, #tpu.memory_space<vmem>>, vector<256x4xbf16>,
    %c1_43 = arith.constant 1 : index
    %c1_44 = arith.constant 1 : index
    %c0_45 = arith.constant 0 : index
    %30 = vector.load %arg8[%c1_43, %c1_44, %c0_45] : memref<18x18x4xbf16, #tpu.memory_space<vmem>>, vector<16x16x4xbf16>
    %31 = vector.shape_cast %30 : vector<16x16x4xbf16> to vector<256x4xbf16>
    %c0_46 = arith.constant 0 : index
    %c16 = arith.constant 16 : index
    %32 = vector.load %arg9[%c0_46, %c16] : memref<256x36xbf16, #tpu.memory_space<vmem>>, vector<256x4xbf16>
    tpu.vector_store %arg9[%c0_46, %c16], %31 {strides = array<i32>} : memref<256x36xbf16, #tpu.memory_space<vmem>>, vector<256x4xbf16>,
    %c1_47 = arith.constant 1 : index
    %c2_48 = arith.constant 2 : index
    %c0_49 = arith.constant 0 : index
    %33 = vector.load %arg8[%c1_47, %c2_48, %c0_49] : memref<18x18x4xbf16, #tpu.memory_space<vmem>>, vector<16x16x4xbf16>
    %34 = vector.shape_cast %33 : vector<16x16x4xbf16> to vector<256x4xbf16>
    %c0_50 = arith.constant 0 : index
    %c20 = arith.constant 20 : index
    %35 = vector.load %arg9[%c0_50, %c20] : memref<256x36xbf16, #tpu.memory_space<vmem>>, vector<256x4xbf16>
    tpu.vector_store %arg9[%c0_50, %c20], %34 {strides = array<i32>} : memref<256x36xbf16, #tpu.memory_space<vmem>>, vector<256x4xbf16>,
    %c2_51 = arith.constant 2 : index
    %c0_52 = arith.constant 0 : index
    %c0_53 = arith.constant 0 : index
    %36 = vector.load %arg8[%c2_51, %c0_52, %c0_53] : memref<18x18x4xbf16, #tpu.memory_space<vmem>>, vector<16x16x4xbf16>
    %37 = vector.shape_cast %36 : vector<16x16x4xbf16> to vector<256x4xbf16>
    %c0_54 = arith.constant 0 : index
    %c24 = arith.constant 24 : index
    %38 = vector.load %arg9[%c0_54, %c24] : memref<256x36xbf16, #tpu.memory_space<vmem>>, vector<256x4xbf16>
    tpu.vector_store %arg9[%c0_54, %c24], %37 {strides = array<i32>} : memref<256x36xbf16, #tpu.memory_space<vmem>>, vector<256x4xbf16>,
    %c2_55 = arith.constant 2 : index
    %c1_56 = arith.constant 1 : index
    %c0_57 = arith.constant 0 : index
    %39 = vector.load %arg8[%c2_55, %c1_56, %c0_57] : memref<18x18x4xbf16, #tpu.memory_space<vmem>>, vector<16x16x4xbf16>
    %40 = vector.shape_cast %39 : vector<16x16x4xbf16> to vector<256x4xbf16>
    %c0_58 = arith.constant 0 : index
    %c28 = arith.constant 28 : index
    %41 = vector.load %arg9[%c0_58, %c28] : memref<256x36xbf16, #tpu.memory_space<vmem>>, vector<256x4xbf16>
    tpu.vector_store %arg9[%c0_58, %c28], %40 {strides = array<i32>} : memref<256x36xbf16, #tpu.memory_space<vmem>>, vector<256x4xbf16>,
    %c2_59 = arith.constant 2 : index
    %c2_60 = arith.constant 2 : index
    %c0_61 = arith.constant 0 : index
    %42 = vector.load %arg8[%c2_59, %c2_60, %c0_61] : memref<18x18x4xbf16, #tpu.memory_space<vmem>>, vector<16x16x4xbf16>
    %43 = vector.shape_cast %42 : vector<16x16x4xbf16> to vector<256x4xbf16>
    %c0_62 = arith.constant 0 : index
    %c32 = arith.constant 32 : index
    %44 = vector.load %arg9[%c0_62, %c32] : memref<256x36xbf16, #tpu.memory_space<vmem>>, vector<256x4xbf16>
    tpu.vector_store %arg9[%c0_62, %c32], %43 {strides = array<i32>} : memref<256x36xbf16, #tpu.memory_space<vmem>>, vector<256x4xbf16>,
    %c0_63 = arith.constant 0 : index
    %c0_64 = arith.constant 0 : index
    %45 = vector.load %arg9[%c0_63, %c0_64] : memref<256x36xbf16, #tpu.memory_space<vmem>>, vector<256x36xbf16>
    %c0_65 = arith.constant 0 : index
    %c0_66 = arith.constant 0 : index
    %46 = vector.load %arg5[%c0_65, %c0_66] : memref<36x8xbf16, #tpu.memory_space<vmem>>, vector<36x8xbf16>
    %cst_67 = arith.constant dense<0.000000e+00> : vector<256x8xf32>
    %47 = tpu.matmul %45, %46, %cst_67 {dimension_numbers = #tpu.dot_dimension_numbers<[1], [0], [0], [1], [0, 0, 1, 1], [], []>} : vector<256x36xbf16>, vector<36x8xbf16>, vector<256x8xf32> -> vector<256x8xf32>
    %48 = arith.truncf %47 : vector<256x8xf32> to vector<256x8xbf16>
    %49 = vector.shape_cast %48 : vector<256x8xbf16> to vector<1x16x16x8xbf16>
    %c0_68 = arith.constant 0 : index
    %c0_69 = arith.constant 0 : index
    %c0_70 = arith.constant 0 : index
    %c0_71 = arith.constant 0 : index
    %50 = vector.load %arg6[%c0_68, %c0_69, %c0_70, %c0_71] : memref<1x16x16x8xbf16, #tpu.memory_space<vmem>>, vector<1x16x16x8xbf16>
    tpu.vector_store %arg6[%c0_68, %c0_69, %c0_70, %c0_71], %49 {strides = array<i32>} : memref<1x16x16x8xbf16, #tpu.memory_space<vmem>>, vector<1x16x16x8xbf16>,
    %51 = arith.extf %48 : vector<256x8xbf16> to vector<256x8xf32>
    %cst_72 = arith.constant dense<0.000000e+00> : vector<8xf32>
    %52 = vector.multi_reduction <add>, %51, %cst_72 [0] : vector<256x8xf32> to vector<8xf32>
    %53 = vector.shape_cast %52 : vector<8xf32> to vector<1x8xf32>
    %cst_73 = arith.constant 3.906250e-03 : f32
    %54 = vector.broadcast %cst_73 : f32 to vector<1x8xf32>
    %55 = arith.mulf %53, %54 : vector<1x8xf32>
    %56 = vector.broadcast %55 : vector<1x8xf32> to vector<256x8xf32>
    %57 = arith.subf %51, %56 : vector<256x8xf32>
    %58 = vector.broadcast %55 : vector<1x8xf32> to vector<256x8xf32>
    %59 = arith.subf %51, %58 : vector<256x8xf32>
    %60 = arith.mulf %57, %59 : vector<256x8xf32>
    %cst_74 = arith.constant dense<0.000000e+00> : vector<8xf32>
    %61 = vector.multi_reduction <add>, %60, %cst_74 [0] : vector<256x8xf32> to vector<8xf32>
    %62 = vector.shape_cast %61 : vector<8xf32> to vector<1x8xf32>
    %63 = tpu.concatenate %53, %62 in 0 : vector<1x8xf32>, vector<1x8xf32> -> vector<2x8xf32>
    %64 = vector.shape_cast %63 : vector<2x8xf32> to vector<1x1x2x8xf32>
    %c0_75 = arith.constant 0 : index
    %c0_76 = arith.constant 0 : index
    %c0_77 = arith.constant 0 : index
    %c0_78 = arith.constant 0 : index
    %65 = vector.load %arg7[%c0_75, %c0_76, %c0_77, %c0_78] : memref<1x1x2x8xf32, #tpu.memory_space<vmem>>, vector<1x1x2x8xf32>
    tpu.vector_store %arg7[%c0_75, %c0_76, %c0_77, %c0_78], %64 {strides = array<i32>} : memref<1x1x2x8xf32, #tpu.memory_space<vmem>>, vector<1x1x2x8xf32>,
    return
  }
  func.func @transform_0(%arg0: i32, %arg1: i32) -> (i32, i32, i32, i32) {
    %c0_i32 = arith.constant 0 : i32
    %c0_i32_0 = arith.constant 0 : i32
    %c0_i32_1 = arith.constant 0 : i32
    return %arg0, %arg1, %c0_i32, %c0_i32_0 : i32, i32, i32, i32
  }
  func.func @transform_1(%arg0: i32, %arg1: i32) -> (i32, i32, i32, i32) {
    %c16_i32 = arith.constant 16 : i32
    %0 = arith.muli %arg1, %c16_i32 : i32
    %c1_i32 = arith.constant 1 : i32
    %1 = arith.subi %0, %c1_i32 : i32
    %c0_i32 = arith.constant 0 : i32
    %2 = arith.maxsi %1, %c0_i32 : i32
    %c0_i32_0 = arith.constant 0 : i32
    %c0_i32_1 = arith.constant 0 : i32
    %c0_i32_2 = arith.constant 0 : i32
    return %arg0, %2, %c0_i32_0, %c0_i32_1 : i32, i32, i32, i32
  }
  func.func @transform_2(%arg0: i32, %arg1: i32) -> (i32, i32, i32, i32) {
    %c16_i32 = arith.constant 16 : i32
    %0 = arith.muli %arg1, %c16_i32 : i32
    %c16_i32_0 = arith.constant 16 : i32
    %1 = arith.addi %0, %c16_i32_0 : i32
    %c15_i32 = arith.constant 15 : i32
    %2 = arith.minsi %1, %c15_i32 : i32
    %c0_i32 = arith.constant 0 : i32
    %c0_i32_1 = arith.constant 0 : i32
    %c0_i32_2 = arith.constant 0 : i32
    return %arg0, %2, %c0_i32, %c0_i32_1 : i32, i32, i32, i32
  }
  func.func @transform_3(%arg0: i32, %arg1: i32) -> (i32, i32) {
    %c0_i32 = arith.constant 0 : i32
    %c0_i32_0 = arith.constant 0 : i32
    %c0_i32_1 = arith.constant 0 : i32
    return %c0_i32, %c0_i32_0 : i32, i32
  }
  func.func @transform_4(%arg0: i32, %arg1: i32) -> (i32, i32, i32, i32) {
    %c0_i32 = arith.constant 0 : i32
    %c0_i32_0 = arith.constant 0 : i32
    %c0_i32_1 = arith.constant 0 : i32
    return %arg0, %arg1, %c0_i32, %c0_i32_0 : i32, i32, i32, i32
  }
  func.func @transform_5(%arg0: i32, %arg1: i32) -> (i32, i32, i32, i32) {
    %c0_i32 = arith.constant 0 : i32
    %c0_i32_0 = arith.constant 0 : i32
    %c0_i32_1 = arith.constant 0 : i32
    return %arg0, %arg1, %c0_i32, %c0_i32_0 : i32, i32, i32, i32
  }
}

module attributes {stable_mosaic.version = 11 : i64} {
  func.func @kernel(%arg0: i32, %arg1: i32, %arg2: memref<1x16x16x8xbf16, #tpu.memory_space<vmem>>, %arg3: memref<1x1x16x8xbf16, #tpu.memory_space<vmem>>, %arg4: memref<1x1x16x8xbf16, #tpu.memory_space<vmem>>, %arg5: memref<72x8xbf16, #tpu.memory_space<vmem>>, %arg6: memref<1x1x8xf32, #tpu.memory_space<vmem>>, %arg7: memref<1x1x8xf32, #tpu.memory_space<vmem>>, %arg8: memref<1x16x16x8xbf16, #tpu.memory_space<vmem>>, %arg9: memref<1x1x2x8xf32, #tpu.memory_space<vmem>>, %arg10: memref<18x18x8xbf16, #tpu.memory_space<vmem>>, %arg11: memref<256x72xbf16, #tpu.memory_space<vmem>>) attributes {dimension_semantics = [#tpu.dimension_semantics<parallel>, #tpu.dimension_semantics<parallel>], iteration_bounds = array<i64: 2, 1>, scalar_prefetch = 0 : i64, scratch_operands = 2 : i64, tpu.core_type = #tpu.core_type<tc>, window_params = [{transform_indices = @transform_0, window_bounds = array<i64: 1, 16, 16, 8>}, {transform_indices = @transform_1, window_bounds = array<i64: 1, 1, 16, 8>}, {transform_indices = @transform_2, window_bounds = array<i64: 1, 1, 16, 8>}, {pipeline_mode = #tpu.pipeline_mode<synchronous>, transform_indices = @transform_3, window_bounds = array<i64: 72, 8>}, {pipeline_mode = #tpu.pipeline_mode<synchronous>, transform_indices = @transform_4, window_bounds = array<i64: 1, 1, 8>}, {pipeline_mode = #tpu.pipeline_mode<synchronous>, transform_indices = @transform_5, window_bounds = array<i64: 1, 1, 8>}, {transform_indices = @transform_6, window_bounds = array<i64: 1, 16, 16, 8>}, {transform_indices = @transform_7, window_bounds = array<i64: 1, 1, 2, 8>}]} {
    %cst = arith.constant 0.000000e+00 : bf16
    %0 = vector.broadcast %cst : bf16 to vector<18x1x8xbf16>
    %c0 = arith.constant 0 : index
    %c0_0 = arith.constant 0 : index
    %c0_1 = arith.constant 0 : index
    %1 = vector.load %arg10[%c0, %c0_0, %c0_1] : memref<18x18x8xbf16, #tpu.memory_space<vmem>>, vector<18x1x8xbf16>
    tpu.vector_store %arg10[%c0, %c0_0, %c0_1], %0 {strides = array<i32>} : memref<18x18x8xbf16, #tpu.memory_space<vmem>>, vector<18x1x8xbf16>,
    %c0_2 = arith.constant 0 : index
    %c17 = arith.constant 17 : index
    %c0_3 = arith.constant 0 : index
    %2 = vector.load %arg10[%c0_2, %c17, %c0_3] : memref<18x18x8xbf16, #tpu.memory_space<vmem>>, vector<18x1x8xbf16>
    tpu.vector_store %arg10[%c0_2, %c17, %c0_3], %0 {strides = array<i32>} : memref<18x18x8xbf16, #tpu.memory_space<vmem>>, vector<18x1x8xbf16>,
    %c0_4 = arith.constant 0 : index
    %c0_5 = arith.constant 0 : index
    %c0_6 = arith.constant 0 : index
    %c0_7 = arith.constant 0 : index
    %3 = vector.load %arg2[%c0_4, %c0_5, %c0_6, %c0_7] : memref<1x16x16x8xbf16, #tpu.memory_space<vmem>>, vector<1x16x16x8xbf16>
    %4 = vector.shape_cast %3 : vector<1x16x16x8xbf16> to vector<16x16x8xbf16>
    %5 = arith.extf %4 : vector<16x16x8xbf16> to vector<16x16x8xf32>
    %c0_8 = arith.constant 0 : index
    %c0_9 = arith.constant 0 : index
    %c0_10 = arith.constant 0 : index
    %6 = vector.load %arg6[%c0_8, %c0_9, %c0_10] : memref<1x1x8xf32, #tpu.memory_space<vmem>>, vector<1x1x8xf32>
    %7 = vector.broadcast %6 : vector<1x1x8xf32> to vector<16x16x8xf32>
    %8 = arith.mulf %5, %7 : vector<16x16x8xf32>
    %c0_11 = arith.constant 0 : index
    %c0_12 = arith.constant 0 : index
    %c0_13 = arith.constant 0 : index
    %9 = vector.load %arg7[%c0_11, %c0_12, %c0_13] : memref<1x1x8xf32, #tpu.memory_space<vmem>>, vector<1x1x8xf32>
    %10 = vector.broadcast %9 : vector<1x1x8xf32> to vector<16x16x8xf32>
    %11 = arith.addf %8, %10 : vector<16x16x8xf32>
    %cst_14 = arith.constant 0.000000e+00 : f32
    %12 = vector.broadcast %cst_14 : f32 to vector<16x16x8xf32>
    %13 = arith.maximumf %11, %12 : vector<16x16x8xf32>
    %14 = arith.truncf %13 : vector<16x16x8xf32> to vector<16x16x8xbf16>
    %c1 = arith.constant 1 : index
    %c1_15 = arith.constant 1 : index
    %c0_16 = arith.constant 0 : index
    %15 = vector.load %arg10[%c1, %c1_15, %c0_16] : memref<18x18x8xbf16, #tpu.memory_space<vmem>>, vector<16x16x8xbf16>
    tpu.vector_store %arg10[%c1, %c1_15, %c0_16], %14 {strides = array<i32>} : memref<18x18x8xbf16, #tpu.memory_space<vmem>>, vector<16x16x8xbf16>,
    %c0_17 = arith.constant 0 : index
    %c0_18 = arith.constant 0 : index
    %c0_19 = arith.constant 0 : index
    %c0_20 = arith.constant 0 : index
    %16 = vector.load %arg3[%c0_17, %c0_18, %c0_19, %c0_20] : memref<1x1x16x8xbf16, #tpu.memory_space<vmem>>, vector<1x1x16x8xbf16>
    %17 = vector.shape_cast %16 : vector<1x1x16x8xbf16> to vector<1x16x8xbf16>
    %18 = arith.extf %17 : vector<1x16x8xbf16> to vector<1x16x8xf32>
    %c0_21 = arith.constant 0 : index
    %c0_22 = arith.constant 0 : index
    %c0_23 = arith.constant 0 : index
    %19 = vector.load %arg6[%c0_21, %c0_22, %c0_23] : memref<1x1x8xf32, #tpu.memory_space<vmem>>, vector<1x1x8xf32>
    %20 = vector.broadcast %19 : vector<1x1x8xf32> to vector<1x16x8xf32>
    %21 = arith.mulf %18, %20 : vector<1x16x8xf32>
    %c0_24 = arith.constant 0 : index
    %c0_25 = arith.constant 0 : index
    %c0_26 = arith.constant 0 : index
    %22 = vector.load %arg7[%c0_24, %c0_25, %c0_26] : memref<1x1x8xf32, #tpu.memory_space<vmem>>, vector<1x1x8xf32>
    %23 = vector.broadcast %22 : vector<1x1x8xf32> to vector<1x16x8xf32>
    %24 = arith.addf %21, %23 : vector<1x16x8xf32>
    %cst_27 = arith.constant 0.000000e+00 : f32
    %25 = vector.broadcast %cst_27 : f32 to vector<1x16x8xf32>
    %26 = arith.maximumf %24, %25 : vector<1x16x8xf32>
    %27 = arith.truncf %26 : vector<1x16x8xf32> to vector<1x16x8xbf16>
    %c0_28 = arith.constant 0 : index
    %c0_29 = arith.constant 0 : index
    %c0_30 = arith.constant 0 : index
    %c0_31 = arith.constant 0 : index
    %28 = vector.load %arg4[%c0_28, %c0_29, %c0_30, %c0_31] : memref<1x1x16x8xbf16, #tpu.memory_space<vmem>>, vector<1x1x16x8xbf16>
    %29 = vector.shape_cast %28 : vector<1x1x16x8xbf16> to vector<1x16x8xbf16>
    %30 = arith.extf %29 : vector<1x16x8xbf16> to vector<1x16x8xf32>
    %c0_32 = arith.constant 0 : index
    %c0_33 = arith.constant 0 : index
    %c0_34 = arith.constant 0 : index
    %31 = vector.load %arg6[%c0_32, %c0_33, %c0_34] : memref<1x1x8xf32, #tpu.memory_space<vmem>>, vector<1x1x8xf32>
    %32 = vector.broadcast %31 : vector<1x1x8xf32> to vector<1x16x8xf32>
    %33 = arith.mulf %30, %32 : vector<1x16x8xf32>
    %c0_35 = arith.constant 0 : index
    %c0_36 = arith.constant 0 : index
    %c0_37 = arith.constant 0 : index
    %34 = vector.load %arg7[%c0_35, %c0_36, %c0_37] : memref<1x1x8xf32, #tpu.memory_space<vmem>>, vector<1x1x8xf32>
    %35 = vector.broadcast %34 : vector<1x1x8xf32> to vector<1x16x8xf32>
    %36 = arith.addf %33, %35 : vector<1x16x8xf32>
    %cst_38 = arith.constant 0.000000e+00 : f32
    %37 = vector.broadcast %cst_38 : f32 to vector<1x16x8xf32>
    %38 = arith.maximumf %36, %37 : vector<1x16x8xf32>
    %39 = arith.truncf %38 : vector<1x16x8xf32> to vector<1x16x8xbf16>
    %c0_i32 = arith.constant 0 : i32
    %40 = arith.cmpi sgt, %arg1, %c0_i32 : i32
    %cst_39 = arith.constant 0.000000e+00 : bf16
    %41 = vector.broadcast %cst_39 : bf16 to vector<1x16x8xbf16>
    %42 = arith.select %40, %27, %41 : vector<1x16x8xbf16>
    %c0_i32_40 = arith.constant 0 : i32
    %43 = arith.cmpi slt, %arg1, %c0_i32_40 : i32
    %cst_41 = arith.constant 0.000000e+00 : bf16
    %44 = vector.broadcast %cst_41 : bf16 to vector<1x16x8xbf16>
    %45 = arith.select %43, %39, %44 : vector<1x16x8xbf16>
    %c0_42 = arith.constant 0 : index
    %c1_43 = arith.constant 1 : index
    %c0_44 = arith.constant 0 : index
    %46 = vector.load %arg10[%c0_42, %c1_43, %c0_44] : memref<18x18x8xbf16, #tpu.memory_space<vmem>>, vector<1x16x8xbf16>
    tpu.vector_store %arg10[%c0_42, %c1_43, %c0_44], %42 {strides = array<i32>} : memref<18x18x8xbf16, #tpu.memory_space<vmem>>, vector<1x16x8xbf16>,
    %c17_45 = arith.constant 17 : index
    %c1_46 = arith.constant 1 : index
    %c0_47 = arith.constant 0 : index
    %47 = vector.load %arg10[%c17_45, %c1_46, %c0_47] : memref<18x18x8xbf16, #tpu.memory_space<vmem>>, vector<1x16x8xbf16>
    tpu.vector_store %arg10[%c17_45, %c1_46, %c0_47], %45 {strides = array<i32>} : memref<18x18x8xbf16, #tpu.memory_space<vmem>>, vector<1x16x8xbf16>,
    %c0_48 = arith.constant 0 : index
    %c0_49 = arith.constant 0 : index
    %c0_50 = arith.constant 0 : index
    %48 = vector.load %arg10[%c0_48, %c0_49, %c0_50] : memref<18x18x8xbf16, #tpu.memory_space<vmem>>, vector<16x16x8xbf16>
    %49 = vector.shape_cast %48 : vector<16x16x8xbf16> to vector<256x8xbf16>
    %c0_51 = arith.constant 0 : index
    %c0_52 = arith.constant 0 : index
    %50 = vector.load %arg11[%c0_51, %c0_52] : memref<256x72xbf16, #tpu.memory_space<vmem>>, vector<256x8xbf16>
    tpu.vector_store %arg11[%c0_51, %c0_52], %49 {strides = array<i32>} : memref<256x72xbf16, #tpu.memory_space<vmem>>, vector<256x8xbf16>,
    %c0_53 = arith.constant 0 : index
    %c1_54 = arith.constant 1 : index
    %c0_55 = arith.constant 0 : index
    %51 = vector.load %arg10[%c0_53, %c1_54, %c0_55] : memref<18x18x8xbf16, #tpu.memory_space<vmem>>, vector<16x16x8xbf16>
    %52 = vector.shape_cast %51 : vector<16x16x8xbf16> to vector<256x8xbf16>
    %c0_56 = arith.constant 0 : index
    %c8 = arith.constant 8 : index
    %53 = vector.load %arg11[%c0_56, %c8] : memref<256x72xbf16, #tpu.memory_space<vmem>>, vector<256x8xbf16>
    tpu.vector_store %arg11[%c0_56, %c8], %52 {strides = array<i32>} : memref<256x72xbf16, #tpu.memory_space<vmem>>, vector<256x8xbf16>,
    %c0_57 = arith.constant 0 : index
    %c2 = arith.constant 2 : index
    %c0_58 = arith.constant 0 : index
    %54 = vector.load %arg10[%c0_57, %c2, %c0_58] : memref<18x18x8xbf16, #tpu.memory_space<vmem>>, vector<16x16x8xbf16>
    %55 = vector.shape_cast %54 : vector<16x16x8xbf16> to vector<256x8xbf16>
    %c0_59 = arith.constant 0 : index
    %c16 = arith.constant 16 : index
    %56 = vector.load %arg11[%c0_59, %c16] : memref<256x72xbf16, #tpu.memory_space<vmem>>, vector<256x8xbf16>
    tpu.vector_store %arg11[%c0_59, %c16], %55 {strides = array<i32>} : memref<256x72xbf16, #tpu.memory_space<vmem>>, vector<256x8xbf16>,
    %c1_60 = arith.constant 1 : index
    %c0_61 = arith.constant 0 : index
    %c0_62 = arith.constant 0 : index
    %57 = vector.load %arg10[%c1_60, %c0_61, %c0_62] : memref<18x18x8xbf16, #tpu.memory_space<vmem>>, vector<16x16x8xbf16>
    %58 = vector.shape_cast %57 : vector<16x16x8xbf16> to vector<256x8xbf16>
    %c0_63 = arith.constant 0 : index
    %c24 = arith.constant 24 : index
    %59 = vector.load %arg11[%c0_63, %c24] : memref<256x72xbf16, #tpu.memory_space<vmem>>, vector<256x8xbf16>
    tpu.vector_store %arg11[%c0_63, %c24], %58 {strides = array<i32>} : memref<256x72xbf16, #tpu.memory_space<vmem>>, vector<256x8xbf16>,
    %c1_64 = arith.constant 1 : index
    %c1_65 = arith.constant 1 : index
    %c0_66 = arith.constant 0 : index
    %60 = vector.load %arg10[%c1_64, %c1_65, %c0_66] : memref<18x18x8xbf16, #tpu.memory_space<vmem>>, vector<16x16x8xbf16>
    %61 = vector.shape_cast %60 : vector<16x16x8xbf16> to vector<256x8xbf16>
    %c0_67 = arith.constant 0 : index
    %c32 = arith.constant 32 : index
    %62 = vector.load %arg11[%c0_67, %c32] : memref<256x72xbf16, #tpu.memory_space<vmem>>, vector<256x8xbf16>
    tpu.vector_store %arg11[%c0_67, %c32], %61 {strides = array<i32>} : memref<256x72xbf16, #tpu.memory_space<vmem>>, vector<256x8xbf16>,
    %c1_68 = arith.constant 1 : index
    %c2_69 = arith.constant 2 : index
    %c0_70 = arith.constant 0 : index
    %63 = vector.load %arg10[%c1_68, %c2_69, %c0_70] : memref<18x18x8xbf16, #tpu.memory_space<vmem>>, vector<16x16x8xbf16>
    %64 = vector.shape_cast %63 : vector<16x16x8xbf16> to vector<256x8xbf16>
    %c0_71 = arith.constant 0 : index
    %c40 = arith.constant 40 : index
    %65 = vector.load %arg11[%c0_71, %c40] : memref<256x72xbf16, #tpu.memory_space<vmem>>, vector<256x8xbf16>
    tpu.vector_store %arg11[%c0_71, %c40], %64 {strides = array<i32>} : memref<256x72xbf16, #tpu.memory_space<vmem>>, vector<256x8xbf16>,
    %c2_72 = arith.constant 2 : index
    %c0_73 = arith.constant 0 : index
    %c0_74 = arith.constant 0 : index
    %66 = vector.load %arg10[%c2_72, %c0_73, %c0_74] : memref<18x18x8xbf16, #tpu.memory_space<vmem>>, vector<16x16x8xbf16>
    %67 = vector.shape_cast %66 : vector<16x16x8xbf16> to vector<256x8xbf16>
    %c0_75 = arith.constant 0 : index
    %c48 = arith.constant 48 : index
    %68 = vector.load %arg11[%c0_75, %c48] : memref<256x72xbf16, #tpu.memory_space<vmem>>, vector<256x8xbf16>
    tpu.vector_store %arg11[%c0_75, %c48], %67 {strides = array<i32>} : memref<256x72xbf16, #tpu.memory_space<vmem>>, vector<256x8xbf16>,
    %c2_76 = arith.constant 2 : index
    %c1_77 = arith.constant 1 : index
    %c0_78 = arith.constant 0 : index
    %69 = vector.load %arg10[%c2_76, %c1_77, %c0_78] : memref<18x18x8xbf16, #tpu.memory_space<vmem>>, vector<16x16x8xbf16>
    %70 = vector.shape_cast %69 : vector<16x16x8xbf16> to vector<256x8xbf16>
    %c0_79 = arith.constant 0 : index
    %c56 = arith.constant 56 : index
    %71 = vector.load %arg11[%c0_79, %c56] : memref<256x72xbf16, #tpu.memory_space<vmem>>, vector<256x8xbf16>
    tpu.vector_store %arg11[%c0_79, %c56], %70 {strides = array<i32>} : memref<256x72xbf16, #tpu.memory_space<vmem>>, vector<256x8xbf16>,
    %c2_80 = arith.constant 2 : index
    %c2_81 = arith.constant 2 : index
    %c0_82 = arith.constant 0 : index
    %72 = vector.load %arg10[%c2_80, %c2_81, %c0_82] : memref<18x18x8xbf16, #tpu.memory_space<vmem>>, vector<16x16x8xbf16>
    %73 = vector.shape_cast %72 : vector<16x16x8xbf16> to vector<256x8xbf16>
    %c0_83 = arith.constant 0 : index
    %c64 = arith.constant 64 : index
    %74 = vector.load %arg11[%c0_83, %c64] : memref<256x72xbf16, #tpu.memory_space<vmem>>, vector<256x8xbf16>
    tpu.vector_store %arg11[%c0_83, %c64], %73 {strides = array<i32>} : memref<256x72xbf16, #tpu.memory_space<vmem>>, vector<256x8xbf16>,
    %c0_84 = arith.constant 0 : index
    %c0_85 = arith.constant 0 : index
    %75 = vector.load %arg11[%c0_84, %c0_85] : memref<256x72xbf16, #tpu.memory_space<vmem>>, vector<256x72xbf16>
    %c0_86 = arith.constant 0 : index
    %c0_87 = arith.constant 0 : index
    %76 = vector.load %arg5[%c0_86, %c0_87] : memref<72x8xbf16, #tpu.memory_space<vmem>>, vector<72x8xbf16>
    %cst_88 = arith.constant dense<0.000000e+00> : vector<256x8xf32>
    %77 = tpu.matmul %75, %76, %cst_88 {dimension_numbers = #tpu.dot_dimension_numbers<[1], [0], [0], [1], [0, 0, 1, 1], [], []>} : vector<256x72xbf16>, vector<72x8xbf16>, vector<256x8xf32> -> vector<256x8xf32>
    %78 = arith.truncf %77 : vector<256x8xf32> to vector<256x8xbf16>
    %79 = vector.shape_cast %78 : vector<256x8xbf16> to vector<1x16x16x8xbf16>
    %c0_89 = arith.constant 0 : index
    %c0_90 = arith.constant 0 : index
    %c0_91 = arith.constant 0 : index
    %c0_92 = arith.constant 0 : index
    %80 = vector.load %arg8[%c0_89, %c0_90, %c0_91, %c0_92] : memref<1x16x16x8xbf16, #tpu.memory_space<vmem>>, vector<1x16x16x8xbf16>
    tpu.vector_store %arg8[%c0_89, %c0_90, %c0_91, %c0_92], %79 {strides = array<i32>} : memref<1x16x16x8xbf16, #tpu.memory_space<vmem>>, vector<1x16x16x8xbf16>,
    %81 = arith.extf %78 : vector<256x8xbf16> to vector<256x8xf32>
    %cst_93 = arith.constant dense<0.000000e+00> : vector<8xf32>
    %82 = vector.multi_reduction <add>, %81, %cst_93 [0] : vector<256x8xf32> to vector<8xf32>
    %83 = vector.shape_cast %82 : vector<8xf32> to vector<1x8xf32>
    %cst_94 = arith.constant 3.906250e-03 : f32
    %84 = vector.broadcast %cst_94 : f32 to vector<1x8xf32>
    %85 = arith.mulf %83, %84 : vector<1x8xf32>
    %86 = vector.broadcast %85 : vector<1x8xf32> to vector<256x8xf32>
    %87 = arith.subf %81, %86 : vector<256x8xf32>
    %88 = vector.broadcast %85 : vector<1x8xf32> to vector<256x8xf32>
    %89 = arith.subf %81, %88 : vector<256x8xf32>
    %90 = arith.mulf %87, %89 : vector<256x8xf32>
    %cst_95 = arith.constant dense<0.000000e+00> : vector<8xf32>
    %91 = vector.multi_reduction <add>, %90, %cst_95 [0] : vector<256x8xf32> to vector<8xf32>
    %92 = vector.shape_cast %91 : vector<8xf32> to vector<1x8xf32>
    %93 = tpu.concatenate %83, %92 in 0 : vector<1x8xf32>, vector<1x8xf32> -> vector<2x8xf32>
    %94 = vector.shape_cast %93 : vector<2x8xf32> to vector<1x1x2x8xf32>
    %c0_96 = arith.constant 0 : index
    %c0_97 = arith.constant 0 : index
    %c0_98 = arith.constant 0 : index
    %c0_99 = arith.constant 0 : index
    %95 = vector.load %arg9[%c0_96, %c0_97, %c0_98, %c0_99] : memref<1x1x2x8xf32, #tpu.memory_space<vmem>>, vector<1x1x2x8xf32>
    tpu.vector_store %arg9[%c0_96, %c0_97, %c0_98, %c0_99], %94 {strides = array<i32>} : memref<1x1x2x8xf32, #tpu.memory_space<vmem>>, vector<1x1x2x8xf32>,
    return
  }
  func.func @transform_0(%arg0: i32, %arg1: i32) -> (i32, i32, i32, i32) {
    %c0_i32 = arith.constant 0 : i32
    %c0_i32_0 = arith.constant 0 : i32
    %c0_i32_1 = arith.constant 0 : i32
    return %arg0, %arg1, %c0_i32, %c0_i32_0 : i32, i32, i32, i32
  }
  func.func @transform_1(%arg0: i32, %arg1: i32) -> (i32, i32, i32, i32) {
    %c16_i32 = arith.constant 16 : i32
    %0 = arith.muli %arg1, %c16_i32 : i32
    %c1_i32 = arith.constant 1 : i32
    %1 = arith.subi %0, %c1_i32 : i32
    %c0_i32 = arith.constant 0 : i32
    %2 = arith.maxsi %1, %c0_i32 : i32
    %c0_i32_0 = arith.constant 0 : i32
    %c0_i32_1 = arith.constant 0 : i32
    %c0_i32_2 = arith.constant 0 : i32
    return %arg0, %2, %c0_i32_0, %c0_i32_1 : i32, i32, i32, i32
  }
  func.func @transform_2(%arg0: i32, %arg1: i32) -> (i32, i32, i32, i32) {
    %c16_i32 = arith.constant 16 : i32
    %0 = arith.muli %arg1, %c16_i32 : i32
    %c16_i32_0 = arith.constant 16 : i32
    %1 = arith.addi %0, %c16_i32_0 : i32
    %c15_i32 = arith.constant 15 : i32
    %2 = arith.minsi %1, %c15_i32 : i32
    %c0_i32 = arith.constant 0 : i32
    %c0_i32_1 = arith.constant 0 : i32
    %c0_i32_2 = arith.constant 0 : i32
    return %arg0, %2, %c0_i32, %c0_i32_1 : i32, i32, i32, i32
  }
  func.func @transform_3(%arg0: i32, %arg1: i32) -> (i32, i32) {
    %c0_i32 = arith.constant 0 : i32
    %c0_i32_0 = arith.constant 0 : i32
    %c0_i32_1 = arith.constant 0 : i32
    return %c0_i32, %c0_i32_0 : i32, i32
  }
  func.func @transform_4(%arg0: i32, %arg1: i32) -> (i32, i32, i32) {
    %c0_i32 = arith.constant 0 : i32
    %c0_i32_0 = arith.constant 0 : i32
    %c0_i32_1 = arith.constant 0 : i32
    %c0_i32_2 = arith.constant 0 : i32
    return %c0_i32, %c0_i32_0, %c0_i32_1 : i32, i32, i32
  }
  func.func @transform_5(%arg0: i32, %arg1: i32) -> (i32, i32, i32) {
    %c0_i32 = arith.constant 0 : i32
    %c0_i32_0 = arith.constant 0 : i32
    %c0_i32_1 = arith.constant 0 : i32
    %c0_i32_2 = arith.constant 0 : i32
    return %c0_i32, %c0_i32_0, %c0_i32_1 : i32, i32, i32
  }
  func.func @transform_6(%arg0: i32, %arg1: i32) -> (i32, i32, i32, i32) {
    %c0_i32 = arith.constant 0 : i32
    %c0_i32_0 = arith.constant 0 : i32
    %c0_i32_1 = arith.constant 0 : i32
    return %arg0, %arg1, %c0_i32, %c0_i32_0 : i32, i32, i32, i32
  }
  func.func @transform_7(%arg0: i32, %arg1: i32) -> (i32, i32, i32, i32) {
    %c0_i32 = arith.constant 0 : i32
    %c0_i32_0 = arith.constant 0 : i32
    %c0_i32_1 = arith.constant 0 : i32
    return %arg0, %arg1, %c0_i32, %c0_i32_0 : i32, i32, i32, i32
  }
}

</mosaic_0001>

<bundles_post_ra>
// kernel: double_conv.3
= control target key start
LH: loop header
LB: loop body
LE: loop exit
PB: predicated region body
PF: predicated region fallthrough
CT: control target
= control target key end

     0   :  { %s6037_s24 = smov 0   ;;  %s6039_s1 = smov 0   ;;  %s7964_s0 = inlined_call_operand.vmem [shape: bf16[2,16,16,8], index: 0, kind: input, shape index: {}, may-alias: {0,1,2}]   ;;  %s7965_s1 = inlined_call_operand.vmem [shape: bf16[2,16,16,8], index: 1, kind: input, shape index: {}, may-alias: {0,1,2}]   ;;  %s7966_s2 = inlined_call_operand.vmem [shape: bf16[2,16,16,8], index: 2, kind: input, shape index: {}, may-alias: {0,1,2}]   ;;  %s7967_s3 = inlined_call_operand.vmem [shape: bf16[72,8], index: 3, kind: input, shape index: {}]   ;;  %s7968_s4 = inlined_call_operand.vmem [shape: f32[1,1,8], index: 4, kind: input, shape index: {}]   ;;  %s7969_s5 = inlined_call_operand.vmem [shape: f32[1,1,8], index: 5, kind: input, shape index: {}]   ;;  %s7970_s6 = inlined_call_operand.vmem [shape: bf16[2,16,16,8], index: 6, kind: output, shape index: {0}]   ;;  %s7971_s7 = inlined_call_operand.vmem [shape: f32[2,1,2,8], index: 7, kind: output, shape index: {1}]  }
   0x1   :  { %s6041_s2 = smov 0  }
   0x2 LB: > { %s30_s25 = sadd.s32 1, %s5982_s1  ;;  %p5351_p0 = scmp.ge.s32.totalorder %s5986_s2, 1  ;;  %s5986_s2 = sphi %s6041_s2, %s18_s2   ;;  %s5982_s1 = sphi %s6039_s1, %s8073_s1   ;;  %s5978_s24 = sphi %s6037_s24, %s8072_s24  }
   0x3   : > { %p32_p1 = scmp.ge.s32.totalorder %s30_s25, 2  ;;  %p328_p2 = scmp.lt.s32.totalorder %s5986_s2, 3 }
   0x5   : > { %s8075_s25 = smov (%p32_p1, %s30_s25), 0  ;;  %p329_p3 = pnand %p5351_p0, %p328_p2 }
   0x6   : > { %vm467_vm0 = vcmask (!%p329_p3), 57344   ;;  %vm468_vm1 = vsmask.f32 (!%p329_p3), 256  ;;  %v470_v0 = vld [vmem:[#allocation2] sm:$0x1] (!%p329_p3)  ;;  %v5988_v6 = vmov (!%p329_p3), 0  }
   0x7   : > { %332 = sbr.rel (%p329_p3) target bundleno = 883 (0x373), region = 44  ;;  %vm6058_vm2 = vmand (!%p329_p3), %vm467_vm0, %vm468_vm1  ;;  %vm524_vm3 = vsmask.f32 (!%p329_p3), 7938  ;;  %v526_v2 = vld [vmem:[#allocation2 + $0x8] sm:$0x1] (!%p329_p3)  ;;  %v5397_v7 = vcombine.low (!%p329_p3), %v5988_v6, %v5988_v6  ;;  %v5398_v8 = vcombine.high (!%p329_p3), %v5988_v6, %v5988_v6  ;;  %p404_p4 = scmp.lt.s32.totalorder (!%p329_p3), %s5978_s24, 1 }
   0x8   : > { %v471_v3 = vsel (!%p329_p3), %vm6058_vm2, 0, %v470_v0  ;;  %vm6065_vm4 = vmand (!%p329_p3), %vm467_vm0, %vm524_vm3  ;;  %v476_v9 = vld [vmem:[#allocation2 + $0x18] sm:$0x1] (!%p329_p3)  ;;  %vm850_vm5 = vsmask.f32 (!%p329_p3), 4368  ;;  %vm1173_vm6 = vcmask (!%p329_p3), 60416  }
   0x9   : > { %472 = vst [vmem:[#allocation2] sm:$0x1] (!%p329_p3), %v471_v3  ;;  %v527_v5 = vsel (!%p329_p3), %vm6065_vm4, 0, %v526_v2  ;;  %v477_v10 = vsel (!%p329_p3), %vm6058_vm2, 0, %v476_v9  ;;  %v1340_v11 = vshrl.u32 (!%p329_p3), %v5397_v7, 16  ;;  %v1343_v12 = vshll.u32 (!%p329_p3), %v5397_v7, 16  ;;  %vm6078_vm7 = vmor (!%p329_p3), %vm468_vm1, %vm850_vm5 }
   0xa   : > { %528 = vst [vmem:[#allocation2 + $0x8] sm:$0x1] (!%p329_p3), %v527_v5  ;;  %v1348_v13 = vshrl.u32 (!%p329_p3), %v5398_v8, 16  ;;  %v1351_v14 = vshll.u32 (!%p329_p3), %v5398_v8, 16  ;;  %478 = vst [vmem:[#allocation2 + $0x18] sm:$0x1] (!%p329_p3), %v477_v10 }
   0xb   : > { %v473_v15 = vld [vmem:[#allocation2 + $0xc] sm:$0x1] (!%p329_p3)  ;;  %v1342_v17 = vrot.slane (!%p329_p3), %v1340_v11, 7  ;;  %v479_v20 = vld [vmem:[#allocation2 + $0x24] sm:$0x1] (!%p329_p3)  ;;  %vm6089_vm8 = vmand (!%p329_p3), %vm1173_vm6, %vm524_vm3  ;;  %vm2188_vm9 = vcmask (!%p329_p3), 1042432  }
   0xc   : > { %v6082_v18 = vrot.slane (!%p329_p3), %v1348_v13, 7  ;;  %v474_v19 = vsel (!%p329_p3), %vm6058_vm2, 0, %v473_v15  ;;  %vm2189_vm10 = vcmask (!%p329_p3), 1046532   ;;  %v6103_v22 = vld [vmem:[%s7968_s4] ss:$0 sm:$0xff] (!%p329_p3)  ;;  %v480_v23 = vsel (!%p329_p3), %vm6058_vm2, 0, %v479_v20 }
   0xd   : > { %475 = vst [vmem:[#allocation2 + $0xc] sm:$0x1] (!%p329_p3), %v474_v19  ;;  %v6107_v24 = vor.u32 (!%p329_p3), %v1343_v12, %v1342_v17  ;;  %v1346_v25 = vrot.slane (!%p329_p3), %v1342_v17, 4  ;;  %481 = vst [vmem:[#allocation2 + $0x24] sm:$0x1] (!%p329_p3), %v480_v23  ;;  %s5989_s11 = smov (!%p329_p3), 16  }
   0xe   : > { %s8077_s24 = smov (!%p404_p4, %s5978_s24), 1  ;;  %v1353_v26 = vor.u32 %v1351_v14, %v6082_v18  ;;  %v1355_v27 = vrot.slane %v6082_v18, 4  ;;  %v482_v36 = vld [vmem:[#allocation2 + $0x30] sm:$0x1]  ;;  %v6122_v40 = vld [vmem:[%s7969_s5] ss:$0 sm:$0xff]  ;;  %vm6148_vm13 = vmor %vm2188_vm9, %vm2189_vm10 }
   0xf   : > { %s5648_s26 = sshll.u32 %s8077_s24, 7  ;;  %v483_v51 = vsel %vm6058_vm2, 0, %v482_v36  ;;  %vm1592_vm11 = vsmask.f32 3328  ;;  %vm1593_vm12 = vsmask.f32 7440 }
  0x10   : > { %s6098_s29 = scalar_lea.vmem %s7964_s0, %s5648_s26  ;;  %v1359_v31 = vld [vmem:[#allocation2] sm:$0xf]  ;;  %v1354_v37 = vsel %vm6078_vm7, %v1346_v25, %v1353_v26  ;;  %484 = vst [vmem:[#allocation2 + $0x30] sm:$0x1] %v483_v51  ;;  %vm6175_vm14 = vmor %vm1592_vm11, %vm1593_vm12  ;;  %s5990_s12 = smov 8   ;;  %vm7972_vm15 = vcmask 64512  }
  0x11   : > { %v5781_v28 = vld [vmem:[%s6098_s29 + $0x8] sm:$0xff]   ;;  %v5718_v29 = vld [vmem:[%s6098_s29] sm:$0xff]   ;;  %v5782_v30 = vld [vmem:[%s6098_s29 + $0x10] sm:$0xff]   ;;  %v1360_v38 = vsel %vm6089_vm8, %v6107_v24, %v1359_v31  ;;  %1362 = vst.msk [vmem:[#allocation2 + $0x4] sm:$0xf] %vm1173_vm6, %v1354_v37  ;;  %s5991_s13 = smov 24  }
  0x12   : > { %v5723_v32 = vunpack.c.l.bf16 %v5781_v28  ;;  %v5724_v33 = vunpack.c.h.bf16 %v5781_v28  ;;  %v5719_v34 = vunpack.c.l.bf16 %v5718_v29  ;;  %v5720_v35 = vunpack.c.h.bf16 %v5718_v29  ;;  %v1363_v39 = vld [vmem:[#allocation2 + $0x8] sm:$0x1]  ;;  %v5783_v43 = vld [vmem:[%s6098_s29 + $0x18] sm:$0xff]   ;;  %1361 = vst [vmem:[#allocation2] sm:$0xf] %v1360_v38  ;;  %v6154_v7 = vld [vmem:[%s6098_s29 + $0x20] sm:$0xff]  }
  0x13   : > { %v5727_v41 = vunpack.c.l.bf16 %v5782_v30  ;;  %v5728_v42 = vunpack.c.h.bf16 %v5782_v30  ;;  %v1364_v44 = vsel %vm6058_vm2, %v1355_v27, %v1363_v39  ;;  %1395 = vst.msk [vmem:[#allocation2 + $0xd0] sm:$0xf] %vm1173_vm6, %v1354_v37  ;;  %v5731_v55 = vunpack.c.l.bf16 %v5783_v43  ;;  %s5992_s14 = smov 48   ;;  %s5993_s15 = smov 40  }
  0x14   : > { %v653_v45 = vmul.f32 %v5723_v32, %v6103_v22  ;;  %v654_v46 = vmul.f32 %v5724_v33, %v6103_v22  ;;  %v651_v47 = vmul.f32 %v5719_v34, %v6103_v22  ;;  %1365 = vst [vmem:[#allocation2 + $0x8] sm:$0x1] %v1364_v44  ;;  %v652_v48 = vmul.f32 %v5720_v35, %v6103_v22  ;;  %s5994_s16 = smov 64   ;;  %s5995_s17 = smov 32  }
  0x15   : > { %v655_v49 = vmul.f32 %v5727_v41, %v6103_v22  ;;  %v656_v50 = vmul.f32 %v5728_v42, %v6103_v22  ;;  %v5732_v59 = vunpack.c.h.bf16 %v5783_v43  ;;  %v657_v63 = vmul.f32 %v5731_v55, %v6103_v22  ;;  %s5996_s18 = smov 56  }
  0x16   : > { %v692_v52 = vadd.f32 %v6122_v40, %v653_v45  ;;  %v693_v53 = vadd.f32 %v6122_v40, %v654_v46  ;;  %v690_v54 = vadd.f32 %v6122_v40, %v651_v47  ;;  %v691_v56 = vadd.f32 %v6122_v40, %v652_v48  ;;  %v1183_v48 = vld [vmem:[#allocation2 + $0x18] sm:$0xf] }
  0x17   : > { %v694_v57 = vadd.f32 %v6122_v40, %v655_v49  ;;  %v695_v58 = vadd.f32 %v6122_v40, %v656_v50  ;;  %v658_v6 = vmul.f32 %v5732_v59, %v6103_v22  ;;  %v6163_v19 = vadd.f32 %v6122_v40, %v657_v63 }
  0x18   : > { %v724_v60 = vmax.f32 %v692_v52, 0.0  ;;  %v725_v61 = vmax.f32 %v693_v53, 0.0  ;;  %v722_v62 = vmax.f32 %v690_v54, 0.0  ;;  %v723_v2 = vmax.f32 %v691_v56, 0.0  ;;  %v2093_v12 = vld [vmem:[#allocation2 + $0x4] sm:$0xf] }
  0x19   : > { %v726_v3 = vmax.f32 %v694_v57, 0.0  ;;  %v727_v5 = vmax.f32 %v695_v58, 0.0  ;;  %v2092_v11 = vld [vmem:[#allocation2] sm:$0xe]  ;;  %v2193_v25 = vrot.slane %v2093_v12, 5  ;;  %v6166_v28 = vadd.f32 %v6122_v40, %v658_v6 }
  0x1a   : > { %v5655_v8 = vpack.c.bf16 %v724_v60, %v724_v60  ;;  %v5656_v9 = vpack.c.bf16 %v725_v61, %v725_v61  ;;  %v5653_v10 = vpack.c.bf16 %v722_v62, %v722_v62  ;;  %v1544_v13 = vld [vmem:[#allocation2] sm:$0xf]  ;;  %v6156_v14 = vpack.c.bf16 %v723_v2, %v723_v2  ;;  %v1545_v26 = vld [vmem:[#allocation2 + $0x4] sm:$0xf] }
  0x1b   : > { %v6158_v15 = vpack.c.bf16 %v726_v3, %v726_v3  ;;  %v6160_v17 = vpack.c.bf16 %v727_v5, %v727_v5  ;;  %v2094_v20 = vld [vmem:[#allocation2 + $0x8] sm:$0x1]  ;;  %v5433_v23 = vrot.slane %v2092_v11, 9  ;;  %v5735_v29 = vunpack.c.l.bf16 %v6154_v7 }
  0x1c   : > { %v2196_v30 = vrot.slane %v2094_v20, 5  ;;  %v1546_v31 = vld [vmem:[#allocation2 + $0x8] sm:$0x1]  ;;  %v1596_v32 = vshrl.u32 %v1544_v13, 16  ;;  %v1599_v33 = vshll.u32 %v1544_v13, 16  ;;  %v1605_v34 = vshll.u32 %v1545_v26, 16 }
  0x1d   : > { %v2194_v35 = vsel %vm6148_vm13, %v5433_v23, %v2193_v25  ;;  %v2195_v36 = vrot.slane %v2193_v25, 4  ;;  %v1609_v37 = vshrl.u32 %v1545_v26, 16  ;;  %v1615_v38 = vshll.u32 %v1546_v31, 16  ;;  %v532_v31 = vld [vmem:[#allocation2 + $0x20] sm:$0x1] }
  0x1e   : > { %v1598_v39 = vrot.slane %v1596_v32, 4  ;;  %v1601_v41 = vrot.slane %v1599_v33, 5  ;;  %v1607_v42 = vrot.slane %v1605_v34, 5  ;;  %v870_v43 = vshrl.u32 %v5655_v8, 16 }
  0x1f   : > { %v2197_v44 = vsel %vm6148_vm13, %v2195_v36, %v2196_v30  ;;  %v1611_v45 = vrot.slane %v1609_v37, 4  ;;  %v1617_v46 = vrot.slane %v1615_v38, 5  ;;  %v873_v47 = vshll.u32 %v5655_v8, 16  ;;  %v529_v30 = vld [vmem:[#allocation2 + $0x14] sm:$0x1] }
  0x20   : > { %v5449_v49 = vcombine.low %v2194_v35, %v2197_v44  ;;  %v1602_v50 = vor.u32 %v1601_v41, %v1598_v39  ;;  %v872_v51 = vrot.slane %v870_v43, 7  ;;  %v878_v52 = vshrl.u32 %v5656_v9, 16  ;;  %v535_v36 = vld [vmem:[#allocation2 + $0x2c] sm:$0x1]  ;;  %v538_v41 = vld [vmem:[#allocation2 + $0x38] sm:$0x1] }
  0x21   : > { %v1612_v54 = vor.u32 %v1611_v45, %v1607_v42  ;;  %v881_v55 = vshll.u32 %v5656_v9, 16  ;;  %v853_v56 = vshrl.u32 %v5653_v10, 16  ;;  %v856_v57 = vshll.u32 %v5653_v10, 16  ;;  %v1175_v9 = vld [vmem:[#allocation2 + $0xc] sm:$0xf] }
  0x22   : > { %2351 = vrot.lane.b32.xlu1 %v5449_v49, %s5989_s11  ;;  %v1603_v58 = vrot.slane %v1602_v50, 4  ;;  %v875_v59 = vor.u32 %v873_v47, %v872_v51  ;;  %v876_v60 = vrot.slane %v872_v51, 4  ;;  %v6180_v61 = vrot.slane %v878_v52, 7  ;;  %v1190_v44 = vld [vmem:[#allocation2 + $0x24] sm:$0xf]  ;;  %v5785_v52 = vld [vmem:[%s6098_s29 + $0x28] sm:$0xff]  }
  0x23   : > { %v1613_v62 = vrot.slane %v1612_v54, 4  ;;  %v855_v63 = vrot.slane %v853_v56, 7  ;;  %v861_v2 = vshrl.u32 %v6156_v14, 16  ;;  %v864_v3 = vshll.u32 %v6156_v14, 16  ;;  %v6225_v54 = vld [vmem:[%s6098_s29 + $0x30] sm:$0xff]  }
  0x24   : > { %v1608_v5 = vsel %vm6175_vm14, %v1603_v58, %v1607_v42  ;;  %v883_v6 = vor.u32 %v881_v55, %v6180_v61  ;;  %v1184_v8 = vsel %vm6089_vm8, %v875_v59, %v1183_v48  ;;  %v5736_v10 = vunpack.c.h.bf16 %v6154_v7 }
  0x25   : > { %v1618_v11 = vsel %vm6175_vm14, %v1613_v62, %v1617_v46  ;;  %1185 = vst [vmem:[#allocation2 + $0x18] sm:$0xf] %v1184_v8  ;;  %v858_v12 = vor.u32 %v856_v57, %v855_v63  ;;  %v859_v13 = vrot.slane %v855_v63, 4  ;;  %v6192_v20 = vrot.slane %v861_v2, 7  ;;  %v1197_v63 = vld [vmem:[#allocation2 + $0x30] sm:$0xf] }
  0x26   : > { %v5417_v14 = vcombine.low %v1608_v5, %v1618_v11  ;;  %v884_v23 = vsel %vm6078_vm7, %v876_v60, %v883_v6  ;;  %v887_v25 = vshrl.u32 %v6158_v15, 16  ;;  %v890_v26 = vshll.u32 %v6158_v15, 16 }
  0x27   : > { %v885_v32 = vrot.slane %v6180_v61, 4  ;;  %1186 = vst.msk [vmem:[#allocation2 + $0x1c] sm:$0xf] %vm1173_vm6, %v884_v23  ;;  %v866_v33 = vor.u32 %v864_v3, %v6192_v20  ;;  %v1176_v34 = vsel %vm6089_vm8, %v858_v12, %v1175_v9  ;;  %v895_v35 = vshrl.u32 %v6160_v17, 16 }
  0x28   : > { %2027 = vrot.lane.b32.xlu0 %v5417_v14, %s5990_s12  ;;  %1177 = vst [vmem:[#allocation2 + $0xc] sm:$0xf] %v1176_v34  ;;  %v889_v37 = vrot.slane %v887_v25, 7  ;;  %v898_v15 = vshll.u32 %v6160_v17, 16  ;;  %v728_v38 = vmax.f32 %v6163_v19, 0.0  ;;  %v729_v39 = vmax.f32 %v6166_v28, 0.0 }
  0x29   : > { %v867_v42 = vsel %vm6078_vm7, %v859_v13, %v866_v33  ;;  %v6210_v43 = vrot.slane %v895_v35, 7  ;;  %v530_v45 = vsel %vm6065_vm4, 0, %v529_v30  ;;  %v533_v46 = vsel %vm6065_vm4, 0, %v532_v31 }
  0x2a   : > { %1179 = vst.msk [vmem:[#allocation2 + $0x10] sm:$0xf] %vm1173_vm6, %v867_v42  ;;  %v892_v17 = vor.u32 %v890_v26, %v889_v37  ;;  %v893_v19 = vrot.slane %v889_v37, 4  ;;  %v5659_v28 = vpack.c.bf16 %v728_v38, %v728_v38  ;;  %v5660_v47 = vpack.c.bf16 %v729_v39, %v729_v39  ;;  %531 = vst [vmem:[#allocation2 + $0x14] sm:$0x1] %v530_v45 }
  0x2b   : > { %534 = vst [vmem:[#allocation2 + $0x20] sm:$0x1] %v533_v46  ;;  %v868_v48 = vrot.slane %v6192_v20, 4  ;;  %v900_v49 = vor.u32 %v898_v15, %v6210_v43  ;;  %v536_v50 = vsel %vm6065_vm4, 0, %v535_v36  ;;  %v539_v51 = vsel %vm6065_vm4, 0, %v538_v41 }
  0x2c   : > { %v1191_v55 = vsel %vm6089_vm8, %v892_v17, %v1190_v44  ;;  %v904_v56 = vshrl.u32 %v5659_v28, 16  ;;  %v907_v57 = vshll.u32 %v5659_v28, 16  ;;  %537 = vst [vmem:[#allocation2 + $0x2c] sm:$0x1] %v536_v50  ;;  %540 = vst [vmem:[#allocation2 + $0x38] sm:$0x1] %v539_v51  ;;  %v5739_v6 = vunpack.c.l.bf16 %v5785_v52 }
  0x2d   : > { %v901_v58 = vsel %vm6078_vm7, %v893_v19, %v900_v49  ;;  %v902_v59 = vrot.slane %v6210_v43, 4  ;;  %1192 = vst [vmem:[#allocation2 + $0x24] sm:$0xf] %v1191_v55  ;;  %v912_v60 = vshrl.u32 %v5660_v47, 16  ;;  %v915_v62 = vshll.u32 %v5660_v47, 16  ;;  %v6256_v44 = vld [vmem:[%s6098_s29 + $0x38] sm:$0xff]  }
  0x2e   : > { %v6232_v2 = vld [vmem:[#allocation2 + $0x18] sm:$0xe]  ;;  %1193 = vst.msk [vmem:[#allocation2 + $0x28] sm:$0xf] %vm1173_vm6, %v901_v58  ;;  %v906_v5 = vrot.slane %v904_v56, 7  ;;  %v5740_v8 = vunpack.c.h.bf16 %v5785_v52  ;;  %v659_v12 = vmul.f32 %v5735_v29, %v6103_v22  ;;  %v660_v13 = vmul.f32 %v5736_v10, %v6103_v22 }
  0x2f   : > { %v5904_v3 = vld [vmem:[#allocation2 + $0x18] sm:$0xff]   ;;  %v6235_v9 = vrot.slane %v912_v60, 7  ;;  %v2095_v11 = vld [vmem:[#allocation2 + $0xc] sm:$0xe]  ;;  %v5743_v20 = vunpack.c.l.bf16 %v6225_v54  ;;  %v5744_v31 = vunpack.c.h.bf16 %v6225_v54  ;;  %v661_v35 = vmul.f32 %v5739_v6, %v6103_v22 }
  0x30   : > { %2530 = vrot.lane.b32.xlu1 %v5904_v3, %s5991_s13  ;;  %v909_v14 = vor.u32 %v907_v57, %v906_v5  ;;  %v910_v23 = vrot.slane %v906_v5, 4  ;;  %v5434_v25 = vrot.slane %v2095_v11, 9  ;;  %v3138_v26 = vld [vmem:[#allocation2 + $0xc] sm:$0xe]  ;;  %v3142_v30 = vld [vmem:[#allocation2 + $0x1c] sm:$0xf]  ;;  %v662_v36 = vmul.f32 %v5740_v8, %v6103_v22 }
  0x31   : > { %v5905_v33 = vld [vmem:[#allocation2 + $0xc] sm:$0xff]   ;;  %v917_v29 = vor.u32 %v915_v62, %v6235_v9  ;;  %v919_v34 = vrot.slane %v6235_v9, 4  ;;  %v1180_v7 = vld [vmem:[#allocation2 + $0x14] sm:$0x1]  ;;  %v4182_v10 = vld [vmem:[#allocation2 + $0x18] sm:$0xe]  ;;  %v6267_v51 = vadd.f32 %v6122_v40, %v659_v12  ;;  %v6270_v52 = vadd.f32 %v6122_v40, %v660_v13 }
  0x32   : > { %v1198_v37 = vsel %vm6089_vm8, %v909_v14, %v1197_v63  ;;  %v1181_v15 = vsel %vm6058_vm2, %v868_v48, %v1180_v7  ;;  %v2096_v38 = vld [vmem:[#allocation2 + $0x10] sm:$0xf]  ;;  %v5497_v41 = vrot.slane %v3138_v26, 9  ;;  %v5498_v42 = vrot.slane %v6232_v2, 9  ;;  %2528 = vrot.lane.b32.xlu0 %v5905_v33, %s5991_s13  ;;  %v5907_v45 = vld [vmem:[#allocation2 + $0x18] sm:$0xff]  }
  0x33   : > { %v3139_v39 = vld [vmem:[#allocation2 + $0x10] sm:$0xf]  ;;  %v918_v46 = vsel %vm6078_vm7, %v910_v23, %v917_v29  ;;  %1199 = vst [vmem:[#allocation2 + $0x30] sm:$0xf] %v1198_v37  ;;  %1182 = vst [vmem:[#allocation2 + $0x14] sm:$0x1] %v1181_v15  ;;  %v6273_v56 = vadd.f32 %v6122_v40, %v661_v35  ;;  %v663_v57 = vmul.f32 %v5743_v20, %v6103_v22  ;;  %v5747_v12 = vunpack.c.l.bf16 %v6256_v44 }
  0x34   : > { %v2200_v17 = vrot.slane %v2096_v38, 5  ;;  %v3236_v19 = vrot.slane %v3139_v39, 5  ;;  %v1187_v28 = vld [vmem:[#allocation2 + $0x20] sm:$0x1]  ;;  %v3243_v47 = vrot.slane %v3142_v30, 5  ;;  %v664_v61 = vmul.f32 %v5744_v31, %v6103_v22 }
  0x35   : > { %1200 = vst.msk [vmem:[#allocation2 + $0x34] sm:$0xf] %vm1173_vm6, %v918_v46  ;;  %v1188_v48 = vsel %vm6058_vm2, %v885_v32, %v1187_v28  ;;  %v4183_v49 = vld [vmem:[#allocation2 + $0x1c] sm:$0xf]  ;;  %v5906_v54 = vld [vmem:[#allocation2 + $0x24] sm:$0xff]   ;;  %v5561_v62 = vrot.slane %v4182_v10, 9  ;;  %v6286_v11 = vadd.f32 %v6122_v40, %v662_v36  ;;  %v6302_v43 = vadd.f32 %v6122_v40, %v663_v57 }
  0x36   : > { %v485_v50 = vld [vmem:[#allocation2 + $0x3c] sm:$0x1]  ;;  %v2202_v55 = vrot.slane %v2200_v17, 4  ;;  %1189 = vst [vmem:[#allocation2 + $0x20] sm:$0x1] %v1188_v48  ;;  %v5909_v58 = vld [vmem:[#allocation2 + $0x24] sm:$0xff]   ;;  %3574 = vrot.lane.b32.xlu1 %v5906_v54, %s5992_s14  ;;  %3572 = vrot.lane.b32.xlu0 %v5907_v45, %s5992_s14  ;;  %v6281_v2 = vsel %vm6148_vm13, %v5434_v25, %v2200_v17  ;;  %v3237_v3 = vsel %vm6148_vm13, %v5497_v41, %v3236_v19  ;;  %v5748_v37 = vunpack.c.h.bf16 %v6256_v44 }
  0x37   : > { %v3238_v32 = vrot.slane %v3236_v19, 4  ;;  %v3245_v60 = vrot.slane %v3243_v47, 4  ;;  %v4280_v63 = vrot.slane %v4183_v49, 5  ;;  %v1194_v5 = vld [vmem:[#allocation2 + $0x2c] sm:$0x1]  ;;  %v6291_v13 = vsel %vm6148_vm13, %v5498_v42, %v3243_v47 }
  0x38   : > { %v2101_v6 = vld [vmem:[#allocation2 + $0x24] sm:$0xe]  ;;  %v2102_v8 = vld [vmem:[#allocation2 + $0x28] sm:$0xf]  ;;  %v1195_v14 = vsel %vm6058_vm2, %v902_v59, %v1194_v5  ;;  %v2596_v29 = vld [vmem:[#allocation2 + $0x18] sm:$0xf]  ;;  %v6305_v59 = vadd.f32 %v6122_v40, %v664_v61  ;;  %v6310_v42 = vmul.f32 %v5747_v12, %v6103_v22 }
  0x39   : > { %v4282_v20 = vrot.slane %v4280_v63, 4  ;;  %v5436_v23 = vrot.slane %v2101_v6, 9  ;;  %v4185_v25 = vld [vmem:[#allocation2 + $0x24] sm:$0xe]  ;;  %v4186_v26 = vld [vmem:[#allocation2 + $0x28] sm:$0xf]  ;;  %v4281_v36 = vsel %vm6148_vm13, %v5561_v62, %v4280_v63 }
  0x3a   : > { %1196 = vst [vmem:[#allocation2 + $0x2c] sm:$0x1] %v1195_v14  ;;  %v2214_v30 = vrot.slane %v2102_v8, 5  ;;  %v5562_v31 = vrot.slane %v4185_v25, 9  ;;  %v4287_v33 = vrot.slane %v4186_v26, 5  ;;  %v486_v7 = vsel %vm6058_vm2, 0, %v485_v50  ;;  %2532 = vrot.lane.b32.xlu0 %v5909_v58, %s5991_s13 }
  0x3b   : > { %v2097_v10 = vld [vmem:[#allocation2 + $0x14] sm:$0x1]  ;;  %487 = vst [vmem:[#allocation2 + $0x3c] sm:$0x1] %v486_v7  ;;  %v2666_v28 = vshrl.u32 %v2596_v29, 16  ;;  %v2669_v62 = vshll.u32 %v2596_v29, 16 }
  0x3c   : > { %v3140_v35 = vld [vmem:[#allocation2 + $0x14] sm:$0x1]  ;;  %v2203_v38 = vrot.slane %v2097_v10, 5  ;;  %v2216_v41 = vrot.slane %v2214_v30, 4  ;;  %v6314_v17 = vsel %vm6148_vm13, %v5436_v23, %v2214_v30  ;;  %v6318_v40 = vsel %vm6148_vm13, %v5562_v31, %v4287_v33  ;;  %v2597_v50 = vld [vmem:[#allocation2 + $0x1c] sm:$0xf] }
  0x3d   : > { %v5908_v15 = vld [vmem:[#allocation2 + $0x30] sm:$0xff]   ;;  %v3239_v39 = vrot.slane %v3140_v35, 5  ;;  %v3143_v45 = vld [vmem:[#allocation2 + $0x20] sm:$0x1]  ;;  %v4289_v19 = vrot.slane %v4287_v33, 4  ;;  %v2668_v58 = vrot.slane %v2666_v28, 4 }
  0x3e   : > { %v4184_v46 = vld [vmem:[#allocation2 + $0x20] sm:$0x1]  ;;  %2534 = vrot.lane.b32.xlu1 %v5908_v15, %s5991_s13  ;;  %v2204_v47 = vsel %vm6148_vm13, %v2202_v55, %v2203_v38  ;;  %v3246_v48 = vrot.slane %v3143_v45, 5  ;;  %v2098_v63 = vld [vmem:[#allocation2 + $0x18] sm:$0xe]  ;;  %v2675_v55 = vshll.u32 %v2597_v50, 16 }
  0x3f   : > { %v3240_v22 = vsel %vm6148_vm13, %v3238_v32, %v3239_v39  ;;  %v4283_v49 = vrot.slane %v4184_v46, 5  ;;  %v2598_v54 = vld [vmem:[#allocation2 + $0x20] sm:$0x1]  ;;  %v5450_v57 = vcombine.low %v6281_v2, %v2204_v47  ;;  %v2679_v8 = vshrl.u32 %v2597_v50, 16  ;;  %v2099_v12 = vld [vmem:[#allocation2 + $0x1c] sm:$0xf] }
  0x40   : > { %v5513_v61 = vcombine.low %v3237_v3, %v3240_v22  ;;  %v3247_v5 = vsel %vm6148_vm13, %v3245_v60, %v3246_v48  ;;  %v2100_v32 = vld [vmem:[#allocation2 + $0x20] sm:$0x1]  ;;  %v2671_v25 = vrot.slane %v2669_v62, 5  ;;  %v2685_v26 = vshll.u32 %v2598_v54, 16  ;;  %v3640_v35 = vld [vmem:[#allocation2 + $0x24] sm:$0xf] }
  0x41   : > { %v4284_v6 = vsel %vm6148_vm13, %v4282_v20, %v4283_v49  ;;  %v5514_v14 = vcombine.low %v6291_v13, %v3247_v5  ;;  %v2103_v3 = vld [vmem:[#allocation2 + $0x2c] sm:$0x1]  ;;  %v2677_v31 = vrot.slane %v2675_v55, 5  ;;  %v2681_v20 = vrot.slane %v2679_v8, 4  ;;  %v3641_v39 = vld [vmem:[#allocation2 + $0x28] sm:$0xf] }
  0x42   : > { %3394 = vrot.lane.b32.xlu0 %v5513_v61, %s5993_s15  ;;  %v5577_v2 = vcombine.low %v4281_v36, %v4284_v6  ;;  %v4187_v23 = vld [vmem:[#allocation2 + $0x2c] sm:$0x1]  ;;  %2353 = vrot.lane.b32.xlu1 %v5450_v57, %s5989_s11  ;;  %v2217_v60 = vrot.slane %v2103_v3, 5  ;;  %v2672_v33 = vor.u32 %v2671_v25, %v2668_v58  ;;  %v2687_v29 = vrot.slane %v2685_v26, 5  ;;  %v1548_v5 = vld [vmem:[#allocation2 + $0x10] sm:$0xf] }
  0x43   : > { %v4290_v30 = vrot.slane %v4187_v23, 5  ;;  %v5435_v7 = vrot.slane %v2098_v63, 9  ;;  %v2207_v10 = vrot.slane %v2099_v12, 5  ;;  %v2682_v36 = vor.u32 %v2681_v20, %v2677_v31  ;;  %v3642_v45 = vld [vmem:[#allocation2 + $0x2c] sm:$0x1] }
  0x44   : > { %v2218_v15 = vsel %vm6148_vm13, %v2216_v41, %v2217_v60  ;;  %v2210_v38 = vrot.slane %v2100_v32, 5  ;;  %v2673_v47 = vrot.slane %v2672_v33, 4  ;;  %v3713_v49 = vshll.u32 %v3640_v35, 16  ;;  %v1547_v58 = vld [vmem:[#allocation2 + $0xc] sm:$0xf] }
  0x45   : > { %v4291_v13 = vsel %vm6148_vm13, %v4289_v19, %v4290_v30  ;;  %v5452_v46 = vcombine.low %v6314_v17, %v2218_v15  ;;  %v2208_v22 = vsel %vm6148_vm13, %v5435_v7, %v2207_v10  ;;  %v2683_v41 = vrot.slane %v2682_v36, 4  ;;  %v1549_v6 = vld [vmem:[#allocation2 + $0x14] sm:$0x1]  ;;  %v1551_v7 = vld [vmem:[#allocation2 + $0x1c] sm:$0xf] }
  0x46   : > { %4438 = vrot.lane.b32.xlu0 %v5577_v2, %s5994_s16  ;;  %v5578_v28 = vcombine.low %v6318_v40, %v4291_v13  ;;  %3396 = vrot.lane.b32.xlu1 %v5514_v14, %s5993_s15  ;;  %v2209_v48 = vrot.slane %v2207_v10, 4  ;;  %v3710_v19 = vshrl.u32 %v3640_v35, 16  ;;  %v2678_v50 = vsel %vm6175_vm14, %v2673_v47, %v2677_v31  ;;  %v1550_v14 = vld [vmem:[#allocation2 + $0x18] sm:$0xf]  ;;  %v2593_v47 = vld [vmem:[#allocation2 + $0xc] sm:$0xf] }
  0x47   : > { %v3719_v54 = vshll.u32 %v3641_v39, 16  ;;  %v3723_v57 = vshrl.u32 %v3641_v39, 16  ;;  %v3729_v61 = vshll.u32 %v3642_v45, 16  ;;  %v2688_v17 = vsel %vm6175_vm14, %v2683_v41, %v2687_v29 }
  0x48   : > { %v2211_v40 = vsel %vm6148_vm13, %v2209_v48, %v2210_v38  ;;  %v3712_v62 = vrot.slane %v3710_v19, 4  ;;  %v3715_v63 = vrot.slane %v3713_v49, 5  ;;  %v5482_v55 = vcombine.low %v2678_v50, %v2688_v17  ;;  %v1552_v38 = vld [vmem:[#allocation2 + $0x20] sm:$0x1] }
  0x49   : > { %v5451_v8 = vcombine.low %v2208_v22, %v2211_v40  ;;  %v3721_v12 = vrot.slane %v3719_v54, 5  ;;  %v3725_v32 = vrot.slane %v3723_v57, 4  ;;  %v3731_v3 = vrot.slane %v3729_v61, 5  ;;  %v2594_v61 = vld [vmem:[#allocation2 + $0x10] sm:$0xf] }
  0x4a   : > { %4440 = vrot.lane.b32.xlu0 %v5578_v28, %s5994_s16  ;;  %2357 = vrot.lane.b32.xlu1 %v5452_v46, %s5989_s11  ;;  %v3716_v2 = vor.u32 %v3715_v63, %v3712_v62  ;;  %v1620_v23 = vshrl.u32 %v1547_v58, 16  ;;  %v1623_v25 = vshll.u32 %v1547_v58, 16  ;;  %v1629_v60 = vshll.u32 %v1548_v5, 16 }
  0x4b   : > { %v3726_v26 = vor.u32 %v3725_v32, %v3721_v12  ;;  %v1633_v30 = vshrl.u32 %v1548_v5, 16  ;;  %v1639_v31 = vshll.u32 %v1549_v6, 16  ;;  %v1644_v10 = vshrl.u32 %v1550_v14, 16 }
  0x4c   : > { %v3717_v20 = vrot.slane %v3716_v2, 4  ;;  %v1622_v33 = vrot.slane %v1620_v23, 4  ;;  %v1625_v29 = vrot.slane %v1623_v25, 5  ;;  %v1631_v15 = vrot.slane %v1629_v60, 5  ;;  %v1554_v23 = vld [vmem:[#allocation2 + $0x28] sm:$0xf] }
  0x4d   : > { %v3727_v35 = vrot.slane %v3726_v26, 4  ;;  %v1635_v13 = vrot.slane %v1633_v30, 4  ;;  %v1641_v36 = vrot.slane %v1639_v31, 5  ;;  %v1646_v46 = vrot.slane %v1644_v10, 4  ;;  %v1555_v31 = vld [vmem:[#allocation2 + $0x2c] sm:$0x1] }
  0x4e   : > { %2355 = vrot.lane.b32.xlu0 %v5451_v8, %s5989_s11  ;;  %3075 = vrot.lane.b32.xlu1 %v5482_v55, %s5995_s17  ;;  %v3722_v39 = vsel %vm6175_vm14, %v3717_v20, %v3721_v12  ;;  %v1626_v45 = vor.u32 %v1625_v29, %v1622_v33  ;;  %v1647_v28 = vshll.u32 %v1550_v14, 16  ;;  %v1653_v48 = vshll.u32 %v1551_v7, 16  ;;  %v2595_v55 = vld [vmem:[#allocation2 + $0x14] sm:$0x1]  ;;  %v1553_v12 = vld [vmem:[#allocation2 + $0x24] sm:$0xf] }
  0x4f   : > { %v3732_v22 = vsel %vm6175_vm14, %v3727_v35, %v3731_v3  ;;  %v1636_v41 = vor.u32 %v1635_v13, %v1631_v15  ;;  %v1657_v19 = vshrl.u32 %v1551_v7, 16  ;;  %v1663_v57 = vshll.u32 %v1552_v38, 16  ;;  %v3637_v10 = vld [vmem:[#allocation2 + $0x18] sm:$0xf] }
  0x50   : > { %v5546_v49 = vcombine.low %v3722_v39, %v3732_v22  ;;  %v1627_v50 = vrot.slane %v1626_v45, 4  ;;  %v1649_v54 = vrot.slane %v1647_v28, 5  ;;  %v1655_v17 = vrot.slane %v1653_v48, 5  ;;  %v3638_v48 = vld [vmem:[#allocation2 + $0x1c] sm:$0xf] }
  0x51   : > { %v1637_v58 = vrot.slane %v1636_v41, 4  ;;  %v1659_v40 = vrot.slane %v1657_v19, 4  ;;  %v2642_v62 = vshrl.u32 %v2593_v47, 16  ;;  %v1665_v6 = vrot.slane %v1663_v57, 5 }
  0x52   : > { %4119 = vrot.lane.b32.xlu1 %v5546_v49, %s5996_s18  ;;  %v1632_v63 = vsel %vm6175_vm14, %v1627_v50, %v1631_v15  ;;  %v1650_v5 = vor.u32 %v1649_v54, %v1646_v46  ;;  %v2645_v8 = vshll.u32 %v2593_v47, 16  ;;  %v2651_v3 = vshll.u32 %v2594_v61, 16 }
  0x53   : > { %v1642_v32 = vsel %vm6175_vm14, %v1637_v58, %v1641_v36  ;;  %v1660_v14 = vor.u32 %v1659_v40, %v1655_v17  ;;  %v2644_v2 = vrot.slane %v2642_v62, 4  ;;  %v2655_v30 = vshrl.u32 %v2594_v61, 16 }
  0x54   : > { %v5418_v25 = vcombine.low %v1632_v63, %v1642_v32  ;;  %v1651_v26 = vrot.slane %v1650_v5, 4  ;;  %v2647_v60 = vrot.slane %v2645_v8, 5  ;;  %v2653_v33 = vrot.slane %v2651_v3, 5 }
  0x55   : > { %v1661_v20 = vrot.slane %v1660_v14, 4  ;;  %v2661_v29 = vshll.u32 %v2595_v55, 16  ;;  %v1668_v7 = vshrl.u32 %v1553_v12, 16  ;;  %v2657_v13 = vrot.slane %v2655_v30, 4  ;;  %v2599_v55 = vld [vmem:[#allocation2 + $0x24] sm:$0xf] }
  0x56   : > { %2029 = vrot.lane.b32.xlu0 %v5418_v25, %s5990_s12  ;;  %v1656_v35 = vsel %vm6175_vm14, %v1651_v26, %v1655_v17  ;;  %v2648_v15 = vor.u32 %v2647_v60, %v2644_v2  ;;  %v1671_v36 = vshll.u32 %v1553_v12, 16  ;;  %v1677_v46 = vshll.u32 %v1554_v23, 16  ;;  %v3639_v17 = vld [vmem:[#allocation2 + $0x20] sm:$0x1]  ;;  %v2600_v2 = vld [vmem:[#allocation2 + $0x28] sm:$0xf] }
  0x57   : > { %v1666_v38 = vsel %vm6175_vm14, %v1661_v20, %v1665_v6  ;;  %v2663_v39 = vrot.slane %v2661_v29, 5  ;;  %v1670_v45 = vrot.slane %v1668_v7, 4  ;;  %v2658_v22 = vor.u32 %v2657_v13, %v2653_v33  ;;  %v2601_v20 = vld [vmem:[#allocation2 + $0x2c] sm:$0x1]  ;;  %v1201_v29 = vld [vmem:[#allocation2 + $0x38] sm:$0x1] }
  0x58   : > { %v5419_v28 = vcombine.low %v1656_v35, %v1666_v38  ;;  %v2649_v47 = vrot.slane %v2648_v15, 4  ;;  %v1673_v41 = vrot.slane %v1671_v36, 5  ;;  %v1679_v19 = vrot.slane %v1677_v46, 5  ;;  %v2602_v13 = vld [vmem:[#allocation2 + $0x30] sm:$0xf] }
  0x59   : > { %v1681_v49 = vshrl.u32 %v1554_v23, 16  ;;  %v1687_v50 = vshll.u32 %v1555_v31, 16  ;;  %v3686_v54 = vshrl.u32 %v3637_v10, 16  ;;  %v2659_v61 = vrot.slane %v2658_v22, 4  ;;  %v2603_v46 = vld [vmem:[#allocation2 + $0x34] sm:$0xf] }
  0x5a   : > { %2031 = vrot.lane.b32.xlu1 %v5419_v28, %s5990_s12  ;;  %v2654_v57 = vsel %vm6175_vm14, %v2649_v47, %v2653_v33  ;;  %v1674_v58 = vor.u32 %v1673_v41, %v1670_v45  ;;  %v3689_v40 = vshll.u32 %v3637_v10, 16  ;;  %v3695_v6 = vshll.u32 %v3638_v48, 16 }
  0x5b   : > { %v1683_v62 = vrot.slane %v1681_v49, 4  ;;  %v1689_v63 = vrot.slane %v1687_v50, 5  ;;  %v3688_v5 = vrot.slane %v3686_v54, 4  ;;  %v2664_v8 = vsel %vm6175_vm14, %v2659_v61, %v2663_v39  ;;  %v3146_v61 = vld [vmem:[#allocation2 + $0x2c] sm:$0x1] }
  0x5c   : > { %v1675_v12 = vrot.slane %v1674_v58, 4  ;;  %v3691_v32 = vrot.slane %v3689_v40, 5  ;;  %v3699_v14 = vshrl.u32 %v3638_v48, 16  ;;  %v5481_v3 = vcombine.low %v2654_v57, %v2664_v8  ;;  %v3144_v48 = vld [vmem:[#allocation2 + $0x24] sm:$0xe] }
  0x5d   : > { %v1684_v23 = vor.u32 %v1683_v62, %v1679_v19  ;;  %v3697_v25 = vrot.slane %v3695_v6, 5  ;;  %v3705_v26 = vshll.u32 %v3639_v17, 16  ;;  %v2690_v33 = vshrl.u32 %v2599_v55, 16  ;;  %v3145_v57 = vld [vmem:[#allocation2 + $0x28] sm:$0xf] }
  0x5e   : > { %v1680_v60 = vsel %vm6175_vm14, %v1675_v12, %v1679_v19  ;;  %v3692_v30 = vor.u32 %v3691_v32, %v3688_v5  ;;  %v3701_v31 = vrot.slane %v3699_v14, 4  ;;  %3073 = vrot.lane.b32.xlu0 %v5481_v3, %s5995_s17  ;;  %v2693_v35 = vshll.u32 %v2599_v55, 16  ;;  %v3148_v5 = vld [vmem:[#allocation2 + $0x34] sm:$0xf] }
  0x5f   : > { %v1685_v7 = vrot.slane %v1684_v23, 4  ;;  %v3707_v10 = vrot.slane %v3705_v26, 5  ;;  %v2699_v15 = vshll.u32 %v2600_v2, 16  ;;  %v2692_v39 = vrot.slane %v2690_v33, 4 }
  0x60   : > { %v3693_v36 = vrot.slane %v3692_v30, 4  ;;  %v3702_v38 = vor.u32 %v3701_v31, %v3697_v25  ;;  %v2703_v45 = vshrl.u32 %v2600_v2, 16  ;;  %v2695_v47 = vrot.slane %v2693_v35, 5 }
  0x61   : > { %v1690_v28 = vsel %vm6175_vm14, %v1685_v7, %v1689_v63  ;;  %v2701_v22 = vrot.slane %v2699_v15, 5  ;;  %v2709_v41 = vshll.u32 %v2601_v20, 16  ;;  %v1202_v40 = vsel %vm6058_vm2, %v919_v34, %v1201_v29  ;;  %v3147_v63 = vld [vmem:[#allocation2 + $0x30] sm:$0xe] }
  0x62   : > { %v5420_v19 = vcombine.low %v1680_v60, %v1690_v28  ;;  %v3698_v49 = vsel %vm6175_vm14, %v3693_v36, %v3697_v25  ;;  %v3703_v50 = vrot.slane %v3702_v38, 4  ;;  %v2705_v54 = vrot.slane %v2703_v45, 4  ;;  %1203 = vst [vmem:[#allocation2 + $0x38] sm:$0x1] %v1202_v40  ;;  %v3643_v36 = vld [vmem:[#allocation2 + $0x30] sm:$0xf] }
  0x63   : > { %v2696_v58 = vor.u32 %v2695_v47, %v2692_v39  ;;  %v2711_v17 = vrot.slane %v2709_v41, 5  ;;  %v2714_v62 = vshrl.u32 %v2602_v13, 16  ;;  %v2717_v8 = vshll.u32 %v2602_v13, 16  ;;  %v6397_v28 = vld [vmem:[%s7968_s4] ss:$0 sm:$0xff] }
  0x64   : > { %2033 = vrot.lane.b32.xlu1 %v5420_v19, %s5990_s12  ;;  %v3708_v6 = vsel %vm6175_vm14, %v3703_v50, %v3707_v10  ;;  %v2706_v55 = vor.u32 %v2705_v54, %v2701_v22  ;;  %v2723_v12 = vshll.u32 %v2603_v46, 16  ;;  %v2727_v3 = vshrl.u32 %v2603_v46, 16  ;;  %v3644_v46 = vld [vmem:[#allocation2 + $0x34] sm:$0xf] }
  0x65   : > { %v5545_v32 = vcombine.low %v3698_v49, %v3708_v6  ;;  %v2697_v14 = vrot.slane %v2696_v58, 4  ;;  %v2716_v2 = vrot.slane %v2714_v62, 4  ;;  %v2719_v23 = vrot.slane %v2717_v8, 5  ;;  %v541_v6 = vld [vmem:[#allocation2 + $0x44] sm:$0x1] }
  0x66   : > { %v2707_v9 = vrot.slane %v2706_v55, 4  ;;  %v2725_v25 = vrot.slane %v2723_v12, 5  ;;  %v5499_v34 = vrot.slane %v3144_v48, 9  ;;  %v2729_v60 = vrot.slane %v2727_v3, 4  ;;  %v5910_v55 = vld [vmem:[#allocation2 + $0x30] sm:$0xff]  }
  0x67   : > { %4117 = vrot.lane.b32.xlu0 %v5545_v32, %s5996_s18  ;;  %v2702_v26 = vsel %vm6175_vm14, %v2697_v14, %v2701_v22  ;;  %v3250_v30 = vrot.slane %v3145_v57, 5  ;;  %v3253_v31 = vrot.slane %v3146_v61, 5  ;;  %v2720_v33 = vor.u32 %v2719_v23, %v2716_v2 }
  0x68   : > { %v2712_v20 = vsel %vm6175_vm14, %v2707_v9, %v2711_v17  ;;  %v5500_v29 = vrot.slane %v3147_v63, 9  ;;  %v3257_v7 = vrot.slane %v3148_v5, 5  ;;  %v2730_v35 = vor.u32 %v2729_v60, %v2725_v25  ;;  %v1204_v9 = vld [vmem:[#allocation2 + $0x3c] sm:$0xf] }
  0x69   : > { %v5483_v10 = vcombine.low %v2702_v26, %v2712_v20  ;;  %v3251_v15 = vsel %vm6148_vm13, %v5499_v34, %v3250_v30  ;;  %v3252_v13 = vrot.slane %v3250_v30, 4  ;;  %v2721_v38 = vrot.slane %v2720_v33, 4  ;;  %v2604_v22 = vld [vmem:[#allocation2 + $0x38] sm:$0x1]  ;;  %v4188_v34 = vld [vmem:[#allocation2 + $0x30] sm:$0xe] }
  0x6a   : > { %v3259_v39 = vrot.slane %v3257_v7, 4  ;;  %v730_v45 = vmax.f32 %v6267_v51, 0.0  ;;  %v6402_v47 = vmul.f32 %v6397_v28, %v5748_v37  ;;  %v2731_v41 = vrot.slane %v2730_v35, 4  ;;  %v3149_v19 = vld [vmem:[#allocation2 + $0x38] sm:$0x1] }
  0x6b   : > { %3077 = vrot.lane.b32.xlu0 %v5483_v10, %s5995_s17  ;;  %v3254_v48 = vsel %vm6148_vm13, %v3252_v13, %v3253_v31  ;;  %v6409_v51 = vsel %vm6148_vm13, %v5500_v29, %v3257_v7  ;;  %v731_v49 = vmax.f32 %v6270_v52, 0.0  ;;  %v2726_v44 = vsel %vm6175_vm14, %v2721_v38, %v2725_v25  ;;  %v3645_v14 = vld [vmem:[#allocation2 + $0x38] sm:$0x1]  ;;  %v4189_v20 = vld [vmem:[#allocation2 + $0x34] sm:$0xf] }
  0x6c   : > { %v2733_v50 = vshll.u32 %v2604_v22, 16  ;;  %v5515_v37 = vcombine.low %v3251_v15, %v3254_v48  ;;  %v3260_v54 = vrot.slane %v3149_v19, 5  ;;  %v5661_v57 = vpack.c.bf16 %v730_v45, %v730_v45  ;;  %v4190_v35 = vld [vmem:[#allocation2 + $0x38] sm:$0x1]  ;;  %v1557_v48 = vld [vmem:[#allocation2 + $0x34] sm:$0xf] }
  0x6d   : > { %v5662_v61 = vpack.c.bf16 %v731_v49, %v731_v49  ;;  %v3734_v58 = vshrl.u32 %v3643_v36, 16  ;;  %v3737_v17 = vshll.u32 %v3643_v36, 16  ;;  %v3743_v63 = vshll.u32 %v3644_v46, 16 }
  0x6e   : > { %v2735_v40 = vrot.slane %v2733_v50, 5  ;;  %v3261_v62 = vsel %vm6148_vm13, %v3259_v39, %v3260_v54  ;;  %v3747_v5 = vshrl.u32 %v3644_v46, 16  ;;  %v921_v8 = vshrl.u32 %v5661_v57, 16  ;;  %v1556_v39 = vld [vmem:[#allocation2 + $0x30] sm:$0xf] }
  0x6f   : > { %3398 = vrot.lane.b32.xlu0 %v5515_v37, %s5993_s15  ;;  %v5516_v52 = vcombine.low %v6409_v51, %v3261_v62  ;;  %v924_v12 = vshll.u32 %v5661_v57, 16  ;;  %v929_v32 = vshrl.u32 %v5662_v61, 16  ;;  %v932_v3 = vshll.u32 %v5662_v61, 16  ;;  %v1558_v50 = vld [vmem:[#allocation2 + $0x38] sm:$0x1] }
  0x70   : > { %v2736_v2 = vsel %vm6175_vm14, %v2731_v41, %v2735_v40  ;;  %v3736_v23 = vrot.slane %v3734_v58, 4  ;;  %v3739_v25 = vrot.slane %v3737_v17, 5  ;;  %v923_v60 = vrot.slane %v921_v8, 7  ;;  %v2104_v58 = vld [vmem:[#allocation2 + $0x30] sm:$0xe] }
  0x71   : > { %v5484_v26 = vcombine.low %v2726_v44, %v2736_v2  ;;  %v931_v30 = vrot.slane %v929_v32, 7  ;;  %v3745_v31 = vrot.slane %v3743_v63, 5  ;;  %v3749_v29 = vrot.slane %v3747_v5, 4  ;;  %v6434_v5 = vld [vmem:[#allocation2 + $0x34] sm:$0xf] }
  0x72   : > { %v3740_v33 = vor.u32 %v3739_v25, %v3736_v23  ;;  %v3753_v7 = vshll.u32 %v3645_v14, 16  ;;  %v542_v10 = vsel %vm6065_vm4, 0, %v541_v6  ;;  %v926_v15 = vor.u32 %v924_v12, %v923_v60  ;;  %v6438_v32 = vld [vmem:[#allocation2 + $0x38] sm:$0x1] }
  0x73   : > { %3079 = vrot.lane.b32.xlu1 %v5484_v26, %s5995_s17  ;;  %3576 = vrot.lane.b32.xlu0 %v5910_v55, %s5992_s14  ;;  %v927_v13 = vrot.slane %v923_v60, 4  ;;  %v934_v36 = vor.u32 %v932_v3, %v931_v30  ;;  %v936_v38 = vrot.slane %v931_v30, 4  ;;  %543 = vst [vmem:[#allocation2 + $0x44] sm:$0x1] %v542_v10  ;;  %v3750_v46 = vor.u32 %v3749_v29, %v3745_v31  ;;  %v6448_v29 = vld [vmem:[%s6098_s29 + $0x40] sm:$0xff]  }
  0x74   : > { %v3741_v45 = vrot.slane %v3740_v33, 4  ;;  %v3755_v22 = vrot.slane %v3753_v7, 5  ;;  %v5563_v41 = vrot.slane %v4188_v34, 9  ;;  %v1205_v51 = vsel %vm6089_vm8, %v926_v15, %v1204_v9  ;;  %v488_v9 = vld [vmem:[#allocation2 + $0x48] sm:$0x1] }
  0x75   : > { %v935_v19 = vsel %vm6078_vm7, %v927_v13, %v934_v36  ;;  %v4294_v49 = vrot.slane %v4189_v20, 5  ;;  %v4297_v44 = vrot.slane %v4190_v35, 5  ;;  %1206 = vst [vmem:[#allocation2 + $0x3c] sm:$0xf] %v1205_v51  ;;  %v3751_v54 = vrot.slane %v3750_v46, 4 }
  0x76   : > { %1207 = vst.msk [vmem:[#allocation2 + $0x40] sm:$0xf] %vm1173_vm6, %v935_v19  ;;  %v3746_v37 = vsel %vm6175_vm14, %v3741_v45, %v3745_v31  ;;  %v1692_v57 = vshrl.u32 %v1556_v39, 16  ;;  %v1695_v61 = vshll.u32 %v1556_v39, 16  ;;  %v1701_v62 = vshll.u32 %v1557_v48, 16 }
  0x77   : > { %3400 = vrot.lane.b32.xlu1 %v5516_v52, %s5993_s15  ;;  %v4295_v17 = vsel %vm6148_vm13, %v5563_v41, %v4294_v49  ;;  %v4296_v40 = vrot.slane %v4294_v49, 4  ;;  %v1705_v63 = vshrl.u32 %v1557_v48, 16  ;;  %v3756_v6 = vsel %vm6175_vm14, %v3751_v54, %v3755_v22  ;;  %v6463_v39 = vld [vmem:[%s7969_s5] ss:$0 sm:$0xff] }
  0x78   : > { %v1694_v55 = vrot.slane %v1692_v57, 4  ;;  %v1697_v8 = vrot.slane %v1695_v61, 5  ;;  %v1711_v12 = vshll.u32 %v1558_v50, 16  ;;  %v5547_v14 = vcombine.low %v3746_v37, %v3756_v6 }
  0x79   : > { %v4298_v52 = vsel %vm6148_vm13, %v4296_v40, %v4297_v44  ;;  %v1703_v2 = vrot.slane %v1701_v62, 5  ;;  %v1707_v3 = vrot.slane %v1705_v63, 4  ;;  %v5437_v60 = vrot.slane %v2104_v58, 9 }
  0x7a   : > { %v1208_v23 = vld [vmem:[#allocation2 + $0x44] sm:$0x1]  ;;  %v5579_v25 = vcombine.low %v4295_v17, %v4298_v52  ;;  %v1698_v34 = vor.u32 %v1697_v8, %v1694_v55  ;;  %v1713_v26 = vrot.slane %v1711_v12, 5  ;;  %4121 = vrot.lane.b32.xlu0 %v5547_v14, %s5996_s18  ;;  %v2221_v20 = vrot.slane %v6434_v5, 5 }
  0x7b   : > { %v1209_v30 = vsel %vm6058_vm2, %v936_v38, %v1208_v23  ;;  %v1708_v31 = vor.u32 %v1707_v3, %v1703_v2  ;;  %v2224_v33 = vrot.slane %v6438_v32, 5  ;;  %v489_v10 = vsel %vm6058_vm2, 0, %v488_v9  ;;  %v5923_v5 = vld [vmem:[%s7967_s3] sm:$0xff]  }
  0x7c   : > { %1210 = vst [vmem:[#allocation2 + $0x44] sm:$0x1] %v1209_v30  ;;  %v1699_v7 = vrot.slane %v1698_v34, 4  ;;  %v732_v35 = vmax.f32 %v6273_v56, 0.0  ;;  %v733_v15 = vmax.f32 %v6286_v11, 0.0  ;;  %v6458_v38 = vsel %vm6148_vm13, %v5437_v60, %v2221_v20  ;;  %v6474_v11 = vld [vmem:[%s6098_s29 + $0x48] sm:$0xff]   ;;  %5817 = vmatprep.subr.bf16.mxu0 %v5923_v5  ;;  %5859 = vmatprep.subr.bf16.mxu1 %v5923_v5 }
  0x7d   : > { %v5911_v13 = vld [vmem:[#allocation2 + $0x3c] sm:$0xff]   ;;  %v1709_v36 = vrot.slane %v1708_v31, 4  ;;  %490 = vst [vmem:[#allocation2 + $0x48] sm:$0x1] %v489_v10  ;;  %v6467_v45 = vadd.f32 %v6463_v39, %v6310_v42  ;;  %v6471_v56 = vadd.f32 %v6463_v39, %v6402_v47  ;;  %v5751_v51 = vunpack.c.l.bf16 %v6448_v29  ;;  %5818 = vmatpush3.bf16.msra.mxu0 %v5923_v5  ;;  %5864 = vmatpush3.bf16.msra.mxu1 %v5923_v5 }
  0x7e   : > { %v3646_v46 = vld [vmem:[#allocation2 + $0x3c] sm:$0xf]  ;;  %v3647_v22 = vld [vmem:[#allocation2 + $0x40] sm:$0xf]  ;;  %v1704_v41 = vsel %vm6175_vm14, %v1699_v7, %v1703_v2  ;;  %v6478_v19 = vpack.c.bf16 %v732_v35, %v732_v35  ;;  %v5752_v49 = vunpack.c.h.bf16 %v6448_v29  ;;  %3578 = vrot.lane.b32.xlu1 %v5911_v13, %s5992_s14  ;;  %4442 = vrot.lane.b32.xlu0 %v5579_v25, %s5994_s16  ;;  %v6486_v17 = vpack.c.bf16 %v733_v15, %v733_v15 }
  0x7f   : > { %v4191_v48 = vld [vmem:[#allocation2 + $0x3c] sm:$0xe]  ;;  %v3758_v42 = vshrl.u32 %v3646_v46, 16  ;;  %v3761_v44 = vshll.u32 %v3646_v46, 16  ;;  %v3767_v47 = vshll.u32 %v3647_v22, 16  ;;  %v3771_v50 = vshrl.u32 %v3647_v22, 16 }
  0x80   : > { %v4192_v37 = vld [vmem:[#allocation2 + $0x40] sm:$0xf]  ;;  %v1714_v54 = vsel %vm6175_vm14, %v1709_v36, %v1713_v26  ;;  %v5564_v57 = vrot.slane %v4191_v48, 9  ;;  %v1559_v58 = vld [vmem:[#allocation2 + $0x3c] sm:$0xf]  ;;  %v6489_v14 = vmul.f32 %v6397_v28, %v5751_v51  ;;  %v5755_v52 = vunpack.c.l.bf16 %v6474_v11 }
  0x81   : > { %v4301_v61 = vrot.slane %v4192_v37, 5  ;;  %v3760_v40 = vrot.slane %v3758_v42, 4  ;;  %v3763_v62 = vrot.slane %v3761_v44, 5  ;;  %v3769_v63 = vrot.slane %v3767_v47, 5  ;;  %v1560_v8 = vld [vmem:[#allocation2 + $0x40] sm:$0xf] }
  0x82   : > { %v3773_v6 = vrot.slane %v3771_v50, 4  ;;  %v1716_v12 = vshrl.u32 %v1559_v58, 16  ;;  %v6492_v23 = vcombine.low %v1704_v41, %v1714_v54  ;;  %v1719_v7 = vshll.u32 %v1559_v58, 16  ;;  %v2107_v10 = vld [vmem:[#allocation2 + $0x3c] sm:$0xe] }
  0x83   : > { %v4303_v55 = vrot.slane %v4301_v61, 4  ;;  %v3648_v2 = vld [vmem:[#allocation2 + $0x44] sm:$0x1]  ;;  %v3764_v3 = vor.u32 %v3763_v62, %v3760_v40  ;;  %v4302_v34 = vsel %vm6148_vm13, %v5564_v57, %v4301_v61  ;;  %v1725_v13 = vshll.u32 %v1560_v8, 16  ;;  %v2108_v51 = vld [vmem:[#allocation2 + $0x40] sm:$0xf] }
  0x84   : > { %v3774_v9 = vor.u32 %v3773_v6, %v3769_v63  ;;  %v4193_v25 = vld [vmem:[#allocation2 + $0x44] sm:$0x1]  ;;  %v3777_v60 = vshll.u32 %v3648_v2, 16  ;;  %v1718_v31 = vrot.slane %v1716_v12, 4  ;;  %v1729_v36 = vshrl.u32 %v1560_v8, 16 }
  0x85   : > { %v1561_v26 = vld [vmem:[#allocation2 + $0x44] sm:$0x1]  ;;  %v4304_v30 = vrot.slane %v4193_v25, 5  ;;  %v3765_v35 = vrot.slane %v3764_v3, 4  ;;  %v1721_v41 = vrot.slane %v1719_v7, 5  ;;  %v1727_v47 = vrot.slane %v1725_v13, 5 }
  0x86   : > { %v3775_v15 = vrot.slane %v3774_v9, 4  ;;  %v3779_v46 = vrot.slane %v3777_v60, 5  ;;  %v1735_v48 = vshll.u32 %v1561_v26, 16  ;;  %v1731_v50 = vrot.slane %v1729_v36, 4  ;;  %v2109_v37 = vld [vmem:[#allocation2 + $0x44] sm:$0x1] }
  0x87   : > { %v4305_v22 = vsel %vm6148_vm13, %v4303_v55, %v4304_v30  ;;  %v3770_v42 = vsel %vm6175_vm14, %v3765_v35, %v3769_v63  ;;  %v1722_v57 = vor.u32 %v1721_v41, %v1718_v31  ;;  %v2223_v58 = vrot.slane %v2221_v20, 4  ;;  %v2605_v3 = vld [vmem:[#allocation2 + $0x3c] sm:$0xf]  ;;  %v2606_v7 = vld [vmem:[#allocation2 + $0x40] sm:$0xf] }
  0x88   : > { %v5580_v44 = vcombine.low %v4302_v34, %v4305_v22  ;;  %v3780_v54 = vsel %vm6175_vm14, %v3775_v15, %v3779_v46  ;;  %v1737_v61 = vrot.slane %v1735_v48, 5  ;;  %v1732_v62 = vor.u32 %v1731_v50, %v1727_v47  ;;  %v544_v34 = vld [vmem:[#allocation2 + $0x50] sm:$0x1]  ;;  %v5912_v26 = vld [vmem:[#allocation2 + $0x3c] sm:$0xff]   ;;  %v1211_v15 = vld [vmem:[#allocation2 + $0x48] sm:$0xf] }
  0x89   : > { %v5548_v40 = vcombine.low %v3770_v42, %v3780_v54  ;;  %v5438_v6 = vrot.slane %v2107_v10, 9  ;;  %v2228_v55 = vrot.slane %v2108_v51, 5  ;;  %v1723_v8 = vrot.slane %v1722_v57, 4  ;;  %v2607_v13 = vld [vmem:[#allocation2 + $0x44] sm:$0x1]  ;;  %v5926_v42 = vld [vmem:[%s7967_s3 + $0x8] sm:$0xff]  }
  0x8a   : > { %4444 = vrot.lane.b32.xlu0 %v5580_v44, %s5994_s16  ;;  %v2225_v63 = vsel %vm6148_vm13, %v2223_v58, %v2224_v33  ;;  %v2231_v12 = vrot.slane %v2109_v37, 5  ;;  %v938_v2 = vshrl.u32 %v6478_v19, 16  ;;  %v1733_v20 = vrot.slane %v1732_v62, 4  ;;  %v3150_v48 = vld [vmem:[#allocation2 + $0x3c] sm:$0xe]  ;;  %5819 = vmatprep.subr.bf16.mxu0 %v5926_v42 }
  0x8b   : > { %4123 = vrot.lane.b32.xlu1 %v5548_v40, %s5996_s18  ;;  %v5453_v9 = vcombine.low %v6458_v38, %v2225_v63  ;;  %v6517_v25 = vsel %vm6148_vm13, %v5438_v6, %v2228_v55  ;;  %v2230_v32 = vrot.slane %v2228_v55, 4  ;;  %v1728_v33 = vsel %vm6175_vm14, %v1723_v8, %v1727_v47  ;;  %v491_v51 = vld [vmem:[#allocation2 + $0x54] sm:$0x1]  ;;  %v3151_v37 = vld [vmem:[#allocation2 + $0x40] sm:$0xf]  ;;  %5860 = vmatprep.subr.bf16.mxu1 %v5926_v42 }
  0x8c   : > { %v940_v60 = vrot.slane %v938_v2, 7  ;;  %v941_v30 = vshll.u32 %v6478_v19, 16  ;;  %v946_v31 = vshrl.u32 %v6486_v17, 16  ;;  %v1738_v38 = vsel %vm6175_vm14, %v1733_v20, %v1737_v61  ;;  %v3152_v40 = vld [vmem:[#allocation2 + $0x44] sm:$0x1]  ;;  %5820 = vmatpush3.bf16.msra.mxu0 %v5926_v42  ;;  %5865 = vmatpush3.bf16.msra.mxu1 %v5926_v42 }
  0x8d   : > { %v6528_v10 = vsel %vm6148_vm13, %v2230_v32, %v2231_v12  ;;  %v949_v35 = vshll.u32 %v6486_v17, 16  ;;  %v2738_v36 = vshrl.u32 %v2605_v3, 16  ;;  %v5422_v19 = vcombine.low %v1728_v33, %v1738_v38  ;;  %v547_v8 = vld [vmem:[#allocation2 + $0x5c] sm:$0x1]  ;;  %v494_v5 = vld [vmem:[#allocation2 + $0x60] sm:$0x1] }
  0x8e   : > { %2359 = vrot.lane.b32.xlu0 %v5453_v9, %s5989_s11  ;;  %v5454_v46 = vcombine.low %v6517_v25, %v6528_v10  ;;  %v943_v22 = vor.u32 %v941_v30, %v940_v60  ;;  %v944_v41 = vrot.slane %v940_v60, 4  ;;  %v6538_v17 = vrot.slane %v946_v31, 7  ;;  %v5929_v30 = vld [vmem:[%s7967_s3 + $0x10] sm:$0xff]  }
  0x8f   : > { %2035 = vrot.lane.b32.xlu1 %v6492_v23, %s5990_s12  ;;  %v2740_v44 = vrot.slane %v2738_v36, 4  ;;  %v2741_v47 = vshll.u32 %v2605_v3, 16  ;;  %v2747_v50 = vshll.u32 %v2606_v7, 16  ;;  %v2751_v57 = vshrl.u32 %v2606_v7, 16  ;;  %5821 = vmatprep.subr.bf16.mxu0 %v5929_v30 }
  0x90   : > { %v1212_v54 = vsel %vm6089_vm8, %v943_v22, %v1211_v15  ;;  %v2757_v61 = vshll.u32 %v2607_v13, 16  ;;  %v545_v58 = vsel %vm6065_vm4, 0, %v544_v34  ;;  %v951_v23 = vor.u32 %v949_v35, %v6538_v17  ;;  %5861 = vmatprep.subr.bf16.mxu1 %v5929_v30  ;;  %5822 = vmatpush3.bf16.msra.mxu0 %v5929_v30 }
  0x91   : > { %v953_v62 = vrot.slane %v6538_v17, 4  ;;  %1213 = vst [vmem:[#allocation2 + $0x48] sm:$0xf] %v1212_v54  ;;  %v2743_v6 = vrot.slane %v2741_v47, 5  ;;  %v2749_v55 = vrot.slane %v2747_v50, 5  ;;  %v2753_v63 = vrot.slane %v2751_v57, 4  ;;  %5866 = vmatpush3.bf16.msra.mxu1 %v5929_v30 }
  0x92   : > { %2536 = vrot.lane.b32.xlu0 %v5912_v26, %s5991_s13  ;;  %546 = vst [vmem:[#allocation2 + $0x50] sm:$0x1] %v545_v58  ;;  %v2759_v12 = vrot.slane %v2757_v61, 5  ;;  %v5501_v2 = vrot.slane %v3150_v48, 9  ;;  %v3264_v3 = vrot.slane %v3151_v37, 5  ;;  %v952_v20 = vsel %vm6078_vm7, %v944_v41, %v951_v23 }
  0x93   : > { %2037 = vrot.lane.b32.xlu1 %v5422_v19, %s5990_s12  ;;  %v2744_v9 = vor.u32 %v2743_v6, %v2740_v44  ;;  %v3267_v25 = vrot.slane %v3152_v40, 5  ;;  %v492_v32 = vsel %vm6058_vm2, 0, %v491_v51  ;;  %1214 = vst.msk [vmem:[#allocation2 + $0x4c] sm:$0xf] %vm1173_vm6, %v952_v20  ;;  %v2754_v34 = vor.u32 %v2753_v63, %v2749_v55 }
  0x94   : > { %v6555_v33 = vsel %vm6148_vm13, %v5501_v2, %v3264_v3  ;;  %v3266_v26 = vrot.slane %v3264_v3, 4  ;;  %493 = vst [vmem:[#allocation2 + $0x54] sm:$0x1] %v492_v32  ;;  %v734_v60 = vmax.f32 %v6302_v43, 0.0  ;;  %v735_v7 = vmax.f32 %v6305_v59, 0.0 }
  0x95   : > { %v2745_v31 = vrot.slane %v2744_v9, 4  ;;  %v548_v38 = vsel %vm6065_vm4, 0, %v547_v8  ;;  %v495_v10 = vsel %vm6058_vm2, 0, %v494_v5  ;;  %v2755_v35 = vrot.slane %v2754_v34, 4 }
  0x96   : > { %v3268_v15 = vsel %vm6148_vm13, %v3266_v26, %v3267_v25  ;;  %v5665_v13 = vpack.c.bf16 %v734_v60, %v734_v60  ;;  %549 = vst [vmem:[#allocation2 + $0x5c] sm:$0x1] %v548_v38  ;;  %496 = vst [vmem:[#allocation2 + $0x60] sm:$0x1] %v495_v10  ;;  %v668_v43 = vmul.f32 %v6397_v28, %v5752_v49  ;;  %v736_v19 = vmax.f32 %v6467_v45, 0.0 }
  0x97   : > { %2361 = vrot.lane.b32.xlu1 %v5454_v46, %s5989_s11  ;;  %v2750_v59 = vsel %vm6175_vm14, %v2745_v31, %v2749_v55  ;;  %v5666_v36 = vpack.c.bf16 %v735_v7, %v735_v7  ;;  %v737_v22 = vmax.f32 %v6471_v56, 0.0  ;;  %v2760_v41 = vsel %vm6175_vm14, %v2755_v35, %v2759_v12  ;;  %v6597_v12 = vld [vmem:[%s6098_s29 + $0x50] sm:$0xff]  }
  0x98   : > { %v2608_v29 = vld [vmem:[#allocation2 + $0x48] sm:$0xf]  ;;  %v5517_v49 = vcombine.low %v6555_v33, %v3268_v15  ;;  %v6581_v51 = vadd.f32 %v6463_v39, %v6489_v14  ;;  %v5756_v46 = vunpack.c.h.bf16 %v6474_v11  ;;  %v5485_v42 = vcombine.low %v2750_v59, %v2760_v41 }
  0x99   : > { %v1215_v48 = vld [vmem:[#allocation2 + $0x50] sm:$0x1]  ;;  %v2762_v56 = vshrl.u32 %v2608_v29, 16  ;;  %v2765_v17 = vshll.u32 %v2608_v29, 16  ;;  %v3153_v44 = vld [vmem:[#allocation2 + $0x48] sm:$0xe]  ;;  %v6587_v58 = vpack.c.bf16 %v736_v19, %v736_v19  ;;  %v6590_v40 = vadd.f32 %v6463_v39, %v668_v43 }
  0x9a   : > { %v1216_v45 = vsel %vm6058_vm2, %v953_v62, %v1215_v48  ;;  %v5502_v47 = vrot.slane %v3153_v44, 9  ;;  %v955_v50 = vshrl.u32 %v5665_v13, 16  ;;  %v958_v37 = vshll.u32 %v5665_v13, 16  ;;  %v5913_v57 = vld [vmem:[#allocation2 + $0x48] sm:$0xff]   ;;  %3081 = vrot.lane.b32.xlu0 %v5485_v42, %s5995_s17  ;;  %v6606_v43 = vpop.permute.xlu0 %2027 }
  0x9b   : > { %1217 = vst [vmem:[#allocation2 + $0x50] sm:$0x1] %v1216_v45  ;;  %v963_v54 = vshrl.u32 %v5666_v36, 16  ;;  %v2609_v14 = vld [vmem:[#allocation2 + $0x4c] sm:$0xf]  ;;  %v2764_v61 = vrot.slane %v2762_v56, 4  ;;  %v669_v23 = vmul.f32 %v6397_v28, %v5755_v52  ;;  %v670_v63 = vmul.f32 %v6397_v28, %v5756_v46  ;;  %2538 = vrot.lane.b32.xlu1 %v5913_v57, %s5991_s13  ;;  %v6602_v52 = vpop.permute.xlu1 %2351 }
  0x9c   : > { %v2767_v62 = vrot.slane %v2765_v17, 5  ;;  %v2771_v6 = vshll.u32 %v2609_v14, 16  ;;  %v2775_v55 = vshrl.u32 %v2609_v14, 16  ;;  %v3154_v8 = vld [vmem:[#allocation2 + $0x4c] sm:$0xf]  ;;  %v957_v3 = vrot.slane %v955_v50, 7 }
  0x9d   : > { %v3271_v2 = vrot.slane %v3154_v8, 5  ;;  %v965_v5 = vrot.slane %v963_v54, 7  ;;  %v966_v20 = vshll.u32 %v5666_v36, 16  ;;  %v1218_v11 = vld [vmem:[#allocation2 + $0x54] sm:$0xf]  ;;  %v6600_v34 = vpack.c.bf16 %v737_v22, %v737_v22  ;;  %v5914_v26 = vld [vmem:[#allocation2 + $0x48] sm:$0xff]  }
  0x9e   : > { %v2768_v9 = vor.u32 %v2767_v62, %v2764_v61  ;;  %v2773_v25 = vrot.slane %v2771_v6, 5  ;;  %v2777_v32 = vrot.slane %v2775_v55, 4  ;;  %3402 = vrot.lane.b32.xlu0 %v5517_v49, %s5993_s15  ;;  %v960_v60 = vor.u32 %v958_v37, %v957_v3  ;;  %v3649_v15 = vld [vmem:[#allocation2 + $0x48] sm:$0xf]  ;;  %v3650_v13 = vld [vmem:[#allocation2 + $0x4c] sm:$0xf] }
  0x9f   : > { %v3273_v33 = vrot.slane %v3271_v2, 4  ;;  %v961_v30 = vrot.slane %v957_v3, 4  ;;  %v5759_v31 = vunpack.c.l.bf16 %v6597_v12  ;;  %v968_v10 = vor.u32 %v966_v20, %v965_v5  ;;  %v1222_v48 = vld [vmem:[#allocation2 + $0x5c] sm:$0x1]  ;;  %v4194_v56 = vld [vmem:[#allocation2 + $0x48] sm:$0xe] }
  0xa0   : > { %v2769_v7 = vrot.slane %v2768_v9, 4  ;;  %v2778_v38 = vor.u32 %v2777_v32, %v2773_v25  ;;  %v970_v35 = vrot.slane %v965_v5, 4  ;;  %v6610_v19 = vsel %vm6148_vm13, %v5502_v47, %v3271_v2  ;;  %v4195_v54 = vld [vmem:[#allocation2 + $0x4c] sm:$0xf]  ;;  %v5931_v57 = vld [vmem:[%s7967_s3 + $0x18] sm:$0xff]  }
  0xa1   : > { %v1219_v22 = vsel %vm6089_vm8, %v960_v60, %v1218_v11  ;;  %v6615_v29 = vadd.f32 %v6463_v39, %v669_v23  ;;  %v6618_v49 = vadd.f32 %v6463_v39, %v670_v63  ;;  %v5760_v17 = vunpack.c.h.bf16 %v6597_v12  ;;  %v1562_v6 = vld [vmem:[#allocation2 + $0x48] sm:$0xf]  ;;  %5823 = vmatprep.subr.bf16.mxu0 %v5931_v57  ;;  %5862 = vmatprep.subr.bf16.mxu1 %v5931_v57 }
  0xa2   : > { %v2610_v59 = vld [vmem:[#allocation2 + $0x50] sm:$0x1]  ;;  %v2779_v46 = vrot.slane %v2778_v38, 4  ;;  %1220 = vst [vmem:[#allocation2 + $0x54] sm:$0xf] %v1219_v22  ;;  %3580 = vrot.lane.b32.xlu0 %v5914_v26, %s5992_s14  ;;  %v969_v44 = vsel %vm6078_vm7, %v961_v30, %v968_v10  ;;  %v3782_v47 = vshrl.u32 %v3649_v15, 16  ;;  %v2774_v14 = vsel %vm6175_vm14, %v2769_v7, %v2773_v25  ;;  %v6630_v55 = vpop.permute.xlu1 %2530  ;;  %5824 = vmatpush3.bf16.msra.mxu0 %v5931_v57 }
  0xa3   : > { %v3155_v36 = vld [vmem:[#allocation2 + $0x50] sm:$0x1]  ;;  %v2781_v42 = vshll.u32 %v2610_v59, 16  ;;  %v3785_v50 = vshll.u32 %v3649_v15, 16  ;;  %v3791_v37 = vshll.u32 %v3650_v13, 16  ;;  %v3795_v23 = vshrl.u32 %v3650_v13, 16  ;;  %5867 = vmatpush3.bf16.msra.mxu1 %v5931_v57 }
  0xa4   : > { %v3651_v41 = vld [vmem:[#allocation2 + $0x50] sm:$0x1]  ;;  %v3274_v45 = vrot.slane %v3155_v36, 5  ;;  %1221 = vst.msk [vmem:[#allocation2 + $0x58] sm:$0xf] %vm1173_vm6, %v969_v44  ;;  %v3784_v63 = vrot.slane %v3782_v47, 4  ;;  %v1223_v32 = vsel %vm6058_vm2, %v970_v35, %v1222_v48  ;;  %v6638_v11 = vpop.permute.xlu0 %2528 }
  0xa5   : > { %v2783_v61 = vrot.slane %v2781_v42, 5  ;;  %v3801_v62 = vshll.u32 %v3651_v41, 16  ;;  %v3787_v2 = vrot.slane %v3785_v50, 5  ;;  %v3793_v3 = vrot.slane %v3791_v37, 5  ;;  %v4196_v5 = vld [vmem:[#allocation2 + $0x50] sm:$0x1] }
  0xa6   : > { %v3275_v8 = vsel %vm6148_vm13, %v3273_v33, %v3274_v45  ;;  %v3797_v9 = vrot.slane %v3795_v23, 4  ;;  %1224 = vst [vmem:[#allocation2 + $0x5c] sm:$0x1] %v1223_v32  ;;  %v5565_v60 = vrot.slane %v4194_v56, 9  ;;  %v4308_v30 = vrot.slane %v4195_v54, 5 }
  0xa7   : > { %v2784_v20 = vsel %vm6175_vm14, %v2779_v46, %v2783_v61  ;;  %v3803_v25 = vrot.slane %v3801_v62, 5  ;;  %v3788_v33 = vor.u32 %v3787_v2, %v3784_v63  ;;  %v4311_v38 = vrot.slane %v4196_v5, 5  ;;  %v1563_v42 = vld [vmem:[#allocation2 + $0x4c] sm:$0xf]  ;;  %v1564_v62 = vld [vmem:[#allocation2 + $0x50] sm:$0x1] }
  0xa8   : > { %v5486_v26 = vcombine.low %v2774_v14, %v2784_v20  ;;  %v3798_v7 = vor.u32 %v3797_v9, %v3793_v3  ;;  %v1740_v10 = vshrl.u32 %v1562_v6, 16  ;;  %v1743_v15 = vshll.u32 %v1562_v6, 16  ;;  %v6644_v56 = vpop.permute.xlu1 %3574  ;;  %v6646_v44 = vpop.permute.xlu0 %3572 }
  0xa9   : > { %v5518_v13 = vcombine.low %v6610_v19, %v3275_v8  ;;  %v3789_v59 = vrot.slane %v3788_v33, 4  ;;  %v3652_v36 = vld [vmem:[#allocation2 + $0x54] sm:$0xf]  ;;  %v4309_v35 = vsel %vm6148_vm13, %v5565_v60, %v4308_v30  ;;  %v4310_v22 = vrot.slane %v4308_v30, 4 }
  0xaa   : > { %3083 = vrot.lane.b32.xlu1 %v5486_v26, %s5995_s17  ;;  %v3799_v41 = vrot.slane %v3798_v7, 4  ;;  %v3806_v48 = vshrl.u32 %v3652_v36, 16  ;;  %v3809_v46 = vshll.u32 %v3652_v36, 16  ;;  %v1742_v45 = vrot.slane %v1740_v10, 4  ;;  %v4197_v5 = vld [vmem:[#allocation2 + $0x54] sm:$0xe] }
  0xab   : > { %v3794_v47 = vsel %vm6175_vm14, %v3789_v59, %v3793_v3  ;;  %v3653_v50 = vld [vmem:[#allocation2 + $0x58] sm:$0xf]  ;;  %v4312_v19 = vsel %vm6148_vm13, %v4310_v22, %v4311_v38  ;;  %v1745_v37 = vrot.slane %v1743_v15, 5  ;;  %v6655_v54 = vmul.f32 %v6397_v28, %v5759_v31  ;;  %v1565_v36 = vld [vmem:[#allocation2 + $0x54] sm:$0xf] }
  0xac   : > { %v3804_v57 = vsel %vm6175_vm14, %v3799_v41, %v3803_v25  ;;  %v3808_v14 = vrot.slane %v3806_v48, 4  ;;  %v3811_v61 = vrot.slane %v3809_v46, 5  ;;  %v3815_v23 = vshll.u32 %v3653_v50, 16  ;;  %v5915_v6 = vld [vmem:[#allocation2 + $0x54] sm:$0xff]   ;;  %v6660_v33 = vpop.permute.xlu0 %2532 }
  0xad   : > { %v5549_v8 = vcombine.low %v3794_v47, %v3804_v57  ;;  %v3819_v63 = vshrl.u32 %v3653_v50, 16  ;;  %v5581_v2 = vcombine.low %v4309_v35, %v4312_v19  ;;  %v1746_v3 = vor.u32 %v1745_v37, %v1742_v45  ;;  %v4198_v20 = vld [vmem:[#allocation2 + $0x58] sm:$0xf]  ;;  %v3654_v9 = vld [vmem:[#allocation2 + $0x5c] sm:$0x1] }
  0xae   : > { %3404 = vrot.lane.b32.xlu1 %v5518_v13, %s5993_s15  ;;  %v3812_v32 = vor.u32 %v3811_v61, %v3808_v14  ;;  %v3817_v28 = vrot.slane %v3815_v23, 5  ;;  %v1749_v31 = vshll.u32 %v1563_v42, 16  ;;  %v1753_v26 = vshrl.u32 %v1563_v42, 16  ;;  %v4199_v38 = vld [vmem:[#allocation2 + $0x5c] sm:$0x1] }
  0xaf   : > { %4125 = vrot.lane.b32.xlu0 %v5549_v8, %s5996_s18  ;;  %v3821_v25 = vrot.slane %v3819_v63, 4  ;;  %v3825_v60 = vshll.u32 %v3654_v9, 16  ;;  %v1747_v30 = vrot.slane %v1746_v3, 4  ;;  %v1759_v7 = vshll.u32 %v1564_v62, 16  ;;  %v1566_v42 = vld [vmem:[#allocation2 + $0x58] sm:$0xf] }
  0xb0   : > { %v3813_v10 = vrot.slane %v3812_v32, 4  ;;  %v1751_v15 = vrot.slane %v1749_v31, 5  ;;  %v1755_v13 = vrot.slane %v1753_v26, 4  ;;  %v5566_v59 = vrot.slane %v4197_v5, 9  ;;  %v6663_v35 = vpop.permute.xlu1 %2534  ;;  %v1567_v37 = vld [vmem:[#allocation2 + $0x5c] sm:$0x1] }
  0xb1   : > { %v3822_v22 = vor.u32 %v3821_v25, %v3817_v28  ;;  %v3827_v41 = vrot.slane %v3825_v60, 5  ;;  %v1761_v48 = vrot.slane %v1759_v7, 5  ;;  %v4315_v46 = vrot.slane %v4198_v20, 5  ;;  %v2110_v62 = vld [vmem:[#allocation2 + $0x48] sm:$0xe] }
  0xb2   : > { %3582 = vrot.lane.b32.xlu1 %v5915_v6, %s5992_s14  ;;  %v3818_v45 = vsel %vm6175_vm14, %v3813_v10, %v3817_v28  ;;  %v1752_v47 = vsel %vm6175_vm14, %v1747_v30, %v1751_v15  ;;  %v1756_v50 = vor.u32 %v1755_v13, %v1751_v15  ;;  %v4318_v19 = vrot.slane %v4199_v38, 5  ;;  %v2111_v6 = vld [vmem:[#allocation2 + $0x4c] sm:$0xf]  ;;  %v2112_v26 = vld [vmem:[#allocation2 + $0x50] sm:$0x1] }
  0xb3   : > { %v3823_v57 = vrot.slane %v3822_v22, 4  ;;  %4446 = vrot.lane.b32.xlu0 %v5581_v2, %s5994_s16  ;;  %v4316_v14 = vsel %vm6148_vm13, %v5566_v59, %v4315_v46  ;;  %v4317_v61 = vrot.slane %v4315_v46, 4  ;;  %v1764_v23 = vshrl.u32 %v1565_v36, 16  ;;  %v2113_v25 = vld [vmem:[#allocation2 + $0x54] sm:$0xe] }
  0xb4   : > { %v6673_v8 = vpop.permute.xlu0 %3394  ;;  %v1757_v63 = vrot.slane %v1756_v50, 4  ;;  %v1767_v3 = vshll.u32 %v1565_v36, 16  ;;  %v1773_v5 = vshll.u32 %v1566_v42, 16  ;;  %v1777_v20 = vshrl.u32 %v1566_v42, 16  ;;  %v6675_v9 = vpop.permute.xlu1 %2353  ;;  %v2114_v10 = vld [vmem:[#allocation2 + $0x58] sm:$0xf] }
  0xb5   : > { %v3828_v32 = vsel %vm6175_vm14, %v3823_v57, %v3827_v41  ;;  %v4319_v2 = vsel %vm6148_vm13, %v4317_v61, %v4318_v19  ;;  %v1766_v28 = vrot.slane %v1764_v23, 4  ;;  %v1783_v31 = vshll.u32 %v1567_v37, 16  ;;  %v2115_v15 = vld [vmem:[#allocation2 + $0x5c] sm:$0x1] }
  0xb6   : > { %v5550_v60 = vcombine.low %v3818_v45, %v3828_v32  ;;  %v1762_v30 = vsel %vm6175_vm14, %v1757_v63, %v1761_v48  ;;  %v5582_v7 = vcombine.low %v4316_v14, %v4319_v2  ;;  %v1769_v38 = vrot.slane %v1767_v3, 5  ;;  %v2611_v3 = vld [vmem:[#allocation2 + $0x54] sm:$0xf]  ;;  %v1225_v2 = vld [vmem:[#allocation2 + $0x60] sm:$0xf] }
  0xb7   : > { %v5423_v13 = vcombine.low %v1752_v47, %v1762_v30  ;;  %v1775_v59 = vrot.slane %v1773_v5, 5  ;;  %v1779_v36 = vrot.slane %v1777_v20, 4  ;;  %v1785_v22 = vrot.slane %v1783_v31, 5  ;;  %v2612_v5 = vld [vmem:[#allocation2 + $0x58] sm:$0xf] }
  0xb8   : > { %v6683_v41 = vpop.permute.xlu0 %4438  ;;  %4127 = vrot.lane.b32.xlu1 %v5550_v60, %s5996_s18  ;;  %4448 = vrot.lane.b32.xlu0 %v5582_v7, %s5994_s16  ;;  %v1770_v46 = vor.u32 %v1769_v38, %v1766_v28  ;;  %v5439_v42 = vrot.slane %v2110_v62, 9  ;;  %v2235_v45 = vrot.slane %v2111_v6, 5  ;;  %v2238_v50 = vrot.slane %v2112_v26, 5  ;;  %v6687_v19 = vpop.permute.xlu1 %3396  ;;  %v550_v28 = vld [vmem:[#allocation2 + $0x68] sm:$0x1] }
  0xb9   : > { %v1780_v48 = vor.u32 %v1779_v36, %v1775_v59  ;;  %v5440_v37 = vrot.slane %v2113_v25, 9  ;;  %v2242_v57 = vrot.slane %v2114_v10, 5  ;;  %v2245_v14 = vrot.slane %v2115_v15, 5 }
  0xba   : > { %v1771_v47 = vrot.slane %v1770_v46, 4  ;;  %v2236_v61 = vsel %vm6148_vm13, %v5439_v42, %v2235_v45  ;;  %v2237_v23 = vrot.slane %v2235_v45, 4  ;;  %v972_v63 = vshrl.u32 %v6587_v58, 16  ;;  %v5916_v46 = vld [vmem:[#allocation2 + $0x54] sm:$0xff]  }
  0xbb   : > { %v1781_v20 = vrot.slane %v1780_v48, 4  ;;  %v2243_v62 = vsel %vm6148_vm13, %v5440_v37, %v2242_v57  ;;  %v2244_v6 = vrot.slane %v2242_v57, 4  ;;  %v975_v32 = vshll.u32 %v6587_v58, 16 }
  0xbc   : > { %2039 = vrot.lane.b32.xlu1 %v5423_v13, %s5990_s12  ;;  %v1776_v31 = vsel %vm6175_vm14, %v1771_v47, %v1775_v59  ;;  %v2239_v26 = vsel %vm6148_vm13, %v2237_v23, %v2238_v50  ;;  %v974_v25 = vrot.slane %v972_v63, 7  ;;  %v980_v60 = vshrl.u32 %v6600_v34, 16  ;;  %v6701_v30 = vpop.permute.xlu1 %2357  ;;  %v6703_v7 = vpop.permute.xlu0 %4440  ;;  %v2613_v13 = vld [vmem:[#allocation2 + $0x5c] sm:$0x1]  ;;  %v6710_v50 = vld [vmem:[#allocation2 + $0x54] sm:$0xe] }
  0xbd   : > { %v1786_v58 = vsel %vm6175_vm14, %v1781_v20, %v1785_v22  ;;  %v5455_v38 = vcombine.low %v2236_v61, %v2239_v26  ;;  %v2246_v10 = vsel %vm6148_vm13, %v2244_v6, %v2245_v14  ;;  %v983_v15 = vshll.u32 %v6600_v34, 16  ;;  %v6715_v47 = vld [vmem:[#allocation2 + $0x58] sm:$0xf]  ;;  %v5918_v14 = vld [vmem:[#allocation2] sm:$0xff]   ;;  %v497_v61 = vld [vmem:[#allocation2 + $0x6c] sm:$0x1] }
  0xbe   : > { %v5424_v59 = vcombine.low %v1776_v31, %v1786_v58  ;;  %v5456_v36 = vcombine.low %v2243_v62, %v2246_v10  ;;  %v977_v42 = vor.u32 %v975_v32, %v974_v25  ;;  %v978_v45 = vrot.slane %v974_v25, 4  ;;  %v5924_v34 = vld [vmem:[#allocation2 + $0xc] sm:$0xff]   ;;  %v3158_v6 = vld [vmem:[#allocation2 + $0x5c] sm:$0x1]  ;;  %1528 = vst.msk [vmem:[#allocation3] sm:$0xff] %vm7972_vm15, %v5918_v14 }
  0xbf   : > { %2363 = vrot.lane.b32.xlu0 %v5455_v38, %s5989_s11  ;;  %v6713_v48 = vrot.slane %v980_v60, 7  ;;  %v2786_v37 = vshrl.u32 %v2611_v3, 16  ;;  %v2789_v22 = vshll.u32 %v2611_v3, 16  ;;  %v2795_v57 = vshll.u32 %v2612_v5, 16  ;;  %v5928_v3 = vld [vmem:[#allocation2 + $0x18] sm:$0xff]   ;;  %1529 = vst.msk [vmem:[#allocation3 + $0x8] sm:$0xff] %vm7972_vm15, %v5924_v34 }
  0xc0   : > { %2041 = vrot.lane.b32.xlu1 %v5424_v59, %s5990_s12  ;;  %v1226_v23 = vsel %vm6089_vm8, %v977_v42, %v1225_v2  ;;  %v2799_v63 = vshrl.u32 %v2612_v5, 16  ;;  %v2805_v20 = vshll.u32 %v2613_v13, 16  ;;  %v551_v62 = vsel %vm6065_vm4, 0, %v550_v28  ;;  %v6722_v32 = vpop.permute.xlu1 %3075  ;;  %v6728_v60 = vld [vmem:[%s7968_s4] ss:$0 sm:$0xff]  ;;  %v5930_v2 = vld [vmem:[#allocation2 + $0x24] sm:$0xff]   ;;  %v6736_v59 = vpop.permute.xlu0 %2355 }
  0xc1   : > { %v985_v31 = vor.u32 %v983_v15, %v6713_v48  ;;  %1227 = vst [vmem:[#allocation2 + $0x60] sm:$0xf] %v1226_v23  ;;  %v2788_v26 = vrot.slane %v2786_v37, 4  ;;  %v2791_v25 = vrot.slane %v2789_v22, 5  ;;  %552 = vst [vmem:[#allocation2 + $0x68] sm:$0x1] %v551_v62  ;;  %v6733_v5 = vmul.f32 %v6728_v60, %v5760_v17 }
  0xc2   : > { %v5935_v28 = vld [vmem:[#allocation2 + $0x30] sm:$0xff]   ;;  %v5936_v58 = vld [vmem:[#allocation2 + $0x3c] sm:$0xff]   ;;  %v2797_v38 = vrot.slane %v2795_v57, 5  ;;  %v2801_v10 = vrot.slane %v2799_v63, 4  ;;  %v2807_v15 = vrot.slane %v2805_v20, 5  ;;  %v5503_v13 = vrot.slane %v6710_v50, 9 }
  0xc3   : > { %2540 = vrot.lane.b32.xlu0 %v5916_v46, %s5991_s13  ;;  %v986_v42 = vsel %vm6078_vm7, %v978_v45, %v985_v31  ;;  %v2792_v37 = vor.u32 %v2791_v25, %v2788_v26  ;;  %v3278_v12 = vrot.slane %v6715_v47, 5  ;;  %v3281_v17 = vrot.slane %v3158_v6, 5  ;;  %v553_v57 = vld [vmem:[#allocation2 + $0x74] sm:$0x1]  ;;  %1530 = vst.msk [vmem:[#allocation3 + $0x10] sm:$0xff] %vm7972_vm15, %v5928_v3  ;;  %1531 = vst.msk [vmem:[#allocation3 + $0x18] sm:$0xff] %vm7972_vm15, %v5930_v2 }
  0xc4   : > { %2365 = vrot.lane.b32.xlu1 %v5456_v36, %s5989_s11  ;;  %1228 = vst.msk [vmem:[#allocation2 + $0x64] sm:$0xf] %vm1173_vm6, %v986_v42  ;;  %v2802_v22 = vor.u32 %v2801_v10, %v2797_v38  ;;  %vm2075_vm0 = vcmask 130112   ;;  %v498_v50 = vsel %vm6058_vm2, 0, %v497_v61  ;;  %v987_v46 = vrot.slane %v6713_v48, 4 }
  0xc5   : > { %v2793_v23 = vrot.slane %v2792_v37, 4  ;;  %v3280_v63 = vrot.slane %v3278_v12, 4  ;;  %499 = vst [vmem:[#allocation2 + $0x6c] sm:$0x1] %v498_v50  ;;  %v738_v45 = vmax.f32 %v6581_v51, 0.0  ;;  %1532 = vst.msk [vmem:[#allocation3 + $0x20] sm:$0xff] %vm7972_vm15, %v5935_v28  ;;  %v6757_v51 = vpop.permute.xlu1 %4119  ;;  %v6767_v34 = vadd.f32 %v6463_v39, %v6655_v54 }
  0xc6   : > { %1533 = vst.msk [vmem:[#allocation3 + $0x28] sm:$0xff] %vm7972_vm15, %v5936_v58  ;;  %v2803_v36 = vrot.slane %v2802_v22, 4  ;;  %v739_v48 = vmax.f32 %v6590_v40, 0.0  ;;  %vm2399_vm1 = vcmask 195712   ;;  %vm2576_vm3 = vcmask 261312  }
  0xc7   : > { %2076 = vst.msk [vmem:[#allocation3] sm:$0xff] %vm2075_vm0, %v6606_v43  ;;  %v2798_v47 = vsel %vm6175_vm14, %v2793_v23, %v2797_v38  ;;  %v5669_v14 = vpack.c.bf16 %v738_v45, %v738_v45  ;;  %v554_v61 = vsel %vm6065_vm4, 0, %v553_v57  ;;  %v6770_v43 = vld [vmem:[%s6098_s29 + $0x58] sm:$0xff]   ;;  %v3279_v6 = vsel %vm6148_vm13, %v5503_v13, %v3278_v12 }
  0xc8   : > { %2400 = vst.msk [vmem:[#allocation3] sm:$0xff] %vm2399_vm1, %v6602_v52  ;;  %v2808_v40 = vsel %vm6175_vm14, %v2803_v36, %v2807_v15  ;;  %v1229_v20 = vld [vmem:[#allocation2 + $0x68] sm:$0x1]  ;;  %v2614_v62 = vld [vmem:[#allocation2 + $0x60] sm:$0xf]  ;;  %v3282_v52 = vsel %vm6148_vm13, %v3280_v63, %v3281_v17  ;;  %v5670_v3 = vpack.c.bf16 %v739_v48, %v739_v48  ;;  %v2030_v54 = vpop.permute.xlu0 %2029  ;;  %v6790_v12 = vadd.f32 %v6463_v39, %v6733_v5 }
  0xc9   : > { %2577 = vst.msk [vmem:[#allocation3] sm:$0xff] %vm2576_vm3, %v6638_v11  ;;  %555 = vst [vmem:[#allocation2 + $0x74] sm:$0x1] %v554_v61  ;;  %v5487_v31 = vcombine.low %v2798_v47, %v2808_v40  ;;  %v1230_v26 = vsel %vm6058_vm2, %v987_v46, %v1229_v20  ;;  %v2810_v25 = vshrl.u32 %v2614_v62, 16  ;;  %v2813_v2 = vshll.u32 %v2614_v62, 16  ;;  %v6795_v63 = vld [vmem:[%s6098_s29 + $0x60] sm:$0xff]  }
  0xca   : > { %v3159_v28 = vld [vmem:[#allocation2 + $0x60] sm:$0xe]  ;;  %2077 = vst.msk [vmem:[#allocation3 + $0x8] sm:$0xff] %vm2075_vm0, %v2030_v54  ;;  %1231 = vst [vmem:[#allocation2 + $0x68] sm:$0x1] %v1230_v26  ;;  %v989_v38 = vshrl.u32 %v5669_v14, 16  ;;  %v5519_v37 = vcombine.low %v3279_v6, %v3282_v52  ;;  %v5763_v17 = vunpack.c.l.bf16 %v6770_v43  ;;  %v5764_v23 = vunpack.c.h.bf16 %v6770_v43 }
  0xcb   : > { %v5504_v58 = vrot.slane %v3159_v28, 9  ;;  %v992_v10 = vshll.u32 %v5669_v14, 16  ;;  %v997_v15 = vshrl.u32 %v5670_v3, 16  ;;  %2401 = vst.msk [vmem:[#allocation3 + $0x8] sm:$0xff] %vm2399_vm1, %v6675_v9  ;;  %v5917_v11 = vld [vmem:[#allocation2 + $0x60] sm:$0xff]   ;;  %3085 = vrot.lane.b32.xlu0 %v5487_v31, %s5995_s17  ;;  %v2812_v42 = vrot.slane %v2810_v25, 4 }
  0xcc   : > { %v2615_v13 = vld [vmem:[#allocation2 + $0x64] sm:$0xf]  ;;  %2578 = vst.msk [vmem:[#allocation3 + $0x8] sm:$0xff] %vm2576_vm3, %v6630_v55  ;;  %v2815_v22 = vrot.slane %v2813_v2, 5  ;;  %v2032_v9 = vpop.permute.xlu1 %2031  ;;  %2542 = vrot.lane.b32.xlu1 %v5917_v11, %s5991_s13  ;;  %v991_v36 = vrot.slane %v989_v38, 7  ;;  %v1000_v48 = vshll.u32 %v5670_v3, 16  ;;  %v673_v61 = vmul.f32 %v6728_v60, %v5763_v17 }
  0xcd   : > { %v2819_v50 = vshll.u32 %v2615_v13, 16  ;;  %v2823_v57 = vshrl.u32 %v2615_v13, 16  ;;  %v3160_v46 = vld [vmem:[#allocation2 + $0x64] sm:$0xf]  ;;  %v999_v55 = vrot.slane %v997_v15, 7  ;;  %2078 = vst.msk [vmem:[#allocation3 + $0x10] sm:$0xff] %vm2075_vm0, %v2032_v9  ;;  %v5767_v6 = vunpack.c.l.bf16 %v6795_v63 }
  0xce   : > { %v3285_v45 = vrot.slane %v3160_v46, 5  ;;  %v2816_v39 = vor.u32 %v2815_v22, %v2812_v42  ;;  %v1232_v14 = vld [vmem:[#allocation2 + $0x6c] sm:$0xf]  ;;  %2402 = vst.msk [vmem:[#allocation3 + $0x10] sm:$0xff] %vm2399_vm1, %v6736_v59  ;;  %v5919_v40 = vld [vmem:[#allocation2 + $0x60] sm:$0xff]   ;;  %v994_v20 = vor.u32 %v992_v10, %v991_v36  ;;  %v995_v62 = vrot.slane %v991_v36, 4 }
  0xcf   : > { %v2821_v5 = vrot.slane %v2819_v50, 5  ;;  %v2825_v47 = vrot.slane %v2823_v57, 4  ;;  %3406 = vrot.lane.b32.xlu0 %v5519_v37, %s5993_s15  ;;  %2579 = vst.msk [vmem:[#allocation3 + $0x10] sm:$0xff] %vm2576_vm3, %v6660_v33  ;;  %v1002_v54 = vor.u32 %v1000_v48, %v999_v55  ;;  %v1004_v31 = vrot.slane %v999_v55, 4  ;;  %v3655_v26 = vld [vmem:[#allocation2 + $0x60] sm:$0xf] }
  0xd0   : > { %v3287_v43 = vrot.slane %v3285_v45, 4  ;;  %v2817_v52 = vrot.slane %v2816_v39, 4  ;;  %v3656_v25 = vld [vmem:[#allocation2 + $0x64] sm:$0xf]  ;;  %v6808_v28 = vsel %vm6148_vm13, %v5504_v58, %v3285_v45  ;;  %v1233_v38 = vsel %vm6089_vm8, %v994_v20, %v1232_v14  ;;  %v1236_v15 = vld [vmem:[#allocation2 + $0x74] sm:$0x1]  ;;  %v6827_v45 = vpop.permute.xlu0 %3073 }
  0xd1   : > { %v2826_v3 = vor.u32 %v2825_v47, %v2821_v5  ;;  %v2616_v59 = vld [vmem:[#allocation2 + $0x68] sm:$0x1]  ;;  %v6813_v33 = vmul.f32 %v6728_v60, %v5764_v23  ;;  %v5768_v11 = vunpack.c.h.bf16 %v6795_v63  ;;  %1234 = vst [vmem:[#allocation2 + $0x6c] sm:$0xf] %v1233_v38  ;;  %v4200_v17 = vld [vmem:[#allocation2 + $0x60] sm:$0xe]  ;;  %v1003_v50 = vsel %vm6078_vm7, %v995_v62, %v1002_v54 }
  0xd2   : > { %v3161_v2 = vld [vmem:[#allocation2 + $0x68] sm:$0x1]  ;;  %v2829_v42 = vshll.u32 %v2616_v59, 16  ;;  %v6819_v58 = vld [vmem:[%s7969_s5] ss:$0 sm:$0xff]  ;;  %v3830_v57 = vshrl.u32 %v3655_v26, 16  ;;  %v2822_v36 = vsel %vm6175_vm14, %v2817_v52, %v2821_v5  ;;  %v1237_v5 = vsel %vm6058_vm2, %v1004_v31, %v1236_v15 }
  0xd3   : > { %v3657_v10 = vld [vmem:[#allocation2 + $0x68] sm:$0x1]  ;;  %v2827_v13 = vrot.slane %v2826_v3, 4  ;;  %v3288_v37 = vrot.slane %v3161_v2, 5  ;;  %v6822_v22 = vadd.f32 %v6819_v58, %v673_v61  ;;  %3584 = vrot.lane.b32.xlu0 %v5919_v40, %s5992_s14  ;;  %v3833_v46 = vshll.u32 %v3655_v26, 16 }
  0xd4   : > { %v3839_v9 = vshll.u32 %v3656_v25, 16  ;;  %v4201_v23 = vld [vmem:[#allocation2 + $0x64] sm:$0xf]  ;;  %v2831_v55 = vrot.slane %v2829_v42, 5  ;;  %1235 = vst.msk [vmem:[#allocation2 + $0x70] sm:$0xf] %vm1173_vm6, %v1003_v50 }
  0xd5   : > { %v3843_v48 = vshrl.u32 %v3656_v25, 16  ;;  %v3849_v39 = vshll.u32 %v3657_v10, 16  ;;  %v1568_v47 = vld [vmem:[#allocation2 + $0x60] sm:$0xf]  ;;  %v3289_v14 = vsel %vm6148_vm13, %v3287_v43, %v3288_v37  ;;  %v3832_v61 = vrot.slane %v3830_v57, 4 }
  0xd6   : > { %v3835_v40 = vrot.slane %v3833_v46, 5  ;;  %v3841_v20 = vrot.slane %v3839_v9, 5  ;;  %v4202_v62 = vld [vmem:[#allocation2 + $0x68] sm:$0x1]  ;;  %v2832_v3 = vsel %vm6175_vm14, %v2827_v13, %v2831_v55  ;;  %v2034_v52 = vpop.permute.xlu1 %2033  ;;  %1238 = vst [vmem:[#allocation2 + $0x74] sm:$0x1] %v1237_v5  ;;  %v5520_v13 = vcombine.low %v6808_v28, %v3289_v14 }
  0xd7   : > { %v3845_v54 = vrot.slane %v3843_v48, 4  ;;  %v3851_v26 = vrot.slane %v3849_v39, 5  ;;  %v5488_v59 = vcombine.low %v2822_v36, %v2832_v3  ;;  %v5567_v2 = vrot.slane %v4200_v17, 9  ;;  %2079 = vst.msk [vmem:[#allocation3 + $0x18] sm:$0xff] %vm2075_vm0, %v2034_v52  ;;  %v1569_v36 = vld [vmem:[#allocation2 + $0x64] sm:$0xf] }
  0xd8   : > { %v3836_v25 = vor.u32 %v3835_v40, %v3832_v61  ;;  %v4322_v38 = vrot.slane %v4201_v23, 5  ;;  %v4325_v10 = vrot.slane %v4202_v62, 5  ;;  %v1788_v42 = vshrl.u32 %v1568_v47, 16  ;;  %2403 = vst.msk [vmem:[#allocation3 + $0x18] sm:$0xff] %vm2399_vm1, %v6701_v30  ;;  %v3658_v15 = vld [vmem:[#allocation2 + $0x6c] sm:$0xf] }
  0xd9   : > { %v3846_v43 = vor.u32 %v3845_v54, %v3841_v20  ;;  %v1791_v37 = vshll.u32 %v1568_v47, 16  ;;  %3087 = vrot.lane.b32.xlu1 %v5488_v59, %s5995_s17  ;;  %2580 = vst.msk [vmem:[#allocation3 + $0x18] sm:$0xff] %vm2576_vm3, %v6663_v35  ;;  %v6847_v57 = vpop.permute.xlu0 %4117  ;;  %v3854_v9 = vshrl.u32 %v3658_v15, 16  ;;  %v3857_v23 = vshll.u32 %v3658_v15, 16  ;;  %v1570_v62 = vld [vmem:[#allocation2 + $0x68] sm:$0x1] }
  0xda   : > { %v3837_v31 = vrot.slane %v3836_v25, 4  ;;  %v4323_v50 = vsel %vm6148_vm13, %v5567_v2, %v4322_v38  ;;  %v4324_v17 = vrot.slane %v4322_v38, 4  ;;  %v1790_v30 = vrot.slane %v1788_v42, 4  ;;  %v4203_v59 = vld [vmem:[#allocation2 + $0x6c] sm:$0xe] }
  0xdb   : > { %v3847_v46 = vrot.slane %v3846_v43, 4  ;;  %v3659_v28 = vld [vmem:[#allocation2 + $0x70] sm:$0xf]  ;;  %v1793_v39 = vrot.slane %v1791_v37, 5  ;;  %v6856_v47 = vmul.f32 %v6728_v60, %v5767_v6  ;;  %v3856_v14 = vrot.slane %v3854_v9, 4 }
  0xdc   : > { %v3842_v55 = vsel %vm6175_vm14, %v3837_v31, %v3841_v20  ;;  %v4326_v48 = vsel %vm6148_vm13, %v4324_v17, %v4325_v10  ;;  %v3859_v61 = vrot.slane %v3857_v23, 5  ;;  %v3863_v40 = vshll.u32 %v3659_v28, 16  ;;  %v5920_v20 = vld [vmem:[#allocation2 + $0x6c] sm:$0xff]  }
  0xdd   : > { %v3852_v35 = vsel %vm6175_vm14, %v3847_v46, %v3851_v26  ;;  %3408 = vrot.lane.b32.xlu1 %v5520_v13, %s5993_s15  ;;  %v3867_v54 = vshrl.u32 %v3659_v28, 16  ;;  %v5583_v5 = vcombine.low %v4323_v50, %v4326_v48  ;;  %v1794_v52 = vor.u32 %v1793_v39, %v1790_v30  ;;  %v4204_v25 = vld [vmem:[#allocation2 + $0x70] sm:$0xf]  ;;  %v6861_v2 = vpop.permute.xlu0 %3077  ;;  %v3660_v6 = vld [vmem:[#allocation2 + $0x74] sm:$0x1] }
  0xde   : > { %v5551_v3 = vcombine.low %v3842_v55, %v3852_v35  ;;  %v3860_v38 = vor.u32 %v3859_v61, %v3856_v14  ;;  %v3865_v43 = vrot.slane %v3863_v40, 5  ;;  %v1797_v10 = vshll.u32 %v1569_v36, 16  ;;  %v4205_v15 = vld [vmem:[#allocation2 + $0x74] sm:$0x1]  ;;  %v1571_v23 = vld [vmem:[#allocation2 + $0x6c] sm:$0xf] }
  0xdf   : > { %v1801_v26 = vshrl.u32 %v1569_v36, 16  ;;  %v3869_v42 = vrot.slane %v3867_v54, 4  ;;  %v3873_v37 = vshll.u32 %v3660_v6, 16  ;;  %v1795_v31 = vrot.slane %v1794_v52, 4  ;;  %v1572_v39 = vld [vmem:[#allocation2 + $0x70] sm:$0xf] }
  0xe0   : > { %4129 = vrot.lane.b32.xlu0 %v5551_v3, %s5996_s18  ;;  %v1807_v13 = vshll.u32 %v1570_v62, 16  ;;  %v3861_v17 = vrot.slane %v3860_v38, 4  ;;  %v1799_v46 = vrot.slane %v1797_v10, 5  ;;  %v5568_v9 = vrot.slane %v4203_v59, 9  ;;  %v1573_v40 = vld [vmem:[#allocation2 + $0x74] sm:$0x1] }
  0xe1   : > { %v1803_v50 = vrot.slane %v1801_v26, 4  ;;  %3586 = vrot.lane.b32.xlu1 %v5920_v20, %s5992_s14  ;;  %v3870_v30 = vor.u32 %v3869_v42, %v3865_v43  ;;  %v3875_v55 = vrot.slane %v3873_v37, 5  ;;  %v4329_v48 = vrot.slane %v4204_v25, 5  ;;  %v2116_v52 = vld [vmem:[#allocation2 + $0x60] sm:$0xe]  ;;  %v6872_v25 = vpop.permute.xlu0 %3398 }
  0xe2   : > { %v1809_v28 = vrot.slane %v1807_v13, 5  ;;  %v3866_v36 = vsel %vm6175_vm14, %v3861_v17, %v3865_v43  ;;  %v1800_v35 = vsel %vm6175_vm14, %v1795_v31, %v1799_v46  ;;  %v4332_v61 = vrot.slane %v4205_v15, 5  ;;  %v2117_v59 = vld [vmem:[#allocation2 + $0x64] sm:$0xf]  ;;  %v2118_v31 = vld [vmem:[#allocation2 + $0x68] sm:$0x1] }
  0xe3   : > { %v1804_v14 = vor.u32 %v1803_v50, %v1799_v46  ;;  %v3871_v62 = vrot.slane %v3870_v30, 4  ;;  %v4330_v20 = vsel %vm6148_vm13, %v5568_v9, %v4329_v48  ;;  %v4331_v3 = vrot.slane %v4329_v48, 4  ;;  %v2119_v13 = vld [vmem:[#allocation2 + $0x6c] sm:$0xe]  ;;  %v2120_v9 = vld [vmem:[#allocation2 + $0x70] sm:$0xf] }
  0xe4   : > { %4450 = vrot.lane.b32.xlu0 %v5583_v5, %s5994_s16  ;;  %v1812_v54 = vshrl.u32 %v1571_v23, 16  ;;  %v1815_v38 = vshll.u32 %v1571_v23, 16  ;;  %v1821_v43 = vshll.u32 %v1572_v39, 16  ;;  %v1825_v10 = vshrl.u32 %v1572_v39, 16  ;;  %v2121_v23 = vld [vmem:[#allocation2 + $0x74] sm:$0x1] }
  0xe5   : > { %v1805_v6 = vrot.slane %v1804_v14, 4  ;;  %v3876_v26 = vsel %vm6175_vm14, %v3871_v62, %v3875_v55  ;;  %v4333_v42 = vsel %vm6148_vm13, %v4331_v3, %v4332_v61  ;;  %v1831_v37 = vshll.u32 %v1573_v40, 16  ;;  %v500_v55 = vld [vmem:[#allocation2 + $0x78] sm:$0x1] }
  0xe6   : > { %v1814_v5 = vrot.slane %v1812_v54, 4  ;;  %v5552_v15 = vcombine.low %v3866_v36, %v3876_v26  ;;  %v5584_v46 = vcombine.low %v4330_v20, %v4333_v42  ;;  %v1817_v50 = vrot.slane %v1815_v38, 5  ;;  %v6882_v38 = vpop.permute.xlu0 %3576  ;;  %v6888_v42 = vpop.permute.xlu1 %3079 }
  0xe7   : > { %v1810_v17 = vsel %vm6175_vm14, %v1805_v6, %v1809_v28  ;;  %v1823_v48 = vrot.slane %v1821_v43, 5  ;;  %v1827_v39 = vrot.slane %v1825_v10, 4  ;;  %v1833_v14 = vrot.slane %v1831_v37, 5  ;;  %v2617_v6 = vld [vmem:[#allocation2 + $0x6c] sm:$0xf] }
  0xe8   : > { %v5425_v30 = vcombine.low %v1800_v35, %v1810_v17  ;;  %4131 = vrot.lane.b32.xlu1 %v5552_v15, %s5996_s18  ;;  %4452 = vrot.lane.b32.xlu0 %v5584_v46, %s5994_s16  ;;  %v1818_v61 = vor.u32 %v1817_v50, %v1814_v5  ;;  %v5441_v40 = vrot.slane %v2116_v52, 9  ;;  %v2249_v62 = vrot.slane %v2117_v59, 5  ;;  %v2618_v17 = vld [vmem:[#allocation2 + $0x70] sm:$0xf] }
  0xe9   : > { %v2252_v36 = vrot.slane %v2118_v31, 5  ;;  %v1828_v3 = vor.u32 %v1827_v39, %v1823_v48  ;;  %v5442_v54 = vrot.slane %v2119_v13, 9  ;;  %v2256_v28 = vrot.slane %v2120_v9, 5  ;;  %v2619_v39 = vld [vmem:[#allocation2 + $0x74] sm:$0x1] }
  0xea   : > { %v2259_v20 = vrot.slane %v2121_v23, 5  ;;  %v1819_v35 = vrot.slane %v1818_v61, 4  ;;  %v2250_v43 = vsel %vm6148_vm13, %v5441_v40, %v2249_v62  ;;  %v2251_v10 = vrot.slane %v2249_v62, 4  ;;  %v5921_v61 = vld [vmem:[#allocation2 + $0x6c] sm:$0xff]   ;;  %v556_v62 = vld [vmem:[#allocation2 + $0x80] sm:$0x1] }
  0xeb   : > { %v501_v26 = vsel %vm6058_vm2, 0, %v500_v55  ;;  %v1829_v52 = vrot.slane %v1828_v3, 4  ;;  %v2257_v59 = vsel %vm6148_vm13, %v5442_v54, %v2256_v28  ;;  %v2258_v5 = vrot.slane %v2256_v28, 4 }
  0xec   : > { %502 = vst [vmem:[#allocation2 + $0x78] sm:$0x1] %v501_v26  ;;  %v740_v37 = vmax.f32 %v6615_v29, 0.0  ;;  %2043 = vrot.lane.b32.xlu1 %v5425_v30, %s5990_s12  ;;  %v1824_v31 = vsel %vm6175_vm14, %v1819_v35, %v1823_v48  ;;  %v2253_v13 = vsel %vm6148_vm13, %v2251_v10, %v2252_v36  ;;  %v741_v15 = vmax.f32 %v6618_v49, 0.0  ;;  %v5941_v36 = vld [vmem:[#allocation2 + $0x48] sm:$0xff]   ;;  %v6904_v35 = vpop.permute.xlu0 %4121 }
  0xed   : > { %v2834_v46 = vshrl.u32 %v2617_v6, 16  ;;  %v1834_v50 = vsel %vm6175_vm14, %v1829_v52, %v1833_v14  ;;  %v5457_v9 = vcombine.low %v2250_v43, %v2253_v13  ;;  %v2260_v23 = vsel %vm6148_vm13, %v2258_v5, %v2259_v20  ;;  %v3162_v14 = vld [vmem:[#allocation2 + $0x6c] sm:$0xe]  ;;  %v3163_v52 = vld [vmem:[#allocation2 + $0x70] sm:$0xf]  ;;  %1534 = vst.msk [vmem:[#allocation3 + $0x30] sm:$0xff] %vm7972_vm15, %v5941_v36 }
  0xee   : > { %v5671_v29 = vpack.c.bf16 %v740_v37, %v740_v37  ;;  %v5426_v30 = vcombine.low %v1824_v31, %v1834_v50  ;;  %v5458_v55 = vcombine.low %v2257_v59, %v2260_v23  ;;  %v5672_v48 = vpack.c.bf16 %v741_v15, %v741_v15  ;;  %v3401_v59 = vpop.permute.xlu1 %3400  ;;  %v3164_v13 = vld [vmem:[#allocation2 + $0x74] sm:$0x1] }
  0xef   : > { %v2836_v40 = vrot.slane %v2834_v46, 4  ;;  %2367 = vrot.lane.b32.xlu0 %v5457_v9, %s5989_s11  ;;  %v2837_v54 = vshll.u32 %v2617_v6, 16  ;;  %v2843_v28 = vshll.u32 %v2618_v17, 16  ;;  %v2847_v10 = vshrl.u32 %v2618_v17, 16 }
  0xf0   : > { %v1006_v49 = vshrl.u32 %v5671_v29, 16  ;;  %v1009_v3 = vshll.u32 %v5671_v29, 16  ;;  %2045 = vrot.lane.b32.xlu1 %v5426_v30, %s5990_s12  ;;  %v1014_v20 = vshrl.u32 %v5672_v48, 16  ;;  %v1017_v43 = vshll.u32 %v5672_v48, 16  ;;  %v5942_v48 = vld [vmem:[#allocation2 + $0x54] sm:$0xff]  }
  0xf1   : > { %v2853_v26 = vshll.u32 %v2619_v39, 16  ;;  %v2839_v37 = vrot.slane %v2837_v54, 5  ;;  %v2845_v31 = vrot.slane %v2843_v28, 5  ;;  %v557_v6 = vsel %vm6065_vm4, 0, %v556_v62  ;;  %1535 = vst.msk [vmem:[#allocation3 + $0x38] sm:$0xff] %vm7972_vm15, %v5942_v48 }
  0xf2   : > { %v1008_v5 = vrot.slane %v1006_v49, 7  ;;  %v6910_v15 = vrot.slane %v1014_v20, 7  ;;  %v2849_v50 = vrot.slane %v2847_v10, 4  ;;  %558 = vst [vmem:[#allocation2 + $0x80] sm:$0x1] %v557_v6  ;;  %v5505_v9 = vrot.slane %v3162_v14, 9  ;;  %v3579_v10 = vpop.permute.xlu1 %3578 }
  0xf3   : > { %v1239_v46 = vld [vmem:[#allocation2 + $0x78] sm:$0xf]  ;;  %v6914_v17 = vadd.f32 %v6819_v58, %v6813_v33  ;;  %2544 = vrot.lane.b32.xlu0 %v5921_v61, %s5991_s13  ;;  %v2840_v39 = vor.u32 %v2839_v37, %v2836_v40  ;;  %v3292_v30 = vrot.slane %v3163_v52, 5  ;;  %v2855_v49 = vrot.slane %v2853_v26, 5  ;;  %v503_v61 = vld [vmem:[#allocation2 + $0x84] sm:$0x1] }
  0xf4   : > { %v1011_v23 = vor.u32 %v1009_v3, %v1008_v5  ;;  %v1012_v29 = vrot.slane %v1008_v5, 4  ;;  %2369 = vrot.lane.b32.xlu1 %v5458_v55, %s5989_s11  ;;  %v1019_v62 = vor.u32 %v1017_v43, %v6910_v15  ;;  %v2850_v36 = vor.u32 %v2849_v50, %v2845_v31  ;;  %v4443_v3 = vpop.permute.xlu0 %4442  ;;  %v559_v43 = vld [vmem:[#allocation2 + $0x8c] sm:$0x1]  ;;  %v5932_v5 = vld [vmem:[%s7967_s3 + $0x20] ss:$0 sps:$4 sm:$0xff]  }
  0xf5   : > { %v3295_v54 = vrot.slane %v3164_v13, 5  ;;  %v1021_v28 = vrot.slane %v6910_v15, 4  ;;  %v2841_v14 = vrot.slane %v2840_v39, 4  ;;  %v3294_v20 = vrot.slane %v3292_v30, 4  ;;  %v506_v37 = vld [vmem:[#allocation2 + $0x90] sm:$0x1] }
  0xf6   : > { %v1240_v33 = vsel %vm6089_vm8, %v1011_v23, %v1239_v46  ;;  %v1020_v40 = vsel %vm6078_vm7, %v1012_v29, %v1019_v62  ;;  %v2851_v55 = vrot.slane %v2850_v36, 4  ;;  %vm3121_vm5 = vcmask 326912  }
  0xf7   : > { %1241 = vst [vmem:[#allocation2 + $0x78] sm:$0xf] %v1240_v33  ;;  %vm7974_vm9 = vcmask 392512   ;;  %1242 = vst.msk [vmem:[#allocation2 + $0x7c] sm:$0xf] %vm1173_vm6, %v1020_v40  ;;  %v2846_v26 = vsel %vm6175_vm14, %v2841_v14, %v2845_v31  ;;  %v6930_v52 = vsel %vm6148_vm13, %v5505_v9, %v3292_v30  ;;  %vm7973_vm10 = vcmask 458112  }
  0xf8   : > { %vm4165_vm11 = vcmask 523712   ;;  %3123 = vst.msk [vmem:[#allocation3 + $0x8] sm:$0xff] %vm3121_vm5, %v6722_v32  ;;  %3122 = vst.msk [vmem:[#allocation3] sm:$0xff] %vm3121_vm5, %v6827_v45  ;;  %v2856_v31 = vsel %vm6175_vm14, %v2851_v55, %v2855_v49  ;;  %v6947_v32 = vsel %vm6148_vm13, %v3294_v20, %v3295_v54  ;;  %vm4486_vm12 = vcmask 589312   ;;  %v7011_v9 = vld [vmem:[%s6098_s29 + $0x70] sm:$0xff]  }
  0xf9   : > { %3124 = vst.msk [vmem:[#allocation3 + $0x10] sm:$0xff] %vm3121_vm5, %v6861_v2  ;;  %3125 = vst.msk [vmem:[#allocation3 + $0x18] sm:$0xff] %vm3121_vm5, %v6888_v42  ;;  %v504_v45 = vsel %vm6058_vm2, 0, %v503_v61  ;;  %v562_v2 = vld [vmem:[#allocation2 + $0x98] sm:$0x1]  ;;  %v5489_v6 = vcombine.low %v2846_v26, %v2856_v31  ;;  %v743_v15 = vmax.f32 %v6790_v12, 0.0  ;;  %v7008_v50 = vadd.f32 %v6819_v58, %v6856_v47 }
  0xfa   : > { %3444 = vst.msk [vmem:[#allocation3 + $0x8] sm:$0xff] %vm7974_vm9, %v6687_v19  ;;  %3443 = vst.msk [vmem:[#allocation3] sm:$0xff] %vm7974_vm9, %v6673_v8  ;;  %v509_v42 = vld [vmem:[#allocation2 + $0x9c] sm:$0x1]  ;;  %v1243_v13 = vld [vmem:[#allocation2 + $0x80] sm:$0x1] }
  0xfb   : > { %3445 = vst.msk [vmem:[#allocation3 + $0x10] sm:$0xff] %vm7974_vm9, %v6872_v25  ;;  %3446 = vst.msk [vmem:[#allocation3 + $0x18] sm:$0xff] %vm7974_vm9, %v3401_v59  ;;  %v742_v19 = vmax.f32 %v6767_v34, 0.0  ;;  %v560_v8 = vsel %vm6065_vm4, 0, %v559_v43  ;;  %v1244_v25 = vsel %vm6058_vm2, %v1021_v28, %v1243_v13  ;;  %vm4604_vm15 = vcmask 1043456   ;;  %3089 = vrot.lane.b32.xlu0 %v5489_v6, %s5995_s17 }
  0xfc   : > { %3622 = vst.msk [vmem:[#allocation3 + $0x8] sm:$0xff] %vm7973_vm10, %v6644_v56  ;;  %505 = vst [vmem:[#allocation2 + $0x84] sm:$0x1] %v504_v45  ;;  %v507_v56 = vsel %vm6058_vm2, 0, %v506_v37  ;;  %5869 = vmatprep.subr.msk.bf16.mxu0 %vm4604_vm15, %v5932_v5  ;;  %v4606_v34 = vsel %vm4604_vm15, %v5932_v5, 0  ;;  %v744_v12 = vmax.f32 %v6822_v22, 0.0  ;;  %v4445_v63 = vpop.permute.xlu0 %4444  ;;  %5870 = vmatprep.subr.msk.bf16.mxu1 %vm4604_vm15, %v5932_v5  ;;  %v7004_v59 = vpack.c.bf16 %v743_v15, %v743_v15 }
  0xfd   : > { %3621 = vst.msk [vmem:[#allocation3] sm:$0xff] %vm7973_vm10, %v6646_v44  ;;  %3623 = vst.msk [vmem:[#allocation3 + $0x10] sm:$0xff] %vm7973_vm10, %v6882_v38  ;;  %v676_v44 = vmul.f32 %v6728_v60, %v5768_v11  ;;  %v6994_v11 = vld [vmem:[%s6098_s29 + $0x68] sm:$0xff]   ;;  %5826 = vmatpush3.bf16.msra.mxu0 %v4606_v34  ;;  %v4124_v46 = vpop.permute.xlu1 %4123  ;;  %5868 = vmatpush3.bf16.msra.mxu1 %v4606_v34  ;;  %v5775_v45 = vunpack.c.l.bf16 %v7011_v9  ;;  %vm7987_vm15 = vcmask 458112  }
  0xfe   : > { %3624 = vst.msk [vmem:[#allocation3 + $0x18] sm:$0xff] %vm7973_vm10, %v3579_v10  ;;  %561 = vst [vmem:[#allocation2 + $0x8c] sm:$0x1] %v560_v8  ;;  %vm4555_vm10 = vcmask 588800   ;;  %v2620_v38 = vld [vmem:[#allocation2 + $0x78] sm:$0xf]  ;;  %v7013_v39 = vpack.c.bf16 %v744_v12, %v744_v12  ;;  %v5771_v48 = vunpack.c.l.bf16 %v6994_v11  ;;  %v5772_v61 = vunpack.c.h.bf16 %v6994_v11 }
  0xff   : > { %4167 = vst.msk [vmem:[#allocation3 + $0x8] sm:$0xff] %vm4165_vm11, %v6757_v51  ;;  %4166 = vst.msk [vmem:[#allocation3] sm:$0xff] %vm4165_vm11, %v6847_v57  ;;  %v5521_v51 = vcombine.low %v6930_v52, %v6947_v32  ;;  %v510_v57 = vsel %vm6058_vm2, 0, %v509_v42  ;;  %v3165_v22 = vld [vmem:[#allocation2 + $0x78] sm:$0xe]  ;;  %v2858_v29 = vshrl.u32 %v2620_v38, 16  ;;  %v7017_v30 = vadd.f32 %v6819_v58, %v676_v44 }
 0x100   : > { %4168 = vst.msk [vmem:[#allocation3 + $0x10] sm:$0xff] %vm4165_vm11, %v6904_v35  ;;  %1245 = vst [vmem:[#allocation2 + $0x80] sm:$0x1] %v1244_v25  ;;  %v7002_v35 = vpack.c.bf16 %v742_v19, %v742_v19  ;;  %v2621_v23 = vld [vmem:[#allocation2 + $0x7c] sm:$0xf]  ;;  %v2861_v62 = vshll.u32 %v2620_v38, 16  ;;  %v2360_v28 = vpop.permute.xlu0 %2359 }
 0x101   : > { %4488 = vst.msk [vmem:[#allocation3 + $0x8] sm:$0xff] %vm4486_vm12, %v6703_v7  ;;  %4487 = vst.msk [vmem:[#allocation3] sm:$0xff] %vm4486_vm12, %v6683_v41  ;;  %v745_v7 = vmax.f32 %v6914_v17, 0.0  ;;  %v563_v41 = vsel %vm6065_vm4, 0, %v562_v2  ;;  %v5922_v17 = vld [vmem:[#allocation2 + $0x78] sm:$0xff]   ;;  %v2867_v36 = vshll.u32 %v2621_v23, 16  ;;  %3410 = vrot.lane.b32.xlu0 %v5521_v51, %s5993_s15  ;;  %v2036_v26 = vpop.permute.xlu1 %2035 }
 0x102   : > { %508 = vst [vmem:[#allocation2 + $0x90] sm:$0x1] %v507_v56  ;;  %4489 = vst.msk [vmem:[#allocation3 + $0x10] sm:$0xff] %vm4486_vm12, %v4443_v3  ;;  %v2871_v49 = vshrl.u32 %v2621_v23, 16  ;;  %v3166_v47 = vld [vmem:[#allocation2 + $0x7c] sm:$0xf]  ;;  %2546 = vrot.lane.b32.xlu1 %v5922_v17, %s5991_s13 }
 0x103   : > { %564 = vst [vmem:[#allocation2 + $0x98] sm:$0x1] %v563_v41  ;;  %511 = vst [vmem:[#allocation2 + $0x9c] sm:$0x1] %v510_v57  ;;  %v5506_v54 = vrot.slane %v3165_v22, 9  ;;  %v2860_v33 = vrot.slane %v2858_v29, 4  ;;  %v7023_v20 = vpack.c.bf16 %v745_v7, %v745_v7 }
 0x104   : > { %4169 = vst.msk [vmem:[#allocation3 + $0x18] sm:$0xff] %vm4165_vm11, %v4124_v46  ;;  %v3299_v14 = vrot.slane %v3166_v47, 5  ;;  %v2863_v3 = vrot.slane %v2861_v62, 5  ;;  %v2869_v40 = vrot.slane %v2867_v36, 5  ;;  %v2873_v55 = vrot.slane %v2871_v49, 4  ;;  %v5925_v43 = vld [vmem:[#allocation2 + $0x78] sm:$0xff]   ;;  %v2537_v15 = vpop.permute.xlu0 %2536 }
 0x105   : > { %4490 = vst.msk [vmem:[#allocation3 + $0x18] sm:$0xff] %vm4486_vm12, %v4445_v63  ;;  %v1023_v10 = vshrl.u32 %v7002_v35, 16  ;;  %v1026_v32 = vshll.u32 %v7002_v35, 16  ;;  %3588 = vrot.lane.b32.xlu0 %v5925_v43, %s5992_s14  ;;  %v3661_v19 = vld [vmem:[#allocation2 + $0x78] sm:$0xf]  ;;  %v1031_v25 = vshrl.u32 %v7004_v59, 16  ;;  %v2038_v38 = vpop.permute.xlu1 %2037 }
 0x106   : > { %v7029_v37 = vsel %vm6148_vm13, %v5506_v54, %v3299_v14  ;;  %v3301_v31 = vrot.slane %v3299_v14, 4  ;;  %2080 = vst.msk [vmem:[#allocation3 + $0x20] sm:$0xff] %vm2075_vm0, %v2036_v26  ;;  %v2864_v2 = vor.u32 %v2863_v3, %v2860_v33  ;;  %v2874_v42 = vor.u32 %v2873_v55, %v2869_v40  ;;  %v1246_v44 = vld [vmem:[#allocation2 + $0x84] sm:$0xf]  ;;  %v3662_v41 = vld [vmem:[#allocation2 + $0x7c] sm:$0xf] }
 0x107   : > { %v2622_v52 = vld [vmem:[#allocation2 + $0x80] sm:$0x1]  ;;  %2404 = vst.msk [vmem:[#allocation3 + $0x20] sm:$0xff] %vm2399_vm1, %v2360_v28  ;;  %v1025_v8 = vrot.slane %v1023_v10, 7  ;;  %v1034_v56 = vshll.u32 %v7004_v59, 16  ;;  %v3878_v51 = vshrl.u32 %v3661_v19, 16 }
 0x108   : > { %v3167_v5 = vld [vmem:[#allocation2 + $0x80] sm:$0x1]  ;;  %v2877_v6 = vshll.u32 %v2622_v52, 16  ;;  %2581 = vst.msk [vmem:[#allocation3 + $0x20] sm:$0xff] %vm2576_vm3, %v2537_v15  ;;  %v2865_v34 = vrot.slane %v2864_v2, 4  ;;  %v2875_v12 = vrot.slane %v2874_v42, 4 }
 0x109   : > { %v3302_v13 = vrot.slane %v3167_v5, 5  ;;  %v4503_v57 = vld [vmem:[#allocation3] sm:$0xff]  ;;  %v1028_v35 = vor.u32 %v1026_v32, %v1025_v8  ;;  %v1029_v46 = vrot.slane %v1025_v8, 4  ;;  %v1033_v17 = vrot.slane %v1031_v25, 7  ;;  %v3663_v23 = vld [vmem:[#allocation2 + $0x80] sm:$0x1] }
 0x10a   : > { %v2879_v63 = vrot.slane %v2877_v6, 5  ;;  %v1250_v59 = vld [vmem:[#allocation2 + $0x8c] sm:$0x1]  ;;  %5827 = vmatprep.mubr.msk.bf16.mxu0 %vm4555_vm10, %v4503_v57  ;;  %2081 = vst.msk [vmem:[#allocation3 + $0x28] sm:$0xff] %vm2075_vm0, %v2038_v38  ;;  %v2870_v29 = vsel %vm6175_vm14, %v2865_v34, %v2869_v40  ;;  %v3880_v36 = vrot.slane %v3878_v51, 4  ;;  %v3881_v49 = vshll.u32 %v3661_v19, 16 }
 0x10b   : > { %v3303_v7 = vsel %vm6148_vm13, %v3301_v31, %v3302_v13  ;;  %v4206_v47 = vld [vmem:[#allocation2 + $0x78] sm:$0xe]  ;;  %v4207_v54 = vld [vmem:[#allocation2 + $0x7c] sm:$0xf]  ;;  %v1036_v33 = vor.u32 %v1034_v56, %v1033_v17  ;;  %v1038_v14 = vrot.slane %v1033_v17, 4  ;;  %v1247_v3 = vsel %vm6089_vm8, %v1028_v35, %v1246_v44  ;;  %v4504_v43 = vld [vmem:[#allocation3 + $0x8] sm:$0xff] }
 0x10c   : > { %v5522_v22 = vcombine.low %v7029_v37, %v3303_v7  ;;  %v2880_v62 = vsel %vm6175_vm14, %v2875_v12, %v2879_v63  ;;  %v4208_v55 = vld [vmem:[#allocation2 + $0x80] sm:$0x1]  ;;  %1248 = vst [vmem:[#allocation2 + $0x84] sm:$0xf] %v1247_v3  ;;  %v3883_v10 = vrot.slane %v3881_v49, 5  ;;  %v3887_v26 = vshll.u32 %v3662_v41, 16  ;;  %5828 = vmatmul.mubr.msk.bf16.vlgmr.msra.gmra.mrb[0].mxu0 %vm4555_vm10, %v4504_v43  ;;  %v2362_v37 = vpop.permute.xlu1 %2361  ;;  %v3082_v38 = vpop.permute.xlu0 %3081 }
 0x10d   : > { %v5490_v28 = vcombine.low %v2870_v29, %v2880_v62  ;;  %v3891_v52 = vshrl.u32 %v3662_v41, 16  ;;  %v3897_v40 = vshll.u32 %v3663_v23, 16  ;;  %v1574_v5 = vld [vmem:[#allocation2 + $0x78] sm:$0xf]  ;;  %v1037_v31 = vsel %vm6078_vm7, %v1029_v46, %v1036_v33  ;;  %v1575_v6 = vld [vmem:[#allocation2 + $0x7c] sm:$0xf] }
 0x10e   : > { %v1251_v32 = vsel %vm6058_vm2, %v1038_v14, %v1250_v59  ;;  %v5569_v2 = vrot.slane %v4206_v47, 9  ;;  %v4336_v42 = vrot.slane %v4207_v54, 5  ;;  %2405 = vst.msk [vmem:[#allocation3 + $0x28] sm:$0xff] %vm2399_vm1, %v2362_v37  ;;  %v3884_v13 = vor.u32 %v3883_v10, %v3880_v36  ;;  %v1576_v8 = vld [vmem:[#allocation2 + $0x80] sm:$0x1]  ;;  %v4505_v25 = vld [vmem:[#allocation3 + $0x10] sm:$0xff] }
 0x10f   : > { %3091 = vrot.lane.b32.xlu1 %v5490_v28, %s5995_s17  ;;  %1249 = vst.msk [vmem:[#allocation2 + $0x88] sm:$0xf] %vm1173_vm6, %v1037_v31  ;;  %v3889_v19 = vrot.slane %v3887_v26, 5  ;;  %v3893_v15 = vrot.slane %v3891_v52, 4  ;;  %1252 = vst [vmem:[#allocation2 + $0x8c] sm:$0x1] %v1251_v32  ;;  %v677_v56 = vmul.f32 %v6728_v60, %v5771_v48  ;;  %5831 = vmatprep.mubr.msk.bf16.mxu0 %vm4555_vm10, %v4505_v25 }
 0x110   : > { %v3899_v44 = vrot.slane %v3897_v40, 5  ;;  %v4338_v51 = vrot.slane %v4336_v42, 4  ;;  %v4339_v34 = vrot.slane %v4208_v55, 5  ;;  %v1836_v12 = vshrl.u32 %v1574_v5, 16  ;;  %v4506_v48 = vld [vmem:[#allocation3 + $0x18] sm:$0xff]  ;;  %3126 = vst.msk [vmem:[#allocation3 + $0x20] sm:$0xff] %vm3121_vm5, %v3082_v38  ;;  %v2539_v36 = vpop.permute.xlu1 %2538  ;;  %v3403_v26 = vpop.permute.xlu0 %3402 }
 0x111   : > { %v3885_v63 = vrot.slane %v3884_v13, 4  ;;  %v3894_v7 = vor.u32 %v3893_v15, %v3889_v19  ;;  %v1839_v41 = vshll.u32 %v1574_v5, 16  ;;  %v1845_v57 = vshll.u32 %v1575_v6, 16  ;;  %2582 = vst.msk [vmem:[#allocation3 + $0x28] sm:$0xff] %vm2576_vm3, %v2539_v36  ;;  %v7076_v54 = vld [vmem:[%s7968_s4] ss:$0 sm:$0xff] }
 0x112   : > { %v7065_v35 = vsel %vm6148_vm13, %v5569_v2, %v4336_v42  ;;  %v1838_v46 = vrot.slane %v1836_v12, 4  ;;  %v1849_v17 = vshrl.u32 %v1575_v6, 16  ;;  %v1855_v60 = vshll.u32 %v1576_v8, 16  ;;  %3447 = vst.msk [vmem:[#allocation3 + $0x20] sm:$0xff] %vm7974_vm9, %v3403_v26 }
 0x113   : > { %3412 = vrot.lane.b32.xlu1 %v5522_v22, %s5993_s15  ;;  %v3890_v23 = vsel %vm6175_vm14, %v3885_v63, %v3889_v19  ;;  %v3895_v59 = vrot.slane %v3894_v7, 4  ;;  %v4340_v29 = vsel %vm6148_vm13, %v4338_v51, %v4339_v34  ;;  %v1841_v62 = vrot.slane %v1839_v41, 5  ;;  %v3664_v22 = vld [vmem:[#allocation2 + $0x84] sm:$0xf] }
 0x114   : > { %v1847_v49 = vrot.slane %v1845_v57, 5  ;;  %v1851_v47 = vrot.slane %v1849_v17, 4  ;;  %v7081_v28 = vmul.f32 %v7076_v54, %v5772_v61  ;;  %v7084_v33 = vadd.f32 %v6819_v58, %v677_v56  ;;  %v4209_v10 = vld [vmem:[#allocation2 + $0x84] sm:$0xe]  ;;  %5832 = vmatmul.mubr.msk.bf16.gmra.mrb[4].mxu0 %vm4555_vm10, %v4506_v48  ;;  %v3581_v63 = vpop.permute.xlu0 %3580 }
 0x115   : > { %v3900_v14 = vsel %vm6175_vm14, %v3895_v59, %v3899_v44  ;;  %v3902_v3 = vshrl.u32 %v3664_v22, 16  ;;  %v3905_v55 = vshll.u32 %v3664_v22, 16  ;;  %v1842_v43 = vor.u32 %v1841_v62, %v1838_v46  ;;  %v1577_v6 = vld [vmem:[#allocation2 + $0x84] sm:$0xf]  ;;  %3625 = vst.msk [vmem:[#allocation3 + $0x20] sm:$0xff] %vm7987_vm15, %v3581_v63 }
 0x116   : > { %v5927_v52 = vld [vmem:[#allocation2 + $0x84] sm:$0xff]   ;;  %v5553_v40 = vcombine.low %v3890_v23, %v3900_v14  ;;  %v5585_v11 = vcombine.low %v7065_v35, %v4340_v29  ;;  %v1852_v61 = vor.u32 %v1851_v47, %v1847_v49  ;;  %v1857_v37 = vrot.slane %v1855_v60, 5  ;;  %v3666_v58 = vld [vmem:[#allocation2 + $0x8c] sm:$0x1]  ;;  %v2122_v59 = vld [vmem:[#allocation2 + $0x78] sm:$0xe] }
 0x117   : > { %v3665_v5 = vld [vmem:[#allocation2 + $0x88] sm:$0xf]  ;;  %v3904_v31 = vrot.slane %v3902_v3, 4  ;;  %v3907_v32 = vrot.slane %v3905_v55, 5  ;;  %3590 = vrot.lane.b32.xlu1 %v5927_v52, %s5992_s14  ;;  %v3921_v13 = vshll.u32 %v3666_v58, 16  ;;  %v1843_v19 = vrot.slane %v1842_v43, 4 }
 0x118   : > { %v3911_v2 = vshll.u32 %v3665_v5, 16  ;;  %v3915_v42 = vshrl.u32 %v3665_v5, 16  ;;  %4133 = vrot.lane.b32.xlu0 %v5553_v40, %s5996_s18  ;;  %v1853_v15 = vrot.slane %v1852_v61, 4  ;;  %v4210_v8 = vld [vmem:[#allocation2 + $0x88] sm:$0xf]  ;;  %v5570_v25 = vrot.slane %v4209_v10, 9 }
 0x119   : > { %v3908_v56 = vor.u32 %v3907_v32, %v3904_v31  ;;  %v4211_v34 = vld [vmem:[#allocation2 + $0x8c] sm:$0x1]  ;;  %v4343_v12 = vrot.slane %v4210_v8, 5  ;;  %v3923_v7 = vrot.slane %v3921_v13, 5  ;;  %v1848_v41 = vsel %vm6175_vm14, %v1843_v19, %v1847_v49  ;;  %v1578_v35 = vld [vmem:[#allocation2 + $0x88] sm:$0xf] }
 0x11a   : > { %v3913_v44 = vrot.slane %v3911_v2, 5  ;;  %v3917_v51 = vrot.slane %v3915_v42, 4  ;;  %v1858_v57 = vsel %vm6175_vm14, %v1853_v15, %v1857_v37  ;;  %v4346_v38 = vrot.slane %v4211_v34, 5  ;;  %v1579_v46 = vld [vmem:[#allocation2 + $0x8c] sm:$0x1] }
 0x11b   : > { %v3909_v17 = vrot.slane %v3908_v56, 4  ;;  %v5427_v48 = vcombine.low %v1848_v41, %v1858_v57  ;;  %v4344_v23 = vsel %vm6148_vm13, %v5570_v25, %v4343_v12  ;;  %v2123_v29 = vld [vmem:[#allocation2 + $0x7c] sm:$0xf]  ;;  %v4345_v62 = vrot.slane %v4343_v12, 4  ;;  %v2124_v47 = vld [vmem:[#allocation2 + $0x80] sm:$0x1] }
 0x11c   : > { %v3918_v60 = vor.u32 %v3917_v51, %v3913_v44  ;;  %4454 = vrot.lane.b32.xlu0 %v5585_v11, %s5994_s16  ;;  %v1860_v36 = vshrl.u32 %v1577_v6, 16  ;;  %v1863_v22 = vshll.u32 %v1577_v6, 16  ;;  %v1869_v49 = vshll.u32 %v1578_v35, 16  ;;  %v2125_v14 = vld [vmem:[#allocation2 + $0x84] sm:$0xe]  ;;  %v3084_v2 = vpop.permute.xlu1 %3083 }
 0x11d   : > { %v2126_v3 = vld [vmem:[#allocation2 + $0x88] sm:$0xf]  ;;  %v3914_v55 = vsel %vm6175_vm14, %v3909_v17, %v3913_v44  ;;  %v1873_v10 = vshrl.u32 %v1578_v35, 16  ;;  %v1879_v26 = vshll.u32 %v1579_v46, 16  ;;  %v4347_v52 = vsel %vm6148_vm13, %v4345_v62, %v4346_v38  ;;  %v2127_v32 = vld [vmem:[#allocation2 + $0x8c] sm:$0x1] }
 0x11e   : > { %v3919_v43 = vrot.slane %v3918_v60, 4  ;;  %v1862_v40 = vrot.slane %v1860_v36, 4  ;;  %v1865_v5 = vrot.slane %v1863_v22, 5  ;;  %v1871_v61 = vrot.slane %v1869_v49, 5  ;;  %3127 = vst.msk [vmem:[#allocation3 + $0x28] sm:$0xff] %vm3121_vm5, %v3084_v2 }
 0x11f   : > { %v5586_v37 = vcombine.low %v4344_v23, %v4347_v52  ;;  %v1875_v58 = vrot.slane %v1873_v10, 4  ;;  %v1881_v31 = vrot.slane %v1879_v26, 5  ;;  %v5443_v13 = vrot.slane %v2122_v59, 9  ;;  %v2623_v63 = vld [vmem:[#allocation2 + $0x84] sm:$0xf]  ;;  %v5948_v52 = vld [vmem:[#allocation2 + $0x6c] sm:$0xff]  }
 0x120   : > { %v3924_v11 = vsel %vm6175_vm14, %v3919_v43, %v3923_v7  ;;  %v1866_v6 = vor.u32 %v1865_v5, %v1862_v40  ;;  %v2263_v19 = vrot.slane %v2123_v29, 5  ;;  %v2266_v8 = vrot.slane %v2124_v47, 5  ;;  %v5947_v7 = vld [vmem:[#allocation2 + $0x60] sm:$0xff]   ;;  %v2624_v46 = vld [vmem:[#allocation2 + $0x88] sm:$0xf]  ;;  %v3405_v17 = vpop.permute.xlu1 %3404 }
 0x121   : > { %v5554_v42 = vcombine.low %v3914_v55, %v3924_v11  ;;  %4456 = vrot.lane.b32.xlu0 %v5586_v37, %s5994_s16  ;;  %v1876_v15 = vor.u32 %v1875_v58, %v1871_v61  ;;  %v5444_v25 = vrot.slane %v2125_v14, 9  ;;  %v2270_v56 = vrot.slane %v2126_v3, 5  ;;  %v1253_v62 = vld [vmem:[#allocation2 + $0x90] sm:$0xf]  ;;  %v2625_v36 = vld [vmem:[#allocation2 + $0x8c] sm:$0x1]  ;;  %v4126_v55 = vpop.permute.xlu0 %4125 }
 0x122   : > { %v1867_v44 = vrot.slane %v1866_v6, 4  ;;  %v2264_v51 = vsel %vm6148_vm13, %v5443_v13, %v2263_v19  ;;  %v2265_v34 = vrot.slane %v2263_v19, 4  ;;  %v2273_v12 = vrot.slane %v2127_v32, 5  ;;  %3448 = vst.msk [vmem:[#allocation3 + $0x28] sm:$0xff] %vm7974_vm9, %v3405_v17  ;;  %v1257_v3 = vld [vmem:[#allocation2 + $0x98] sm:$0x1] }
 0x123   : > { %4135 = vrot.lane.b32.xlu1 %v5554_v42, %s5996_s18  ;;  %v1877_v41 = vrot.slane %v1876_v15, 4  ;;  %v7114_v57 = vsel %vm6148_vm13, %v5444_v25, %v2270_v56  ;;  %v2272_v38 = vrot.slane %v2270_v56, 4  ;;  %v1040_v35 = vshrl.u32 %v7013_v39, 16  ;;  %4170 = vst.msk [vmem:[#allocation3 + $0x20] sm:$0xff] %vm4165_vm11, %v4126_v55  ;;  %v5933_v40 = vld [vmem:[#allocation2 + $0x84] sm:$0xff]  }
 0x124   : > { %v1872_v60 = vsel %vm6175_vm14, %v1867_v44, %v1871_v61  ;;  %v2267_v23 = vsel %vm6148_vm13, %v2265_v34, %v2266_v8  ;;  %v1043_v59 = vshll.u32 %v7013_v39, 16  ;;  %v1048_v29 = vshrl.u32 %v7023_v20, 16  ;;  %v3168_v58 = vld [vmem:[#allocation2 + $0x84] sm:$0xe]  ;;  %v3169_v6 = vld [vmem:[#allocation2 + $0x88] sm:$0xf] }
 0x125   : > { %vm7988_vm15 = vcmask 64512   ;;  %v1882_v22 = vsel %vm6175_vm14, %v1877_v41, %v1881_v31  ;;  %v5459_v49 = vcombine.low %v2264_v51, %v2267_v23  ;;  %v2274_v47 = vsel %vm6148_vm13, %v2272_v38, %v2273_v12  ;;  %v3583_v31 = vpop.permute.xlu1 %3582  ;;  %v3170_v8 = vld [vmem:[#allocation2 + $0x8c] sm:$0x1]  ;;  %v4447_v25 = vpop.permute.xlu0 %4446  ;;  %v565_v12 = vld [vmem:[#allocation2 + $0xa4] sm:$0x1] }
 0x126   : > { %1536 = vst.msk [vmem:[#allocation3 + $0x40] sm:$0xff] %vm7988_vm15, %v5947_v7  ;;  %v1042_v14 = vrot.slane %v1040_v35, 7  ;;  %v5428_v39 = vcombine.low %v1872_v60, %v1882_v22  ;;  %v5460_v43 = vcombine.low %v7114_v57, %v2274_v47  ;;  %v1050_v10 = vrot.slane %v1048_v29, 7  ;;  %v512_v57 = vld [vmem:[#allocation2 + $0xa8] sm:$0x1] }
 0x127   : > { %2047 = vrot.lane.b32.xlu1 %v5427_v48, %s5990_s12  ;;  %v1051_v26 = vshll.u32 %v7023_v20, 16  ;;  %2371 = vrot.lane.b32.xlu0 %v5459_v49, %s5989_s11  ;;  %v2882_v11 = vshrl.u32 %v2623_v63, 16  ;;  %v2885_v37 = vshll.u32 %v2623_v63, 16  ;;  %v2891_v2 = vshll.u32 %v2624_v46, 16  ;;  %4491 = vst.msk [vmem:[#allocation3 + $0x20] sm:$0xff] %vm4486_vm12, %v4447_v25 }
 0x128   : > { %v1045_v5 = vor.u32 %v1043_v59, %v1042_v14  ;;  %v1046_v61 = vrot.slane %v1042_v14, 4  ;;  %v1055_v48 = vrot.slane %v1050_v10, 4  ;;  %v2895_v42 = vshrl.u32 %v2624_v46, 16  ;;  %v7149_v38 = vld [vmem:[%s7969_s5] ss:$0 sm:$0xff] }
 0x129   : > { %v1053_v32 = vor.u32 %v1051_v26, %v1050_v10  ;;  %vm7989_vm15 = vcmask 458112   ;;  %vm7990_vm9 = vcmask 64512   ;;  %v2884_v13 = vrot.slane %v2882_v11, 4 }
 0x12a   : > { %3626 = vst.msk [vmem:[#allocation3 + $0x28] sm:$0xff] %vm7989_vm15, %v3583_v31  ;;  %v1254_v20 = vsel %vm6089_vm8, %v1045_v5, %v1253_v62  ;;  %v2887_v19 = vrot.slane %v2885_v37, 5  ;;  %v2901_v15 = vshll.u32 %v2625_v36, 16  ;;  %v2893_v44 = vrot.slane %v2891_v2, 5  ;;  %v4128_v14 = vpop.permute.xlu1 %4127  ;;  %vm7991_vm15 = vmmov %vm7990_vm9 }
 0x12b   : > { %1537 = vst.msk [vmem:[#allocation3 + $0x48] sm:$0xff] %vm7990_vm9, %v5948_v52  ;;  %2049 = vrot.lane.b32.xlu1 %v5428_v39, %s5990_s12  ;;  %v1054_v56 = vsel %vm6078_vm7, %v1046_v61, %v1053_v32  ;;  %1255 = vst [vmem:[#allocation2 + $0x90] sm:$0xf] %v1254_v20  ;;  %v2897_v51 = vrot.slane %v2895_v42, 4  ;;  %v1258_v34 = vsel %vm6058_vm2, %v1055_v48, %v1257_v3  ;;  %2548 = vrot.lane.b32.xlu0 %v5933_v40, %s5991_s13 }
 0x12c   : > { %1256 = vst.msk [vmem:[#allocation2 + $0x94] sm:$0xf] %vm1173_vm6, %v1054_v56  ;;  %v2888_v63 = vor.u32 %v2887_v19, %v2884_v13  ;;  %1259 = vst [vmem:[#allocation2 + $0x98] sm:$0x1] %v1258_v34  ;;  %v5507_v7 = vrot.slane %v3168_v58, 9  ;;  %v3306_v41 = vrot.slane %v3169_v6, 5  ;;  %v717_v35 = vadd.f32 %v7149_v38, %v7081_v28 }
 0x12d   : > { %v2898_v46 = vor.u32 %v2897_v51, %v2893_v44  ;;  %v2903_v17 = vrot.slane %v2901_v15, 5  ;;  %v3309_v60 = vrot.slane %v3170_v8, 5  ;;  %v746_v23 = vmax.f32 %v7008_v50, 0.0  ;;  %v4449_v50 = vpop.permute.xlu0 %4448  ;;  %4171 = vst.msk [vmem:[#allocation3 + $0x28] sm:$0xff] %vm4165_vm11, %v4128_v14 }
 0x12e   : > { %v2889_v59 = vrot.slane %v2888_v63, 4  ;;  %v3308_v29 = vrot.slane %v3306_v41, 4  ;;  %v566_v62 = vsel %vm6065_vm4, 0, %v565_v12  ;;  %v5776_v36 = vunpack.c.h.bf16 %v7011_v9  ;;  %4492 = vst.msk [vmem:[#allocation3 + $0x28] sm:$0xff] %vm4486_vm12, %v4449_v50  ;;  %v2040_v48 = vpop.permute.xlu1 %2039  ;;  %v1260_v63 = vld [vmem:[#allocation2 + $0x9c] sm:$0xf] }
 0x12f   : > { %2373 = vrot.lane.b32.xlu1 %v5460_v43, %s5989_s11  ;;  %v2899_v22 = vrot.slane %v2898_v46, 4  ;;  %v747_v49 = vmax.f32 %v7017_v30, 0.0  ;;  %v7159_v47 = vpack.c.bf16 %v746_v23, %v746_v23  ;;  %567 = vst [vmem:[#allocation2 + $0xa4] sm:$0x1] %v566_v62  ;;  %v513_v28 = vsel %vm6058_vm2, 0, %v512_v57  ;;  %2082 = vst.msk [vmem:[#allocation3 + $0x30] sm:$0xff] %vm2075_vm0, %v2040_v48 }
 0x130   : > { %v2894_v3 = vsel %vm6175_vm14, %v2889_v59, %v2893_v44  ;;  %v3307_v55 = vsel %vm6148_vm13, %v5507_v7, %v3306_v41  ;;  %v3310_v39 = vsel %vm6148_vm13, %v3308_v29, %v3309_v60  ;;  %514 = vst [vmem:[#allocation2 + $0xa8] sm:$0x1] %v513_v28  ;;  %v748_v30 = vmax.f32 %v7084_v33, 0.0 }
 0x131   : > { %v2904_v43 = vsel %vm6175_vm14, %v2899_v22, %v2903_v17  ;;  %v1057_v10 = vshrl.u32 %v7159_v47, 16  ;;  %v1060_v26 = vshll.u32 %v7159_v47, 16  ;;  %v749_v52 = vmax.f32 %v717_v35, 0.0  ;;  %v2364_v7 = vpop.permute.xlu0 %2363  ;;  %v4507_v22 = vld [vmem:[#allocation3 + $0x20] sm:$0xff] }
 0x132   : > { %v5491_v40 = vcombine.low %v2894_v3, %v2904_v43  ;;  %v2626_v5 = vld [vmem:[#allocation2 + $0x90] sm:$0xf]  ;;  %v679_v11 = vmul.f32 %v7076_v54, %v5775_v45  ;;  %v5523_v31 = vcombine.low %v3307_v55, %v3310_v39  ;;  %v7179_v32 = vpack.c.bf16 %v747_v49, %v747_v49  ;;  %v2042_v46 = vpop.permute.xlu1 %2041  ;;  %2406 = vst.msk [vmem:[#allocation3 + $0x30] sm:$0xff] %vm2399_vm1, %v2364_v7 }
 0x133   : > { %v3171_v61 = vld [vmem:[#allocation2 + $0x90] sm:$0xe]  ;;  %v2627_v37 = vld [vmem:[#allocation2 + $0x94] sm:$0xf]  ;;  %v2906_v58 = vshrl.u32 %v2626_v5, 16  ;;  %v7182_v2 = vmul.f32 %v7076_v54, %v5776_v36  ;;  %v2909_v6 = vshll.u32 %v2626_v5, 16  ;;  %v7187_v25 = vpack.c.bf16 %v748_v30, %v748_v30  ;;  %5835 = vmatprep.mubr.msk.bf16.mxu0 %vm4555_vm10, %v4507_v22 }
 0x134   : > { %v5934_v33 = vld [vmem:[#allocation2 + $0x90] sm:$0xff]   ;;  %3093 = vrot.lane.b32.xlu0 %v5491_v40, %s5995_s17  ;;  %v2628_v42 = vld [vmem:[#allocation2 + $0x98] sm:$0x1]  ;;  %v2915_v20 = vshll.u32 %v2627_v37, 16  ;;  %v2919_v13 = vshrl.u32 %v2627_v37, 16  ;;  %v5508_v19 = vrot.slane %v3171_v61, 9  ;;  %v7189_v56 = vpack.c.bf16 %v749_v52, %v749_v52 }
 0x135   : > { %2550 = vrot.lane.b32.xlu1 %v5934_v33, %s5991_s13  ;;  %v2908_v9 = vrot.slane %v2906_v58, 4  ;;  %v2925_v45 = vshll.u32 %v2628_v42, 16  ;;  %v3172_v15 = vld [vmem:[#allocation2 + $0x94] sm:$0xf]  ;;  %v3173_v8 = vld [vmem:[#allocation2 + $0x98] sm:$0x1]  ;;  %v7192_v17 = vadd.f32 %v7149_v38, %v679_v11 }
 0x136   : > { %v2911_v44 = vrot.slane %v2909_v6, 5  ;;  %v2917_v51 = vrot.slane %v2915_v20, 5  ;;  %v2921_v34 = vrot.slane %v2919_v13, 4  ;;  %v3313_v12 = vrot.slane %v3172_v15, 5  ;;  %v5937_v62 = vld [vmem:[#allocation2 + $0x90] sm:$0xff]   ;;  %2083 = vst.msk [vmem:[#allocation3 + $0x38] sm:$0xff] %vm2075_vm0, %v2042_v46  ;;  %v2366_v37 = vpop.permute.xlu1 %2365 }
 0x137   : > { %v2927_v41 = vrot.slane %v2925_v45, 5  ;;  %v3316_v57 = vrot.slane %v3173_v8, 5  ;;  %v1059_v35 = vrot.slane %v1057_v10, 7  ;;  %v3667_v36 = vld [vmem:[#allocation2 + $0x90] sm:$0xf]  ;;  %v1065_v28 = vshrl.u32 %v7179_v32, 16  ;;  %v2541_v10 = vpop.permute.xlu0 %2540 }
 0x138   : > { %v2912_v60 = vor.u32 %v2911_v44, %v2908_v9  ;;  %v2922_v23 = vor.u32 %v2921_v34, %v2917_v51  ;;  %3414 = vrot.lane.b32.xlu0 %v5523_v31, %s5993_s15  ;;  %v7198_v59 = vsel %vm6148_vm13, %v5508_v19, %v3313_v12  ;;  %v3315_v29 = vrot.slane %v3313_v12, 4  ;;  %v3668_v50 = vld [vmem:[#allocation2 + $0x94] sm:$0xf]  ;;  %v4508_v3 = vld [vmem:[#allocation3 + $0x28] sm:$0xff]  ;;  %v3669_v61 = vld [vmem:[#allocation2 + $0x98] sm:$0x1] }
 0x139   : > { %v1062_v49 = vor.u32 %v1060_v26, %v1059_v35  ;;  %v1063_v47 = vrot.slane %v1059_v35, 4  ;;  %v1068_v14 = vshll.u32 %v7179_v32, 16  ;;  %v3926_v43 = vshrl.u32 %v3667_v36, 16  ;;  %5836 = vmatmul.mubr.msk.bf16.gmra.mrb[8].mxu0 %vm4555_vm10, %v4508_v3  ;;  %v5951_v26 = vld [vmem:[#allocation2 + $0x78] sm:$0xff]   ;;  %v4212_v33 = vld [vmem:[#allocation2 + $0x90] sm:$0xe] }
 0x13a   : > { %v2913_v55 = vrot.slane %v2912_v60, 4  ;;  %v2923_v39 = vrot.slane %v2922_v23, 4  ;;  %v3317_v30 = vsel %vm6148_vm13, %v3315_v29, %v3316_v57  ;;  %v1067_v40 = vrot.slane %v1065_v28, 7  ;;  %2583 = vst.msk [vmem:[#allocation3 + $0x30] sm:$0xff] %vm2576_vm3, %v2541_v10  ;;  %v7212_v58 = vld [vmem:[%s6098_s29 + $0x78] sm:$0xff]   ;;  %v5952_v46 = vld [vmem:[#allocation2 + $0x84] sm:$0xff]  }
 0x13b   : > { %v5524_v52 = vcombine.low %v7198_v59, %v3317_v30  ;;  %v1261_v5 = vsel %vm6089_vm8, %v1062_v49, %v1260_v63  ;;  %v3929_v11 = vshll.u32 %v3667_v36, 16  ;;  %v3928_v48 = vrot.slane %v3926_v43, 4  ;;  %v1264_v6 = vld [vmem:[#allocation2 + $0xa4] sm:$0x1]  ;;  %v4213_v20 = vld [vmem:[#allocation2 + $0x94] sm:$0xf] }
 0x13c   : > { %v2918_v31 = vsel %vm6175_vm14, %v2913_v55, %v2917_v51  ;;  %v2928_v32 = vsel %vm6175_vm14, %v2923_v39, %v2927_v41  ;;  %3592 = vrot.lane.b32.xlu0 %v5937_v62, %s5992_s14  ;;  %1262 = vst [vmem:[#allocation2 + $0x9c] sm:$0xf] %v1261_v5  ;;  %v3935_v42 = vshll.u32 %v3668_v50, 16  ;;  %2407 = vst.msk [vmem:[#allocation3 + $0x38] sm:$0xff] %vm2399_vm1, %v2366_v37  ;;  %v1072_v9 = vrot.slane %v1067_v40, 4 }
 0x13d   : > { %1538 = vst.msk [vmem:[#allocation3 + $0x50] sm:$0xff] %vm7990_vm9, %v5951_v26  ;;  %v5492_v13 = vcombine.low %v2918_v31, %v2928_v32  ;;  %v1070_v19 = vor.u32 %v1068_v14, %v1067_v40  ;;  %v3931_v45 = vrot.slane %v3929_v11, 5  ;;  %v4214_v15 = vld [vmem:[#allocation2 + $0x98] sm:$0x1]  ;;  %v1580_v8 = vld [vmem:[#allocation2 + $0x90] sm:$0xf]  ;;  %v5779_v62 = vunpack.c.l.bf16 %v7212_v58  ;;  %v3086_v55 = vpop.permute.xlu0 %3085 }
 0x13e   : > { %v3937_v44 = vrot.slane %v3935_v42, 5  ;;  %v3939_v51 = vshrl.u32 %v3668_v50, 16  ;;  %v3945_v34 = vshll.u32 %v3669_v61, 16  ;;  %v5571_v12 = vrot.slane %v4212_v33, 9  ;;  %v1581_v35 = vld [vmem:[#allocation2 + $0x94] sm:$0xf] }
 0x13f   : > { %3095 = vrot.lane.b32.xlu1 %v5492_v13, %s5995_s17  ;;  %v1071_v63 = vsel %vm6078_vm7, %v1063_v47, %v1070_v19  ;;  %v3932_v7 = vor.u32 %v3931_v45, %v3928_v48  ;;  %v1265_v41 = vsel %vm6058_vm2, %v1072_v9, %v1264_v6  ;;  %v4350_v57 = vrot.slane %v4213_v20, 5  ;;  %v1582_v59 = vld [vmem:[#allocation2 + $0x98] sm:$0x1]  ;;  %1539 = vst.msk [vmem:[#allocation3 + $0x58] sm:$0xff] %vm7991_vm15, %v5952_v46  ;;  %v5953_v9 = vld [vmem:[#allocation2 + $0x90] sm:$0xff]  }
 0x140   : > { %1263 = vst.msk [vmem:[#allocation2 + $0xa0] sm:$0xf] %vm1173_vm6, %v1071_v63  ;;  %v3941_v60 = vrot.slane %v3939_v51, 4  ;;  %1266 = vst [vmem:[#allocation2 + $0xa4] sm:$0x1] %v1265_v41  ;;  %v4353_v23 = vrot.slane %v4214_v15, 5  ;;  %v7253_v46 = vmul.f32 %v7076_v54, %v5779_v62 }
 0x141   : > { %v1884_v29 = vshrl.u32 %v1580_v8, 16  ;;  %v3933_v36 = vrot.slane %v3932_v7, 4  ;;  %v3947_v22 = vrot.slane %v3945_v34, 5  ;;  %v4352_v49 = vrot.slane %v4350_v57, 4  ;;  %3128 = vst.msk [vmem:[#allocation3 + $0x30] sm:$0xff] %vm3121_vm5, %v3086_v55  ;;  %v3407_v19 = vpop.permute.xlu0 %3406 }
 0x142   : > { %v1887_v47 = vshll.u32 %v1580_v8, 16  ;;  %v3942_v28 = vor.u32 %v3941_v60, %v3937_v44  ;;  %v1893_v50 = vshll.u32 %v1581_v35, 16  ;;  %v1897_v3 = vshrl.u32 %v1581_v35, 16  ;;  %1540 = vst.msk [vmem:[#allocation3 + $0x60] sm:$0xff] %vm7991_vm15, %v5953_v9 }
 0x143   : > { %v1886_v14 = vrot.slane %v1884_v29, 4  ;;  %3416 = vrot.lane.b32.xlu1 %v5524_v52, %s5993_s15  ;;  %v3938_v39 = vsel %vm6175_vm14, %v3933_v36, %v3937_v44  ;;  %v3670_v30 = vld [vmem:[#allocation2 + $0x9c] sm:$0xf]  ;;  %v7234_v43 = vsel %vm6148_vm13, %v5571_v12, %v4350_v57  ;;  %v1903_v26 = vshll.u32 %v1582_v59, 16  ;;  %v2543_v52 = vpop.permute.xlu1 %2542 }
 0x144   : > { %v1889_v10 = vrot.slane %v1887_v47, 5  ;;  %v3943_v40 = vrot.slane %v3942_v28, 4  ;;  %v3950_v5 = vshrl.u32 %v3670_v30, 16  ;;  %v3953_v61 = vshll.u32 %v3670_v30, 16  ;;  %v4215_v33 = vld [vmem:[#allocation2 + $0x9c] sm:$0xe] }
 0x145   : > { %v4354_v11 = vsel %vm6148_vm13, %v4352_v49, %v4353_v23  ;;  %v7239_v31 = vrot.slane %v1893_v50, 5  ;;  %v1899_v32 = vrot.slane %v1897_v3, 4  ;;  %v7241_v48 = vrot.slane %v1903_v26, 5  ;;  %2584 = vst.msk [vmem:[#allocation3 + $0x38] sm:$0xff] %vm2576_vm3, %v2543_v52  ;;  %v1583_v34 = vld [vmem:[#allocation2 + $0x9c] sm:$0xf]  ;;  %v3585_v54 = vpop.permute.xlu0 %3584 }
 0x146   : > { %v1890_v37 = vor.u32 %v1889_v10, %v1886_v14  ;;  %v3948_v42 = vsel %vm6175_vm14, %v3943_v40, %v3947_v22  ;;  %v3952_v6 = vrot.slane %v3950_v5, 4  ;;  %v3955_v20 = vrot.slane %v3953_v61, 5  ;;  %v2128_v14 = vld [vmem:[#allocation2 + $0x90] sm:$0xe]  ;;  %v2129_v30 = vld [vmem:[#allocation2 + $0x94] sm:$0xf] }
 0x147   : > { %v5572_v13 = vrot.slane %v4215_v33, 9  ;;  %v5938_v45 = vld [vmem:[#allocation2 + $0x9c] sm:$0xff]   ;;  %v5555_v15 = vcombine.low %v3938_v39, %v3948_v42  ;;  %v1900_v51 = vor.u32 %v1899_v32, %v7239_v31  ;;  %v7249_v12 = vadd.f32 %v7149_v38, %v7182_v2  ;;  %v3672_v63 = vld [vmem:[#allocation2 + $0xa4] sm:$0x1]  ;;  %v2130_v5 = vld [vmem:[#allocation2 + $0x98] sm:$0x1] }
 0x148   : > { %v3671_v8 = vld [vmem:[#allocation2 + $0xa0] sm:$0xf]  ;;  %v1891_v44 = vrot.slane %v1890_v37, 4  ;;  %vm7992_vm9 = vcmask 392512   ;;  %v3956_v7 = vor.u32 %v3955_v20, %v3952_v6  ;;  %3594 = vrot.lane.b32.xlu1 %v5938_v45, %s5992_s14  ;;  %v3969_v60 = vshll.u32 %v3672_v63, 16 }
 0x149   : > { %3449 = vst.msk [vmem:[#allocation3 + $0x30] sm:$0xff] %vm7992_vm9, %v3407_v19  ;;  %v3959_v41 = vshll.u32 %v3671_v8, 16  ;;  %v3963_v57 = vshrl.u32 %v3671_v8, 16  ;;  %v4216_v35 = vld [vmem:[#allocation2 + $0xa0] sm:$0xf]  ;;  %4137 = vrot.lane.b32.xlu0 %v5555_v15, %s5996_s18  ;;  %v5587_v2 = vcombine.low %v7234_v43, %v4354_v11  ;;  %v1901_v23 = vrot.slane %v1900_v51, 4 }
 0x14a   : > { %v4217_v59 = vld [vmem:[#allocation2 + $0xa4] sm:$0x1]  ;;  %v4357_v29 = vrot.slane %v4216_v35, 5  ;;  %v3957_v36 = vrot.slane %v3956_v7, 4  ;;  %v1584_v28 = vld [vmem:[#allocation2 + $0xa0] sm:$0xf]  ;;  %v1896_v50 = vsel %vm6175_vm14, %v1891_v44, %v7239_v31 }
 0x14b   : > { %v3961_v22 = vrot.slane %v3959_v41, 5  ;;  %v3965_v49 = vrot.slane %v3963_v57, 4  ;;  %v4360_v47 = vrot.slane %v4217_v59, 5  ;;  %v3971_v62 = vrot.slane %v3969_v60, 5  ;;  %v1585_v39 = vld [vmem:[#allocation2 + $0xa4] sm:$0x1] }
 0x14c   : > { %v4358_v3 = vsel %vm6148_vm13, %v5572_v13, %v4357_v29  ;;  %v4359_v55 = vrot.slane %v4357_v29, 4  ;;  %vm7993_vm9 = vcmask 458112   ;;  %v1906_v26 = vsel %vm6175_vm14, %v1901_v23, %v7241_v48  ;;  %v5954_v61 = vld [vmem:[#allocation2 + $0x9c] sm:$0xff]   ;;  %v2133_v35 = vld [vmem:[#allocation2 + $0xa4] sm:$0x1] }
 0x14d   : > { %3627 = vst.msk [vmem:[#allocation3 + $0x30] sm:$0xff] %vm7993_vm9, %v3585_v54  ;;  %v3962_v43 = vsel %vm6175_vm14, %v3957_v36, %v3961_v22  ;;  %v3966_v10 = vor.u32 %v3965_v49, %v3961_v22  ;;  %v1908_v40 = vshrl.u32 %v1583_v34, 16  ;;  %4458 = vrot.lane.b32.xlu0 %v5587_v2, %s5994_s16  ;;  %v1911_v33 = vshll.u32 %v1583_v34, 16  ;;  %v2131_v20 = vld [vmem:[#allocation2 + $0x9c] sm:$0xe]  ;;  %v3088_v34 = vpop.permute.xlu1 %3087 }
 0x14e   : > { %v4361_v11 = vsel %vm6148_vm13, %v4359_v55, %v4360_v47  ;;  %v1917_v52 = vshll.u32 %v1584_v28, 16  ;;  %v1921_v37 = vshrl.u32 %v1584_v28, 16  ;;  %v1927_v6 = vshll.u32 %v1585_v39, 16  ;;  %1541 = vst.msk [vmem:[#allocation3 + $0x68] sm:$0xff] %vm7991_vm15, %v5954_v61  ;;  %v2132_v45 = vld [vmem:[#allocation2 + $0xa0] sm:$0xf] }
 0x14f   : > { %v3967_v31 = vrot.slane %v3966_v10, 4  ;;  %v5588_v32 = vcombine.low %v4358_v3, %v4361_v11  ;;  %v1910_v42 = vrot.slane %v1908_v40, 4  ;;  %v1913_v13 = vrot.slane %v1911_v33, 5  ;;  %3129 = vst.msk [vmem:[#allocation3 + $0x38] sm:$0xff] %vm3121_vm5, %v3088_v34  ;;  %v2629_v29 = vld [vmem:[#allocation2 + $0x9c] sm:$0xf] }
 0x150   : > { %v1919_v48 = vrot.slane %v1917_v52, 5  ;;  %v1923_v19 = vrot.slane %v1921_v37, 4  ;;  %v5445_v9 = vrot.slane %v2128_v14, 9  ;;  %v5429_v8 = vcombine.low %v1896_v50, %v1906_v26  ;;  %v568_v10 = vld [vmem:[#allocation2 + $0xb0] sm:$0x1]  ;;  %v5939_v37 = vld [vmem:[#allocation2 + $0x9c] sm:$0xff]  }
 0x151   : > { %v3972_v15 = vsel %vm6175_vm14, %v3967_v31, %v3971_v62  ;;  %v2277_v44 = vrot.slane %v2129_v30, 5  ;;  %v2280_v51 = vrot.slane %v2130_v5, 5  ;;  %4460 = vrot.lane.b32.xlu0 %v5588_v32, %s5994_s16  ;;  %v1914_v7 = vor.u32 %v1913_v13, %v1910_v42  ;;  %v3409_v50 = vpop.permute.xlu1 %3408  ;;  %v1267_v5 = vld [vmem:[#allocation2 + $0xa8] sm:$0xf]  ;;  %v2631_v61 = vld [vmem:[#allocation2 + $0xa4] sm:$0x1] }
 0x152   : > { %v5556_v63 = vcombine.low %v3962_v43, %v3972_v15  ;;  %v1924_v41 = vor.u32 %v1923_v19, %v1919_v48  ;;  %v1929_v57 = vrot.slane %v1927_v6, 5  ;;  %v5446_v23 = vrot.slane %v2131_v20, 9  ;;  %v2630_v43 = vld [vmem:[#allocation2 + $0xa0] sm:$0xf]  ;;  %v4130_v33 = vpop.permute.xlu0 %4129  ;;  %v515_v6 = vld [vmem:[#allocation2 + $0xb4] sm:$0x1] }
 0x153   : > { %v2278_v60 = vsel %vm6148_vm13, %v5445_v9, %v2277_v44  ;;  %v2279_v2 = vrot.slane %v2277_v44, 4  ;;  %v2284_v59 = vrot.slane %v2132_v45, 5  ;;  %v1915_v36 = vrot.slane %v1914_v7, 4  ;;  %4172 = vst.msk [vmem:[#allocation3 + $0x30] sm:$0xff] %vm4165_vm11, %v4130_v33  ;;  %v3175_v19 = vld [vmem:[#allocation2 + $0xa0] sm:$0xf] }
 0x154   : > { %4139 = vrot.lane.b32.xlu1 %v5556_v63, %s5996_s18  ;;  %v1925_v22 = vrot.slane %v1924_v41, 4  ;;  %v1074_v49 = vshrl.u32 %v7187_v25, 16  ;;  %v1077_v47 = vshll.u32 %v7187_v25, 16  ;;  %v2287_v54 = vrot.slane %v2133_v35, 5 }
 0x155   : > { %v2281_v28 = vsel %vm6148_vm13, %v2279_v2, %v2280_v51  ;;  %v2286_v14 = vrot.slane %v2284_v59, 4  ;;  %v1082_v62 = vshrl.u32 %v7189_v56, 16  ;;  %v1920_v3 = vsel %vm6175_vm14, %v1915_v36, %v1919_v48  ;;  %v3174_v48 = vld [vmem:[#allocation2 + $0x9c] sm:$0xe]  ;;  %v3587_v9 = vpop.permute.xlu1 %3586  ;;  %v3176_v51 = vld [vmem:[#allocation2 + $0xa4] sm:$0x1] }
 0x156   : > { %v1930_v55 = vsel %vm6175_vm14, %v1925_v22, %v1929_v57  ;;  %v5461_v39 = vcombine.low %v2278_v60, %v2281_v28  ;;  %v1076_v30 = vrot.slane %v1074_v49, 7  ;;  %vm7994_vm9 = vcmask 392512   ;;  %v571_v57 = vld [vmem:[#allocation2 + $0xbc] sm:$0x1]  ;;  %v4451_v35 = vpop.permute.xlu0 %4450 }
 0x157   : > { %3450 = vst.msk [vmem:[#allocation3 + $0x38] sm:$0xff] %vm7994_vm9, %v3409_v50  ;;  %v2285_v25 = vsel %vm6148_vm13, %v5446_v23, %v2284_v59  ;;  %v7293_v26 = vrot.slane %v1082_v62, 7  ;;  %v1085_v40 = vshll.u32 %v7189_v56, 16  ;;  %v7298_v11 = vadd.f32 %v7149_v38, %v7253_v46 }
 0x158   : > { %2051 = vrot.lane.b32.xlu1 %v5429_v8, %s5990_s12  ;;  %v5430_v52 = vcombine.low %v1920_v3, %v1930_v55  ;;  %2375 = vrot.lane.b32.xlu0 %v5461_v39, %s5989_s11  ;;  %v1079_v31 = vor.u32 %v1077_v47, %v1076_v30  ;;  %v1080_v32 = vrot.slane %v1076_v30, 4  ;;  %v2930_v42 = vshrl.u32 %v2629_v29, 16  ;;  %4493 = vst.msk [vmem:[#allocation3 + $0x30] sm:$0xff] %vm4486_vm12, %v4451_v35 }
 0x159   : > { %v2288_v56 = vsel %vm6148_vm13, %v2286_v14, %v2287_v54  ;;  %v1087_v20 = vor.u32 %v1085_v40, %v7293_v26  ;;  %v2933_v46 = vshll.u32 %v2629_v29, 16  ;;  %v2939_v13 = vshll.u32 %v2630_v43, 16  ;;  %v518_v29 = vld [vmem:[#allocation2 + $0xc0] sm:$0x1] }
 0x15a   : > { %v1268_v45 = vsel %vm6089_vm8, %v1079_v31, %v1267_v5  ;;  %v2932_v15 = vrot.slane %v2930_v42, 4  ;;  %v2943_v8 = vshrl.u32 %v2630_v43, 16  ;;  %v2949_v44 = vshll.u32 %v2631_v61, 16 }
 0x15b   : > { %vm7995_vm15 = vcmask 458112   ;;  %v1088_v34 = vsel %vm6078_vm7, %v1080_v32, %v1087_v20  ;;  %1269 = vst [vmem:[#allocation2 + $0xa8] sm:$0xf] %v1268_v45  ;;  %v2935_v63 = vrot.slane %v2933_v46, 5  ;;  %v2941_v7 = vrot.slane %v2939_v13, 5 }
 0x15c   : > { %3628 = vst.msk [vmem:[#allocation3 + $0x38] sm:$0xff] %vm7995_vm15, %v3587_v9  ;;  %v569_v41 = vsel %vm6065_vm4, 0, %v568_v10  ;;  %2053 = vrot.lane.b32.xlu1 %v5430_v52, %s5990_s12  ;;  %v5462_v60 = vcombine.low %v2285_v25, %v2288_v56  ;;  %2552 = vrot.lane.b32.xlu0 %v5939_v37, %s5991_s13  ;;  %v2945_v2 = vrot.slane %v2943_v8, 4  ;;  %v5509_v23 = vrot.slane %v3174_v48, 9  ;;  %v4132_v10 = vpop.permute.xlu1 %4131 }
 0x15d   : > { %1270 = vst.msk [vmem:[#allocation2 + $0xac] sm:$0xf] %vm1173_vm6, %v1088_v34  ;;  %570 = vst [vmem:[#allocation2 + $0xb0] sm:$0x1] %v569_v41  ;;  %v3320_v59 = vrot.slane %v3175_v19, 5  ;;  %v2936_v36 = vor.u32 %v2935_v63, %v2932_v15  ;;  %v3323_v22 = vrot.slane %v3176_v51, 5 }
 0x15e   : > { %v516_v49 = vsel %vm6058_vm2, 0, %v515_v6  ;;  %v750_v47 = vmax.f32 %v7192_v17, 0.0  ;;  %v2946_v28 = vor.u32 %v2945_v2, %v2941_v7  ;;  %v2951_v14 = vrot.slane %v2949_v44, 5  ;;  %4173 = vst.msk [vmem:[#allocation3 + $0x38] sm:$0xff] %vm4165_vm11, %v4132_v10 }
 0x15f   : > { %v3322_v54 = vrot.slane %v3320_v59, 4  ;;  %517 = vst [vmem:[#allocation2 + $0xb4] sm:$0x1] %v516_v49  ;;  %v751_v62 = vmax.f32 %v7249_v12, 0.0  ;;  %v2937_v50 = vrot.slane %v2936_v36, 4  ;;  %v572_v55 = vsel %vm6065_vm4, 0, %v571_v57  ;;  %v4453_v12 = vpop.permute.xlu0 %4452 }
 0x160   : > { %v5681_v3 = vpack.c.bf16 %v750_v47, %v750_v47  ;;  %v519_v39 = vsel %vm6058_vm2, 0, %v518_v29  ;;  %2377 = vrot.lane.b32.xlu1 %v5462_v60, %s5989_s11  ;;  %v1089_v30 = vrot.slane %v7293_v26, 4  ;;  %v2947_v43 = vrot.slane %v2946_v28, 4  ;;  %573 = vst [vmem:[#allocation2 + $0xbc] sm:$0x1] %v572_v55  ;;  %4494 = vst.msk [vmem:[#allocation3 + $0x38] sm:$0xff] %vm4486_vm12, %v4453_v12  ;;  %v2044_v9 = vpop.permute.xlu1 %2043 }
 0x161   : > { %v3321_v17 = vsel %vm6148_vm13, %v5509_v23, %v3320_v59  ;;  %520 = vst [vmem:[#allocation2 + $0xc0] sm:$0x1] %v519_v39  ;;  %v2942_v25 = vsel %vm6175_vm14, %v2937_v50, %v2941_v7  ;;  %v3324_v40 = vsel %vm6148_vm13, %v3322_v54, %v3323_v22  ;;  %v752_v61 = vmax.f32 %v7298_v11, 0.0  ;;  %2084 = vst.msk [vmem:[#allocation3 + $0x40] sm:$0xff] %vm2075_vm0, %v2044_v9  ;;  %v4509_v29 = vld [vmem:[#allocation3 + $0x30] sm:$0xff] }
 0x162   : > { %v1091_v5 = vshrl.u32 %v5681_v3, 16  ;;  %v2952_v26 = vsel %vm6175_vm14, %v2947_v43, %v2951_v14  ;;  %v2632_v33 = vld [vmem:[#allocation2 + $0xa8] sm:$0xf]  ;;  %v5682_v37 = vpack.c.bf16 %v751_v62, %v751_v62  ;;  %v5525_v13 = vcombine.low %v3321_v17, %v3324_v40  ;;  %5839 = vmatprep.mubr.msk.bf16.mxu0 %vm4555_vm10, %v4509_v29 }
 0x163   : > { %v7337_v52 = vld [vmem:[#allocation2 + $0xa8] sm:$0xe]  ;;  %v5493_v32 = vcombine.low %v2942_v25, %v2952_v26  ;;  %v2954_v6 = vshrl.u32 %v2632_v33, 16  ;;  %v2957_v46 = vshll.u32 %v2632_v33, 16  ;;  %v1094_v19 = vshll.u32 %v5681_v3, 16  ;;  %v2368_v59 = vpop.permute.xlu0 %2367 }
 0x164   : > { %v5940_v31 = vld [vmem:[#allocation2 + $0xa8] sm:$0xff]   ;;  %v1271_v42 = vld [vmem:[#allocation2 + $0xb0] sm:$0x1]  ;;  %v5510_v34 = vrot.slane %v7337_v52, 9  ;;  %v1093_v63 = vrot.slane %v1091_v5, 7  ;;  %v1099_v7 = vshrl.u32 %v5682_v37, 16  ;;  %v5780_v23 = vunpack.c.h.bf16 %v7212_v58  ;;  %v2046_v54 = vpop.permute.xlu1 %2045 }
 0x165   : > { %v1272_v56 = vsel %vm6058_vm2, %v1089_v30, %v1271_v42  ;;  %v2633_v20 = vld [vmem:[#allocation2 + $0xac] sm:$0xf]  ;;  %2554 = vrot.lane.b32.xlu1 %v5940_v31, %s5991_s13  ;;  %3097 = vrot.lane.b32.xlu0 %v5493_v32, %s5995_s17  ;;  %v2956_v45 = vrot.slane %v2954_v6, 4  ;;  %v2959_v51 = vrot.slane %v2957_v46, 5  ;;  %v3673_v28 = vld [vmem:[#allocation2 + $0xa8] sm:$0xf] }
 0x166   : > { %v3178_v48 = vld [vmem:[#allocation2 + $0xac] sm:$0xf]  ;;  %1273 = vst [vmem:[#allocation2 + $0xb0] sm:$0x1] %v1272_v56  ;;  %v2963_v15 = vshll.u32 %v2633_v20, 16  ;;  %v2967_v8 = vshrl.u32 %v2633_v20, 16  ;;  %v1096_v22 = vor.u32 %v1094_v19, %v1093_v63 }
 0x167   : > { %v3327_v44 = vrot.slane %v3178_v48, 5  ;;  %v5943_v60 = vld [vmem:[#allocation2 + $0xa8] sm:$0xff]   ;;  %v1274_v2 = vld [vmem:[#allocation2 + $0xb4] sm:$0xf]  ;;  %v2960_v36 = vor.u32 %v2959_v51, %v2956_v45  ;;  %v1097_v49 = vrot.slane %v1093_v63, 4  ;;  %v1101_v47 = vrot.slane %v1099_v7, 7  ;;  %v2545_v52 = vpop.permute.xlu0 %2544 }
 0x168   : > { %v7346_v41 = vrot.slane %v2963_v15, 5  ;;  %v2969_v57 = vrot.slane %v2967_v8, 4  ;;  %v3674_v14 = vld [vmem:[#allocation2 + $0xac] sm:$0xf]  ;;  %2408 = vst.msk [vmem:[#allocation3 + $0x40] sm:$0xff] %vm2399_vm1, %v2368_v59  ;;  %v1102_v50 = vshll.u32 %v5682_v37, 16  ;;  %v1275_v17 = vsel %vm6089_vm8, %v1096_v22, %v1274_v2  ;;  %v2370_v46 = vpop.permute.xlu1 %2369 }
 0x169   : > { %v3329_v35 = vrot.slane %v3327_v44, 4  ;;  %3418 = vrot.lane.b32.xlu0 %v5525_v13, %s5993_s15  ;;  %v3974_v3 = vshrl.u32 %v3673_v28, 16  ;;  %v3977_v58 = vshll.u32 %v3673_v28, 16  ;;  %v1278_v55 = vld [vmem:[#allocation2 + $0xbc] sm:$0x1]  ;;  %2085 = vst.msk [vmem:[#allocation3 + $0x48] sm:$0xff] %vm2075_vm0, %v2046_v54  ;;  %v7359_v32 = vsel %vm6148_vm13, %v5510_v34, %v3327_v44 }
 0x16a   : > { %v2970_v62 = vor.u32 %v2969_v57, %v7346_v41  ;;  %v4510_v39 = vld [vmem:[#allocation3 + $0x38] sm:$0xff]  ;;  %v2961_v30 = vrot.slane %v2960_v36, 4  ;;  %v1106_v43 = vrot.slane %v1101_v47, 4  ;;  %v3983_v10 = vshll.u32 %v3674_v14, 16  ;;  %v4218_v12 = vld [vmem:[#allocation2 + $0xa8] sm:$0xe] }
 0x16b   : > { %5840 = vmatmul.mubr.msk.bf16.gmra.mrb[12].mxu0 %vm4555_vm10, %v4510_v39  ;;  %v1104_v40 = vor.u32 %v1102_v50, %v1101_v47  ;;  %1276 = vst [vmem:[#allocation2 + $0xb4] sm:$0xf] %v1275_v17  ;;  %v3976_v5 = vrot.slane %v3974_v3, 4  ;;  %v3979_v26 = vrot.slane %v3977_v58, 5  ;;  %v4219_v33 = vld [vmem:[#allocation2 + $0xac] sm:$0xf] }
 0x16c   : > { %v2971_v25 = vrot.slane %v2970_v62, 4  ;;  %v1279_v6 = vsel %vm6058_vm2, %v1106_v43, %v1278_v55  ;;  %v5963_v56 = vld [vmem:[%s7968_s4] ss:$0 sm:$0xff]  ;;  %2585 = vst.msk [vmem:[#allocation3 + $0x40] sm:$0xff] %vm2576_vm3, %v2545_v52  ;;  %v3985_v15 = vrot.slane %v3983_v10, 5  ;;  %v3987_v8 = vshrl.u32 %v3674_v14, 16 }
 0x16d   : > { %v2634_v37 = vld [vmem:[#allocation2 + $0xb0] sm:$0x1]  ;;  %v682_v20 = vmul.f32 %v5963_v56, %v5780_v23  ;;  %3596 = vrot.lane.b32.xlu0 %v5943_v60, %s5992_s14  ;;  %v1105_v19 = vsel %vm6078_vm7, %v1097_v49, %v1104_v40  ;;  %v3980_v9 = vor.u32 %v3979_v26, %v3976_v5  ;;  %1280 = vst [vmem:[#allocation2 + $0xbc] sm:$0x1] %v1279_v6  ;;  %2409 = vst.msk [vmem:[#allocation3 + $0x48] sm:$0xff] %vm2399_vm1, %v2370_v46  ;;  %v3090_v39 = vpop.permute.xlu0 %3089  ;;  %v5955_v40 = vld [vmem:[#allocation2 + $0xa8] sm:$0xff]  }
 0x16e   : > { %v3179_v31 = vld [vmem:[#allocation2 + $0xb0] sm:$0x1]  ;;  %v2973_v13 = vshll.u32 %v2634_v37, 16  ;;  %1277 = vst.msk [vmem:[#allocation2 + $0xb8] sm:$0xf] %vm1173_vm6, %v1105_v19  ;;  %v5573_v51 = vrot.slane %v4218_v12, 9  ;;  %v2966_v34 = vsel %vm6175_vm14, %v2961_v30, %v7346_v41  ;;  %v7400_v37 = vpack.c.bf16 %v752_v61, %v752_v61 }
 0x16f   : > { %v3675_v42 = vld [vmem:[#allocation2 + $0xb0] sm:$0x1]  ;;  %v3330_v48 = vrot.slane %v3179_v31, 5  ;;  %v4364_v57 = vrot.slane %v4219_v33, 5  ;;  %v1586_v60 = vld [vmem:[#allocation2 + $0xa8] sm:$0xf]  ;;  %v7395_v52 = vadd.f32 %v7149_v38, %v682_v20 }
 0x170   : > { %v4220_v45 = vld [vmem:[#allocation2 + $0xb0] sm:$0x1]  ;;  %v3993_v44 = vshll.u32 %v3675_v42, 16  ;;  %v2975_v63 = vrot.slane %v2973_v13, 5  ;;  %v3981_v23 = vrot.slane %v3980_v9, 4  ;;  %v3989_v59 = vrot.slane %v3987_v8, 4 }
 0x171   : > { %v3331_v7 = vsel %vm6148_vm13, %v3329_v35, %v3330_v48  ;;  %v4367_v29 = vrot.slane %v4220_v45, 5  ;;  %v1587_v36 = vld [vmem:[#allocation2 + $0xac] sm:$0xf]  ;;  %v7382_v47 = vsel %vm6148_vm13, %v5573_v51, %v4364_v57  ;;  %v4366_v41 = vrot.slane %v4364_v57, 4  ;;  %v1588_v10 = vld [vmem:[#allocation2 + $0xb0] sm:$0x1] }
 0x172   : > { %v5526_v2 = vcombine.low %v7359_v32, %v3331_v7  ;;  %v2976_v22 = vsel %vm6175_vm14, %v2971_v25, %v2975_v63  ;;  %v3995_v49 = vrot.slane %v3993_v44, 5  ;;  %v3990_v14 = vor.u32 %v3989_v59, %v3985_v15  ;;  %v3676_v35 = vld [vmem:[#allocation2 + $0xb4] sm:$0xf]  ;;  %3130 = vst.msk [vmem:[#allocation3 + $0x40] sm:$0xff] %vm3121_vm5, %v3090_v39 }
 0x173   : > { %v5494_v28 = vcombine.low %v2966_v34, %v2976_v22  ;;  %v1932_v54 = vshrl.u32 %v1586_v60, 16  ;;  %v1935_v62 = vshll.u32 %v1586_v60, 16  ;;  %v3998_v50 = vshrl.u32 %v3676_v35, 16  ;;  %v4221_v46 = vld [vmem:[#allocation2 + $0xb4] sm:$0xe]  ;;  %v3411_v11 = vpop.permute.xlu0 %3410 }
 0x174   : > { %v4001_v3 = vshll.u32 %v3676_v35, 16  ;;  %v7386_v58 = vsel %vm6148_vm13, %v4366_v41, %v4367_v29  ;;  %v1941_v55 = vshll.u32 %v1587_v36, 16  ;;  %v3986_v30 = vsel %vm6175_vm14, %v3981_v23, %v3985_v15  ;;  %v3678_v17 = vld [vmem:[#allocation2 + $0xbc] sm:$0x1]  ;;  %v1589_v44 = vld [vmem:[#allocation2 + $0xb4] sm:$0xf]  ;;  %v2547_v51 = vpop.permute.xlu1 %2546 }
 0x175   : > { %3099 = vrot.lane.b32.xlu1 %v5494_v28, %s5995_s17  ;;  %v3991_v43 = vrot.slane %v3990_v14, 4  ;;  %v1934_v12 = vrot.slane %v1932_v54, 4  ;;  %v1937_v25 = vrot.slane %v1935_v62, 5  ;;  %v3677_v5 = vld [vmem:[#allocation2 + $0xb8] sm:$0xf]  ;;  %v4000_v26 = vrot.slane %v3998_v50, 4 }
 0x176   : > { %v5589_v33 = vcombine.low %v7382_v47, %v7386_v58  ;;  %v5944_v31 = vld [vmem:[#allocation2 + $0xb4] sm:$0xff]   ;;  %v4003_v42 = vrot.slane %v4001_v3, 5  ;;  %v4007_v6 = vshll.u32 %v3677_v5, 16  ;;  %v4011_v56 = vshrl.u32 %v3677_v5, 16  ;;  %v4223_v9 = vld [vmem:[#allocation2 + $0xbc] sm:$0x1] }
 0x177   : > { %v3996_v32 = vsel %vm6175_vm14, %v3991_v43, %v3995_v49  ;;  %vm7996_vm9 = vcmask 64512   ;;  %v4017_v48 = vshll.u32 %v3678_v17, 16  ;;  %v1938_v19 = vor.u32 %v1937_v25, %v1934_v12  ;;  %v4222_v20 = vld [vmem:[#allocation2 + $0xb8] sm:$0xf]  ;;  %2586 = vst.msk [vmem:[#allocation3 + $0x48] sm:$0xff] %vm2576_vm3, %v2547_v51  ;;  %v3589_v14 = vpop.permute.xlu0 %3588 }
 0x178   : > { %1542 = vst.msk [vmem:[#allocation3 + $0x70] sm:$0xff] %vm7996_vm9, %v5955_v40  ;;  %v5557_v13 = vcombine.low %v3986_v30, %v3996_v32  ;;  %v1943_v38 = vrot.slane %v1941_v55, 5  ;;  %v4004_v61 = vor.u32 %v4003_v42, %v4000_v26  ;;  %v4009_v45 = vrot.slane %v4007_v6, 5  ;;  %v5956_v34 = vld [vmem:[#allocation2 + $0xb4] sm:$0xff]   ;;  %v1591_v41 = vld [vmem:[#allocation2 + $0xbc] sm:$0x1] }
 0x179   : > { %3420 = vrot.lane.b32.xlu1 %v5526_v2, %s5993_s15  ;;  %v4013_v15 = vrot.slane %v4011_v56, 4  ;;  %v1945_v8 = vshrl.u32 %v1587_v36, 16  ;;  %vm7997_vm15 = vcmask 392512   ;;  %v4019_v63 = vrot.slane %v4017_v48, 5  ;;  %v1590_v22 = vld [vmem:[#allocation2 + $0xb8] sm:$0xf] }
 0x17a   : > { %3451 = vst.msk [vmem:[#allocation3 + $0x40] sm:$0xff] %vm7997_vm15, %v3411_v11  ;;  %4141 = vrot.lane.b32.xlu0 %v5557_v13, %s5996_s18  ;;  %v1939_v7 = vrot.slane %v1938_v19, 4  ;;  %v1951_v57 = vshll.u32 %v1588_v10, 16  ;;  %v5574_v60 = vrot.slane %v4221_v46, 9  ;;  %v4005_v23 = vrot.slane %v4004_v61, 4 }
 0x17b   : > { %v4014_v59 = vor.u32 %v4013_v15, %v4009_v45  ;;  %v1947_v2 = vrot.slane %v1945_v8, 4  ;;  %v4371_v29 = vrot.slane %v4222_v20, 5  ;;  %1543 = vst.msk [vmem:[#allocation3 + $0x78] sm:$0xff] %vm7996_vm9, %v5956_v34  ;;  %v4374_v47 = vrot.slane %v4223_v9, 5  ;;  %v2134_v3 = vld [vmem:[#allocation2 + $0xa8] sm:$0xe] }
 0x17c   : > { %v1944_v36 = vsel %vm6175_vm14, %v1939_v7, %v1943_v38  ;;  %v1953_v49 = vrot.slane %v1951_v57, 5  ;;  %v1956_v28 = vshrl.u32 %v1589_v44, 16  ;;  %v4010_v35 = vsel %vm6175_vm14, %v4005_v23, %v4009_v45  ;;  %v2135_v58 = vld [vmem:[#allocation2 + $0xac] sm:$0xf]  ;;  %v2136_v40 = vld [vmem:[#allocation2 + $0xb0] sm:$0x1] }
 0x17d   : > { %3598 = vrot.lane.b32.xlu1 %v5944_v31, %s5992_s14  ;;  %v4015_v54 = vrot.slane %v4014_v59, 4  ;;  %v1948_v62 = vor.u32 %v1947_v2, %v1943_v38  ;;  %v4372_v50 = vsel %vm6148_vm13, %v5574_v60, %v4371_v29  ;;  %vm7998_vm15 = vcmask 458112   ;;  %v2137_v42 = vld [vmem:[#allocation2 + $0xb4] sm:$0xe]  ;;  %v2138_v6 = vld [vmem:[#allocation2 + $0xb8] sm:$0xf] }
 0x17e   : > { %3629 = vst.msk [vmem:[#allocation3 + $0x40] sm:$0xff] %vm7998_vm15, %v3589_v14  ;;  %4462 = vrot.lane.b32.xlu0 %v5589_v33, %s5994_s16  ;;  %v4373_v55 = vrot.slane %v4371_v29, 4  ;;  %v1958_v39 = vrot.slane %v1956_v28, 4  ;;  %v1959_v30 = vshll.u32 %v1589_v44, 16  ;;  %v1965_v43 = vshll.u32 %v1590_v22, 16  ;;  %v5945_v28 = vld [vmem:[#allocation2 + $0xb4] sm:$0xff]  }
 0x17f   : > { %v4020_v17 = vsel %vm6175_vm14, %v4015_v54, %v4019_v63  ;;  %v1949_v10 = vrot.slane %v1948_v62, 4  ;;  %v1969_v12 = vshrl.u32 %v1590_v22, 16  ;;  %v1975_v25 = vshll.u32 %v1591_v41, 16  ;;  %v2139_v48 = vld [vmem:[#allocation2 + $0xbc] sm:$0x1] }
 0x180   : > { %v5558_v5 = vcombine.low %v4010_v35, %v4020_v17  ;;  %v4375_v26 = vsel %vm6148_vm13, %v4373_v55, %v4374_v47  ;;  %v1961_v31 = vrot.slane %v1959_v30, 5  ;;  %v1967_v32 = vrot.slane %v1965_v43, 5  ;;  %v2635_v8 = vld [vmem:[#allocation2 + $0xb4] sm:$0xf]  ;;  %v574_v35 = vld [vmem:[#allocation2 + $0xc8] sm:$0x1] }
 0x181   : > { %v1954_v33 = vsel %vm6175_vm14, %v1949_v10, %v1953_v49  ;;  %v5590_v56 = vcombine.low %v4372_v50, %v4375_v26  ;;  %v1971_v46 = vrot.slane %v1969_v12, 4  ;;  %v1977_v13 = vrot.slane %v1975_v25, 5  ;;  %v3092_v44 = vpop.permute.xlu1 %3091  ;;  %v2636_v49 = vld [vmem:[#allocation2 + $0xb8] sm:$0xf]  ;;  %v2637_v55 = vld [vmem:[#allocation2 + $0xbc] sm:$0x1] }
 0x182   : > { %4143 = vrot.lane.b32.xlu1 %v5558_v5, %s5996_s18  ;;  %v5431_v19 = vcombine.low %v1944_v36, %v1954_v33  ;;  %v1962_v38 = vor.u32 %v1961_v31, %v1958_v39  ;;  %v5447_v20 = vrot.slane %v2134_v3, 9  ;;  %v2291_v9 = vrot.slane %v2135_v58, 5  ;;  %3131 = vst.msk [vmem:[#allocation3 + $0x48] sm:$0xff] %vm3121_vm5, %v3092_v44  ;;  %v1281_v58 = vld [vmem:[#allocation2 + $0xc0] sm:$0xf] }
 0x183   : > { %4464 = vrot.lane.b32.xlu0 %v5590_v56, %s5994_s16  ;;  %v1972_v11 = vor.u32 %v1971_v46, %v1967_v32  ;;  %v2294_v61 = vrot.slane %v2136_v40, 5  ;;  %v5448_v45 = vrot.slane %v2137_v42, 9  ;;  %v2298_v15 = vrot.slane %v2138_v6, 5  ;;  %v3180_v10 = vld [vmem:[#allocation2 + $0xb4] sm:$0xe] }
 0x184   : > { %v1963_v51 = vrot.slane %v1962_v38, 4  ;;  %v2292_v34 = vsel %vm6148_vm13, %v5447_v20, %v2291_v9  ;;  %v2293_v63 = vrot.slane %v2291_v9, 4  ;;  %v2301_v7 = vrot.slane %v2139_v48, 5  ;;  %v521_v12 = vld [vmem:[#allocation2 + $0xcc] sm:$0x1] }
 0x185   : > { %v1973_v57 = vrot.slane %v1972_v11, 4  ;;  %v2299_v60 = vsel %vm6148_vm13, %v5448_v45, %v2298_v15  ;;  %v2300_v23 = vrot.slane %v2298_v15, 4  ;;  %v753_v59 = vmax.f32 %v7395_v52, 0.0  ;;  %v3413_v54 = vpop.permute.xlu1 %3412  ;;  %v3181_v31 = vld [vmem:[#allocation2 + $0xb8] sm:$0xf] }
 0x186   : > { %2055 = vrot.lane.b32.xlu1 %v5431_v19, %s5990_s12  ;;  %v1968_v2 = vsel %vm6175_vm14, %v1963_v51, %v1967_v32  ;;  %v2295_v29 = vsel %vm6148_vm13, %v2293_v63, %v2294_v61  ;;  %v1108_v22 = vshrl.u32 %v7400_v37, 16  ;;  %v1111_v36 = vshll.u32 %v7400_v37, 16  ;;  %v3182_v56 = vld [vmem:[#allocation2 + $0xbc] sm:$0x1]  ;;  %v577_v19 = vld [vmem:[#allocation2 + $0xd4] sm:$0x1] }
 0x187   : > { %v1978_v47 = vsel %vm6175_vm14, %v1973_v57, %v1977_v13  ;;  %v5463_v41 = vcombine.low %v2292_v34, %v2295_v29  ;;  %v2302_v52 = vsel %vm6148_vm13, %v2300_v23, %v2301_v7  ;;  %v5684_v14 = vpack.c.bf16 %v753_v59, %v753_v59  ;;  %v3683_v38 = vld [vmem:[#allocation2 + $0xd0] sm:$0xf] }
 0x188   : > { %v5432_v62 = vcombine.low %v1968_v2, %v1978_v47  ;;  %v5464_v50 = vcombine.low %v2299_v60, %v2302_v52  ;;  %v1110_v3 = vrot.slane %v1108_v22, 7  ;;  %v2978_v39 = vshrl.u32 %v2635_v8, 16 }
 0x189   : > { %vm7999_vm9 = vcmask 392512   ;;  %2379 = vrot.lane.b32.xlu0 %v5463_v41, %s5989_s11  ;;  %v1116_v37 = vshrl.u32 %v5684_v14, 16  ;;  %v1119_v30 = vshll.u32 %v5684_v14, 16  ;;  %v2981_v43 = vshll.u32 %v2635_v8, 16  ;;  %v3591_v45 = vpop.permute.xlu1 %3590 }
 0x18a   : > { %3452 = vst.msk [vmem:[#allocation3 + $0x48] sm:$0xff] %vm7999_vm9, %v3413_v54  ;;  %v2987_v17 = vshll.u32 %v2636_v49, 16  ;;  %2057 = vrot.lane.b32.xlu1 %v5432_v62, %s5990_s12  ;;  %v1113_v25 = vor.u32 %v1111_v36, %v1110_v3  ;;  %v1114_v40 = vrot.slane %v1110_v3, 4  ;;  %v2980_v5 = vrot.slane %v2978_v39, 4  ;;  %v4134_v15 = vpop.permute.xlu0 %4133 }
 0x18b   : > { %v2991_v26 = vshrl.u32 %v2636_v49, 16  ;;  %v1118_v32 = vrot.slane %v1116_v37, 7  ;;  %v2983_v42 = vrot.slane %v2981_v43, 5  ;;  %v2997_v33 = vshll.u32 %v2637_v55, 16  ;;  %3630 = vst.msk [vmem:[#allocation3 + $0x48] sm:$0xff] %vm7998_vm15, %v3591_v45 }
 0x18c   : > { %v2989_v6 = vrot.slane %v2987_v17, 5  ;;  %v1282_v46 = vsel %vm6089_vm8, %v1113_v25, %v1281_v58  ;;  %v575_v48 = vsel %vm6065_vm4, 0, %v574_v35  ;;  %v5511_v61 = vrot.slane %v3180_v10, 9  ;;  %4174 = vst.msk [vmem:[#allocation3 + $0x40] sm:$0xff] %vm4165_vm11, %v4134_v15 }
 0x18d   : > { %v2993_v13 = vrot.slane %v2991_v26, 4  ;;  %2556 = vrot.lane.b32.xlu0 %v5945_v28, %s5991_s13  ;;  %v1121_v20 = vor.u32 %v1119_v30, %v1118_v32  ;;  %1283 = vst [vmem:[#allocation2 + $0xc0] sm:$0xf] %v1282_v46  ;;  %v2984_v9 = vor.u32 %v2983_v42, %v2980_v5  ;;  %v2999_v11 = vrot.slane %v2997_v33, 5  ;;  %576 = vst [vmem:[#allocation2 + $0xc8] sm:$0x1] %v575_v48 }
 0x18e   : > { %2381 = vrot.lane.b32.xlu1 %v5464_v50, %s5989_s11  ;;  %v3334_v44 = vrot.slane %v3181_v31, 5  ;;  %v3337_v51 = vrot.slane %v3182_v56, 5  ;;  %v522_v34 = vsel %vm6058_vm2, 0, %v521_v12  ;;  %v578_v57 = vsel %vm6065_vm4, 0, %v577_v19  ;;  %v4455_v36 = vpop.permute.xlu0 %4454  ;;  %vm8001_vm4 = vmmov %vm7998_vm15 }
 0x18f   : > { %v2994_v8 = vor.u32 %v2993_v13, %v2989_v6  ;;  %v1122_v63 = vsel %vm6078_vm7, %v1114_v40, %v1121_v20  ;;  %v2985_v7 = vrot.slane %v2984_v9, 4  ;;  %523 = vst [vmem:[#allocation2 + $0xcc] sm:$0x1] %v522_v34  ;;  %v4055_v60 = vshll.u32 %v3683_v38, 16  ;;  %579 = vst [vmem:[#allocation2 + $0xd4] sm:$0x1] %v578_v57 }
 0x190   : > { %1284 = vst.msk [vmem:[#allocation2 + $0xc4] sm:$0xf] %vm1173_vm6, %v1122_v63  ;;  %v3336_v59 = vrot.slane %v3334_v44, 4  ;;  %v4059_v2 = vshrl.u32 %v3683_v38, 16  ;;  %v1123_v29 = vrot.slane %v1118_v32, 4  ;;  %v3335_v49 = vsel %vm6148_vm13, %v5511_v61, %v3334_v44  ;;  %vm8007_vm15 = vmmov %vm8001_vm4 }
 0x191   : > { %v2995_v23 = vrot.slane %v2994_v8, 4  ;;  %v2990_v22 = vsel %vm6175_vm14, %v2985_v7, %v2989_v6  ;;  %4495 = vst.msk [vmem:[#allocation3 + $0x40] sm:$0xff] %vm4486_vm12, %v4455_v36  ;;  %v7471_v41 = vrot.slane %v4055_v60, 5 }
 0x192   : > { %v3338_v4 = vsel %vm6148_vm13, %v3336_v59, %v3337_v51  ;;  %v7473_v52 = vrot.slane %v4059_v2, 4 }
 0x193   : > { %v3000_v16 = vsel %vm6175_vm14, %v2995_v23, %v2999_v11  ;;  %v5527_v50 = vcombine.low %v3335_v49, %v3338_v4  ;;  %v4457_v39 = vpop.permute.xlu0 %4456 }
 0x194   : > { %v5495_v47 = vcombine.low %v2990_v22, %v3000_v16  ;;  %v1285_v28 = vld [vmem:[#allocation2 + $0xc8] sm:$0x1]  ;;  %v2638_v14 = vld [vmem:[#allocation2 + $0xc0] sm:$0xf]  ;;  %v4062_v63 = vor.u32 %v7473_v52, %v7471_v41  ;;  %v7498_v16 = vld [vmem:[#allocation2 + $0xd0] sm:$0xf] }
 0x195   : > { %v1286_v35 = vsel %vm6058_vm2, %v1123_v29, %v1285_v28  ;;  %v3002_v54 = vshrl.u32 %v2638_v14, 16  ;;  %v3005_v62 = vshll.u32 %v2638_v14, 16  ;;  %v7478_v3 = vld [vmem:[#allocation2 + $0xc0] sm:$0xe]  ;;  %v4136_v10 = vpop.permute.xlu1 %4135 }
 0x196   : > { %3101 = vrot.lane.b32.xlu0 %v5495_v47, %s5995_s17  ;;  %1287 = vst [vmem:[#allocation2 + $0xc8] sm:$0x1] %v1286_v35  ;;  %v1392_v58 = vld [vmem:[#allocation2 + $0xcc] sm:$0xf]  ;;  %v3679_v55 = vld [vmem:[#allocation2 + $0xc0] sm:$0xf] }
 0x197   : > { %v5946_v37 = vld [vmem:[#allocation2 + $0xc0] sm:$0xff]   ;;  %v3004_v43 = vrot.slane %v3002_v54, 4  ;;  %v1393_v17 = vsel %vm6089_vm8, %v6107_v24, %v1392_v58  ;;  %v3007_v12 = vrot.slane %v3005_v62, 5  ;;  %4175 = vst.msk [vmem:[#allocation3 + $0x48] sm:$0xff] %vm4165_vm11, %v4136_v10  ;;  %v4022_v42 = vshrl.u32 %v3679_v55, 16  ;;  %vm8003_vm8 = vmmov %vm8001_vm4 }
 0x198   : > { %v2639_v30 = vld [vmem:[#allocation2 + $0xc4] sm:$0xf]  ;;  %1394 = vst [vmem:[#allocation2 + $0xcc] sm:$0xf] %v1393_v17  ;;  %2558 = vrot.lane.b32.xlu1 %v5946_v37, %s5991_s13  ;;  %4496 = vst.msk [vmem:[#allocation3 + $0x48] sm:$0xff] %vm4486_vm12, %v4457_v39  ;;  %v4025_v33 = vshll.u32 %v3679_v55, 16  ;;  %s7564_s13 = scalar_lea.vmem %s7970_s6, %s5648_s26 }
 0x199   : > { %v3011_v25 = vshll.u32 %v2639_v30, 16  ;;  %v3015_v40 = vshrl.u32 %v2639_v30, 16  ;;  %v3184_v5 = vld [vmem:[#allocation2 + $0xc4] sm:$0xf]  ;;  %v3008_v21 = vor.u32 %v3007_v12, %v3004_v43  ;;  %v1396_v56 = vld [vmem:[#allocation2 + $0xd4] sm:$0x1]  ;;  %v2048_v38 = vpop.permute.xlu1 %2047  ;;  %v2372_v15 = vpop.permute.xlu0 %2371 }
 0x19a   : > { %v5949_v26 = vld [vmem:[#allocation2 + $0xc0] sm:$0xff]   ;;  %3422 = vrot.lane.b32.xlu0 %v5527_v50, %s5993_s15  ;;  %v3341_v31 = vrot.slane %v3184_v5, 5  ;;  %v4511_v46 = vld [vmem:[#allocation3 + $0x40] sm:$0xff]  ;;  %v5512_v13 = vrot.slane %v7478_v3, 9  ;;  %v4024_v48 = vrot.slane %v4022_v42, 4  ;;  %v4027_v11 = vrot.slane %v4025_v33, 5 }
 0x19b   : > { %v3680_v32 = vld [vmem:[#allocation2 + $0xc4] sm:$0xf]  ;;  %v3013_v24 = vrot.slane %v3011_v25, 5  ;;  %v3017_v6 = vrot.slane %v3015_v40, 4  ;;  %5843 = vmatprep.mubr.msk.bf16.mxu1 %vm4555_vm10, %v4511_v46  ;;  %v3009_v20 = vrot.slane %v3008_v21, 4  ;;  %2086 = vst.msk [vmem:[#allocation3 + $0x50] sm:$0xff] %vm2075_vm0, %v2048_v38  ;;  %v1397_v34 = vsel %vm6058_vm2, %v1355_v27, %v1396_v56  ;;  %vm8000_vm2 = vmmov %vm7999_vm9 }
 0x19c   : > { %v4031_v19 = vshll.u32 %v3680_v32, 16  ;;  %v4035_v61 = vshrl.u32 %v3680_v32, 16  ;;  %v4225_v45 = vld [vmem:[#allocation2 + $0xc4] sm:$0xf]  ;;  %2410 = vst.msk [vmem:[#allocation3 + $0x50] sm:$0xff] %vm2399_vm1, %v2372_v15  ;;  %v3343_v60 = vrot.slane %v3341_v31, 4  ;;  %v4028_v2 = vor.u32 %v4027_v11, %v4024_v48  ;;  %vm8002_vm7 = vmmov %vm8000_vm2 }
 0x19d   : > { %v3018_v9 = vor.u32 %v3017_v6, %v3013_v24  ;;  %v2640_v8 = vld [vmem:[#allocation2 + $0xc8] sm:$0x1]  ;;  %1398 = vst [vmem:[#allocation2 + $0xd4] sm:$0x1] %v1397_v34  ;;  %v4224_v59 = vld [vmem:[#allocation2 + $0xc0] sm:$0xe]  ;;  %v2050_v18 = vpop.permute.xlu1 %2049  ;;  %v3014_v1 = vsel %vm6175_vm14, %v3009_v20, %v3013_v24  ;;  %v3342_v49 = vsel %vm6148_vm13, %v5512_v13, %v3341_v31  ;;  %v2549_v52 = vpop.permute.xlu0 %2548  ;;  %vm8006_vm9 = vmmov %vm8000_vm2 }
 0x19e   : > { %v3185_v44 = vld [vmem:[#allocation2 + $0xc8] sm:$0x1]  ;;  %3600 = vrot.lane.b32.xlu0 %v5949_v26, %s5992_s14  ;;  %v3021_v57 = vshll.u32 %v2640_v8, 16  ;;  %v4033_v29 = vrot.slane %v4031_v19, 5  ;;  %v4037_v22 = vrot.slane %v4035_v61, 4  ;;  %v4378_v47 = vrot.slane %v4225_v45, 5 }
 0x19f   : > { %v3681_v51 = vld [vmem:[#allocation2 + $0xc8] sm:$0x1]  ;;  %v3019_v7 = vrot.slane %v3018_v9, 4  ;;  %v3344_v23 = vrot.slane %v3185_v44, 5  ;;  %v3682_v4 = vld [vmem:[#allocation2 + $0xcc] sm:$0xf] }
 0x1a0   : > { %v4041_v36 = vshll.u32 %v3681_v51, 16  ;;  %v3023_v27 = vrot.slane %v3021_v57, 5  ;;  %2087 = vst.msk [vmem:[#allocation3 + $0x58] sm:$0xff] %vm2075_vm0, %v2050_v18  ;;  %v4512_v28 = vld [vmem:[#allocation3 + $0x48] sm:$0xff]  ;;  %v4029_v14 = vrot.slane %v4028_v2, 4  ;;  %v4038_v35 = vor.u32 %v4037_v22, %v4033_v29  ;;  %v5950_v9 = vld [vmem:[#allocation2 + $0xcc] sm:$0xff]  }
 0x1a1   : > { %v4226_v62 = vld [vmem:[#allocation2 + $0xc8] sm:$0x1]  ;;  %v5575_v50 = vrot.slane %v4224_v59, 9  ;;  %2587 = vst.msk [vmem:[#allocation3 + $0x50] sm:$0xff] %vm2576_vm3, %v2549_v52  ;;  %5844 = vmatmul.mubr.msk.bf16.vlgmr.msra.gmra.mrb[0].mxu1 %vm4555_vm10, %v4512_v28  ;;  %v3345_v58 = vsel %vm6148_vm13, %v3343_v60, %v3344_v23  ;;  %v4046_v55 = vshrl.u32 %v3682_v4, 16  ;;  %v4049_v39 = vshll.u32 %v3682_v4, 16  ;;  %v2374_v10 = vpop.permute.xlu1 %2373 }
 0x1a2   : > { %v4043_v54 = vrot.slane %v4041_v36, 5  ;;  %v3024_v3 = vsel %vm6175_vm14, %v3019_v7, %v3023_v27  ;;  %v4034_v30 = vsel %vm6175_vm14, %v4029_v14, %v4033_v29  ;;  %v4039_v43 = vrot.slane %v4038_v35, 4  ;;  %2411 = vst.msk [vmem:[#allocation3 + $0x58] sm:$0xff] %vm2399_vm1, %v2374_v10  ;;  %v4227_v46 = vld [vmem:[#allocation2 + $0xcc] sm:$0xe]  ;;  %s5360_s26 = sshll.u32 %s8077_s24, 1 }
 0x1a3   : > { %v5496_v37 = vcombine.low %v3014_v1, %v3024_v3  ;;  %v4380_v17 = vrot.slane %v4378_v47, 4  ;;  %v4048_v12 = vrot.slane %v4046_v55, 4  ;;  %v4051_v25 = vrot.slane %v4049_v39, 5 }
 0x1a4   : > { %v4381_v40 = vrot.slane %v4226_v62, 5  ;;  %v4385_v5 = vrot.slane %v7498_v16, 5  ;;  %v5528_v26 = vcombine.low %v3342_v49, %v3345_v58  ;;  %v4044_v31 = vsel %vm6175_vm14, %v4039_v43, %v4043_v54  ;;  %v3684_v32 = vld [vmem:[#allocation2 + $0xd4] sm:$0x1] }
 0x1a5   : > { %3103 = vrot.lane.b32.xlu1 %v5496_v37, %s5995_s17  ;;  %v4063_v42 = vrot.slane %v4062_v63, 4  ;;  %v4379_v21 = vsel %vm6148_vm13, %v5575_v50, %v4378_v47  ;;  %v5559_v24 = vcombine.low %v4034_v30, %v4044_v31  ;;  %v4052_v6 = vor.u32 %v4051_v25, %v4048_v12  ;;  %v4229_v13 = vld [vmem:[#allocation2 + $0xd4] sm:$0x1] }
 0x1a6   : > { %v4065_v33 = vshll.u32 %v3684_v32, 16  ;;  %v4382_v56 = vsel %vm6148_vm13, %v4380_v17, %v4381_v40  ;;  %v3094_v20 = vpop.permute.xlu0 %3093  ;;  %v4387_v11 = vrot.slane %v4385_v5, 4  ;;  %v5576_v8 = vrot.slane %v4227_v46, 9 }
 0x1a7   : > { %4145 = vrot.lane.b32.xlu0 %v5559_v24, %s5996_s18  ;;  %v4053_v48 = vrot.slane %v4052_v6, 4  ;;  %v5591_v38 = vcombine.low %v4379_v21, %v4382_v56  ;;  %v2551_v61 = vpop.permute.xlu1 %2550  ;;  %3132 = vst.msk [vmem:[#allocation3 + $0x50] sm:$0xff] %vm3121_vm5, %v3094_v20  ;;  %v4388_v44 = vrot.slane %v4229_v13, 5 }
 0x1a8   : > { %v4067_v19 = vrot.slane %v4065_v33, 5  ;;  %2588 = vst.msk [vmem:[#allocation3 + $0x58] sm:$0xff] %vm2576_vm3, %v2551_v61  ;;  %v4386_v63 = vsel %vm6148_vm13, %v5576_v8, %v4385_v5 }
 0x1a9   : > { %3424 = vrot.lane.b32.xlu1 %v5528_v26, %s5993_s15  ;;  %v4058_v45 = vsel %vm6175_vm14, %v4053_v48, %v7471_v41  ;;  %v4389_v41 = vsel %vm6148_vm13, %v4387_v11, %v4388_v44  ;;  %vm8004_vm13 = vmmov %vm8000_vm2 }
 0x1aa   : > { %v4068_v15 = vsel %vm6175_vm14, %v4063_v42, %v4067_v19  ;;  %v3415_v51 = vpop.permute.xlu0 %3414  ;;  %v5592_v7 = vcombine.low %v4386_v63, %v4389_v41  ;;  %vm8005_vm14 = vmmov %vm8001_vm4 }
 0x1ab   : > { %4466 = vrot.lane.b32.xlu0 %v5591_v38, %s5994_s16  ;;  %v5560_v34 = vcombine.low %v4058_v45, %v4068_v15  ;;  %3453 = vst.msk [vmem:[#allocation3 + $0x50] sm:$0xff] %vm8000_vm2, %v3415_v51 }
 0x1ad   : > { %3602 = vrot.lane.b32.xlu1 %v5950_v9, %s5992_s14 }
 0x1ae   : > { %v3593_v53 = vpop.permute.xlu0 %3592 }
 0x1af   : > { %3631 = vst.msk [vmem:[#allocation3 + $0x50] sm:$0xff] %vm8001_vm4, %v3593_v53 }
 0x1b1   : > { %4147 = vrot.lane.b32.xlu1 %v5560_v34, %s5996_s18  ;;  %v3096_v57 = vpop.permute.xlu1 %3095 }
 0x1b2   : > { %3133 = vst.msk [vmem:[#allocation3 + $0x58] sm:$0xff] %vm3121_vm5, %v3096_v57 }
 0x1b5   : > { %4468 = vrot.lane.b32.xlu1 %v5592_v7, %s5994_s16  ;;  %v3417_v60 = vpop.permute.xlu1 %3416  ;;  %s465_s16 = scalar_lea.vmem %s7971_s7, %s5360_s26 }
 0x1b6   : > { %3454 = vst.msk [vmem:[#allocation3 + $0x58] sm:$0xff] %vm8002_vm7, %v3417_v60 }
 0x1ba   : > { %v3595_v23 = vpop.permute.xlu1 %3594 }
 0x1bb   : > { %v4138_v59 = vpop.permute.xlu0 %4137  ;;  %3632 = vst.msk [vmem:[#allocation3 + $0x58] sm:$0xff] %vm8003_vm8, %v3595_v23 }
 0x1bc   : > { %4176 = vst.msk [vmem:[#allocation3 + $0x50] sm:$0xff] %vm4165_vm11, %v4138_v59 }
 0x1bf   : > { %v4459_v0 = vpop.permute.xlu0 %4458 }
 0x1c0   : > { %4497 = vst.msk [vmem:[#allocation3 + $0x50] sm:$0xff] %vm4486_vm12, %v4459_v0 }
 0x1c3   : > { %v4461_v2 = vpop.permute.xlu0 %4460 }
 0x1c6   : > { %v4140_v29 = vpop.permute.xlu1 %4139 }
 0x1c7   : > { %4177 = vst.msk [vmem:[#allocation3 + $0x58] sm:$0xff] %vm4165_vm11, %v4140_v29  ;;  %v4513_v22 = vld [vmem:[#allocation3 + $0x50] sm:$0xff] }
 0x1c8   : > { %4498 = vst.msk [vmem:[#allocation3 + $0x58] sm:$0xff] %vm4486_vm12, %v4461_v2  ;;  %5847 = vmatprep.mubr.msk.bf16.mxu1 %vm4555_vm10, %v4513_v22 }
 0x1ca   : > { %v2052_v36 = vpop.permute.xlu1 %2051  ;;  %v2376_v16 = vpop.permute.xlu0 %2375 }
 0x1cb   : > { %2088 = vst.msk [vmem:[#allocation3 + $0x60] sm:$0xff] %vm2075_vm0, %v2052_v36 }
 0x1cc   : > { %2412 = vst.msk [vmem:[#allocation3 + $0x60] sm:$0xff] %vm2399_vm1, %v2376_v16 }
 0x1ce   : > { %v2054_v18 = vpop.permute.xlu1 %2053  ;;  %v2553_v1 = vpop.permute.xlu0 %2552 }
 0x1cf   : > { %2089 = vst.msk [vmem:[#allocation3 + $0x68] sm:$0xff] %vm2075_vm0, %v2054_v18  ;;  %v4514_v27 = vld [vmem:[#allocation3 + $0x58] sm:$0xff] }
 0x1d0   : > { %2589 = vst.msk [vmem:[#allocation3 + $0x60] sm:$0xff] %vm2576_vm3, %v2553_v1  ;;  %5848 = vmatmul.mubr.msk.bf16.gmra.mrb[4].mxu1 %vm4555_vm10, %v4514_v27 }
 0x1d2   : > { %v2378_v49 = vpop.permute.xlu1 %2377 }
 0x1d3   : > { %2413 = vst.msk [vmem:[#allocation3 + $0x68] sm:$0xff] %vm2399_vm1, %v2378_v49 }
 0x1d7   : > { %v2555_v4 = vpop.permute.xlu1 %2554  ;;  %v3098_v47 = vpop.permute.xlu0 %3097 }
 0x1d8   : > { %2590 = vst.msk [vmem:[#allocation3 + $0x68] sm:$0xff] %vm2576_vm3, %v2555_v4 }
 0x1d9   : > { %3134 = vst.msk [vmem:[#allocation3 + $0x60] sm:$0xff] %vm3121_vm5, %v3098_v47 }
 0x1db   : > { %v3419_v52 = vpop.permute.xlu0 %3418 }
 0x1dc   : > { %3455 = vst.msk [vmem:[#allocation3 + $0x60] sm:$0xff] %vm8004_vm13, %v3419_v52 }
 0x1df   : > { %v3597_v28 = vpop.permute.xlu0 %3596  ;;  %v5829_v14 = vpop.f32.mrb[0].mxu0 }
 0x1e0   : > { %3633 = vst.msk [vmem:[#allocation3 + $0x60] sm:$0xff] %vm8005_vm14, %v3597_v28  ;;  %v5687_v35 = vpack.c.bf16 %v5829_v14, %v5829_v14  ;;  %v4642_v54 = vpop.f32.mrb[1].mxu0 }
 0x1e1   : > { %v5685_v62 = vpack.c.bf16 %v4642_v54, %v4642_v54  ;;  %v5830_v50 = vpop.f32.mrb[2].mxu0 }
 0x1e2   : > { %4899 = vst.msk [vmem:[%s7564_s13 + $0x8] sm:$0xf] %vm1173_vm6, %v5687_v35  ;;  %v7568_v3 = vpack.c.bf16 %v5830_v50, %v5829_v14  ;;  %v5688_v58 = vpack.c.bf16 %v5830_v50, %v5830_v50  ;;  %v4645_v55 = vpop.f32.mrb[3].mxu0 }
 0x1e3   : > { %4897 = vst.msk [vmem:[%s7564_s13] sm:$0xf] %vm1173_vm6, %v5685_v62  ;;  %v7572_v37 = vpack.c.bf16 %v4645_v55, %v4642_v54  ;;  %v5686_v30 = vpack.c.bf16 %v4645_v55, %v4645_v55 }
 0x1e4   : > { %4900 = vst.msk [vmem:[%s7564_s13 + $0xc] sm:$0xf] %vm1173_vm6, %v5688_v58 }
 0x1e5   : > { %4898 = vst.msk [vmem:[%s7564_s13 + $0x4] sm:$0xf] %vm1173_vm6, %v5686_v30 }
 0x1e7   : > { %v3100_v39 = vpop.permute.xlu1 %3099  ;;  %v5833_v17 = vpop.f32.mrb[4].mxu0 }
 0x1e8   : > { %3135 = vst.msk [vmem:[#allocation3 + $0x68] sm:$0xff] %vm3121_vm5, %v3100_v39  ;;  %v5691_v12 = vpack.c.bf16 %v5833_v17, %v5833_v17  ;;  %v4658_v25 = vpop.f32.mrb[5].mxu0 }
 0x1e9   : > { %v5689_v40 = vpack.c.bf16 %v4658_v25, %v4658_v25  ;;  %v5834_v5 = vpop.f32.mrb[6].mxu0 }
 0x1ea   : > { %4903 = vst.msk [vmem:[%s7564_s13 + $0x18] sm:$0xf] %vm1173_vm6, %v5691_v12  ;;  %v7583_v26 = vpack.c.bf16 %v5834_v5, %v5833_v17  ;;  %v5692_v31 = vpack.c.bf16 %v5834_v5, %v5834_v5  ;;  %v4661_v32 = vpop.f32.mrb[7].mxu0 }
 0x1eb   : > { %v3421_v43 = vpop.permute.xlu1 %3420  ;;  %4901 = vst.msk [vmem:[%s7564_s13 + $0x10] sm:$0xf] %vm1173_vm6, %v5689_v40  ;;  %v7587_v21 = vpack.c.bf16 %v4661_v32, %v4658_v25  ;;  %v5690_v24 = vpack.c.bf16 %v4661_v32, %v4661_v32 }
 0x1ec   : > { %3456 = vst.msk [vmem:[#allocation3 + $0x68] sm:$0xff] %vm8006_vm9, %v3421_v43  ;;  %v4142_v10 = vpop.permute.xlu0 %4141 }
 0x1ed   : > { %4178 = vst.msk [vmem:[#allocation3 + $0x60] sm:$0xff] %vm4165_vm11, %v4142_v10 }
 0x1ee   : > { %4904 = vst.msk [vmem:[%s7564_s13 + $0x1c] sm:$0xf] %vm1173_vm6, %v5692_v31  ;;  %4902 = vst.msk [vmem:[%s7564_s13 + $0x14] sm:$0xf] %vm1173_vm6, %v5690_v24  ;;  %v4930_v24 = vunpack.c.h.bf16 %v7572_v37 }
 0x1ef   : > { %v3599_v42 = vpop.permute.xlu1 %3598 }
 0x1f0   : > { %3634 = vst.msk [vmem:[#allocation3 + $0x68] sm:$0xff] %vm8007_vm15, %v3599_v42  ;;  %v4463_v6 = vpop.permute.xlu0 %4462  ;;  %v4929_v42 = vunpack.c.l.bf16 %v7572_v37 }
 0x1f1   : > { %4499 = vst.msk [vmem:[#allocation3 + $0x60] sm:$0xff] %vm4486_vm12, %v4463_v6 }
 0x1f4   : > { %v4144_v33 = vpop.permute.xlu1 %4143 }
 0x1f5   : > { %4179 = vst.msk [vmem:[#allocation3 + $0x68] sm:$0xff] %vm4165_vm11, %v4144_v33  ;;  %v4465_v56 = vpop.permute.xlu0 %4464 }
 0x1f6   : > { %4500 = vst.msk [vmem:[#allocation3 + $0x68] sm:$0xff] %vm4486_vm12, %v4465_v56 }
 0x1f8   : > { %v2056_v46 = vpop.permute.xlu1 %2055  ;;  %v4515_v13 = vld [vmem:[#allocation3 + $0x60] sm:$0xff] }
 0x1f9   : > { %2090 = vst.msk [vmem:[#allocation3 + $0x70] sm:$0xff] %vm2075_vm0, %v2056_v46  ;;  %5851 = vmatprep.mubr.msk.bf16.mxu1 %vm4555_vm10, %v4515_v13 }
 0x1fb   : > { %v2380_v48 = vpop.permute.xlu0 %2379 }
 0x1fc   : > { %v2058_v19 = vpop.permute.xlu1 %2057  ;;  %2414 = vst.msk [vmem:[#allocation3 + $0x70] sm:$0xff] %vm2399_vm1, %v2380_v48 }
 0x1fd   : > { %2091 = vst.msk [vmem:[#allocation3 + $0x78] sm:$0xff] %vm2075_vm0, %v2058_v19  ;;  %v4516_v38 = vld [vmem:[#allocation3 + $0x68] sm:$0xff]  ;;  %vm8008_vm0 = vmmov %vm8001_vm4 }
 0x1fe   : > { %5852 = vmatmul.mubr.msk.bf16.gmra.mrb[8].mxu1 %vm4555_vm10, %v4516_v38  ;;  %v4931_v38 = vunpack.c.l.bf16 %v7568_v3 }
 0x1ff   : > { %v2557_v20 = vpop.permute.xlu0 %2556 }
 0x200   : > { %v2382_v9 = vpop.permute.xlu1 %2381  ;;  %2591 = vst.msk [vmem:[#allocation3 + $0x70] sm:$0xff] %vm2576_vm3, %v2557_v20 }
 0x201   : > { %2415 = vst.msk [vmem:[#allocation3 + $0x78] sm:$0xff] %vm2399_vm1, %v2382_v9  ;;  %vm8009_vm1 = vmmov %vm8000_vm2  ;;  %v4932_v9 = vunpack.c.h.bf16 %v7568_v3 }
 0x208   : > { %v3102_v11 = vpop.permute.xlu0 %3101 }
 0x209   : > { %3136 = vst.msk [vmem:[#allocation3 + $0x70] sm:$0xff] %vm3121_vm5, %v3102_v11 }
 0x20a   : > { %v2559_v61 = vpop.permute.xlu1 %2558 }
 0x20b   : > { %2592 = vst.msk [vmem:[#allocation3 + $0x78] sm:$0xff] %vm2576_vm3, %v2559_v61  ;;  %vm8010_vm3 = vmmov %vm8008_vm0  ;;  %v4933_v61 = vunpack.c.l.bf16 %v7587_v21 }
 0x20c   : > { %v3423_v45 = vpop.permute.xlu0 %3422  ;;  %v5837_v8 = vpop.f32.mrb[8].mxu0 }
 0x20d   : > { %3457 = vst.msk [vmem:[#allocation3 + $0x70] sm:$0xff] %vm8000_vm2, %v3423_v45  ;;  %v5695_v44 = vpack.c.bf16 %v5837_v8, %v5837_v8  ;;  %v4674_v51 = vpop.f32.mrb[9].mxu0 }
 0x20e   : > { %v5693_v34 = vpack.c.bf16 %v4674_v51, %v4674_v51  ;;  %v5838_v63 = vpop.f32.mrb[10].mxu0 }
 0x20f   : > { %4907 = vst.msk [vmem:[%s7564_s13 + $0x28] sm:$0xf] %vm1173_vm6, %v5695_v44  ;;  %v7610_v41 = vpack.c.bf16 %v5838_v63, %v5837_v8  ;;  %v5696_v53 = vpack.c.bf16 %v5838_v63, %v5838_v63  ;;  %v4677_v7 = vpop.f32.mrb[11].mxu0  ;;  %v4935_v63 = vunpack.c.l.bf16 %v7583_v26 }
 0x210   : > { %v3601_v15 = vpop.permute.xlu0 %3600  ;;  %4905 = vst.msk [vmem:[%s7564_s13 + $0x20] sm:$0xf] %vm1173_vm6, %v5693_v34  ;;  %v7614_v57 = vpack.c.bf16 %v4677_v7, %v4674_v51  ;;  %v5694_v60 = vpack.c.bf16 %v4677_v7, %v4677_v7  ;;  %v4934_v51 = vunpack.c.h.bf16 %v7587_v21 }
 0x211   : > { %3635 = vst.msk [vmem:[#allocation3 + $0x70] sm:$0xff] %vm8008_vm0, %v3601_v15 }
 0x212   : > { %4908 = vst.msk [vmem:[%s7564_s13 + $0x2c] sm:$0xf] %vm1173_vm6, %v5696_v53  ;;  %4906 = vst.msk [vmem:[%s7564_s13 + $0x24] sm:$0xf] %vm1173_vm6, %v5694_v60  ;;  %v4936_v60 = vunpack.c.h.bf16 %v7583_v26 }
 0x217   : > { %v3104_v23 = vpop.permute.xlu1 %3103 }
 0x218   : > { %3137 = vst.msk [vmem:[#allocation3 + $0x78] sm:$0xff] %vm3121_vm5, %v3104_v23  ;;  %vm8011_vm5 = vcmask 64512  }
 0x219   : > { %v4146_v59 = vpop.permute.xlu0 %4145  ;;  %v4961_v48 = vsel %vm8011_vm5, %v4929_v42, 0.0  ;;  %vm8015_vm4 = vmmov %vm8011_vm5 }
 0x21a   : > { %4180 = vst.msk [vmem:[#allocation3 + $0x70] sm:$0xff] %vm4165_vm11, %v4146_v59  ;;  %v4968_v8 = vsel %vm8015_vm4, %v4933_v61, 0.0  ;;  %vm8016_vm7 = vmmov %vm8015_vm4  ;;  %v4937_v59 = vunpack.c.l.bf16 %v7614_v57 }
 0x21b   : > { %v3425_v0 = vpop.permute.xlu1 %3424  ;;  %v4970_v53 = vsel %vm8016_vm7, %v4934_v51, 0.0  ;;  %vm8017_vm8 = vmmov %vm8015_vm4 }
 0x21c   : > { %3458 = vst.msk [vmem:[#allocation3 + $0x78] sm:$0xff] %vm8009_vm1, %v3425_v0  ;;  %v4972_v23 = vsel %vm8017_vm8, %v4935_v63, 0.0  ;;  %vm8018_vm13 = vmmov %vm8015_vm4 }
 0x21d   : > { %v4467_v2 = vpop.permute.xlu0 %4466  ;;  %vm8019_vm14 = vmmov %vm8015_vm4 }
 0x21e   : > { %4501 = vst.msk [vmem:[#allocation3 + $0x70] sm:$0xff] %vm4486_vm12, %v4467_v2  ;;  %v4974_v2 = vsel %vm8018_vm13, %v4936_v60, 0.0  ;;  %vm8020_vm9 = vmmov %vm8015_vm4 }
 0x21f   : > { %v3603_v29 = vpop.permute.xlu1 %3602  ;;  %vm8021_vm15 = vmmov %vm8015_vm4 }
 0x220   : > { %3636 = vst.msk [vmem:[#allocation3 + $0x78] sm:$0xff] %vm8010_vm3, %v3603_v29  ;;  %v4976_v29 = vsel %vm8019_vm14, %v4937_v59, 0.0  ;;  %vm8022_vm2 = vmmov %vm8015_vm4 }
 0x221   : > { %vm8023_vm0 = vmmov %vm8022_vm2 }
 0x222   : > { %vm8024_vm1 = vmmov %vm8023_vm0 }
 0x223   : > { %v4148_v22 = vpop.permute.xlu1 %4147  ;;  %vm8025_vm3 = vmmov %vm8023_vm0 }
 0x224   : > { %4181 = vst.msk [vmem:[#allocation3 + $0x78] sm:$0xff] %vm4165_vm11, %v4148_v22  ;;  %vm8013_vm11 = vmmov %vm8011_vm5 }
 0x225   : > { %v4517_v36 = vld [vmem:[#allocation3 + $0x70] sm:$0xff]  ;;  %v4964_v11 = vsel %vm8013_vm11, %v4931_v38, 0.0  ;;  %vm8028_vm11 = vmmov %vm8023_vm0 }
 0x226   : > { %5855 = vmatprep.mubr.msk.bf16.mxu1 %vm4555_vm10, %v4517_v36  ;;  %v4938_v36 = vunpack.c.h.bf16 %v7614_v57  ;;  %vm8030_vm4 = vmmov %vm8023_vm0 }
 0x227   : > { %v4469_v16 = vpop.permute.xlu1 %4468  ;;  %vm8031_vm7 = vmmov %vm8023_vm0 }
 0x228   : > { %4502 = vst.msk [vmem:[#allocation3 + $0x78] sm:$0xff] %vm4486_vm12, %v4469_v16  ;;  %vm8014_vm12 = vmmov %vm8011_vm5 }
 0x229   : > { %v4966_v15 = vsel %vm8014_vm12, %v4932_v9, 0.0  ;;  %vm8029_vm12 = vmmov %vm8023_vm0 }
 0x22a   : > { %vm8032_vm8 = vmmov %vm8023_vm0 }
 0x22b   : > { %vm8033_vm13 = vmmov %vm8023_vm0 }
 0x22c   : > { %vm8034_vm14 = vmmov %vm8023_vm0 }
 0x22f   : > { %v4518_v18 = vld [vmem:[#allocation3 + $0x78] sm:$0xff] }
 0x230   : > { %5856 = vmatmul.mubr.msk.bf16.gmra.mrb[12].mxu1 %vm4555_vm10, %v4518_v18  ;;  %vm8012_vm10 = vmmov %vm8011_vm5  ;;  %v4939_v18 = vunpack.c.l.bf16 %v7610_v41 }
 0x231   : > { %v4962_v19 = vsel %vm8012_vm10, %v4930_v24, 0.0  ;;  %vm8026_vm5 = vmmov %vm8023_vm0 }
 0x232   : > { %v4963_v20 = vadd.f32 %v4962_v19, %v4961_v48  ;;  %vm8027_vm10 = vmmov %vm8023_vm0 }
 0x234   : > { %v4965_v45 = vadd.f32 %v4964_v11, %v4963_v20 }
 0x236   : > { %v4967_v44 = vadd.f32 %v4966_v15, %v4965_v45 }
 0x238   : > { %v4969_v34 = vadd.f32 %v4968_v8, %v4967_v44 }
 0x23a   : > { %v4971_v7 = vadd.f32 %v4970_v53, %v4969_v34 }
 0x23c   : > { %v4973_v0 = vadd.f32 %v4972_v23, %v4971_v7 }
 0x23e   : > { %v5841_v1 = vpop.f32.mrb[12].mxu0  ;;  %v4975_v22 = vadd.f32 %v4974_v2, %v4973_v0 }
 0x23f   : > { %v5699_v27 = vpack.c.bf16 %v5841_v1, %v5841_v1  ;;  %v4690_v49 = vpop.f32.mrb[13].mxu0 }
 0x240   : > { %v5697_v4 = vpack.c.bf16 %v4690_v49, %v4690_v49  ;;  %v5842_v47 = vpop.f32.mrb[14].mxu0  ;;  %v4977_v16 = vadd.f32 %v4976_v29, %v4975_v22 }
 0x241   : > { %4911 = vst.msk [vmem:[%s7564_s13 + $0x38] sm:$0xf] %vm1173_vm6, %v5699_v27  ;;  %v7631_v52 = vpack.c.bf16 %v5842_v47, %v5841_v1  ;;  %v5700_v28 = vpack.c.bf16 %v5842_v47, %v5842_v47  ;;  %v4693_v14 = vpop.f32.mrb[15].mxu0  ;;  %v4978_v1 = vsel %vm8020_vm9, %v4938_v36, 0.0  ;;  %vm8035_vm9 = vmmov %vm8023_vm0 }
 0x242   : > { %4909 = vst.msk [vmem:[%s7564_s13 + $0x30] sm:$0xf] %vm1173_vm6, %v5697_v4  ;;  %v7635_v35 = vpack.c.bf16 %v4693_v14, %v4690_v49  ;;  %v5698_v54 = vpack.c.bf16 %v4693_v14, %v4693_v14  ;;  %v4979_v27 = vadd.f32 %v4978_v1, %v4977_v16  ;;  %v4940_v49 = vunpack.c.h.bf16 %v7610_v41 }
 0x243   : > { %4912 = vst.msk [vmem:[%s7564_s13 + $0x3c] sm:$0xf] %vm1173_vm6, %v5700_v28  ;;  %v4980_v4 = vsel %vm8021_vm15, %v4939_v18, 0.0  ;;  %v4944_v48 = vunpack.c.h.bf16 %v7631_v52  ;;  %vm8036_vm15 = vmmov %vm8023_vm0 }
 0x244   : > { %4910 = vst.msk [vmem:[%s7564_s13 + $0x34] sm:$0xf] %vm1173_vm6, %v5698_v54  ;;  %v4941_v47 = vunpack.c.l.bf16 %v7635_v35  ;;  %v4981_v28 = vadd.f32 %v4980_v4, %v4979_v27  ;;  %v4982_v14 = vsel %vm8022_vm2, %v4940_v49, 0.0  ;;  %vm8037_vm2 = vmmov %vm8023_vm0 }
 0x245   : > { %v4990_v45 = vsel %vm8026_vm5, %v4944_v48, 0.0  ;;  %vm8041_vm5 = vmmov %vm8023_vm0 }
 0x246   : > { %v4984_v54 = vsel %vm8023_vm0, %v4941_v47, 0.0 }
 0x274   : > { %v5845_v62 = vpop.f32.mrb[0].mxu1 }
 0x275   : > { %v5703_v50 = vpack.c.bf16 %v5845_v62, %v5845_v62  ;;  %v4706_v58 = vpop.f32.mrb[1].mxu1 }
 0x276   : > { %v5701_v55 = vpack.c.bf16 %v4706_v58, %v4706_v58  ;;  %v5846_v39 = vpop.f32.mrb[2].mxu1 }
 0x277   : > { %4915 = vst.msk [vmem:[%s7564_s13 + $0x48] sm:$0xf] %vm1173_vm6, %v5703_v50  ;;  %v7643_v30 = vpack.c.bf16 %v5846_v39, %v5845_v62  ;;  %v5704_v43 = vpack.c.bf16 %v5846_v39, %v5846_v39  ;;  %v4709_v17 = vpop.f32.mrb[3].mxu1  ;;  %v4983_v50 = vadd.f32 %v4982_v14, %v4981_v28  ;;  %v4942_v39 = vunpack.c.h.bf16 %v7635_v35 }
 0x278   : > { %4913 = vst.msk [vmem:[%s7564_s13 + $0x40] sm:$0xf] %vm1173_vm6, %v5701_v55  ;;  %v7647_v10 = vpack.c.bf16 %v4709_v17, %v4706_v58  ;;  %v5702_v12 = vpack.c.bf16 %v4709_v17, %v4709_v17 }
 0x279   : > { %4916 = vst.msk [vmem:[%s7564_s13 + $0x4c] sm:$0xf] %vm1173_vm6, %v5704_v43  ;;  %v4947_v53 = vunpack.c.l.bf16 %v7643_v30  ;;  %v4948_v0 = vunpack.c.h.bf16 %v7643_v30 }
 0x27a   : > { %4914 = vst.msk [vmem:[%s7564_s13 + $0x44] sm:$0xf] %vm1173_vm6, %v5702_v12  ;;  %v4985_v12 = vadd.f32 %v4984_v54, %v4983_v50  ;;  %v4945_v20 = vunpack.c.l.bf16 %v7647_v10  ;;  %v4946_v44 = vunpack.c.h.bf16 %v7647_v10 }
 0x27b   : > { %v4996_v2 = vsel %vm8029_vm12, %v4947_v53, 0.0  ;;  %v4998_v16 = vsel %vm8030_vm4, %v4948_v0, 0.0  ;;  %vm8044_vm12 = vmmov %vm8023_vm0 }
 0x27c   : > { %v4992_v15 = vsel %vm8027_vm10, %v4945_v20, 0.0  ;;  %v4994_v7 = vsel %vm8028_vm11, %v4946_v44, 0.0  ;;  %vm8042_vm10 = vmmov %vm8023_vm0 }
 0x27d   : > { %vm8043_vm11 = vmmov %vm8023_vm0 }
 0x27e   : > { %vm8045_vm4 = vmmov %vm8023_vm0 }
 0x2a3   : > { %v5849_v25 = vpop.f32.mrb[4].mxu1 }
 0x2a4   : > { %v5707_v40 = vpack.c.bf16 %v5849_v25, %v5849_v25  ;;  %v4722_v5 = vpop.f32.mrb[5].mxu1 }
 0x2a5   : > { %v5705_v31 = vpack.c.bf16 %v4722_v5, %v4722_v5  ;;  %v5850_v32 = vpop.f32.mrb[6].mxu1 }
 0x2a6   : > { %4919 = vst.msk [vmem:[%s7564_s13 + $0x58] sm:$0xf] %vm1173_vm6, %v5707_v40  ;;  %v7657_v6 = vpack.c.bf16 %v5850_v32, %v5849_v25  ;;  %v5708_v33 = vpack.c.bf16 %v5850_v32, %v5850_v32  ;;  %v4725_v56 = vpop.f32.mrb[7].mxu1 }
 0x2a7   : > { %4917 = vst.msk [vmem:[%s7564_s13 + $0x50] sm:$0xf] %vm1173_vm6, %v5705_v31  ;;  %v7661_v46 = vpack.c.bf16 %v4725_v56, %v4722_v5  ;;  %v5706_v13 = vpack.c.bf16 %v4725_v56, %v4725_v56  ;;  %v4986_v56 = vsel %vm8024_vm1, %v4942_v39, 0.0  ;;  %vm8038_vm1 = vmmov %vm8023_vm0 }
 0x2a8   : > { %4920 = vst.msk [vmem:[%s7564_s13 + $0x5c] sm:$0xf] %vm1173_vm6, %v5708_v33  ;;  %v4943_v33 = vunpack.c.l.bf16 %v7631_v52  ;;  %v4951_v14 = vunpack.c.l.bf16 %v7657_v6  ;;  %v4952_v50 = vunpack.c.h.bf16 %v7657_v6 }
 0x2a9   : > { %4918 = vst.msk [vmem:[%s7564_s13 + $0x54] sm:$0xf] %vm1173_vm6, %v5706_v13  ;;  %v4987_v13 = vadd.f32 %v4986_v56, %v4985_v12  ;;  %v4949_v29 = vunpack.c.l.bf16 %v7661_v46  ;;  %v4950_v4 = vunpack.c.h.bf16 %v7661_v46 }
 0x2aa   : > { %v4988_v19 = vsel %vm8025_vm3, %v4943_v33, 0.0  ;;  %vm8039_vm3 = vmmov %vm8023_vm0 }
 0x2ab   : > { %v4989_v11 = vadd.f32 %v4988_v19, %v4987_v13  ;;  %v5000_v1 = vsel %vm8031_vm7, %v4949_v29, 0.0  ;;  %v5002_v54 = vsel %vm8032_vm8, %v4950_v4, 0.0  ;;  %vm8046_vm7 = vmmov %vm8023_vm0 }
 0x2ac   : > { %vm8047_vm8 = vmmov %vm8023_vm0 }
 0x2ad   : > { %v4991_v8 = vadd.f32 %v4990_v45, %v4989_v11 }
 0x2af   : > { %v4993_v34 = vadd.f32 %v4992_v15, %v4991_v8 }
 0x2b1   : > { %v4995_v23 = vadd.f32 %v4994_v7, %v4993_v34 }
 0x2b3   : > { %v4997_v22 = vadd.f32 %v4996_v2, %v4995_v23 }
 0x2b5   : > { %v4999_v27 = vadd.f32 %v4998_v16, %v4997_v22 }
 0x2b7   : > { %v5001_v28 = vadd.f32 %v5000_v1, %v4999_v27 }
 0x2d1   : > { %v5853_v62 = vpop.f32.mrb[8].mxu1 }
 0x2d2   : > { %v5711_v58 = vpack.c.bf16 %v5853_v62, %v5853_v62  ;;  %v4738_v55 = vpop.f32.mrb[9].mxu1 }
 0x2d3   : > { %v5709_v43 = vpack.c.bf16 %v4738_v55, %v4738_v55  ;;  %v5854_v17 = vpop.f32.mrb[10].mxu1 }
 0x2d4   : > { %4923 = vst.msk [vmem:[%s7564_s13 + $0x68] sm:$0xf] %vm1173_vm6, %v5711_v58  ;;  %v7720_v25 = vpack.c.bf16 %v5854_v17, %v5853_v62  ;;  %v5712_v40 = vpack.c.bf16 %v5854_v17, %v5854_v17  ;;  %v4741_v5 = vpop.f32.mrb[11].mxu1  ;;  %v5003_v62 = vadd.f32 %v5002_v54, %v5001_v28  ;;  %v5004_v58 = vsel %vm8033_vm13, %v4951_v14, 0.0  ;;  %vm8048_vm13 = vmmov %vm8023_vm0 }
 0x2d5   : > { %4921 = vst.msk [vmem:[%s7564_s13 + $0x60] sm:$0xf] %vm1173_vm6, %v5709_v43  ;;  %v7724_v31 = vpack.c.bf16 %v4741_v5, %v4738_v55  ;;  %v5710_v32 = vpack.c.bf16 %v4741_v5, %v4741_v5  ;;  %v5006_v17 = vsel %vm8034_vm14, %v4952_v50, 0.0  ;;  %vm8049_vm14 = vmmov %vm8023_vm0 }
 0x2d6   : > { %4924 = vst.msk [vmem:[%s7564_s13 + $0x6c] sm:$0xf] %vm1173_vm6, %v5712_v40  ;;  %v5005_v43 = vadd.f32 %v5004_v58, %v5003_v62  ;;  %v4955_v56 = vunpack.c.l.bf16 %v7720_v25  ;;  %v4956_v8 = vunpack.c.h.bf16 %v7720_v25 }
 0x2d7   : > { %4922 = vst.msk [vmem:[%s7564_s13 + $0x64] sm:$0xf] %vm1173_vm6, %v5710_v32  ;;  %v4953_v55 = vunpack.c.l.bf16 %v7724_v31  ;;  %v4954_v5 = vunpack.c.h.bf16 %v7724_v31 }
 0x2d8   : > { %v5007_v40 = vadd.f32 %v5006_v17, %v5005_v43  ;;  %v5012_v34 = vsel %vm8037_vm2, %v4955_v56, 0.0  ;;  %v5014_v54 = vsel %vm8023_vm0, %v4956_v8, 0.0  ;;  %vm8052_vm2 = vmmov %vm8023_vm0 }
 0x2d9   : > { %v5008_v12 = vsel %vm8035_vm9, %v4953_v55, 0.0  ;;  %v5010_v13 = vsel %vm8036_vm15, %v4954_v5, 0.0  ;;  %vm8050_vm9 = vmmov %vm8023_vm0 }
 0x2da   : > { %v5009_v32 = vadd.f32 %v5008_v12, %v5007_v40  ;;  %vm8051_vm15 = vmmov %vm8023_vm0 }
 0x2dc   : > { %v5011_v19 = vadd.f32 %v5010_v13, %v5009_v32 }
 0x2de   : > { %v5013_v2 = vadd.f32 %v5012_v34, %v5011_v19 }
 0x2e0   : > { %v5015_v43 = vadd.f32 %v5014_v54, %v5013_v2 }
 0x303   : > { %v5857_v11 = vpop.f32.mrb[12].mxu1 }
 0x304   : > { %v5715_v45 = vpack.c.bf16 %v5857_v11, %v5857_v11  ;;  %v4754_v15 = vpop.f32.mrb[13].mxu1 }
 0x305   : > { %v5713_v7 = vpack.c.bf16 %v4754_v15, %v4754_v15  ;;  %v5858_v23 = vpop.f32.mrb[14].mxu1 }
 0x306   : > { %4927 = vst.msk [vmem:[%s7564_s13 + $0x78] sm:$0xf] %vm1173_vm6, %v5715_v45  ;;  %v7788_v22 = vpack.c.bf16 %v5858_v23, %v5857_v11  ;;  %v5716_v16 = vpack.c.bf16 %v5858_v23, %v5858_v23  ;;  %v4757_v1 = vpop.f32.mrb[15].mxu1 }
 0x307   : > { %4925 = vst.msk [vmem:[%s7564_s13 + $0x70] sm:$0xf] %vm1173_vm6, %v5713_v7  ;;  %v7792_v27 = vpack.c.bf16 %v4757_v1, %v4754_v15  ;;  %v5714_v28 = vpack.c.bf16 %v4757_v1, %v4757_v1 }
 0x308   : > { %4928 = vst.msk [vmem:[%s7564_s13 + $0x7c] sm:$0xf] %vm1173_vm6, %v5716_v16  ;;  %v4959_v17 = vunpack.c.l.bf16 %v7788_v22  ;;  %v4960_v32 = vunpack.c.h.bf16 %v7788_v22 }
 0x309   : > { %4926 = vst.msk [vmem:[%s7564_s13 + $0x74] sm:$0xf] %vm1173_vm6, %v5714_v28  ;;  %v4957_v62 = vunpack.c.l.bf16 %v7792_v27  ;;  %v4958_v58 = vunpack.c.h.bf16 %v7792_v27  ;;  %vm8040_vm6 = vmmov %vm8023_vm0 }
 0x30a   : > { %v5020_v11 = vsel %vm8040_vm6, %v4959_v17, 0.0  ;;  %v5022_v15 = vsel %vm8041_vm5, %v4960_v32, 0.0  ;;  %vm8055_vm6 = vmmov %vm8023_vm0 }
 0x30b   : > { %v5016_v12 = vsel %vm8038_vm1, %v4957_v62, 0.0  ;;  %v5018_v13 = vsel %vm8039_vm3, %v4958_v58, 0.0  ;;  %vm8053_vm1 = vmmov %vm8023_vm0 }
 0x30c   : > { %v5017_v40 = vadd.f32 %v5016_v12, %v5015_v43  ;;  %vm8054_vm3 = vmmov %vm8023_vm0 }
 0x30d   : > { %vm8056_vm5 = vmmov %vm8023_vm0 }
 0x30e   : > { %v5019_v19 = vadd.f32 %v5018_v13, %v5017_v40 }
 0x310   : > { %v5021_v45 = vadd.f32 %v5020_v11, %v5019_v19 }
 0x312   : > { %v5023_v34 = vadd.f32 %v5022_v15, %v5021_v45 }
 0x314   : > { %v5024_v7 = vrot.slane %v5023_v34, 4 }
 0x316   : > { %v5025_v23 = vadd.f32 %v5024_v7, %v5023_v34 }
 0x318   : > { %v5026_v2 = vrot.slane %v5025_v23, 2 }
 0x31a   : > { %v5027_v16 = vadd.f32 %v5026_v2, %v5025_v23 }
 0x31c   : > { %v5028_v1 = vrot.slane %v5027_v16, 1 }
 0x31e   : > { %v7817_v28 = vadd.f32 %v5028_v1, %v5027_v16 }
 0x320   : > { %v7820_v54 = vmul.f32 0.00390625, %v7817_v28 }
 0x322   : > { %v5031_v43 = vsub.f32 %v4929_v42, %v7820_v54  ;;  %v5032_v12 = vsub.f32 %v4930_v24, %v7820_v54  ;;  %v5033_v40 = vsub.f32 %v4931_v38, %v7820_v54  ;;  %v5034_v13 = vsub.f32 %v4932_v9, %v7820_v54 }
 0x323   : > { %v5035_v45 = vsub.f32 %v4933_v61, %v7820_v54  ;;  %v5036_v37 = vsub.f32 %v4934_v51, %v7820_v54  ;;  %v5037_v3 = vsub.f32 %v4935_v63, %v7820_v54  ;;  %v5038_v61 = vsub.f32 %v4936_v60, %v7820_v54 }
 0x324   : > { %v5063_v19 = vmul.f32 %v5031_v43, %v5031_v43  ;;  %v5064_v11 = vmul.f32 %v5032_v12, %v5032_v12  ;;  %v5065_v15 = vmul.f32 %v5033_v40, %v5033_v40  ;;  %v5066_v42 = vmul.f32 %v5034_v13, %v5034_v13 }
 0x325   : > { %v5067_v9 = vmul.f32 %v5035_v45, %v5035_v45  ;;  %v5068_v21 = vmul.f32 %v5036_v37, %v5036_v37  ;;  %v5039_v16 = vsub.f32 %v4937_v59, %v7820_v54  ;;  %v5069_v1 = vmul.f32 %v5037_v3, %v5037_v3 }
 0x326   : > { %v5095_v24 = vsel %vm8042_vm10, %v5063_v19, 0.0  ;;  %v5096_v38 = vsel %vm8043_vm11, %v5064_v11, 0.0  ;;  %v5098_v7 = vsel %vm8044_vm12, %v5065_v15, 0.0  ;;  %v5100_v51 = vsel %vm8045_vm4, %v5066_v42, 0.0  ;;  %vm8057_vm10 = vmmov %vm8023_vm0 }
 0x327   : > { %v5097_v34 = vadd.f32 %v5096_v38, %v5095_v24  ;;  %v5102_v43 = vsel %vm8046_vm7, %v5067_v9, 0.0  ;;  %v5040_v12 = vsub.f32 %v4938_v36, %v7820_v54  ;;  %v5070_v40 = vmul.f32 %v5038_v61, %v5038_v61  ;;  %vm8058_vm11 = vmmov %vm8023_vm0 }
 0x328   : > { %v5104_v26 = vsel %vm8047_vm8, %v5068_v21, 0.0  ;;  %v5041_v13 = vsub.f32 %v4939_v18, %v7820_v54  ;;  %v5071_v19 = vmul.f32 %v5039_v16, %v5039_v16  ;;  %v5106_v11 = vsel %vm8048_vm13, %v5069_v1, 0.0  ;;  %vm8059_vm12 = vmmov %vm8023_vm0 }
 0x329   : > { %v5099_v23 = vadd.f32 %v5098_v7, %v5097_v34  ;;  %v5042_v45 = vsub.f32 %v4940_v49, %v7820_v54  ;;  %v5072_v15 = vmul.f32 %v5040_v12, %v5040_v12  ;;  %v5108_v57 = vsel %vm8049_vm14, %v5070_v40, 0.0  ;;  %vm8060_vm4 = vmmov %vm8023_vm0 }
 0x32a   : > { %v5043_v37 = vsub.f32 %v4941_v47, %v7820_v54  ;;  %v5073_v42 = vmul.f32 %v5041_v13, %v5041_v13  ;;  %v5110_v24 = vsel %vm8050_vm9, %v5071_v19, 0.0  ;;  %v5044_v38 = vsub.f32 %v4942_v39, %v7820_v54  ;;  %vm8061_vm7 = vmmov %vm8023_vm0 }
 0x32b   : > { %v5101_v2 = vadd.f32 %v5100_v51, %v5099_v23  ;;  %v5074_v34 = vmul.f32 %v5042_v45, %v5042_v45  ;;  %v5112_v41 = vsel %vm8051_vm15, %v5072_v15, 0.0  ;;  %v5045_v3 = vsub.f32 %v4943_v33, %v7820_v54  ;;  %vm8062_vm8 = vmmov %vm8023_vm0 }
 0x32c   : > { %v5075_v9 = vmul.f32 %v5043_v37, %v5043_v37  ;;  %v5114_v7 = vsel %vm8052_vm2, %v5073_v42, 0.0  ;;  %v5046_v23 = vsub.f32 %v4944_v48, %v7820_v54  ;;  %v5076_v61 = vmul.f32 %v5044_v38, %v5044_v38  ;;  %vm8063_vm13 = vmmov %vm8023_vm0 }
 0x32d   : > { %v5103_v63 = vadd.f32 %v5102_v43, %v5101_v2  ;;  %v5116_v35 = vsel %vm8023_vm0, %v5074_v34, 0.0  ;;  %v5047_v21 = vsub.f32 %v4945_v20, %v7820_v54  ;;  %v5077_v51 = vmul.f32 %v5045_v3, %v5045_v3  ;;  %vm8064_vm14 = vmmov %vm8023_vm0 }
 0x32e   : > { %v5118_v2 = vsel %vm8053_vm1, %v5075_v9, 0.0  ;;  %v5048_v16 = vsub.f32 %v4946_v44, %v7820_v54  ;;  %v5078_v1 = vmul.f32 %v5046_v23, %v5046_v23  ;;  %v5120_v52 = vsel %vm8054_vm3, %v5076_v61, 0.0  ;;  %vm8065_vm9 = vmmov %vm8023_vm0 }
 0x32f   : > { %v5105_v60 = vadd.f32 %v5104_v26, %v5103_v63  ;;  %v5049_v43 = vsub.f32 %v4947_v53, %v7820_v54  ;;  %v5079_v63 = vmul.f32 %v5047_v21, %v5047_v21  ;;  %v5122_v12 = vsel %vm8055_vm6, %v5077_v51, 0.0  ;;  %vm8066_vm15 = vmmov %vm8023_vm0 }
 0x330   : > { %v5050_v40 = vsub.f32 %v4948_v0, %v7820_v54  ;;  %v5080_v26 = vmul.f32 %v5048_v16, %v5048_v16  ;;  %v5124_v10 = vsel %vm8056_vm5, %v5078_v1, 0.0  ;;  %v5053_v45 = vsub.f32 %v4951_v14, %v7820_v54  ;;  %vm8067_vm2 = vmmov %vm8023_vm0 }
 0x331   : > { %v5107_v59 = vadd.f32 %v5106_v11, %v5105_v60  ;;  %v5051_v60 = vsub.f32 %v4949_v29, %v7820_v54  ;;  %v5081_v13 = vmul.f32 %v5049_v43, %v5049_v43  ;;  %v5126_v19 = vsel %vm8057_vm10, %v5079_v63, 0.0  ;;  %vm8068_vm1 = vmmov %vm8023_vm0 }
 0x332   : > { %v5052_v11 = vsub.f32 %v4950_v4, %v7820_v54  ;;  %v5128_v30 = vsel %vm8058_vm11, %v5080_v26, 0.0  ;;  %v5055_v42 = vsub.f32 %v4953_v55, %v7820_v54  ;;  %v5056_v38 = vsub.f32 %v4954_v5, %v7820_v54  ;;  %vm8069_vm3 = vmmov %vm8023_vm0 }
 0x333   : > { %v5109_v36 = vadd.f32 %v5108_v57, %v5107_v59  ;;  %v5082_v59 = vmul.f32 %v5050_v40, %v5050_v40  ;;  %v5083_v15 = vmul.f32 %v5051_v60, %v5051_v60  ;;  %v5130_v57 = vsel %vm8059_vm12, %v5081_v13, 0.0  ;;  %vm8070_vm6 = vmmov %vm8023_vm0 }
 0x334   : > { %v5084_v37 = vmul.f32 %v5052_v11, %v5052_v11  ;;  %v5058_v9 = vsub.f32 %v4956_v8, %v7820_v54  ;;  %v5061_v21 = vsub.f32 %v4959_v17, %v7820_v54  ;;  %vm8071_vm5 = vmmov %vm8023_vm0  ;;  %vm5164_vm10 = vcmask 1040384  }
 0x335   : > { %v5111_v18 = vadd.f32 %v5110_v24, %v5109_v36  ;;  %v5054_v36 = vsub.f32 %v4952_v50, %v7820_v54  ;;  %v5132_v46 = vsel %vm8060_vm4, %v5082_v59, 0.0  ;;  %v5085_v24 = vmul.f32 %v5053_v45, %v5053_v45 }
 0x336   : > { %v5136_v6 = vsel %vm8062_vm8, %v5084_v37, 0.0  ;;  %v5093_v1 = vmul.f32 %v5061_v21, %v5061_v21  ;;  %vm5166_vm11 = vcmask 58368  }
 0x337   : > { %v5113_v49 = vadd.f32 %v5112_v41, %v5111_v18  ;;  %v5134_v18 = vsel %vm8061_vm7, %v5083_v15, 0.0  ;;  %v5086_v34 = vmul.f32 %v5054_v36, %v5054_v36  ;;  %v5057_v41 = vsub.f32 %v4955_v56, %v7820_v54 }
 0x338   : > { %v5138_v3 = vsel %vm8063_vm13, %v5085_v24, 0.0 }
 0x339   : > { %v5115_v47 = vadd.f32 %v5114_v7, %v5113_v49  ;;  %v5087_v49 = vmul.f32 %v5055_v42, %v5055_v42  ;;  %v5088_v7 = vmul.f32 %v5056_v38, %v5056_v38  ;;  %v5140_v31 = vsel %vm8064_vm14, %v5086_v34, 0.0 }
 0x33a   : > { %v5089_v23 = vmul.f32 %v5057_v41, %v5057_v41 }
 0x33b   : > { %v5117_v39 = vadd.f32 %v5116_v35, %v5115_v47  ;;  %v5059_v47 = vsub.f32 %v4957_v62, %v7820_v54  ;;  %v5142_v61 = vsel %vm8065_vm9, %v5087_v49, 0.0  ;;  %v5060_v35 = vsub.f32 %v4958_v58, %v7820_v54 }
 0x33c   : > { %v5144_v25 = vsel %vm8066_vm15, %v5088_v7, 0.0 }
 0x33d   : > { %v5119_v33 = vadd.f32 %v5118_v2, %v5117_v39  ;;  %v5090_v39 = vmul.f32 %v5058_v9, %v5058_v9  ;;  %v5091_v51 = vmul.f32 %v5059_v47, %v5059_v47  ;;  %v5146_v2 = vsel %vm8067_vm2, %v5089_v23, 0.0 }
 0x33e   : > { %v5092_v16 = vmul.f32 %v5060_v35, %v5060_v35 }
 0x33f   : > { %v5121_v48 = vadd.f32 %v5120_v52, %v5119_v33  ;;  %v5062_v33 = vsub.f32 %v4960_v32, %v7820_v54  ;;  %v5148_v27 = vsel %vm8023_vm0, %v5090_v39, 0.0  ;;  %v5150_v52 = vsel %vm8068_vm1, %v5091_v51, 0.0 }
 0x340   : > { %v5152_v17 = vsel %vm8069_vm3, %v5092_v16, 0.0 }
 0x341   : > { %v5123_v20 = vadd.f32 %v5122_v12, %v5121_v48  ;;  %v5094_v43 = vmul.f32 %v5062_v33, %v5062_v33  ;;  %v5154_v12 = vsel %vm8070_vm6, %v5093_v1, 0.0 }
 0x343   : > { %v5125_v44 = vadd.f32 %v5124_v10, %v5123_v20  ;;  %v5156_v40 = vsel %vm8071_vm5, %v5094_v43, 0.0 }
 0x345   : > { %v5127_v53 = vadd.f32 %v5126_v19, %v5125_v44 }
 0x347   : > { %v5129_v0 = vadd.f32 %v5128_v30, %v5127_v53 }
 0x349   : > { %v5131_v29 = vadd.f32 %v5130_v57, %v5129_v0 }
 0x34b   : > { %v5133_v4 = vadd.f32 %v5132_v46, %v5131_v29 }
 0x34d   : > { %v5135_v14 = vadd.f32 %v5134_v18, %v5133_v4 }
 0x34f   : > { %v5137_v50 = vadd.f32 %v5136_v6, %v5135_v14 }
 0x351   : > { %v5139_v55 = vadd.f32 %v5138_v3, %v5137_v50 }
 0x353   : > { %v5141_v5 = vadd.f32 %v5140_v31, %v5139_v55 }
 0x355   : > { %v5143_v56 = vadd.f32 %v5142_v61, %v5141_v5 }
 0x357   : > { %v5145_v8 = vadd.f32 %v5144_v25, %v5143_v56 }
 0x359   : > { %v5147_v62 = vadd.f32 %v5146_v2, %v5145_v8 }
 0x35b   : > { %v5149_v58 = vadd.f32 %v5148_v27, %v5147_v62 }
 0x35d   : > { %v5151_v48 = vadd.f32 %v5150_v52, %v5149_v58 }
 0x35f   : > { %v5153_v63 = vadd.f32 %v5152_v17, %v5151_v48 }
 0x361   : > { %v5155_v20 = vadd.f32 %v5154_v12, %v5153_v63 }
 0x363   : > { %v5157_v22 = vadd.f32 %v5156_v40, %v5155_v20 }
 0x365   : > { %v5158_v32 = vrot.slane %v5157_v22, 4 }
 0x367   : > { %v5159_v54 = vadd.f32 %v5158_v32, %v5157_v22 }
 0x369   : > { %v5160_v26 = vrot.slane %v5159_v54, 2 }
 0x36b   : > { %v5161_v10 = vadd.f32 %v5160_v26, %v5159_v54 }
 0x36d   : > { %v5162_v44 = vrot.slane %v5161_v10, 1 }
 0x36f   : > { %v5163_v60 = vadd.f32 %v5162_v44, %v5161_v10 }
 0x371   : > { %v5165_v13 = vsel %vm5164_vm10, %v7817_v28, %v5163_v60 }
 0x372   : > { %5167 = vst.msk [vmem:[%s465_s16] sm:$0x3] %vm5166_vm11, %v5165_v13 }
 0x373 PF: > { %s18_s2 = sadd.s32 1, %s5986_s2   ;;  %s8072_s24 = smov %s5982_s1 }
 0x374   : > { %p15_p5 = scmp.ge.s32.totalorder %s18_s2, 4   ;;  %s8073_s1 = smov %s8075_s25 }
 0x376   :  { %17 = sbr.rel (!%p15_p5) target bundleno = 2 (0x2), region = 95 }

// kernel: double_conv.2
= control target key start
LH: loop header
LB: loop body
LE: loop exit
PB: predicated region body
PF: predicated region fallthrough
CT: control target
= control target key end

     0   :  { %s5509_s18 = smov 0   ;;  %s5511_s19 = smov 0   ;;  %s7163_s0 = inlined_call_operand.vmem [shape: bf16[2,16,16,4], index: 0, kind: input, shape index: {}, may-alias: {0,1,2}]   ;;  %s7164_s1 = inlined_call_operand.vmem [shape: bf16[2,16,16,4], index: 1, kind: input, shape index: {}, may-alias: {0,1,2}]   ;;  %s7165_s2 = inlined_call_operand.vmem [shape: bf16[2,16,16,4], index: 2, kind: input, shape index: {}, may-alias: {0,1,2}]   ;;  %s7166_s3 = inlined_call_operand.vmem [shape: bf16[36,8], index: 3, kind: input, shape index: {}]   ;;  %s7167_s4 = inlined_call_operand.vmem [shape: bf16[2,16,16,8], index: 4, kind: output, shape index: {0}]   ;;  %s7168_s5 = inlined_call_operand.vmem [shape: f32[2,1,2,8], index: 5, kind: output, shape index: {1}]  }
   0x1   :  { %s5513_s20 = smov 0  }
   0x2 LB: > { %s28_s1 = sadd.s32 1, %s5464_s19  ;;  %p5005_p0 = scmp.ge.s32.totalorder %s5468_s20, 1  ;;  %s5468_s20 = sphi %s5513_s20, %s16_s20   ;;  %s5464_s19 = sphi %s5511_s19, %s7208_s19   ;;  %s5460_s18 = sphi %s5509_s18, %s7207_s18  }
   0x3   : > { %p30_p1 = scmp.ge.s32.totalorder %s28_s1, 2  ;;  %p278_p2 = scmp.lt.s32.totalorder %s5468_s20, 3 }
   0x5   : > { %s7210_s1 = smov (%p30_p1, %s28_s1), 0  ;;  %p279_p3 = pnand %p5005_p0, %p278_p2 }
   0x6   : > { %p350_p4 = scmp.lt.s32.totalorder (!%p279_p3), %s5460_s18, 1  ;;  %vm413_vm0 = vcmask (!%p279_p3), 24576   ;;  %vm414_vm1 = vsmask.f32 (!%p279_p3), 256  ;;  %v419_v0 = vld [vmem:[#allocation2 + $0xc] sm:$0x1] (!%p279_p3) }
   0x7   : > { %282 = sbr.rel (%p279_p3) target bundleno = 859 (0x35b), region = 36  ;;  %vm5528_vm2 = vmand (!%p279_p3), %vm413_vm0, %vm414_vm1  ;;  %vm470_vm3 = vsmask.f32 (!%p279_p3), 7938  ;;  %v422_v4 = vld [vmem:[#allocation2 + $0x18] sm:$0x1] (!%p279_p3)  ;;  %vm881_vm6 = vcmask (!%p279_p3), 27648  }
   0x8   : > { %v420_v2 = vsel (!%p279_p3), %vm5528_vm2, 0, %v419_v0  ;;  %vm5537_vm4 = vmand (!%p279_p3), %vm413_vm0, %vm470_vm3  ;;  %v425_v5 = vld [vmem:[#allocation2 + $0x24] sm:$0x1] (!%p279_p3)  ;;  %v423_v6 = vsel (!%p279_p3), %vm5528_vm2, 0, %v422_v4  ;;  %v475_v8 = vld [vmem:[#allocation2 + $0x14] sm:$0x1] (!%p279_p3) }
   0x9   : > { %421 = vst [vmem:[#allocation2 + $0xc] sm:$0x1] (!%p279_p3), %v420_v2  ;;  %v426_v7 = vsel (!%p279_p3), %vm5528_vm2, 0, %v425_v5  ;;  %424 = vst [vmem:[#allocation2 + $0x18] sm:$0x1] (!%p279_p3), %v423_v6  ;;  %v476_v9 = vsel (!%p279_p3), %vm5537_vm4, 0, %v475_v8 }
   0xa   : > { %427 = vst [vmem:[#allocation2 + $0x24] sm:$0x1] (!%p279_p3), %v426_v7  ;;  %v416_v10 = vld [vmem:[#allocation2] sm:$0x1] (!%p279_p3)  ;;  %vm558_vm5 = vsmask.f32 (!%p279_p3), 4368  ;;  %vm5571_vm8 = vmand (!%p279_p3), %vm881_vm6, %vm470_vm3 }
   0xb   : > { %477 = vst [vmem:[#allocation2 + $0x14] sm:$0x1] (!%p279_p3), %v476_v9  ;;  %v417_v11 = vsel (!%p279_p3), %vm5528_vm2, 0, %v416_v10  ;;  %vm5564_vm7 = vmor (!%p279_p3), %vm414_vm1, %vm558_vm5  ;;  %v472_v42 = vld [vmem:[#allocation2 + $0x8] sm:$0x1] (!%p279_p3)  ;;  %vm1856_vm9 = vcmask (!%p279_p3), 1042432  }
   0xc   : > { %418 = vst [vmem:[#allocation2] sm:$0x1] (!%p279_p3), %v417_v11  ;;  %v478_v52 = vld [vmem:[#allocation2 + $0x20] sm:$0x1] (!%p279_p3)  ;;  %v473_v56 = vsel (!%p279_p3), %vm5537_vm4, 0, %v472_v42  ;;  %v5470_v0 = vmov (!%p279_p3), 0  }
   0xd   : > { %v481_v58 = vld [vmem:[#allocation2 + $0x2c] sm:$0x1] (!%p279_p3)  ;;  %474 = vst [vmem:[#allocation2 + $0x8] sm:$0x1] (!%p279_p3), %v473_v56  ;;  %v428_v62 = vld [vmem:[#allocation2 + $0x30] sm:$0x1] (!%p279_p3) }
   0xe   : > { %s7212_s18 = smov (!%p350_p4, %s5460_s18), 1  ;;  %v5598_v2 = vrot.slane %v5470_v0, 7  ;;  %v479_v4 = vsel %vm5537_vm4, 0, %v478_v52  ;;  %v482_v5 = vsel %vm5537_vm4, 0, %v481_v58  ;;  %vm1857_vm10 = vcmask 1046532   ;;  %s5471_s24 = smov 12  }
   0xf   : > { %s5260_s2 = sshll.u32 %s7212_s18, 7  ;;  %480 = vst [vmem:[#allocation2 + $0x20] sm:$0x1] %v479_v4  ;;  %483 = vst [vmem:[#allocation2 + $0x2c] sm:$0x1] %v482_v5  ;;  %v429_v8 = vsel %vm5528_vm2, 0, %v428_v62 }
  0x10   : > { %s5553_s23 = scalar_lea.vmem %s7163_s0, %s5260_s2  ;;  %v883_v32 = vld [vmem:[#allocation2 + $0xc] sm:$0xf]  ;;  %v891_v41 = vld [vmem:[#allocation2 + $0x18] sm:$0xf]  ;;  %v5613_v10 = vrot.slane %v5598_v2, 4  ;;  %vm5624_vm11 = vmor %vm1856_vm9, %vm1857_vm10  ;;  %s5472_s25 = smov 24  }
  0x11   : > { %v526_v12 = vld [vmem:[%s5553_s23] sm:$0xf]  ;;  %v527_v13 = vld [vmem:[%s5553_s23 + $0x4] sm:$0xf]  ;;  %v528_v14 = vld [vmem:[%s5553_s23 + $0x8] sm:$0xf]  ;;  %s6765_s15 = scalar_lea.vmem %s7167_s4, %s5260_s2 }
  0x12   : > { %v561_v15 = vshrl.u32 %v526_v12, 16  ;;  %v564_v16 = vshll.u32 %v526_v12, 16  ;;  %v569_v17 = vshrl.u32 %v527_v13, 16  ;;  %v572_v18 = vshll.u32 %v527_v13, 16  ;;  %v529_v19 = vld [vmem:[%s5553_s23 + $0xc] sm:$0xf] }
  0x13   : > { %v578_v20 = vshrl.u32 %v528_v14, 16  ;;  %v581_v21 = vshll.u32 %v528_v14, 16  ;;  %v586_v22 = vshrl.u32 %v529_v19, 16  ;;  %v589_v23 = vshll.u32 %v529_v19, 16  ;;  %v530_v24 = vld [vmem:[%s5553_s23 + $0x10] sm:$0xf] }
  0x14   : > { %v563_v26 = vrot.slane %v561_v15, 7  ;;  %v571_v27 = vrot.slane %v569_v17, 7  ;;  %v531_v28 = vld [vmem:[%s5553_s23 + $0x14] sm:$0xf]  ;;  %v595_v29 = vshrl.u32 %v530_v24, 16  ;;  %v598_v30 = vshll.u32 %v530_v24, 16 }
  0x15   : > { %v580_v33 = vrot.slane %v578_v20, 7  ;;  %v5575_v34 = vrot.slane %v586_v22, 7  ;;  %v603_v35 = vshrl.u32 %v531_v28, 16  ;;  %v606_v36 = vshll.u32 %v531_v28, 16  ;;  %v888_v46 = vld [vmem:[#allocation2 + $0x14] sm:$0x1] }
  0x16   : > { %v566_v37 = vor.u32 %v564_v16, %v563_v26  ;;  %v567_v38 = vrot.slane %v563_v26, 4  ;;  %v574_v39 = vor.u32 %v572_v18, %v571_v27  ;;  %v576_v40 = vrot.slane %v571_v27, 4  ;;  %v898_v51 = vld [vmem:[#allocation2 + $0x24] sm:$0xf]  ;;  %v1032_v57 = vld [vmem:[#allocation2] sm:$0xf] }
  0x17   : > { %v583_v43 = vor.u32 %v581_v21, %v580_v33  ;;  %v584_v44 = vrot.slane %v580_v33, 4  ;;  %v591_v45 = vor.u32 %v589_v23, %v5575_v34  ;;  %v597_v49 = vrot.slane %v595_v29, 7  ;;  %v5596_v63 = vld [vmem:[%s5553_s23 + $0x18] sm:$0xf]  ;;  %v533_v9 = vld [vmem:[%s5553_s23 + $0x1c] sm:$0xf] }
  0x18   : > { %v575_v47 = vsel %vm5564_vm7, %v567_v38, %v574_v39  ;;  %v884_v48 = vsel %vm5571_vm8, %v566_v37, %v883_v32  ;;  %v5582_v50 = vrot.slane %v603_v35, 7  ;;  %v889_v55 = vsel %vm5528_vm2, %v576_v40, %v888_v46  ;;  %430 = vst [vmem:[#allocation2 + $0x30] sm:$0x1] %v429_v8  ;;  %v484_v13 = vld [vmem:[#allocation2 + $0x38] sm:$0x1]  ;;  %s5473_s26 = smov 20  }
  0x19   : > { %885 = vst [vmem:[#allocation2 + $0xc] sm:$0xf] %v884_v48  ;;  %887 = vst.msk [vmem:[#allocation2 + $0x10] sm:$0xf] %vm881_vm6, %v575_v47  ;;  %v592_v53 = vsel %vm5564_vm7, %v584_v44, %v591_v45  ;;  %v892_v54 = vsel %vm5571_vm8, %v583_v43, %v891_v41  ;;  %v600_v59 = vor.u32 %v598_v30, %v597_v49  ;;  %v601_v60 = vrot.slane %v597_v49, 4  ;;  %s5474_s27 = smov 8  }
  0x1a   : > { %893 = vst [vmem:[#allocation2 + $0x18] sm:$0xf] %v892_v54  ;;  %894 = vst.msk [vmem:[#allocation2 + $0x1c] sm:$0xf] %vm881_vm6, %v592_v53  ;;  %v608_v61 = vor.u32 %v606_v36, %v5582_v50  ;;  %v1033_v11 = vsel %vm5571_vm8, %v5598_v2, %v1032_v57  ;;  %v612_v12 = vshrl.u32 %v5596_v63, 16  ;;  %v620_v14 = vshrl.u32 %v533_v9, 16 }
  0x1b   : > { %890 = vst [vmem:[#allocation2 + $0x14] sm:$0x1] %v889_v55  ;;  %v899_v7 = vsel %vm5571_vm8, %v600_v59, %v898_v51  ;;  %1034 = vst [vmem:[#allocation2] sm:$0xf] %v1033_v11  ;;  %v623_v15 = vshll.u32 %v533_v9, 16  ;;  %v485_v16 = vsel %vm5537_vm4, 0, %v484_v13  ;;  %v1027_v20 = vsel %vm5564_vm7, %v5613_v10, %v5598_v2 }
  0x1c   : > { %v609_v6 = vsel %vm5564_vm7, %v601_v60, %v608_v61  ;;  %900 = vst [vmem:[#allocation2 + $0x24] sm:$0xf] %v899_v7  ;;  %v431_v17 = vld [vmem:[#allocation2 + $0x3c] sm:$0x1]  ;;  %v593_v18 = vrot.slane %v5575_v34, 4  ;;  %v614_v21 = vrot.slane %v612_v12, 7 }
  0x1d   : > { %901 = vst.msk [vmem:[#allocation2 + $0x28] sm:$0xf] %vm881_vm6, %v609_v6  ;;  %486 = vst [vmem:[#allocation2 + $0x38] sm:$0x1] %v485_v16  ;;  %v432_v22 = vsel %vm5528_vm2, 0, %v431_v17  ;;  %v5636_v24 = vrot.slane %v620_v14, 7 }
  0x1e   : > { %1035 = vst.msk [vmem:[#allocation2 + $0x4] sm:$0xf] %vm881_vm6, %v1027_v20  ;;  %1063 = vst.msk [vmem:[#allocation2 + $0xd0] sm:$0xf] %vm881_vm6, %v1027_v20  ;;  %v618_v27 = vrot.slane %v614_v21, 4  ;;  %v610_v29 = vrot.slane %v5582_v50, 4 }
  0x1f   : > { %433 = vst [vmem:[#allocation2 + $0x3c] sm:$0x1] %v432_v22  ;;  %v625_v30 = vor.u32 %v623_v15, %v5636_v24  ;;  %v1036_v40 = vld [vmem:[#allocation2 + $0x8] sm:$0x1]  ;;  %v895_v43 = vld [vmem:[#allocation2 + $0x20] sm:$0x1] }
  0x20   : > { %v5395_v23 = vld [vmem:[#allocation2 + $0xc] sm:$0xff]   ;;  %v1037_v42 = vsel %vm5528_vm2, %v5613_v10, %v1036_v40  ;;  %v615_v45 = vshll.u32 %v5596_v63, 16  ;;  %v627_v46 = vrot.slane %v5636_v24, 4  ;;  %v896_v51 = vsel %vm5528_vm2, %v593_v18, %v895_v43  ;;  %v5657_v57 = vld [vmem:[%s5553_s23 + $0x20] sm:$0xf]  ;;  %s5475_s28 = smov 32  }
  0x21   : > { %v5396_v26 = vld [vmem:[#allocation2 + $0x18] sm:$0xff]   ;;  %2196 = vrot.lane.b32.xlu0 %v5395_v23, %s5471_s24  ;;  %v2806_v32 = vld [vmem:[#allocation2 + $0xc] sm:$0xe]  ;;  %v2807_v33 = vld [vmem:[#allocation2 + $0x10] sm:$0xf]  ;;  %v626_v37 = vsel %vm5564_vm7, %v618_v27, %v625_v30  ;;  %v629_v27 = vshrl.u32 %v5657_v57, 16 }
  0x22   : > { %v5397_v28 = vld [vmem:[#allocation2 + $0x18] sm:$0xff]   ;;  %2198 = vrot.lane.b32.xlu1 %v5396_v26, %s5471_s24  ;;  %v2808_v34 = vld [vmem:[#allocation2 + $0x14] sm:$0x1]  ;;  %v5111_v36 = vrot.slane %v2806_v32, 9  ;;  %v2904_v38 = vrot.slane %v2807_v33, 5  ;;  %v5661_v7 = vor.u32 %v615_v45, %v614_v21  ;;  %s5476_s29 = smov 4  }
  0x23   : > { %v2907_v39 = vrot.slane %v2808_v34, 5  ;;  %v1760_v41 = vld [vmem:[#allocation2] sm:$0xe]  ;;  %908 = vst.msk [vmem:[#allocation2 + $0x34] sm:$0xf] %vm881_vm6, %v626_v37  ;;  %s5477_s30 = smov 16  }
  0x24   : > { %v5398_v35 = vld [vmem:[#allocation2 + $0x24] sm:$0xff]   ;;  %v3850_v44 = vld [vmem:[#allocation2 + $0x18] sm:$0xe]  ;;  %v2905_v47 = vsel %vm5624_vm11, %v5111_v36, %v2904_v38  ;;  %v2906_v48 = vrot.slane %v2904_v38, 4  ;;  %1038 = vst [vmem:[#allocation2 + $0x8] sm:$0x1] %v1037_v42 }
  0x25   : > { %3240 = vrot.lane.b32.xlu0 %v5397_v28, %s5472_s25  ;;  %v1761_v49 = vld [vmem:[#allocation2 + $0x4] sm:$0xf]  ;;  %v5047_v50 = vrot.slane %v1760_v41, 9  ;;  %v3851_v52 = vld [vmem:[#allocation2 + $0x1c] sm:$0xf]  ;;  %v5175_v4 = vrot.slane %v3850_v44, 9 }
  0x26   : > { %3242 = vrot.lane.b32.xlu1 %v5398_v35, %s5472_s25  ;;  %v1861_v53 = vrot.slane %v1761_v49, 5  ;;  %897 = vst [vmem:[#allocation2 + $0x20] sm:$0x1] %v896_v51  ;;  %v3948_v54 = vrot.slane %v3851_v52, 5  ;;  %v1763_v55 = vld [vmem:[#allocation2 + $0xc] sm:$0xe]  ;;  %v2908_v58 = vsel %vm5624_vm11, %v2906_v48, %v2907_v39 }
  0x27   : > { %v1764_v56 = vld [vmem:[#allocation2 + $0x10] sm:$0xf]  ;;  %v1765_v59 = vld [vmem:[#allocation2 + $0x14] sm:$0x1]  ;;  %v5048_v60 = vrot.slane %v1763_v55, 9  ;;  %v5127_v63 = vcombine.low %v2905_v47, %v2908_v58  ;;  %s5478_s6 = smov 28  }
  0x28   : > { %v1868_v61 = vrot.slane %v1764_v56, 5  ;;  %v902_v62 = vld [vmem:[#allocation2 + $0x2c] sm:$0x1]  ;;  %v1863_v0 = vrot.slane %v1861_v53, 4  ;;  %v3853_v5 = vld [vmem:[#allocation2 + $0x24] sm:$0xe]  ;;  %v1862_v20 = vsel %vm5624_vm11, %v5047_v50, %v1861_v53 }
  0x29   : > { %v3854_v6 = vld [vmem:[#allocation2 + $0x28] sm:$0xf]  ;;  %vm1260_vm12 = vsmask.f32 3328  ;;  %vm1261_vm13 = vsmask.f32 7440  ;;  %3062 = vrot.lane.b32.xlu0 %v5127_v63, %s5473_s26  ;;  %v903_v14 = vsel %vm5528_vm2, %v610_v29, %v902_v62  ;;  %v3949_v29 = vsel %vm5624_vm11, %v5175_v4, %v3948_v54 }
  0x2a   : > { %v3950_v8 = vrot.slane %v3948_v54, 4  ;;  %v5665_v9 = vsel %vm5624_vm11, %v5048_v60, %v1868_v61  ;;  %v1870_v11 = vrot.slane %v1868_v61, 4  ;;  %v1871_v12 = vrot.slane %v1765_v59, 5  ;;  %v2809_v13 = vld [vmem:[#allocation2 + $0x18] sm:$0xe]  ;;  %vm5695_vm14 = vmor %vm1260_vm12, %vm1261_vm13  ;;  %s5014_s16 = sshll.u32 %s7212_s18, 1 }
  0x2b   : > { %v5176_v15 = vrot.slane %v3853_v5, 9  ;;  %v3955_v16 = vrot.slane %v3854_v6, 5  ;;  %v2810_v17 = vld [vmem:[#allocation2 + $0x1c] sm:$0xf]  ;;  %v5112_v18 = vrot.slane %v2809_v13, 9  ;;  %vm7169_vm15 = vcmask 31744   ;;  %s411_s21 = scalar_lea.vmem %s7168_s5, %s5014_s16 }
  0x2c   : > { %v1872_v21 = vsel %vm5624_vm11, %v1870_v11, %v1871_v12  ;;  %904 = vst [vmem:[#allocation2 + $0x2c] sm:$0x1] %v903_v14  ;;  %v2911_v22 = vrot.slane %v2810_v17, 5  ;;  %v1212_v23 = vld [vmem:[#allocation2] sm:$0xf]  ;;  %vm1743_vm0 = vcmask 64544  }
  0x2d   : > { %v1213_v26 = vld [vmem:[#allocation2 + $0x4] sm:$0xf]  ;;  %v1762_v28 = vld [vmem:[#allocation2 + $0x8] sm:$0x1]  ;;  %v5064_v30 = vcombine.low %v5665_v9, %v1872_v21  ;;  %v3957_v32 = vrot.slane %v3955_v16, 4  ;;  %v1264_v34 = vshrl.u32 %v1212_v23, 16  ;;  %v3956_v37 = vsel %vm5624_vm11, %v5176_v15, %v3955_v16 }
  0x2e   : > { %v1214_v33 = vld [vmem:[#allocation2 + $0x8] sm:$0x1]  ;;  %v1864_v35 = vrot.slane %v1762_v28, 5  ;;  %v3852_v36 = vld [vmem:[#allocation2 + $0x20] sm:$0x1]  ;;  %v5682_v39 = vsel %vm5624_vm11, %v5112_v18, %v2911_v22  ;;  %v2913_v40 = vrot.slane %v2911_v22, 4 }
  0x2f   : > { %v2811_v38 = vld [vmem:[#allocation2 + $0x20] sm:$0x1]  ;;  %v3951_v41 = vrot.slane %v3852_v36, 5  ;;  %v1266_v43 = vrot.slane %v1264_v34, 4  ;;  %v1267_v44 = vshll.u32 %v1212_v23, 16  ;;  %v1273_v47 = vshll.u32 %v1213_v26, 16 }
  0x30   : > { %v2914_v42 = vrot.slane %v2811_v38, 5  ;;  %v1865_v45 = vsel %vm5624_vm11, %v1863_v0, %v1864_v35  ;;  %v1277_v48 = vshrl.u32 %v1213_v26, 16  ;;  %v1283_v49 = vshll.u32 %v1214_v33, 16  ;;  %v2264_v50 = vld [vmem:[#allocation2 + $0x18] sm:$0xf] }
  0x31   : > { %v5063_v51 = vcombine.low %v1862_v20, %v1865_v45  ;;  %v3952_v52 = vsel %vm5624_vm11, %v3950_v8, %v3951_v41  ;;  %v1269_v54 = vrot.slane %v1267_v44, 5  ;;  %v2265_v55 = vld [vmem:[#allocation2 + $0x1c] sm:$0xf]  ;;  %v1275_v59 = vrot.slane %v1273_v47, 5  ;;  %v2266_v61 = vld [vmem:[#allocation2 + $0x20] sm:$0x1] }
  0x32   : > { %v2915_v53 = vsel %vm5624_vm11, %v2913_v40, %v2914_v42  ;;  %v5191_v56 = vcombine.low %v3949_v29, %v3952_v52  ;;  %v1279_v60 = vrot.slane %v1277_v48, 4  ;;  %v1285_v0 = vrot.slane %v1283_v49, 5  ;;  %v1215_v17 = vld [vmem:[#allocation2 + $0xc] sm:$0xf]  ;;  %v1216_v23 = vld [vmem:[#allocation2 + $0x10] sm:$0xf] }
  0x33   : > { %v5128_v58 = vcombine.low %v5682_v39, %v2915_v53  ;;  %2019 = vrot.lane.b32.xlu1 %v5063_v51, %s5474_s27  ;;  %v3855_v62 = vld [vmem:[#allocation2 + $0x2c] sm:$0x1]  ;;  %v1270_v63 = vor.u32 %v1269_v54, %v1266_v43  ;;  %v2334_v4 = vshrl.u32 %v2264_v50, 16  ;;  %v2337_v5 = vshll.u32 %v2264_v50, 16  ;;  %v1217_v34 = vld [vmem:[#allocation2 + $0x14] sm:$0x1] }
  0x34   : > { %4106 = vrot.lane.b32.xlu0 %v5191_v56, %s5475_s28  ;;  %v3958_v6 = vrot.slane %v3855_v62, 5  ;;  %v1280_v9 = vor.u32 %v1279_v60, %v1275_v59  ;;  %v2343_v11 = vshll.u32 %v2265_v55, 16  ;;  %v2347_v12 = vshrl.u32 %v2265_v55, 16  ;;  %v3309_v47 = vld [vmem:[#allocation2 + $0x28] sm:$0xf] }
  0x35   : > { %v1271_v13 = vrot.slane %v1270_v63, 4  ;;  %v2336_v14 = vrot.slane %v2334_v4, 4  ;;  %v2339_v15 = vrot.slane %v2337_v5, 5  ;;  %v2353_v16 = vshll.u32 %v2266_v61, 16  ;;  %v3310_v51 = vld [vmem:[#allocation2 + $0x2c] sm:$0x1] }
  0x36   : > { %v3959_v18 = vsel %vm5624_vm11, %v3957_v32, %v3958_v6  ;;  %v1281_v20 = vrot.slane %v1280_v9, 4  ;;  %v2345_v21 = vrot.slane %v2343_v11, 5  ;;  %v2349_v22 = vrot.slane %v2347_v12, 4  ;;  %v3308_v32 = vld [vmem:[#allocation2 + $0x24] sm:$0xf] }
  0x37   : > { %2021 = vrot.lane.b32.xlu1 %v5064_v30, %s5474_s27  ;;  %v5192_v26 = vcombine.low %v3956_v37, %v3959_v18  ;;  %v1276_v28 = vsel %vm5695_vm14, %v1271_v13, %v1275_v59  ;;  %v2340_v29 = vor.u32 %v2339_v15, %v2336_v14  ;;  %v2355_v33 = vrot.slane %v2353_v16, 5  ;;  %v2261_v59 = vld [vmem:[#allocation2 + $0xc] sm:$0xf]  ;;  %v2262_v6 = vld [vmem:[#allocation2 + $0x10] sm:$0xf] }
  0x38   : > { %v1286_v35 = vsel %vm5695_vm14, %v1281_v20, %v1285_v0  ;;  %v2350_v36 = vor.u32 %v2349_v22, %v2345_v21  ;;  %v1288_v38 = vshrl.u32 %v1215_v17, 16  ;;  %v1291_v39 = vshll.u32 %v1215_v17, 16  ;;  %v2263_v18 = vld [vmem:[#allocation2 + $0x14] sm:$0x1]  ;;  %v1218_v20 = vld [vmem:[#allocation2 + $0x18] sm:$0xf] }
  0x39   : > { %4108 = vrot.lane.b32.xlu0 %v5192_v26, %s5475_s28  ;;  %v5031_v40 = vcombine.low %v1276_v28, %v1286_v35  ;;  %v2341_v41 = vrot.slane %v2340_v29, 4  ;;  %v1297_v42 = vshll.u32 %v1216_v23, 16  ;;  %v1301_v30 = vshrl.u32 %v1216_v23, 16  ;;  %v1219_v35 = vld [vmem:[#allocation2 + $0x1c] sm:$0xf] }
  0x3a   : > { %v2351_v37 = vrot.slane %v2350_v36, 4  ;;  %v1290_v43 = vrot.slane %v1288_v38, 4  ;;  %v1293_v44 = vrot.slane %v1291_v39, 5  ;;  %v1307_v45 = vshll.u32 %v1217_v34, 16  ;;  %v1220_v36 = vld [vmem:[#allocation2 + $0x20] sm:$0x1] }
  0x3b   : > { %3064 = vrot.lane.b32.xlu1 %v5128_v58, %s5473_s26  ;;  %v2346_v48 = vsel %vm5695_vm14, %v2341_v41, %v2345_v21  ;;  %v1299_v49 = vrot.slane %v1297_v42, 5  ;;  %v1303_v50 = vrot.slane %v1301_v30, 4  ;;  %v3378_v52 = vshrl.u32 %v3308_v32, 16 }
  0x3c   : > { %v2356_v53 = vsel %vm5695_vm14, %v2351_v37, %v2355_v33  ;;  %v1294_v54 = vor.u32 %v1293_v44, %v1290_v43  ;;  %v1309_v55 = vrot.slane %v1307_v45, 5  ;;  %v3381_v56 = vshll.u32 %v3308_v32, 16 }
  0x3d   : > { %1695 = vrot.lane.b32.xlu0 %v5031_v40, %s5476_s29  ;;  %v5096_v60 = vcombine.low %v2346_v48, %v2356_v53  ;;  %v1304_v61 = vor.u32 %v1303_v50, %v1299_v49  ;;  %v3380_v58 = vrot.slane %v3378_v52, 4  ;;  %v3387_v62 = vshll.u32 %v3309_v47, 16  ;;  %v3305_v48 = vld [vmem:[#allocation2 + $0x18] sm:$0xf]  ;;  %v3306_v53 = vld [vmem:[#allocation2 + $0x1c] sm:$0xf] }
  0x3e   : > { %v1295_v63 = vrot.slane %v1294_v54, 4  ;;  %v3383_v0 = vrot.slane %v3381_v56, 5  ;;  %v3391_v4 = vshrl.u32 %v3309_v47, 16  ;;  %v3397_v5 = vshll.u32 %v3310_v51, 16 }
  0x3f   : > { %2743 = vrot.lane.b32.xlu1 %v5096_v60, %s5477_s30  ;;  %v1305_v9 = vrot.slane %v1304_v61, 4  ;;  %v3389_v11 = vrot.slane %v3387_v62, 5  ;;  %v2310_v12 = vshrl.u32 %v2261_v59, 16  ;;  %v2313_v13 = vshll.u32 %v2261_v59, 16  ;;  %v3307_v62 = vld [vmem:[#allocation2 + $0x20] sm:$0x1] }
  0x40   : > { %v1300_v14 = vsel %vm5695_vm14, %v1295_v63, %v1299_v49  ;;  %v3384_v15 = vor.u32 %v3383_v0, %v3380_v58  ;;  %v3393_v16 = vrot.slane %v3391_v4, 4  ;;  %v3399_v17 = vrot.slane %v3397_v5, 5 }
  0x41   : > { %v1310_v21 = vsel %vm5695_vm14, %v1305_v9, %v1309_v55  ;;  %v2312_v22 = vrot.slane %v2310_v12, 4  ;;  %v2315_v23 = vrot.slane %v2313_v13, 5  ;;  %v2319_v26 = vshll.u32 %v2262_v6, 16  ;;  %v1221_v9 = vld [vmem:[#allocation2 + $0x24] sm:$0xf] }
  0x42   : > { %v5032_v28 = vcombine.low %v1300_v14, %v1310_v21  ;;  %v3385_v29 = vrot.slane %v3384_v15, 4  ;;  %v3394_v33 = vor.u32 %v3393_v16, %v3389_v11  ;;  %v2323_v34 = vshrl.u32 %v2262_v6, 16  ;;  %v1222_v15 = vld [vmem:[#allocation2 + $0x28] sm:$0xf]  ;;  %v1223_v21 = vld [vmem:[#allocation2 + $0x2c] sm:$0x1] }
  0x43   : > { %v2316_v38 = vor.u32 %v2315_v23, %v2312_v22  ;;  %v2321_v39 = vrot.slane %v2319_v26, 5  ;;  %v2329_v32 = vshll.u32 %v2263_v18, 16  ;;  %v1312_v40 = vshrl.u32 %v1218_v20, 16 }
  0x44   : > { %1697 = vrot.lane.b32.xlu0 %v5032_v28, %s5476_s29  ;;  %v3390_v41 = vsel %vm5695_vm14, %v3385_v29, %v3389_v11  ;;  %v3395_v42 = vrot.slane %v3394_v33, 4  ;;  %v2325_v30 = vrot.slane %v2323_v34, 4  ;;  %v1315_v37 = vshll.u32 %v1218_v20, 16  ;;  %v1766_v29 = vld [vmem:[#allocation2 + $0x18] sm:$0xe] }
  0x45   : > { %v2317_v43 = vrot.slane %v2316_v38, 4  ;;  %v2331_v44 = vrot.slane %v2329_v32, 5  ;;  %v1314_v45 = vrot.slane %v1312_v40, 4  ;;  %v1321_v47 = vshll.u32 %v1219_v35, 16  ;;  %v1767_v38 = vld [vmem:[#allocation2 + $0x1c] sm:$0xf] }
  0x46   : > { %v3400_v49 = vsel %vm5695_vm14, %v3395_v42, %v3399_v17  ;;  %v2326_v50 = vor.u32 %v2325_v30, %v2321_v39  ;;  %v1317_v51 = vrot.slane %v1315_v37, 5  ;;  %v1325_v52 = vshrl.u32 %v1219_v35, 16  ;;  %v1768_v42 = vld [vmem:[#allocation2 + $0x20] sm:$0x1] }
  0x47   : > { %v5160_v54 = vcombine.low %v3390_v41, %v3400_v49  ;;  %v2322_v55 = vsel %vm5695_vm14, %v2317_v43, %v2321_v39  ;;  %v1323_v56 = vrot.slane %v1321_v47, 5  ;;  %v1331_v59 = vshll.u32 %v1220_v36, 16 }
  0x48   : > { %v2327_v60 = vrot.slane %v2326_v50, 4  ;;  %v1318_v61 = vor.u32 %v1317_v51, %v1314_v45  ;;  %v1327_v58 = vrot.slane %v1325_v52, 4  ;;  %v3354_v63 = vshrl.u32 %v3305_v48, 16  ;;  %v1769_v45 = vld [vmem:[#allocation2 + $0x24] sm:$0xe] }
  0x49   : > { %3787 = vrot.lane.b32.xlu1 %v5160_v54, %s5478_s6  ;;  %v1333_v0 = vrot.slane %v1331_v59, 5  ;;  %v3357_v4 = vshll.u32 %v3305_v48, 16  ;;  %v3363_v5 = vshll.u32 %v3306_v53, 16  ;;  %v3367_v6 = vshrl.u32 %v3306_v53, 16  ;;  %v1770_v51 = vld [vmem:[#allocation2 + $0x28] sm:$0xf] }
  0x4a   : > { %v2332_v11 = vsel %vm5695_vm14, %v2327_v60, %v2331_v44  ;;  %v1319_v12 = vrot.slane %v1318_v61, 4  ;;  %v1328_v13 = vor.u32 %v1327_v58, %v1323_v56  ;;  %v3356_v14 = vrot.slane %v3354_v63, 4  ;;  %v905_v59 = vld [vmem:[#allocation2 + $0x30] sm:$0xf]  ;;  %v2267_v63 = vld [vmem:[#allocation2 + $0x24] sm:$0xf] }
  0x4b   : > { %v5095_v16 = vcombine.low %v2322_v55, %v2332_v11  ;;  %v3359_v17 = vrot.slane %v3357_v4, 5  ;;  %v3365_v18 = vrot.slane %v3363_v5, 5  ;;  %v3369_v20 = vrot.slane %v3367_v6, 4 }
  0x4c   : > { %v1324_v22 = vsel %vm5695_vm14, %v1319_v12, %v1323_v56  ;;  %v1329_v23 = vrot.slane %v1328_v13, 4  ;;  %v3373_v26 = vshll.u32 %v3307_v62, 16  ;;  %v1336_v28 = vshrl.u32 %v1221_v9, 16  ;;  %v1771_v56 = vld [vmem:[#allocation2 + $0x2c] sm:$0x1] }
  0x4d   : > { %2741 = vrot.lane.b32.xlu0 %v5095_v16, %s5477_s30  ;;  %v3360_v33 = vor.u32 %v3359_v17, %v3356_v14  ;;  %v3370_v34 = vor.u32 %v3369_v20, %v3365_v18  ;;  %v1339_v35 = vshll.u32 %v1221_v9, 16  ;;  %v1345_v36 = vshll.u32 %v1222_v15, 16  ;;  %v2268_v14 = vld [vmem:[#allocation2 + $0x28] sm:$0xf]  ;;  %v2269_v17 = vld [vmem:[#allocation2 + $0x2c] sm:$0x1] }
  0x4e   : > { %v1334_v39 = vsel %vm5695_vm14, %v1329_v23, %v1333_v0  ;;  %v3375_v32 = vrot.slane %v3373_v26, 5  ;;  %v1338_v40 = vrot.slane %v1336_v28, 4  ;;  %v1349_v41 = vshrl.u32 %v1222_v15, 16  ;;  %v2271_v28 = vld [vmem:[#allocation2 + $0x34] sm:$0xf] }
  0x4f   : > { %v5033_v30 = vcombine.low %v1324_v22, %v1334_v39  ;;  %v3361_v37 = vrot.slane %v3360_v33, 4  ;;  %v3371_v43 = vrot.slane %v3370_v34, 4  ;;  %v1341_v44 = vrot.slane %v1339_v35, 5  ;;  %v5399_v33 = vld [vmem:[#allocation2 + $0x24] sm:$0xff]  }
  0x50   : > { %v1347_v47 = vrot.slane %v1345_v36, 5  ;;  %v1351_v48 = vrot.slane %v1349_v41, 4  ;;  %v1355_v49 = vshll.u32 %v1223_v21, 16  ;;  %v5049_v50 = vrot.slane %v1766_v29, 9  ;;  %v909_v21 = vld [vmem:[#allocation2 + $0x38] sm:$0x1] }
  0x51   : > { %1699 = vrot.lane.b32.xlu1 %v5033_v30, %s5476_s29  ;;  %v3366_v52 = vsel %vm5695_vm14, %v3361_v37, %v3365_v18  ;;  %v3376_v53 = vsel %vm5695_vm14, %v3371_v43, %v3375_v32  ;;  %v1342_v54 = vor.u32 %v1341_v44, %v1338_v40  ;;  %v1875_v55 = vrot.slane %v1767_v38, 5  ;;  %v2812_v38 = vld [vmem:[#allocation2 + $0x24] sm:$0xe]  ;;  %v2814_v30 = vld [vmem:[#allocation2 + $0x2c] sm:$0x1] }
  0x52   : > { %v5159_v60 = vcombine.low %v3366_v52, %v3376_v53  ;;  %v1352_v61 = vor.u32 %v1351_v48, %v1347_v47  ;;  %v1357_v58 = vrot.slane %v1355_v49, 5  ;;  %v1878_v62 = vrot.slane %v1768_v42, 5  ;;  %v2813_v42 = vld [vmem:[#allocation2 + $0x28] sm:$0xf] }
  0x53   : > { %v1343_v0 = vrot.slane %v1342_v54, 4  ;;  %v1876_v4 = vsel %vm5624_vm11, %v5049_v50, %v1875_v55  ;;  %v1877_v5 = vrot.slane %v1875_v55, 4  ;;  %v5050_v6 = vrot.slane %v1769_v45, 9  ;;  %v2816_v54 = vld [vmem:[#allocation2 + $0x34] sm:$0xf] }
  0x54   : > { %3785 = vrot.lane.b32.xlu0 %v5159_v60, %s5478_s6  ;;  %v1353_v9 = vrot.slane %v1352_v61, 4  ;;  %v1882_v11 = vrot.slane %v1770_v51, 5  ;;  %v1885_v12 = vrot.slane %v1771_v56, 5  ;;  %v906_v13 = vsel %vm5571_vm8, %v5661_v7, %v905_v59 }
  0x55   : > { %v1348_v15 = vsel %vm5695_vm14, %v1343_v0, %v1347_v47  ;;  %v1879_v16 = vsel %vm5624_vm11, %v1877_v5, %v1878_v62  ;;  %907 = vst [vmem:[#allocation2 + $0x30] sm:$0xf] %v906_v13  ;;  %v2358_v18 = vshrl.u32 %v2267_v63, 16  ;;  %v2361_v20 = vshll.u32 %v2267_v63, 16  ;;  %v535_v13 = vld [vmem:[%s5553_s23 + $0x24] sm:$0xf] }
  0x56   : > { %v1358_v22 = vsel %vm5695_vm14, %v1353_v9, %v1357_v58  ;;  %v5065_v23 = vcombine.low %v1876_v4, %v1879_v16  ;;  %v1883_v26 = vsel %vm5624_vm11, %v5050_v6, %v1882_v11  ;;  %v1884_v7 = vrot.slane %v1882_v11, 4 }
  0x57   : > { %v5034_v29 = vcombine.low %v1348_v15, %v1358_v22  ;;  %v2360_v34 = vrot.slane %v2358_v18, 4  ;;  %v2363_v35 = vrot.slane %v2361_v20, 5  ;;  %v2367_v36 = vshll.u32 %v2268_v14, 16 }
  0x58   : > { %2023 = vrot.lane.b32.xlu0 %v5065_v23, %s5474_s27  ;;  %v1886_v39 = vsel %vm5624_vm11, %v1884_v7, %v1885_v12  ;;  %v2371_v32 = vshrl.u32 %v2268_v14, 16  ;;  %v2377_v40 = vshll.u32 %v2269_v17, 16  ;;  %v910_v41 = vsel %vm5528_vm2, %v627_v46, %v909_v21  ;;  %v912_v7 = vld [vmem:[#allocation2 + $0x3c] sm:$0xf] }
  0x59   : > { %1701 = vrot.lane.b32.xlu1 %v5034_v29, %s5476_s29  ;;  %v5066_v37 = vcombine.low %v1883_v26, %v1886_v39  ;;  %v2364_v43 = vor.u32 %v2363_v35, %v2360_v34  ;;  %v2369_v44 = vrot.slane %v2367_v36, 5  ;;  %911 = vst [vmem:[#allocation2 + $0x38] sm:$0x1] %v910_v41  ;;  %v2391_v45 = vshll.u32 %v2271_v28, 16  ;;  %v3312_v35 = vld [vmem:[#allocation2 + $0x34] sm:$0xf] }
  0x5a   : > { %v2373_v47 = vrot.slane %v2371_v32, 4  ;;  %v2379_v48 = vrot.slane %v2377_v40, 5  ;;  %v2395_v49 = vshrl.u32 %v2271_v28, 16  ;;  %v5113_v50 = vrot.slane %v2812_v38, 9  ;;  %v487_v32 = vld [vmem:[#allocation2 + $0x44] sm:$0x1] }
  0x5b   : > { %v2365_v51 = vrot.slane %v2364_v43, 4  ;;  %v2393_v52 = vrot.slane %v2391_v45, 5  ;;  %v2918_v53 = vrot.slane %v2813_v42, 5  ;;  %v2921_v24 = vrot.slane %v2814_v30, 5  ;;  %v3857_v43 = vld [vmem:[#allocation2 + $0x34] sm:$0xf] }
  0x5c   : > { %2200 = vrot.lane.b32.xlu0 %v5399_v33, %s5471_s24  ;;  %v5400_v46 = vld [vmem:[#allocation2 + $0x30] sm:$0xff]   ;;  %v2374_v55 = vor.u32 %v2373_v47, %v2369_v44  ;;  %v2397_v59 = vrot.slane %v2395_v49, 4  ;;  %v2925_v12 = vrot.slane %v2816_v54, 5  ;;  %v631_v14 = vrot.slane %v629_v27, 7 }
  0x5d   : > { %v2270_v56 = vld [vmem:[#allocation2 + $0x30] sm:$0xf]  ;;  %2025 = vrot.lane.b32.xlu1 %v5066_v37, %s5474_s27  ;;  %v2370_v60 = vsel %vm5695_vm14, %v2365_v51, %v2369_v44  ;;  %v2919_v62 = vsel %vm5624_vm11, %v5113_v50, %v2918_v53  ;;  %v2920_v5 = vrot.slane %v2918_v53, 4  ;;  %v632_v20 = vshll.u32 %v5657_v57, 16 }
  0x5e   : > { %v2382_v61 = vshrl.u32 %v2270_v56, 16  ;;  %v2385_v58 = vshll.u32 %v2270_v56, 16  ;;  %v2815_v63 = vld [vmem:[#allocation2 + $0x30] sm:$0xe]  ;;  %v2375_v0 = vrot.slane %v2374_v55, 4  ;;  %v2398_v4 = vor.u32 %v2397_v59, %v2393_v52 }
  0x5f   : > { %v5114_v6 = vrot.slane %v2815_v63, 9  ;;  %v2922_v17 = vsel %vm5624_vm11, %v2920_v5, %v2921_v24  ;;  %v3311_v28 = vld [vmem:[#allocation2 + $0x30] sm:$0xf]  ;;  %v2927_v27 = vrot.slane %v2925_v12, 4  ;;  %v634_v34 = vor.u32 %v632_v20, %v631_v14 }
  0x60   : > { %v2384_v9 = vrot.slane %v2382_v61, 4  ;;  %v2387_v11 = vrot.slane %v2385_v58, 5  ;;  %v2380_v15 = vsel %vm5695_vm14, %v2375_v0, %v2379_v48  ;;  %v2272_v16 = vld [vmem:[#allocation2 + $0x38] sm:$0x1]  ;;  %v2399_v23 = vrot.slane %v2398_v4, 4  ;;  %v5401_v50 = vld [vmem:[#allocation2 + $0x30] sm:$0xff]  }
  0x61   : > { %v2817_v18 = vld [vmem:[#allocation2 + $0x38] sm:$0x1]  ;;  %2202 = vrot.lane.b32.xlu1 %v5400_v46, %s5471_s24  ;;  %v5097_v21 = vcombine.low %v2370_v60, %v2380_v15  ;;  %v2401_v26 = vshll.u32 %v2272_v16, 16  ;;  %v5129_v29 = vcombine.low %v2919_v62, %v2922_v17  ;;  %v2926_v57 = vsel %vm5624_vm11, %v5114_v6, %v2925_v12  ;;  %v3856_v54 = vld [vmem:[#allocation2 + $0x30] sm:$0xe] }
  0x62   : > { %v2388_v22 = vor.u32 %v2387_v11, %v2384_v9  ;;  %v2928_v33 = vrot.slane %v2817_v18, 5  ;;  %v637_v39 = vshrl.u32 %v535_v13, 16  ;;  %v640_v41 = vshll.u32 %v535_v13, 16  ;;  %v3313_v30 = vld [vmem:[#allocation2 + $0x38] sm:$0x1] }
  0x63   : > { %2745 = vrot.lane.b32.xlu0 %v5097_v21, %s5477_s30  ;;  %v2403_v38 = vrot.slane %v2401_v26, 5  ;;  %v913_v42 = vsel %vm5571_vm8, %v634_v34, %v912_v7  ;;  %v3402_v37 = vshrl.u32 %v3311_v28, 16  ;;  %v635_v47 = vrot.slane %v631_v14, 4  ;;  %v3858_v60 = vld [vmem:[#allocation2 + $0x38] sm:$0x1] }
  0x64   : > { %v2389_v36 = vrot.slane %v2388_v22, 4  ;;  %v2929_v40 = vsel %vm5624_vm11, %v2927_v27, %v2928_v33  ;;  %v639_v48 = vrot.slane %v637_v39, 7  ;;  %914 = vst [vmem:[#allocation2 + $0x3c] sm:$0xf] %v913_v42  ;;  %v3405_v53 = vshll.u32 %v3311_v28, 16 }
  0x65   : > { %v2404_v45 = vsel %vm5695_vm14, %v2399_v23, %v2403_v38  ;;  %v3404_v51 = vrot.slane %v3402_v37, 4  ;;  %v3411_v24 = vshll.u32 %v3312_v35, 16  ;;  %v5130_v46 = vcombine.low %v2926_v57, %v2929_v40  ;;  %v1225_v0 = vld [vmem:[#allocation2 + $0x34] sm:$0xf] }
  0x66   : > { %v2394_v44 = vsel %vm5695_vm14, %v2389_v36, %v2393_v52  ;;  %v642_v55 = vor.u32 %v640_v41, %v639_v48  ;;  %v3415_v56 = vshrl.u32 %v3312_v35, 16  ;;  %v3421_v59 = vshll.u32 %v3313_v30, 16  ;;  %v1224_v52 = vld [vmem:[#allocation2 + $0x30] sm:$0xf] }
  0x67   : > { %v5098_v49 = vcombine.low %v2394_v44, %v2404_v45  ;;  %3066 = vrot.lane.b32.xlu0 %v5129_v29, %s5473_s26  ;;  %v644_v61 = vrot.slane %v639_v48, 4  ;;  %v3407_v58 = vrot.slane %v3405_v53, 5  ;;  %v3413_v62 = vrot.slane %v3411_v24, 5  ;;  %v1226_v29 = vld [vmem:[#allocation2 + $0x38] sm:$0x1] }
  0x68   : > { %v488_v63 = vsel %vm5537_vm4, 0, %v487_v32  ;;  %v643_v4 = vsel %vm5564_vm7, %v635_v47, %v642_v55  ;;  %v3417_v5 = vrot.slane %v3415_v56, 4  ;;  %v5177_v6 = vrot.slane %v3856_v54, 9  ;;  %v1773_v24 = vld [vmem:[#allocation2 + $0x34] sm:$0xf] }
  0x69   : > { %2747 = vrot.lane.b32.xlu1 %v5098_v49, %s5477_s30  ;;  %489 = vst [vmem:[#allocation2 + $0x44] sm:$0x1] %v488_v63  ;;  %v3962_v9 = vrot.slane %v3857_v43, 5  ;;  %915 = vst.msk [vmem:[#allocation2 + $0x40] sm:$0xf] %vm881_vm6, %v643_v4  ;;  %v3408_v11 = vor.u32 %v3407_v58, %v3404_v51  ;;  %v3965_v12 = vrot.slane %v3858_v60, 5 }
  0x6a   : > { %v1360_v13 = vshrl.u32 %v1224_v52, 16  ;;  %v1363_v14 = vshll.u32 %v1224_v52, 16  ;;  %v3418_v15 = vor.u32 %v3417_v5, %v3413_v62  ;;  %v3423_v16 = vrot.slane %v3421_v59, 5 }
  0x6b   : > { %3244 = vrot.lane.b32.xlu0 %v5401_v50, %s5472_s25  ;;  %v3964_v17 = vrot.slane %v3962_v9, 4  ;;  %v1369_v18 = vshll.u32 %v1225_v0, 16  ;;  %v3409_v20 = vrot.slane %v3408_v11, 4  ;;  %v3314_v21 = vld [vmem:[#allocation2 + $0x3c] sm:$0xf]  ;;  %v3963_v28 = vsel %vm5624_vm11, %v5177_v6, %v3962_v9 }
  0x6c   : > { %v1362_v22 = vrot.slane %v1360_v13, 4  ;;  %v3419_v23 = vrot.slane %v3418_v15, 4  ;;  %v3426_v26 = vshrl.u32 %v3314_v21, 16  ;;  %v3429_v7 = vshll.u32 %v3314_v21, 16  ;;  %v3859_v36 = vld [vmem:[#allocation2 + $0x3c] sm:$0xe] }
  0x6d   : > { %3068 = vrot.lane.b32.xlu1 %v5130_v46, %s5473_s26  ;;  %v3414_v27 = vsel %vm5695_vm14, %v3409_v20, %v3413_v62  ;;  %v3966_v33 = vsel %vm5624_vm11, %v3964_v17, %v3965_v12  ;;  %v1365_v34 = vrot.slane %v1363_v14, 5  ;;  %v5801_v35 = vrot.slane %v1369_v18, 5  ;;  %v1227_v37 = vld [vmem:[#allocation2 + $0x3c] sm:$0xf]  ;;  %v1772_v62 = vld [vmem:[#allocation2 + $0x30] sm:$0xe] }
  0x6e   : > { %v3424_v38 = vsel %vm5695_vm14, %v3419_v23, %v3423_v16  ;;  %v3428_v57 = vrot.slane %v3426_v26, 4  ;;  %v3431_v39 = vrot.slane %v3429_v7, 5  ;;  %v1373_v32 = vshrl.u32 %v1225_v0, 16  ;;  %v1774_v12 = vld [vmem:[#allocation2 + $0x38] sm:$0x1] }
  0x6f   : > { %v5161_v40 = vcombine.low %v3414_v27, %v3424_v38  ;;  %v1366_v42 = vor.u32 %v1365_v34, %v1362_v22  ;;  %v1379_v30 = vshll.u32 %v1226_v29, 16  ;;  %v5193_v51 = vcombine.low %v3963_v28, %v3966_v33  ;;  %v1775_v17 = vld [vmem:[#allocation2 + $0x3c] sm:$0xe] }
  0x70   : > { %v916_v41 = vld [vmem:[#allocation2 + $0x44] sm:$0x1]  ;;  %v5402_v43 = vld [vmem:[#allocation2 + $0x3c] sm:$0xff]   ;;  %v3432_v47 = vor.u32 %v3431_v39, %v3428_v57  ;;  %v1375_v48 = vrot.slane %v1373_v32, 4  ;;  %v5178_v46 = vrot.slane %v3859_v36, 9  ;;  %v1384_v59 = vshrl.u32 %v1227_v37, 16 }
  0x71   : > { %v917_v44 = vsel %vm5528_vm2, %v644_v61, %v916_v41  ;;  %v3315_v45 = vld [vmem:[#allocation2 + $0x40] sm:$0xf]  ;;  %3789 = vrot.lane.b32.xlu0 %v5161_v40, %s5478_s6  ;;  %3246 = vrot.lane.b32.xlu1 %v5402_v43, %s5472_s25  ;;  %v5810_v61 = vrot.slane %v1366_v42, 4  ;;  %v1387_v58 = vshll.u32 %v1227_v37, 16  ;;  %v5814_v4 = vrot.slane %v1379_v30, 5 }
  0x72   : > { %918 = vst [vmem:[#allocation2 + $0x44] sm:$0x1] %v917_v44  ;;  %v3435_v49 = vshll.u32 %v3315_v45, 16  ;;  %v3439_v50 = vshrl.u32 %v3315_v45, 16  ;;  %v3860_v53 = vld [vmem:[#allocation2 + $0x40] sm:$0xf]  ;;  %v1376_v54 = vor.u32 %v1375_v48, %v5801_v35 }
  0x73   : > { %v3969_v55 = vrot.slane %v3860_v53, 5  ;;  %v1228_v56 = vld [vmem:[#allocation2 + $0x40] sm:$0xf]  ;;  %v3433_v63 = vrot.slane %v3432_v47, 4  ;;  %v1386_v5 = vrot.slane %v1384_v59, 4  ;;  %v1389_v9 = vrot.slane %v1387_v58, 5 }
  0x74   : > { %v3437_v60 = vrot.slane %v3435_v49, 5  ;;  %v3441_v52 = vrot.slane %v3439_v50, 4  ;;  %v5812_v0 = vrot.slane %v1376_v54, 4  ;;  %v1393_v11 = vshll.u32 %v1228_v56, 16  ;;  %v1776_v57 = vld [vmem:[#allocation2 + $0x40] sm:$0xf] }
  0x75   : > { %4110 = vrot.lane.b32.xlu0 %v5193_v51, %s5475_s28  ;;  %v3971_v13 = vrot.slane %v3969_v55, 4  ;;  %v1397_v14 = vshrl.u32 %v1228_v56, 16  ;;  %v5051_v15 = vrot.slane %v1772_v62, 9  ;;  %v1889_v16 = vrot.slane %v1773_v24, 5  ;;  %v434_v39 = vld [vmem:[#allocation2 + $0x48] sm:$0x1] }
  0x76   : > { %v3442_v6 = vor.u32 %v3441_v52, %v3437_v60  ;;  %v1390_v20 = vor.u32 %v1389_v9, %v1386_v5  ;;  %v1395_v21 = vrot.slane %v1393_v11, 5  ;;  %v3438_v23 = vsel %vm5695_vm14, %v3433_v63, %v3437_v60  ;;  %v536_v42 = vld [vmem:[%s5553_s23 + $0x28] sm:$0xf]  ;;  %v537_v30 = vld [vmem:[%s5553_s23 + $0x2c] sm:$0xf]  ;;  %v5416_v59 = vld [vmem:[%s7166_s3] sm:$0xff]  }
  0x77   : > { %v1372_v26 = vsel %vm5695_vm14, %v5810_v61, %v5801_v35  ;;  %v1382_v7 = vsel %vm5695_vm14, %v5812_v0, %v5814_v4  ;;  %v3970_v29 = vsel %vm5624_vm11, %v5178_v46, %v3969_v55  ;;  %v1399_v38 = vrot.slane %v1397_v14, 4  ;;  %v2273_v48 = vld [vmem:[#allocation2 + $0x3c] sm:$0xf]  ;;  %v2274_v56 = vld [vmem:[#allocation2 + $0x40] sm:$0xf]  ;;  %5316 = vmatprep.subr.bf16.mxu0 %v5416_v59  ;;  %5354 = vmatprep.subr.bf16.mxu1 %v5416_v59 }
  0x78   : > { %v3443_v18 = vrot.slane %v3442_v6, 4  ;;  %v1391_v36 = vrot.slane %v1390_v20, 4  ;;  %v1890_v35 = vsel %vm5624_vm11, %v5051_v15, %v1889_v16  ;;  %v1891_v40 = vrot.slane %v1889_v16, 4  ;;  %v5403_v11 = vld [vmem:[#allocation2 + $0x3c] sm:$0xff]   ;;  %v490_v14 = vld [vmem:[#allocation2 + $0x50] sm:$0x1]  ;;  %5317 = vmatpush3.bf16.msra.mxu0 %v5416_v59  ;;  %5357 = vmatpush3.bf16.msra.mxu1 %v5416_v59 }
  0x79   : > { %v3316_v22 = vld [vmem:[#allocation2 + $0x44] sm:$0x1]  ;;  %v1892_v41 = vrot.slane %v1774_v12, 5  ;;  %v1400_v44 = vor.u32 %v1399_v38, %v1395_v21  ;;  %v5052_v47 = vrot.slane %v1775_v17, 9  ;;  %v1896_v53 = vrot.slane %v1776_v57, 5 }
  0x7a   : > { %v3861_v28 = vld [vmem:[#allocation2 + $0x44] sm:$0x1]  ;;  %v3445_v33 = vshll.u32 %v3316_v22, 16  ;;  %v1396_v54 = vsel %vm5695_vm14, %v1391_v36, %v1395_v21  ;;  %v435_v58 = vsel %vm5528_vm2, 0, %v434_v39  ;;  %v646_v63 = vshrl.u32 %v536_v42, 16  ;;  %v5419_v22 = vld [vmem:[%s7166_s3 + $0x8] sm:$0xff]  }
  0x7b   : > { %v1229_v27 = vld [vmem:[#allocation2 + $0x44] sm:$0x1]  ;;  %v3972_v34 = vrot.slane %v3861_v28, 5  ;;  %v1893_v51 = vsel %vm5624_vm11, %v1891_v40, %v1892_v41  ;;  %v1401_v46 = vrot.slane %v1400_v44, 4  ;;  %v1898_v52 = vrot.slane %v1896_v53, 4  ;;  %5318 = vmatprep.subr.bf16.mxu0 %v5419_v22  ;;  %5355 = vmatprep.subr.bf16.mxu1 %v5419_v22 }
  0x7c   : > { %v1403_v32 = vshll.u32 %v1229_v27, 16  ;;  %v3447_v37 = vrot.slane %v3445_v33, 5  ;;  %v1777_v45 = vld [vmem:[#allocation2 + $0x44] sm:$0x1]  ;;  %v5067_v55 = vcombine.low %v1890_v35, %v1893_v51  ;;  %436 = vst [vmem:[#allocation2 + $0x48] sm:$0x1] %v435_v58  ;;  %v5035_v6 = vcombine.low %v1372_v26, %v1382_v7  ;;  %5319 = vmatpush3.bf16.msra.mxu0 %v5419_v22  ;;  %5358 = vmatpush3.bf16.msra.mxu1 %v5419_v22 }
  0x7d   : > { %v3973_v43 = vsel %vm5624_vm11, %v3971_v13, %v3972_v34  ;;  %v1899_v61 = vrot.slane %v1777_v45, 5  ;;  %v649_v0 = vshll.u32 %v536_v42, 16  ;;  %v654_v4 = vshrl.u32 %v537_v30, 16  ;;  %v2275_v5 = vld [vmem:[#allocation2 + $0x44] sm:$0x1] }
  0x7e   : > { %v5194_v49 = vcombine.low %v3970_v29, %v3973_v43  ;;  %v1405_v50 = vrot.slane %v1403_v32, 5  ;;  %v3448_v24 = vsel %vm5695_vm14, %v3443_v18, %v3447_v37  ;;  %v5852_v9 = vsel %vm5624_vm11, %v5052_v47, %v1896_v53  ;;  %v2818_v20 = vld [vmem:[#allocation2 + $0x3c] sm:$0xe]  ;;  %v437_v21 = vld [vmem:[#allocation2 + $0x54] sm:$0x1] }
  0x7f   : > { %v5162_v60 = vcombine.low %v3438_v23, %v3448_v24  ;;  %v657_v12 = vshll.u32 %v537_v30, 16  ;;  %v2406_v13 = vshrl.u32 %v2273_v48, 16  ;;  %v648_v16 = vrot.slane %v646_v63, 7  ;;  %v2819_v29 = vld [vmem:[#allocation2 + $0x40] sm:$0xf] }
  0x80   : > { %4112 = vrot.lane.b32.xlu0 %v5194_v49, %s5475_s28  ;;  %v1406_v62 = vsel %vm5695_vm14, %v1401_v46, %v1405_v50  ;;  %v5854_v17 = vrot.slane %v654_v4, 7  ;;  %v2409_v18 = vshll.u32 %v2273_v48, 16  ;;  %v2415_v26 = vshll.u32 %v2274_v56, 16  ;;  %v5861_v27 = vld [vmem:[%s5553_s23 + $0x30] sm:$0xf] }
  0x81   : > { %3791 = vrot.lane.b32.xlu1 %v5162_v60, %s5478_s6  ;;  %v5036_v15 = vcombine.low %v1396_v54, %v1406_v62  ;;  %v2408_v23 = vrot.slane %v2406_v13, 4  ;;  %v2419_v7 = vshrl.u32 %v2274_v56, 16  ;;  %v2425_v28 = vshll.u32 %v2275_v5, 16  ;;  %v2820_v57 = vld [vmem:[#allocation2 + $0x44] sm:$0x1] }
  0x82   : > { %v1900_v33 = vsel %vm5624_vm11, %v1898_v52, %v1899_v61  ;;  %v651_v34 = vor.u32 %v649_v0, %v648_v16  ;;  %v652_v36 = vrot.slane %v648_v16, 4  ;;  %v659_v38 = vor.u32 %v657_v12, %v5854_v17  ;;  %v539_v39 = vld [vmem:[%s5553_s23 + $0x34] sm:$0xf]  ;;  %v493_v44 = vld [vmem:[#allocation2 + $0x5c] sm:$0x1] }
  0x83   : > { %v2411_v32 = vrot.slane %v2409_v18, 5  ;;  %v2417_v35 = vrot.slane %v2415_v26, 5  ;;  %v2421_v40 = vrot.slane %v2419_v7, 4  ;;  %v2427_v41 = vrot.slane %v2425_v28, 5  ;;  %v919_v45 = vld [vmem:[#allocation2 + $0x48] sm:$0xf] }
  0x84   : > { %2027 = vrot.lane.b32.xlu0 %v5067_v55, %s5474_s27  ;;  %v660_v42 = vsel %vm5564_vm7, %v652_v36, %v659_v38  ;;  %v491_v30 = vsel %vm5537_vm4, 0, %v490_v14  ;;  %v5115_v37 = vrot.slane %v2818_v20, 9  ;;  %v2932_v43 = vrot.slane %v2819_v29, 5  ;;  %v440_v60 = vld [vmem:[#allocation2 + $0x60] sm:$0x1] }
  0x85   : > { %1703 = vrot.lane.b32.xlu1 %v5035_v6, %s5476_s29  ;;  %922 = vst.msk [vmem:[#allocation2 + $0x4c] sm:$0xf] %vm881_vm6, %v660_v42  ;;  %v2412_v47 = vor.u32 %v2411_v32, %v2408_v23  ;;  %v2422_v48 = vor.u32 %v2421_v40, %v2417_v35  ;;  %492 = vst [vmem:[#allocation2 + $0x50] sm:$0x1] %v491_v30  ;;  %v2935_v49 = vrot.slane %v2820_v57, 5  ;;  %v438_v50 = vsel %vm5528_vm2, 0, %v437_v21 }
  0x86   : > { %v5068_v51 = vcombine.low %v5852_v9, %v1900_v33  ;;  %v920_v53 = vsel %vm5571_vm8, %v651_v34, %v919_v45  ;;  %v2934_v24 = vrot.slane %v2932_v43, 4  ;;  %439 = vst [vmem:[#allocation2 + $0x54] sm:$0x1] %v438_v50  ;;  %v663_v54 = vshrl.u32 %v5861_v27, 16  ;;  %v5887_v63 = vld [vmem:[%s5553_s23 + $0x38] sm:$0xf] }
  0x87   : > { %v661_v46 = vrot.slane %v5854_v17, 4  ;;  %921 = vst [vmem:[#allocation2 + $0x48] sm:$0xf] %v920_v53  ;;  %v2413_v55 = vrot.slane %v2412_v47, 4  ;;  %v2423_v56 = vrot.slane %v2422_v48, 4  ;;  %v671_v59 = vshrl.u32 %v539_v39, 16 }
  0x88   : > { %2204 = vrot.lane.b32.xlu0 %v5403_v11, %s5471_s24  ;;  %v2933_v52 = vsel %vm5624_vm11, %v5115_v37, %v2932_v43  ;;  %v665_v61 = vrot.slane %v663_v54, 7  ;;  %v674_v58 = vshll.u32 %v539_v39, 16  ;;  %v494_v62 = vsel %vm5537_vm4, 0, %v493_v44 }
  0x89   : > { %1705 = vrot.lane.b32.xlu1 %v5036_v15, %s5476_s29  ;;  %v2418_v0 = vsel %vm5695_vm14, %v2413_v55, %v2417_v35  ;;  %v2428_v4 = vsel %vm5695_vm14, %v2423_v56, %v2427_v41  ;;  %v2936_v5 = vsel %vm5624_vm11, %v2934_v24, %v2935_v49  ;;  %v673_v6 = vrot.slane %v671_v59, 7  ;;  %495 = vst [vmem:[#allocation2 + $0x5c] sm:$0x1] %v494_v62 }
  0x8a   : > { %v5099_v9 = vcombine.low %v2418_v0, %v2428_v4  ;;  %v666_v11 = vshll.u32 %v5861_v27, 16  ;;  %v669_v12 = vrot.slane %v665_v61, 4  ;;  %v441_v13 = vsel %vm5528_vm2, 0, %v440_v60 }
  0x8b   : > { %v676_v14 = vor.u32 %v674_v58, %v673_v6  ;;  %v678_v15 = vrot.slane %v673_v6, 4  ;;  %442 = vst [vmem:[#allocation2 + $0x60] sm:$0x1] %v441_v13  ;;  %v680_v16 = vshrl.u32 %v5887_v63, 16  ;;  %v5131_v20 = vcombine.low %v2933_v52, %v2936_v5 }
  0x8c   : > { %2749 = vrot.lane.b32.xlu0 %v5099_v9, %s5477_s30  ;;  %v923_v17 = vld [vmem:[#allocation2 + $0x50] sm:$0x1]  ;;  %v2277_v18 = vld [vmem:[#allocation2 + $0x4c] sm:$0xf]  ;;  %v668_v33 = vor.u32 %v666_v11, %v665_v61  ;;  %v683_v41 = vshll.u32 %v5887_v63, 16  ;;  %vm2067_vm1 = vcmask 97344  }
  0x8d   : > { %2029 = vrot.lane.b32.xlu1 %v5068_v51, %s5474_s27  ;;  %v924_v21 = vsel %vm5528_vm2, %v661_v46, %v923_v17  ;;  %v2439_v22 = vshll.u32 %v2277_v18, 16  ;;  %v2443_v23 = vshrl.u32 %v2277_v18, 16  ;;  %v2822_v26 = vld [vmem:[#allocation2 + $0x4c] sm:$0xf]  ;;  %v677_v7 = vsel %vm5564_vm7, %v669_v12, %v676_v14  ;;  %v926_v43 = vld [vmem:[#allocation2 + $0x54] sm:$0xf] }
  0x8e   : > { %v5404_v28 = vld [vmem:[#allocation2 + $0x48] sm:$0xff]   ;;  %925 = vst [vmem:[#allocation2 + $0x50] sm:$0x1] %v924_v21  ;;  %v2939_v27 = vrot.slane %v2822_v26, 5  ;;  %929 = vst.msk [vmem:[#allocation2 + $0x58] sm:$0xf] %vm881_vm6, %v677_v7  ;;  %v927_v45 = vsel %vm5571_vm8, %v668_v33, %v926_v43 }
  0x8f   : > { %v2276_v29 = vld [vmem:[#allocation2 + $0x48] sm:$0xf]  ;;  %v5906_v38 = vrot.slane %v2439_v22, 5  ;;  %v2445_v57 = vrot.slane %v2443_v23, 4  ;;  %v3318_v47 = vld [vmem:[#allocation2 + $0x4c] sm:$0xf] }
  0x90   : > { %v2430_v34 = vshrl.u32 %v2276_v29, 16  ;;  %v2433_v36 = vshll.u32 %v2276_v29, 16  ;;  %v2821_v39 = vld [vmem:[#allocation2 + $0x48] sm:$0xe]  ;;  %3070 = vrot.lane.b32.xlu0 %v5131_v20, %s5473_s26  ;;  %v2941_v35 = vrot.slane %v2939_v27, 4  ;;  %v3459_v53 = vshll.u32 %v3318_v47, 16 }
  0x91   : > { %2206 = vrot.lane.b32.xlu1 %v5404_v28, %s5471_s24  ;;  %v5116_v32 = vrot.slane %v2821_v39, 9  ;;  %v5405_v40 = vld [vmem:[#allocation2 + $0x48] sm:$0xff]   ;;  %v2446_v37 = vor.u32 %v2445_v57, %v5906_v38  ;;  %v930_v50 = vld [vmem:[#allocation2 + $0x5c] sm:$0x1]  ;;  %928 = vst [vmem:[#allocation2 + $0x54] sm:$0xf] %v927_v45 }
  0x92   : > { %v2432_v42 = vrot.slane %v2430_v34, 4  ;;  %v2435_v30 = vrot.slane %v2433_v36, 5  ;;  %v3317_v44 = vld [vmem:[#allocation2 + $0x48] sm:$0xf]  ;;  %v3463_v24 = vshrl.u32 %v3318_v47, 16  ;;  %v5914_v54 = vrot.slane %v680_v16, 7 }
  0x93   : > { %v3450_v48 = vshrl.u32 %v3317_v44, 16  ;;  %v3453_v49 = vshll.u32 %v3317_v44, 16  ;;  %v2447_v46 = vrot.slane %v2446_v37, 4  ;;  %v931_v59 = vsel %vm5528_vm2, %v678_v15, %v930_v50  ;;  %v3862_v60 = vld [vmem:[#allocation2 + $0x48] sm:$0xe]  ;;  %v5919_v52 = vpop.permute.xlu0 %2196 }
  0x94   : > { %v2436_v51 = vor.u32 %v2435_v30, %v2432_v42  ;;  %3248 = vrot.lane.b32.xlu0 %v5405_v40, %s5472_s25  ;;  %v3461_v63 = vrot.slane %v3459_v53, 5  ;;  %932 = vst [vmem:[#allocation2 + $0x5c] sm:$0x1] %v931_v59  ;;  %v2940_v4 = vsel %vm5624_vm11, %v5116_v32, %v2939_v27  ;;  %v3465_v12 = vrot.slane %v3463_v24, 4  ;;  %v3863_v21 = vld [vmem:[#allocation2 + $0x4c] sm:$0xf]  ;;  %v5931_v27 = vpop.permute.xlu1 %2198 }
  0x95   : > { %v3452_v55 = vrot.slane %v3450_v48, 4  ;;  %v3455_v56 = vrot.slane %v3453_v49, 5  ;;  %v2278_v61 = vld [vmem:[#allocation2 + $0x50] sm:$0x1]  ;;  %v3321_v14 = vld [vmem:[#allocation2 + $0x58] sm:$0xf]  ;;  %v5929_v29 = vor.u32 %v683_v41, %v5914_v54 }
  0x96   : > { %v2437_v58 = vrot.slane %v2436_v51, 4  ;;  %v2823_v62 = vld [vmem:[#allocation2 + $0x50] sm:$0x1]  ;;  %v2449_v0 = vshll.u32 %v2278_v61, 16  ;;  %v5179_v15 = vrot.slane %v3862_v60, 9  ;;  %v3483_v20 = vshll.u32 %v3321_v14, 16 }
  0x97   : > { %v2942_v5 = vrot.slane %v2823_v62, 5  ;;  %v3319_v6 = vld [vmem:[#allocation2 + $0x50] sm:$0x1]  ;;  %v3456_v9 = vor.u32 %v3455_v56, %v3452_v55  ;;  %v3466_v22 = vor.u32 %v3465_v12, %v3461_v63  ;;  %v3487_v26 = vshrl.u32 %v3321_v14, 16  ;;  %v1230_v28 = vld [vmem:[#allocation2 + $0x48] sm:$0xf]  ;;  %v5937_v39 = vpop.permute.xlu0 %3240 }
  0x98   : > { %v2442_v11 = vsel %vm5695_vm14, %v2437_v58, %v5906_v38  ;;  %v3469_v13 = vshll.u32 %v3319_v6, 16  ;;  %v2451_v16 = vrot.slane %v2449_v0, 5  ;;  %v3864_v7 = vld [vmem:[#allocation2 + $0x50] sm:$0x1]  ;;  %v3320_v38 = vld [vmem:[#allocation2 + $0x54] sm:$0xf] }
  0x99   : > { %v2943_v17 = vsel %vm5624_vm11, %v2941_v35, %v2942_v5  ;;  %v3457_v18 = vrot.slane %v3456_v9, 4  ;;  %v3485_v57 = vrot.slane %v3483_v20, 5  ;;  %v3467_v35 = vrot.slane %v3466_v22, 4  ;;  %v1231_v50 = vld [vmem:[#allocation2 + $0x4c] sm:$0xf]  ;;  %v5406_v12 = vld [vmem:[#allocation2 + $0x54] sm:$0xff]  }
  0x9a   : > { %v3471_v23 = vrot.slane %v3469_v13, 5  ;;  %v2452_v33 = vsel %vm5695_vm14, %v2447_v46, %v2451_v16  ;;  %v5132_v34 = vcombine.low %v2940_v4, %v2943_v17  ;;  %v3474_v40 = vshrl.u32 %v3320_v38, 16  ;;  %v1232_v55 = vld [vmem:[#allocation2 + $0x50] sm:$0x1]  ;;  %v3865_v56 = vld [vmem:[#allocation2 + $0x54] sm:$0xe] }
  0x9b   : > { %v3462_v36 = vsel %vm5695_vm14, %v3457_v18, %v3461_v63  ;;  %v5100_v32 = vcombine.low %v2442_v11, %v2452_v33  ;;  %v3477_v42 = vshll.u32 %v3320_v38, 16  ;;  %v3322_v30 = vld [vmem:[#allocation2 + $0x5c] sm:$0x1]  ;;  %v3489_v41 = vrot.slane %v3487_v26, 4  ;;  %v3866_v62 = vld [vmem:[#allocation2 + $0x58] sm:$0xf]  ;;  %v5944_v63 = vpop.permute.xlu1 %3242  ;;  %v5949_v11 = vpop.permute.xlu0 %3062 }
  0x9c   : > { %v3976_v37 = vrot.slane %v3863_v21, 5  ;;  %v3979_v43 = vrot.slane %v3864_v7, 5  ;;  %v1408_v44 = vshrl.u32 %v1230_v28, 16  ;;  %v3472_v45 = vsel %vm5695_vm14, %v3467_v35, %v3471_v23  ;;  %v3867_v9 = vld [vmem:[#allocation2 + $0x5c] sm:$0x1] }
  0x9d   : > { %2751 = vrot.lane.b32.xlu1 %v5100_v32, %s5477_s30  ;;  %v3476_v47 = vrot.slane %v3474_v40, 4  ;;  %v3479_v48 = vrot.slane %v3477_v42, 5  ;;  %v3493_v49 = vshll.u32 %v3322_v30, 16  ;;  %v5163_v51 = vcombine.low %v3462_v36, %v3472_v45  ;;  %v1233_v17 = vld [vmem:[#allocation2 + $0x54] sm:$0xf] }
  0x9e   : > { %v3490_v53 = vor.u32 %v3489_v41, %v3485_v57  ;;  %v3977_v24 = vsel %vm5624_vm11, %v5179_v15, %v3976_v37  ;;  %v3978_v46 = vrot.slane %v3976_v37, 4  ;;  %v1410_v61 = vrot.slane %v1408_v44, 4  ;;  %v1234_v33 = vld [vmem:[#allocation2 + $0x58] sm:$0xf]  ;;  %v1235_v32 = vld [vmem:[#allocation2 + $0x5c] sm:$0x1] }
  0x9f   : > { %v3480_v59 = vor.u32 %v3479_v48, %v3476_v47  ;;  %v3495_v60 = vrot.slane %v3493_v49, 5  ;;  %v1411_v58 = vshll.u32 %v1230_v28, 16  ;;  %3793 = vrot.lane.b32.xlu0 %v5163_v51, %s5478_s6  ;;  %v1417_v5 = vshll.u32 %v1231_v50, 16  ;;  %v1778_v40 = vld [vmem:[#allocation2 + $0x48] sm:$0xe] }
  0xa0   : > { %v3491_v0 = vrot.slane %v3490_v53, 4  ;;  %v3980_v4 = vsel %vm5624_vm11, %v3978_v46, %v3979_v43  ;;  %v1421_v6 = vshrl.u32 %v1231_v50, 16  ;;  %v1427_v16 = vshll.u32 %v1232_v55, 16  ;;  %v1779_v37 = vld [vmem:[#allocation2 + $0x4c] sm:$0xf] }
  0xa1   : > { %3072 = vrot.lane.b32.xlu1 %v5132_v34, %s5473_s26  ;;  %v3481_v13 = vrot.slane %v3480_v59, 4  ;;  %v5195_v14 = vcombine.low %v3977_v24, %v3980_v4  ;;  %v1413_v15 = vrot.slane %v1411_v58, 5  ;;  %v1419_v20 = vrot.slane %v1417_v5, 5  ;;  %v1780_v46 = vld [vmem:[#allocation2 + $0x50] sm:$0x1] }
  0xa2   : > { %v3496_v18 = vsel %vm5695_vm14, %v3491_v0, %v3495_v60  ;;  %v1423_v21 = vrot.slane %v1421_v6, 4  ;;  %v5180_v22 = vrot.slane %v3865_v56, 9  ;;  %v1429_v7 = vrot.slane %v1427_v16, 5  ;;  %v1781_v55 = vld [vmem:[#allocation2 + $0x54] sm:$0xe] }
  0xa3   : > { %v3486_v23 = vsel %vm5695_vm14, %v3481_v13, %v3485_v57  ;;  %v1414_v26 = vor.u32 %v1413_v15, %v1410_v61  ;;  %v3983_v28 = vrot.slane %v3866_v62, 5  ;;  %4114 = vrot.lane.b32.xlu0 %v5195_v14, %s5475_s28  ;;  %v3986_v38 = vrot.slane %v3867_v9, 5  ;;  %v1782_v58 = vld [vmem:[#allocation2 + $0x58] sm:$0xf]  ;;  %v1783_v62 = vld [vmem:[#allocation2 + $0x5c] sm:$0x1] }
  0xa4   : > { %v5164_v34 = vcombine.low %v3486_v23, %v3496_v18  ;;  %v1424_v36 = vor.u32 %v1423_v21, %v1419_v20  ;;  %v1432_v35 = vshrl.u32 %v1233_v17, 16  ;;  %v1435_v57 = vshll.u32 %v1233_v17, 16  ;;  %v541_v9 = vld [vmem:[%s5553_s23 + $0x3c] sm:$0xf]  ;;  %v933_v21 = vld [vmem:[#allocation2 + $0x60] sm:$0xf] }
  0xa5   : > { %3250 = vrot.lane.b32.xlu1 %v5406_v12, %s5472_s25  ;;  %v1415_v42 = vrot.slane %v1414_v26, 4  ;;  %v3984_v30 = vsel %vm5624_vm11, %v5180_v22, %v3983_v28  ;;  %v3985_v41 = vrot.slane %v3983_v28, 4  ;;  %v5960_v43 = vpop.permute.xlu1 %2019  ;;  %v1441_v47 = vshll.u32 %v1234_v33, 16 }
  0xa6   : > { %v1425_v44 = vrot.slane %v1424_v36, 4  ;;  %v1434_v45 = vrot.slane %v1432_v35, 4  ;;  %v1445_v48 = vshrl.u32 %v1234_v33, 16  ;;  %v5962_v49 = vpop.permute.xlu0 %4106  ;;  %v1437_v53 = vrot.slane %v1435_v57, 5  ;;  %v2279_v33 = vld [vmem:[#allocation2 + $0x54] sm:$0xf] }
  0xa7   : > { %v1420_v50 = vsel %vm5695_vm14, %v1415_v42, %v1419_v20  ;;  %v3987_v51 = vsel %vm5624_vm11, %v3985_v41, %v3986_v38  ;;  %v1451_v24 = vshll.u32 %v1235_v32, 16  ;;  %v1443_v60 = vrot.slane %v1441_v47, 5  ;;  %v496_v35 = vld [vmem:[#allocation2 + $0x68] sm:$0x1]  ;;  %v2280_v57 = vld [vmem:[#allocation2 + $0x58] sm:$0xf] }
  0xa8   : > { %v1430_v56 = vsel %vm5695_vm14, %v1425_v44, %v1429_v7  ;;  %v5196_v59 = vcombine.low %v3984_v30, %v3987_v51  ;;  %v1447_v61 = vrot.slane %v1445_v48, 4  ;;  %v1438_v4 = vor.u32 %v1437_v53, %v1434_v45  ;;  %v2825_v51 = vld [vmem:[#allocation2 + $0x58] sm:$0xf]  ;;  %v443_v53 = vld [vmem:[#allocation2 + $0x6c] sm:$0x1] }
  0xa9   : > { %3795 = vrot.lane.b32.xlu1 %v5164_v34, %s5478_s6  ;;  %v5037_v0 = vcombine.low %v1420_v50, %v1430_v56  ;;  %v1453_v5 = vrot.slane %v1451_v24, 5  ;;  %v5053_v6 = vrot.slane %v1778_v40, 9  ;;  %v1903_v13 = vrot.slane %v1779_v37, 5  ;;  %v5974_v22 = vpop.permute.xlu1 %2021  ;;  %v2281_v37 = vld [vmem:[#allocation2 + $0x5c] sm:$0x1] }
  0xaa   : > { %4116 = vrot.lane.b32.xlu0 %v5196_v59, %s5475_s28  ;;  %v1448_v12 = vor.u32 %v1447_v61, %v1443_v60  ;;  %v1906_v14 = vrot.slane %v1780_v46, 5  ;;  %v5054_v15 = vrot.slane %v1781_v55, 9  ;;  %v1439_v16 = vrot.slane %v1438_v4, 4  ;;  %v2824_v50 = vld [vmem:[#allocation2 + $0x54] sm:$0xe] }
  0xab   : > { %v1910_v17 = vrot.slane %v1782_v58, 5  ;;  %v1913_v18 = vrot.slane %v1783_v62, 5  ;;  %v686_v20 = vrot.slane %v5914_v54, 4  ;;  %v1904_v26 = vsel %vm5624_vm11, %v5053_v6, %v1903_v13  ;;  %v5978_v34 = vpop.permute.xlu0 %4108  ;;  %v542_v24 = vld [vmem:[%s5553_s23 + $0x40] sm:$0xf]  ;;  %v5407_v55 = vld [vmem:[#allocation2 + $0x54] sm:$0xff]  }
  0xac   : > { %v1449_v23 = vrot.slane %v1448_v12, 4  ;;  %v1905_v7 = vrot.slane %v1903_v13, 4  ;;  %v688_v28 = vshrl.u32 %v541_v9, 16  ;;  %v1444_v36 = vsel %vm5695_vm14, %v1439_v16, %v1443_v60  ;;  %v2826_v60 = vld [vmem:[#allocation2 + $0x5c] sm:$0x1] }
  0xad   : > { %1707 = vrot.lane.b32.xlu1 %v5037_v0, %s5476_s29  ;;  %v1911_v54 = vsel %vm5624_vm11, %v5054_v15, %v1910_v17  ;;  %v1912_v38 = vrot.slane %v1910_v17, 4  ;;  %v691_v32 = vshll.u32 %v541_v9, 16  ;;  %v934_v41 = vsel %vm5571_vm8, %v5929_v29, %v933_v21  ;;  %v6000_v0 = vpop.permute.xlu1 %3064 }
  0xae   : > { %v1454_v40 = vsel %vm5695_vm14, %v1449_v23, %v1453_v5  ;;  %v1907_v42 = vsel %vm5624_vm11, %v1905_v7, %v1906_v14  ;;  %v5989_v30 = vrot.slane %v688_v28, 7  ;;  %935 = vst [vmem:[#allocation2 + $0x60] sm:$0xf] %v934_v41  ;;  %v2454_v48 = vshrl.u32 %v2279_v33, 16 }
  0xaf   : > { %v5038_v44 = vcombine.low %v1444_v36, %v1454_v40  ;;  %v5069_v45 = vcombine.low %v1904_v26, %v1907_v42  ;;  %v1914_v47 = vsel %vm5624_vm11, %v1912_v38, %v1913_v18  ;;  %v2457_v59 = vshll.u32 %v2279_v33, 16  ;;  %v6006_v9 = vpop.permute.xlu0 %1695 }
  0xb0   : > { %v5070_v46 = vcombine.low %v1911_v54, %v1914_v47  ;;  %v693_v56 = vor.u32 %v691_v32, %v5989_v30  ;;  %v2456_v29 = vrot.slane %v2454_v48, 4  ;;  %v2463_v61 = vshll.u32 %v2280_v57, 16 }
  0xb1   : > { %1709 = vrot.lane.b32.xlu1 %v5038_v44, %s5476_s29  ;;  %2031 = vrot.lane.b32.xlu0 %v5069_v45, %s5474_s27  ;;  %v2467_v58 = vshrl.u32 %v2280_v57, 16  ;;  %v2473_v62 = vshll.u32 %v2281_v37, 16  ;;  %v2459_v5 = vrot.slane %v2457_v59, 5  ;;  %v497_v6 = vsel %vm5537_vm4, 0, %v496_v35  ;;  %v543_v35 = vld [vmem:[%s5553_s23 + $0x44] sm:$0xf]  ;;  %v6015_v42 = vpop.permute.xlu1 %2743 }
  0xb2   : > { %v694_v4 = vsel %vm5564_vm7, %v686_v20, %v693_v56  ;;  %v2465_v12 = vrot.slane %v2463_v61, 5  ;;  %498 = vst [vmem:[#allocation2 + $0x68] sm:$0x1] %v497_v6  ;;  %v5117_v14 = vrot.slane %v2824_v50, 9  ;;  %v2946_v15 = vrot.slane %v2825_v51, 5 }
  0xb3   : > { %936 = vst.msk [vmem:[#allocation2 + $0x64] sm:$0xf] %vm881_vm6, %v694_v4  ;;  %v2469_v13 = vrot.slane %v2467_v58, 4  ;;  %v2460_v16 = vor.u32 %v2459_v5, %v2456_v29  ;;  %v2949_v17 = vrot.slane %v2826_v60, 5  ;;  %v444_v18 = vsel %vm5528_vm2, 0, %v443_v53 }
  0xb4   : > { %v697_v20 = vshrl.u32 %v542_v24, 16  ;;  %v695_v21 = vrot.slane %v5989_v30, 4  ;;  %v2475_v26 = vrot.slane %v2473_v62, 5  ;;  %v2948_v7 = vrot.slane %v2946_v15, 4  ;;  %445 = vst [vmem:[#allocation2 + $0x6c] sm:$0x1] %v444_v18 }
  0xb5   : > { %2033 = vrot.lane.b32.xlu1 %v5070_v46, %s5474_s27  ;;  %2208 = vrot.lane.b32.xlu0 %v5407_v55, %s5471_s24  ;;  %v2470_v23 = vor.u32 %v2469_v13, %v2465_v12  ;;  %v2461_v28 = vrot.slane %v2460_v16, 4  ;;  %v2282_v33 = vld [vmem:[#allocation2 + $0x60] sm:$0xf]  ;;  %v700_v36 = vshll.u32 %v542_v24, 16  ;;  %v2947_v30 = vsel %vm5624_vm11, %v5117_v14, %v2946_v15 }
  0xb6   : > { %v2478_v38 = vshrl.u32 %v2282_v33, 16  ;;  %v2481_v32 = vshll.u32 %v2282_v33, 16  ;;  %v699_v40 = vrot.slane %v697_v20, 7  ;;  %v2950_v57 = vsel %vm5624_vm11, %v2948_v7, %v2949_v17  ;;  %v6023_v37 = vpop.permute.xlu0 %1697  ;;  %v2827_v48 = vld [vmem:[#allocation2 + $0x60] sm:$0xe] }
  0xb7   : > { %v2471_v54 = vrot.slane %v2470_v23, 4  ;;  %v2466_v41 = vsel %vm5695_vm14, %v2461_v28, %v2465_v12  ;;  %v705_v24 = vshrl.u32 %v543_v35, 16  ;;  %v5133_v59 = vcombine.low %v2947_v30, %v2950_v57  ;;  %v3323_v5 = vld [vmem:[#allocation2 + $0x60] sm:$0xf] }
  0xb8   : > { %v2480_v45 = vrot.slane %v2478_v38, 4  ;;  %v2483_v47 = vrot.slane %v2481_v32, 5  ;;  %v702_v29 = vor.u32 %v700_v36, %v699_v40  ;;  %v703_v6 = vrot.slane %v699_v40, 4  ;;  %v3868_v36 = vld [vmem:[#allocation2 + $0x60] sm:$0xe] }
  0xb9   : > { %v2476_v44 = vsel %vm5695_vm14, %v2471_v54, %v2475_v26  ;;  %v937_v53 = vld [vmem:[#allocation2 + $0x68] sm:$0x1]  ;;  %v6031_v4 = vrot.slane %v705_v24, 7  ;;  %v708_v12 = vshll.u32 %v543_v35, 16  ;;  %v5118_v20 = vrot.slane %v2827_v48, 9 }
  0xba   : > { %v5408_v50 = vld [vmem:[#allocation2 + $0x60] sm:$0xff]   ;;  %v5101_v51 = vcombine.low %v2466_v41, %v2476_v44  ;;  %v938_v46 = vsel %vm5528_vm2, %v695_v21, %v937_v53  ;;  %v2484_v56 = vor.u32 %v2483_v47, %v2480_v45  ;;  %v499_v21 = vld [vmem:[#allocation2 + $0x74] sm:$0x1]  ;;  %v3498_v33 = vshrl.u32 %v3323_v5, 16 }
  0xbb   : > { %v2283_v55 = vld [vmem:[#allocation2 + $0x64] sm:$0xf]  ;;  %2210 = vrot.lane.b32.xlu1 %v5408_v50, %s5471_s24  ;;  %939 = vst [vmem:[#allocation2 + $0x68] sm:$0x1] %v938_v46  ;;  %v940_v13 = vld [vmem:[#allocation2 + $0x6c] sm:$0xf]  ;;  %v6033_v15 = vpop.permute.xlu1 %3787  ;;  %v710_v7 = vor.u32 %v708_v12, %v6031_v4 }
  0xbc   : > { %v2828_v60 = vld [vmem:[#allocation2 + $0x64] sm:$0xf]  ;;  %2753 = vrot.lane.b32.xlu0 %v5101_v51, %s5477_s30  ;;  %v2487_v61 = vshll.u32 %v2283_v55, 16  ;;  %v2491_v58 = vshrl.u32 %v2283_v55, 16  ;;  %v2485_v16 = vrot.slane %v2484_v56, 4  ;;  %v941_v28 = vsel %vm5571_vm8, %v702_v29, %v940_v13 }
  0xbd   : > { %v2953_v62 = vrot.slane %v2828_v60, 5  ;;  %v3324_v14 = vld [vmem:[#allocation2 + $0x64] sm:$0xf]  ;;  %v712_v32 = vrot.slane %v6031_v4, 4  ;;  %942 = vst [vmem:[#allocation2 + $0x6c] sm:$0xf] %v941_v28  ;;  %v711_v30 = vsel %vm5564_vm7, %v703_v6, %v710_v7 }
  0xbe   : > { %v2489_v17 = vrot.slane %v2487_v61, 5  ;;  %v2493_v18 = vrot.slane %v2491_v58, 4  ;;  %v5409_v38 = vld [vmem:[#allocation2 + $0x60] sm:$0xff]   ;;  %v3501_v35 = vshll.u32 %v3323_v5, 16  ;;  %v3507_v40 = vshll.u32 %v3324_v14, 16 }
  0xbf   : > { %v6035_v23 = vpop.permute.xlu0 %2741  ;;  %v2955_v26 = vrot.slane %v2953_v62, 4  ;;  %v3869_v41 = vld [vmem:[#allocation2 + $0x64] sm:$0xf]  ;;  %v3500_v57 = vrot.slane %v3498_v33, 4  ;;  %v3511_v44 = vshrl.u32 %v3324_v14, 16  ;;  %v500_v45 = vsel %vm5537_vm4, 0, %v499_v21 }
  0xc0   : > { %v2494_v54 = vor.u32 %v2493_v18, %v2489_v17  ;;  %3074 = vrot.lane.b32.xlu0 %v5133_v59, %s5473_s26  ;;  %v6046_v47 = vld [vmem:[#allocation2 + $0x60] sm:$0xf]  ;;  %943 = vst.msk [vmem:[#allocation2 + $0x70] sm:$0xf] %vm881_vm6, %v711_v30  ;;  %v3503_v50 = vrot.slane %v3501_v35, 5  ;;  %v3509_v51 = vrot.slane %v3507_v40, 5  ;;  %v2490_v46 = vsel %vm5695_vm14, %v2485_v16, %v2489_v17 }
  0xc1   : > { %501 = vst [vmem:[#allocation2 + $0x74] sm:$0x1] %v500_v45  ;;  %v5181_v53 = vrot.slane %v3868_v36, 9  ;;  %v6053_v56 = vsel %vm5624_vm11, %v5118_v20, %v2953_v62  ;;  %v3513_v4 = vrot.slane %v3511_v44, 4  ;;  %v3990_v13 = vrot.slane %v3869_v41, 5 }
  0xc2   : > { %v2495_v48 = vrot.slane %v2494_v54, 4  ;;  %v2284_v24 = vld [vmem:[#allocation2 + $0x68] sm:$0x1]  ;;  %v3504_v58 = vor.u32 %v3503_v50, %v3500_v57  ;;  %v1456_v16 = vshrl.u32 %v6046_v47, 16  ;;  %v1237_v40 = vld [vmem:[#allocation2 + $0x64] sm:$0xf] }
  0xc3   : > { %v2829_v55 = vld [vmem:[#allocation2 + $0x68] sm:$0x1]  ;;  %v6055_v60 = vpop.permute.xlu1 %1699  ;;  %v2497_v29 = vshll.u32 %v2284_v24, 16  ;;  %v3514_v20 = vor.u32 %v3513_v4, %v3509_v51  ;;  %v3991_v28 = vsel %vm5624_vm11, %v5181_v53, %v3990_v13  ;;  %v3992_v33 = vrot.slane %v3990_v13, 4 }
  0xc4   : > { %v3325_v59 = vld [vmem:[#allocation2 + $0x68] sm:$0x1]  ;;  %v2956_v61 = vrot.slane %v2829_v55, 5  ;;  %3252 = vrot.lane.b32.xlu0 %v5409_v38, %s5472_s25  ;;  %v3505_v18 = vrot.slane %v3504_v58, 4  ;;  %v3326_v7 = vld [vmem:[#allocation2 + $0x6c] sm:$0xf] }
  0xc5   : > { %v3870_v5 = vld [vmem:[#allocation2 + $0x68] sm:$0x1]  ;;  %v3517_v12 = vshll.u32 %v3325_v59, 16  ;;  %v2499_v17 = vrot.slane %v2497_v29, 5  ;;  %v3515_v38 = vrot.slane %v3514_v20, 4  ;;  %v3522_v35 = vshrl.u32 %v3326_v7, 16 }
  0xc6   : > { %v6058_v6 = vpop.permute.xlu0 %3785  ;;  %v3993_v14 = vrot.slane %v3870_v5, 5  ;;  %v2957_v62 = vsel %vm5624_vm11, %v2955_v26, %v2956_v61  ;;  %v3510_v54 = vsel %vm5695_vm14, %v3505_v18, %v3509_v51  ;;  %v3525_v44 = vshll.u32 %v3326_v7, 16  ;;  %v1238_v59 = vld [vmem:[#allocation2 + $0x68] sm:$0x1]  ;;  %v3871_v58 = vld [vmem:[#allocation2 + $0x6c] sm:$0xe] }
  0xc7   : > { %v3519_v21 = vrot.slane %v3517_v12, 5  ;;  %v2500_v36 = vsel %vm5695_vm14, %v2495_v48, %v2499_v17  ;;  %v5134_v30 = vcombine.low %v6053_v56, %v2957_v62  ;;  %v3327_v53 = vld [vmem:[#allocation2 + $0x70] sm:$0xf]  ;;  %v3524_v24 = vrot.slane %v3522_v35, 4  ;;  %v1239_v20 = vld [vmem:[#allocation2 + $0x6c] sm:$0xf] }
  0xc8   : > { %v5102_v26 = vcombine.low %v2490_v46, %v2500_v36  ;;  %v944_v57 = vld [vmem:[#allocation2 + $0x74] sm:$0x1]  ;;  %v3994_v45 = vsel %vm5624_vm11, %v3992_v33, %v3993_v14  ;;  %v3527_v56 = vrot.slane %v3525_v44, 5  ;;  %v3531_v29 = vshll.u32 %v3327_v53, 16  ;;  %v3872_v14 = vld [vmem:[#allocation2 + $0x70] sm:$0xf] }
  0xc9   : > { %v3520_v48 = vsel %vm5695_vm14, %v3515_v38, %v3519_v21  ;;  %v945_v51 = vsel %vm5528_vm2, %v712_v32, %v944_v57  ;;  %v5197_v55 = vcombine.low %v3991_v28, %v3994_v45  ;;  %v3535_v61 = vshrl.u32 %v3327_v53, 16  ;;  %v1240_v53 = vld [vmem:[#allocation2 + $0x70] sm:$0xf] }
  0xca   : > { %v6069_v41 = vpop.permute.xlu0 %2023  ;;  %2755 = vrot.lane.b32.xlu1 %v5102_v26, %s5477_s30  ;;  %v5165_v46 = vcombine.low %v3510_v54, %v3520_v48  ;;  %946 = vst [vmem:[#allocation2 + $0x74] sm:$0x1] %v945_v51  ;;  %v1458_v4 = vrot.slane %v1456_v16, 4  ;;  %v1459_v5 = vshll.u32 %v6046_v47, 16  ;;  %v1465_v12 = vshll.u32 %v1237_v40, 16  ;;  %v5410_v47 = vld [vmem:[#allocation2 + $0x6c] sm:$0xff]  }
  0xcb   : > { %v6074_v50 = vpop.permute.xlu1 %1701  ;;  %v1469_v13 = vshrl.u32 %v1237_v40, 16  ;;  %v3528_v32 = vor.u32 %v3527_v56, %v3524_v24  ;;  %v6083_v17 = vrot.slane %v3531_v29, 5  ;;  %v3537_v62 = vrot.slane %v3535_v61, 4 }
  0xcc   : > { %3797 = vrot.lane.b32.xlu0 %v5165_v46, %s5478_s6  ;;  %v1475_v18 = vshll.u32 %v1238_v59, 16  ;;  %v1461_v28 = vrot.slane %v1459_v5, 5  ;;  %v1467_v33 = vrot.slane %v1465_v12, 5  ;;  %v5182_v36 = vrot.slane %v3871_v58, 9 }
  0xcd   : > { %v1471_v16 = vrot.slane %v1469_v13, 4  ;;  %v3529_v54 = vrot.slane %v3528_v32, 4  ;;  %v3538_v38 = vor.u32 %v3537_v62, %v6083_v17  ;;  %v3997_v40 = vrot.slane %v3872_v14, 5 }
  0xce   : > { %v6087_v7 = vpop.permute.xlu0 %2200  ;;  %3076 = vrot.lane.b32.xlu1 %v5134_v30, %s5473_s26  ;;  %v1477_v35 = vrot.slane %v1475_v18, 5  ;;  %v1462_v26 = vor.u32 %v1461_v28, %v1458_v4  ;;  %v1480_v44 = vshrl.u32 %v1239_v20, 16  ;;  %v1483_v45 = vshll.u32 %v1239_v20, 16  ;;  %v1784_v18 = vld [vmem:[#allocation2 + $0x60] sm:$0xe] }
  0xcf   : > { %v6085_v21 = vpop.permute.xlu1 %2025  ;;  %v1472_v57 = vor.u32 %v1471_v16, %v1467_v33  ;;  %v3539_v48 = vrot.slane %v3538_v38, 4  ;;  %v3999_v51 = vrot.slane %v3997_v40, 4  ;;  %v3534_v30 = vsel %vm5695_vm14, %v3529_v54, %v6083_v17  ;;  %v1785_v20 = vld [vmem:[#allocation2 + $0x64] sm:$0xf]  ;;  %v1786_v54 = vld [vmem:[#allocation2 + $0x68] sm:$0x1] }
  0xd0   : > { %4118 = vrot.lane.b32.xlu0 %v5197_v55, %s5475_s28  ;;  %v1463_v59 = vrot.slane %v1462_v26, 4  ;;  %v3998_v29 = vsel %vm5624_vm11, %v5182_v36, %v3997_v40  ;;  %v1482_v5 = vrot.slane %v1480_v44, 4  ;;  %v1485_v12 = vrot.slane %v1483_v45, 5  ;;  %v1787_v38 = vld [vmem:[#allocation2 + $0x6c] sm:$0xe]  ;;  %v5411_v40 = vld [vmem:[#allocation2] sm:$0xff]  }
  0xd1   : > { %v3328_v24 = vld [vmem:[#allocation2 + $0x74] sm:$0x1]  ;;  %v1473_v46 = vrot.slane %v1472_v57, 4  ;;  %v1489_v17 = vshll.u32 %v1240_v53, 16  ;;  %v1493_v62 = vshrl.u32 %v1240_v53, 16  ;;  %v5414_v26 = vld [vmem:[#allocation2 + $0xc] sm:$0xff]  }
  0xd2   : > { %v3873_v56 = vld [vmem:[#allocation2 + $0x74] sm:$0x1]  ;;  %3254 = vrot.lane.b32.xlu1 %v5410_v47, %s5472_s25  ;;  %v3541_v58 = vshll.u32 %v3328_v24, 16  ;;  %v1468_v14 = vsel %vm5695_vm14, %v1463_v59, %v1467_v33  ;;  %v1486_v47 = vor.u32 %v1485_v12, %v1482_v5  ;;  %v5415_v57 = vld [vmem:[#allocation2 + $0x18] sm:$0xff]   ;;  %v5417_v33 = vld [vmem:[#allocation2 + $0x24] sm:$0xff]   ;;  %1196 = vst.msk [vmem:[#allocation3] sm:$0xff] %vm7169_vm15, %v5411_v40 }
  0xd3   : > { %v6097_v61 = vpop.permute.xlu1 %2202  ;;  %v4000_v4 = vrot.slane %v3873_v56, 5  ;;  %v1241_v55 = vld [vmem:[#allocation2 + $0x74] sm:$0x1]  ;;  %v1478_v32 = vsel %vm5695_vm14, %v1473_v46, %v1477_v35  ;;  %v1491_v45 = vrot.slane %v1489_v17, 5  ;;  %v1495_v35 = vrot.slane %v1493_v62, 4  ;;  %v5425_v12 = vld [vmem:[#allocation2 + $0x3c] sm:$0xff]  }
  0xd4   : > { %v3543_v28 = vrot.slane %v3541_v58, 5  ;;  %v6106_v16 = vcombine.low %v1468_v14, %v1478_v32  ;;  %v1499_v24 = vshll.u32 %v1241_v55, 16  ;;  %v1788_v53 = vld [vmem:[#allocation2 + $0x70] sm:$0xf]  ;;  %v1487_v56 = vrot.slane %v1486_v47, 4  ;;  %1197 = vst.msk [vmem:[#allocation3 + $0x8] sm:$0xff] %vm7169_vm15, %v5414_v26 }
  0xd5   : > { %v6100_v13 = vpop.permute.xlu0 %2745  ;;  %v4001_v36 = vsel %vm5624_vm11, %v3999_v51, %v4000_v4  ;;  %v5424_v59 = vld [vmem:[#allocation2 + $0x30] sm:$0xff]   ;;  %v5055_v58 = vrot.slane %v1784_v18, 9  ;;  %v1917_v51 = vrot.slane %v1785_v20, 5  ;;  %v1920_v55 = vrot.slane %v1786_v54, 5  ;;  %v446_v17 = vld [vmem:[#allocation2 + $0x78] sm:$0x1] }
  0xd6   : > { %v5198_v44 = vcombine.low %v3998_v29, %v4001_v36  ;;  %v3544_v46 = vsel %vm5695_vm14, %v3539_v48, %v3543_v28  ;;  %v1789_v4 = vld [vmem:[#allocation2 + $0x74] sm:$0x1]  ;;  %v1496_v29 = vor.u32 %v1495_v35, %v1491_v45  ;;  %v1501_v32 = vrot.slane %v1499_v24, 5  ;;  %v6122_v36 = vld [vmem:[%s5553_s23 + $0x48] sm:$0xf]  ;;  %1198 = vst.msk [vmem:[#allocation3 + $0x10] sm:$0xff] %vm7169_vm15, %v5415_v57 }
  0xd7   : > { %v5166_v14 = vcombine.low %v3534_v30, %v3544_v46  ;;  %v1492_v48 = vsel %vm5695_vm14, %v1487_v56, %v1491_v45  ;;  %v1918_v18 = vsel %vm5624_vm11, %v5055_v58, %v1917_v51  ;;  %v1919_v20 = vrot.slane %v1917_v51, 4  ;;  %v6126_v54 = vld [vmem:[%s5553_s23 + $0x4c] sm:$0xf]  ;;  %1199 = vst.msk [vmem:[#allocation3 + $0x18] sm:$0xff] %vm7169_vm15, %v5417_v33  ;;  %1200 = vst.msk [vmem:[#allocation3 + $0x20] sm:$0xff] %vm7169_vm15, %v5424_v59  ;;  %v5431_v51 = vld [vmem:[#allocation2 + $0x54] sm:$0xff]  }
  0xd8   : > { %4120 = vrot.lane.b32.xlu0 %v5198_v44, %s5475_s28  ;;  %v5056_v28 = vrot.slane %v1787_v38, 9  ;;  %v1497_v30 = vrot.slane %v1496_v29, 4  ;;  %v1924_v47 = vrot.slane %v1788_v53, 5  ;;  %v1927_v44 = vrot.slane %v1789_v4, 5  ;;  %1201 = vst.msk [vmem:[#allocation3 + $0x28] sm:$0xff] %vm7169_vm15, %v5425_v12  ;;  %v5430_v45 = vld [vmem:[#allocation2 + $0x48] sm:$0xff]  }
  0xd9   : > { %v6112_v5 = vpop.permute.xlu0 %3066  ;;  %3799 = vrot.lane.b32.xlu1 %v5166_v14, %s5478_s6  ;;  %v1921_v35 = vsel %vm5624_vm11, %v1919_v20, %v1920_v55  ;;  %v447_v38 = vsel %vm5528_vm2, 0, %v446_v17  ;;  %1744 = vst.msk [vmem:[#allocation3] sm:$0xff] %vm1743_vm0, %v6006_v9  ;;  %1745 = vst.msk [vmem:[#allocation3 + $0x8] sm:$0xff] %vm1743_vm0, %v6023_v37  ;;  %v714_v33 = vshrl.u32 %v6122_v36, 16  ;;  %v717_v59 = vshll.u32 %v6122_v36, 16 }
  0xda   : > { %v1502_v24 = vsel %vm5695_vm14, %v1497_v30, %v1501_v32  ;;  %v5071_v40 = vcombine.low %v1918_v18, %v1921_v35  ;;  %v6142_v53 = vsel %vm5624_vm11, %v5056_v28, %v1924_v47  ;;  %v1926_v46 = vrot.slane %v1924_v47, 4  ;;  %448 = vst [vmem:[#allocation2 + $0x78] sm:$0x1] %v447_v38  ;;  %1746 = vst.msk [vmem:[#allocation3 + $0x10] sm:$0xff] %vm1743_vm0, %v6055_v60  ;;  %v6159_v37 = vld [vmem:[#allocation2 + $0x6c] sm:$0xf] }
  0xdb   : > { %v6115_v62 = vpop.permute.xlu1 %2747  ;;  %1747 = vst.msk [vmem:[#allocation3 + $0x18] sm:$0xff] %vm1743_vm0, %v6074_v50  ;;  %v5040_v57 = vcombine.low %v1492_v48, %v1502_v24  ;;  %v722_v9 = vshrl.u32 %v6126_v54, 16  ;;  %v725_v50 = vshll.u32 %v6126_v54, 16  ;;  %vm7170_vm3 = vcmask 130144   ;;  %v502_v56 = vld [vmem:[#allocation2 + $0x80] sm:$0x1] }
  0xdc   : > { %2068 = vst.msk [vmem:[#allocation3] sm:$0xff] %vm2067_vm1, %v5960_v43  ;;  %2069 = vst.msk [vmem:[#allocation3 + $0x8] sm:$0xff] %vm2067_vm1, %v5974_v22  ;;  %2035 = vrot.lane.b32.xlu0 %v5071_v40, %s5474_s27  ;;  %v6171_v43 = vsel %vm5624_vm11, %v1926_v46, %v1927_v44  ;;  %v5412_v22 = vld [vmem:[#allocation2 + $0x6c] sm:$0xff]   ;;  %vm2789_vm5 = vcmask 162944   ;;  %vm3110_vm9 = vcmask 195744   ;;  %vm7171_vm10 = vcmask 228544  }
  0xdd   : > { %v3245_v26 = vpop.permute.xlu0 %3244  ;;  %2070 = vst.msk [vmem:[#allocation3 + $0x10] sm:$0xff] %vm2067_vm1, %v6069_v41  ;;  %2071 = vst.msk [vmem:[#allocation3 + $0x18] sm:$0xff] %vm2067_vm1, %v6085_v21  ;;  %1711 = vrot.lane.b32.xlu1 %v6106_v16, %s5476_s29  ;;  %v2286_v41 = vld [vmem:[#allocation2 + $0x70] sm:$0xf]  ;;  %v716_v21 = vrot.slane %v714_v33, 7  ;;  %v6174_v58 = vrot.slane %v722_v9, 7  ;;  %v5072_v4 = vcombine.low %v6142_v53, %v6171_v43 }
  0xde   : > { %1202 = vst.msk [vmem:[#allocation3 + $0x30] sm:$0xff] %vm7169_vm15, %v5430_v45  ;;  %v6180_v16 = vld [vmem:[#allocation2 + $0x6c] sm:$0xe]  ;;  %vm3833_vm12 = vcmask 261344   ;;  %vm4154_vm13 = vcmask 294144   ;;  %1203 = vst.msk [vmem:[#allocation3 + $0x38] sm:$0xff] %vm7169_vm15, %v5431_v51 }
  0xdf   : > { %v3069_v60 = vpop.permute.xlu1 %3068  ;;  %2246 = vst.msk [vmem:[#allocation3 + $0x8] sm:$0xff] %vm7170_vm3, %v5931_v27  ;;  %2245 = vst.msk [vmem:[#allocation3] sm:$0xff] %vm7170_vm3, %v5919_v52  ;;  %v2287_v52 = vld [vmem:[#allocation2 + $0x74] sm:$0x1]  ;;  %v2502_v27 = vshrl.u32 %v6159_v37, 16  ;;  %v720_v12 = vrot.slane %v716_v21, 4  ;;  %v727_v14 = vor.u32 %v725_v50, %v6174_v58 }
  0xe0   : > { %2247 = vst.msk [vmem:[#allocation3 + $0x10] sm:$0xff] %vm7170_vm3, %v6087_v7  ;;  %2248 = vst.msk [vmem:[#allocation3 + $0x18] sm:$0xff] %vm7170_vm3, %v6097_v61  ;;  %v449_v7 = vld [vmem:[#allocation2 + $0x84] sm:$0x1]  ;;  %v719_v61 = vor.u32 %v717_v59, %v716_v21  ;;  %2212 = vrot.lane.b32.xlu0 %v5412_v22, %s5471_s24  ;;  %v2515_v29 = vshrl.u32 %v2286_v41, 16  ;;  %v5119_v48 = vrot.slane %v6180_v16, 9 }
  0xe1   : > { %2791 = vst.msk [vmem:[#allocation3 + $0x8] sm:$0xff] %vm2789_vm5, %v6015_v42  ;;  %2790 = vst.msk [vmem:[#allocation3] sm:$0xff] %vm2789_vm5, %v6035_v23  ;;  %v2831_v42 = vld [vmem:[#allocation2 + $0x70] sm:$0xf]  ;;  %1713 = vrot.lane.b32.xlu1 %v5040_v57, %s5476_s29  ;;  %v728_v55 = vsel %vm5564_vm7, %v720_v12, %v727_v14  ;;  %v947_v17 = vld [vmem:[#allocation2 + $0x78] sm:$0xf] }
  0xe2   : > { %2792 = vst.msk [vmem:[#allocation3 + $0x10] sm:$0xff] %vm2789_vm5, %v6100_v13  ;;  %2793 = vst.msk [vmem:[#allocation3 + $0x18] sm:$0xff] %vm2789_vm5, %v6115_v62  ;;  %v6203_v23 = vld [vmem:[%s5553_s23 + $0x50] sm:$0xf]  ;;  %v2511_v13 = vshll.u32 %v2286_v41, 16  ;;  %v503_v62 = vsel %vm5537_vm4, 0, %v502_v56  ;;  %v948_v18 = vsel %vm5571_vm8, %v719_v61, %v947_v17 }
  0xe3   : > { %3112 = vst.msk [vmem:[#allocation3 + $0x8] sm:$0xff] %vm3110_vm9, %v6000_v0  ;;  %3111 = vst.msk [vmem:[#allocation3] sm:$0xff] %vm3110_vm9, %v5949_v11  ;;  %v2504_v0 = vrot.slane %v2502_v27, 4  ;;  %v2505_v11 = vshll.u32 %v6159_v37, 16  ;;  %v3790_v32 = vpop.permute.xlu0 %3789  ;;  %v2517_v28 = vrot.slane %v2515_v29, 4  ;;  %v2960_v30 = vrot.slane %v2831_v42, 5 }
  0xe4   : > { %3113 = vst.msk [vmem:[#allocation3 + $0x10] sm:$0xff] %vm3110_vm9, %v6112_v5  ;;  %3114 = vst.msk [vmem:[#allocation3 + $0x18] sm:$0xff] %vm3110_vm9, %v3069_v60  ;;  %v2832_v5 = vld [vmem:[#allocation2 + $0x74] sm:$0x1]  ;;  %v2513_v20 = vrot.slane %v2511_v13, 5  ;;  %v450_v47 = vsel %vm5528_vm2, 0, %v449_v7 }
  0xe5   : > { %3290 = vst.msk [vmem:[#allocation3 + $0x8] sm:$0xff] %vm7171_vm10, %v5944_v63  ;;  %3289 = vst.msk [vmem:[#allocation3] sm:$0xff] %vm7171_vm10, %v5937_v39  ;;  %v2521_v63 = vshll.u32 %v2287_v52, 16  ;;  %v3247_v39 = vpop.permute.xlu1 %3246  ;;  %v547_v36 = vld [vmem:[%s5553_s23 + $0x54] sm:$0xf]  ;;  %2037 = vrot.lane.b32.xlu1 %v5072_v4, %s5474_s27  ;;  %v2963_v35 = vrot.slane %v2832_v5, 5  ;;  %v2961_v33 = vsel %vm5624_vm11, %v5119_v48, %v2960_v30 }
  0xe6   : > { %3291 = vst.msk [vmem:[#allocation3 + $0x10] sm:$0xff] %vm7171_vm10, %v3245_v26  ;;  %504 = vst [vmem:[#allocation2 + $0x80] sm:$0x1] %v503_v62  ;;  %v2518_v54 = vor.u32 %v2517_v28, %v2513_v20  ;;  %v505_v38 = vld [vmem:[#allocation2 + $0x8c] sm:$0x1]  ;;  %v729_v24 = vrot.slane %v6174_v58, 4 }
  0xe7   : > { %3835 = vst.msk [vmem:[#allocation3 + $0x8] sm:$0xff] %vm3833_vm12, %v6033_v15  ;;  %3834 = vst.msk [vmem:[#allocation3] sm:$0xff] %vm3833_vm12, %v6058_v6  ;;  %v2507_v15 = vrot.slane %v2505_v11, 5  ;;  %v2523_v6 = vrot.slane %v2521_v63, 5  ;;  %v4111_v45 = vpop.permute.xlu0 %4110  ;;  %v2962_v40 = vrot.slane %v2960_v30, 4  ;;  %v734_v53 = vshll.u32 %v6203_v23, 16 }
  0xe8   : > { %3836 = vst.msk [vmem:[#allocation3 + $0x10] sm:$0xff] %vm3833_vm12, %v3790_v32  ;;  %949 = vst [vmem:[#allocation2 + $0x78] sm:$0xf] %v948_v18  ;;  %v739_v46 = vshrl.u32 %v547_v36, 16  ;;  %v2519_v57 = vrot.slane %v2518_v54, 4  ;;  %vm4256_vm15 = vcmask 1041408  }
  0xe9   : > { %950 = vst.msk [vmem:[#allocation2 + $0x7c] sm:$0xf] %vm881_vm6, %v728_v55  ;;  %v2508_v44 = vor.u32 %v2507_v15, %v2504_v0  ;;  %451 = vst [vmem:[#allocation2 + $0x84] sm:$0x1] %v450_v47  ;;  %v742_v9 = vshll.u32 %v547_v36, 16  ;;  %v506_v37 = vsel %vm5537_vm4, 0, %v505_v38  ;;  %v2964_v50 = vsel %vm5624_vm11, %v2962_v40, %v2963_v35 }
  0xea   : > { %4156 = vst.msk [vmem:[#allocation3 + $0x8] sm:$0xff] %vm4154_vm13, %v5978_v34  ;;  %4155 = vst.msk [vmem:[#allocation3] sm:$0xff] %vm4154_vm13, %v5962_v49  ;;  %v5421_v34 = vld [vmem:[%s7166_s3 + $0x10] ss:$0 sps:$4 sm:$0x33]   ;;  %v731_v49 = vshrl.u32 %v6203_v23, 16  ;;  %v2524_v22 = vsel %vm5695_vm14, %v2519_v57, %v2523_v6  ;;  %v5135_v12 = vcombine.low %v2961_v33, %v2964_v50 }
  0xeb   : > { %3292 = vst.msk [vmem:[#allocation3 + $0x18] sm:$0xff] %vm7171_vm10, %v3247_v39  ;;  %v2509_v26 = vrot.slane %v2508_v44, 4  ;;  %5360 = vmatprep.subr.msk.bf16.mxu0 %vm4256_vm15, %v5421_v34  ;;  %v4258_v60 = vsel %vm4256_vm15, %v5421_v34, 0  ;;  %5361 = vmatprep.subr.msk.bf16.mxu1 %vm4256_vm15, %v5421_v34  ;;  %v741_v41 = vrot.slane %v739_v46, 7  ;;  %507 = vst [vmem:[#allocation2 + $0x8c] sm:$0x1] %v506_v37 }
  0xec   : > { %4157 = vst.msk [vmem:[#allocation3 + $0x10] sm:$0xff] %vm4154_vm13, %v4111_v45  ;;  %v733_v59 = vrot.slane %v731_v49, 7  ;;  %5321 = vmatpush3.bf16.msra.mxu0 %v4258_v60  ;;  %5359 = vmatpush3.bf16.msra.mxu1 %v4258_v60  ;;  %vm4207_vm15 = vcmask 293888  }
  0xed   : > { %v2514_v43 = vsel %vm5695_vm14, %v2509_v26, %v2513_v20  ;;  %v951_v21 = vld [vmem:[#allocation2 + $0x80] sm:$0x1]  ;;  %v744_v11 = vor.u32 %v742_v9, %v741_v41  ;;  %v746_v63 = vrot.slane %v741_v41, 4 }
  0xee   : > { %v5103_v56 = vcombine.low %v2514_v43, %v2524_v22  ;;  %v952_v51 = vsel %vm5528_vm2, %v729_v24, %v951_v21  ;;  %v736_v0 = vor.u32 %v734_v53, %v733_v59  ;;  %v737_v17 = vrot.slane %v733_v59, 4 }
  0xef   : > { %v2288_v4 = vld [vmem:[#allocation2 + $0x78] sm:$0xf]  ;;  %953 = vst [vmem:[#allocation2 + $0x80] sm:$0x1] %v952_v51 }
  0xf0   : > { %v2289_v58 = vld [vmem:[#allocation2 + $0x7c] sm:$0xf]  ;;  %2757 = vrot.lane.b32.xlu0 %v5103_v56, %s5477_s30  ;;  %v2526_v27 = vshrl.u32 %v2288_v4, 16  ;;  %v2529_v7 = vshll.u32 %v2288_v4, 16  ;;  %v6259_v14 = vld [vmem:[#allocation2 + $0x78] sm:$0xe]  ;;  %v745_v30 = vsel %vm5564_vm7, %v737_v17, %v744_v11 }
  0xf1   : > { %v5413_v16 = vld [vmem:[#allocation2 + $0x78] sm:$0xff]   ;;  %v2535_v52 = vshll.u32 %v2289_v58, 16  ;;  %v2539_v61 = vshrl.u32 %v2289_v58, 16  ;;  %v954_v62 = vld [vmem:[#allocation2 + $0x84] sm:$0xf]  ;;  %v5120_v15 = vrot.slane %v6259_v14, 9 }
  0xf2   : > { %2214 = vrot.lane.b32.xlu1 %v5413_v16, %s5471_s24  ;;  %v2834_v23 = vld [vmem:[#allocation2 + $0x7c] sm:$0xf]  ;;  %v2528_v13 = vrot.slane %v2526_v27, 4  ;;  %v2531_v29 = vrot.slane %v2529_v7, 5  ;;  %v4113_v55 = vpop.permute.xlu0 %4112  ;;  %v3329_v48 = vld [vmem:[#allocation2 + $0x78] sm:$0xf]  ;;  %v955_v47 = vsel %vm5571_vm8, %v736_v0, %v954_v62 }
  0xf3   : > { %v6262_v42 = vrot.slane %v2535_v52, 5  ;;  %v2541_v5 = vrot.slane %v2539_v61, 4  ;;  %v2967_v32 = vrot.slane %v2834_v23, 5  ;;  %v5418_v20 = vld [vmem:[#allocation2 + $0x78] sm:$0xff]   ;;  %v958_v36 = vld [vmem:[#allocation2 + $0x8c] sm:$0x1]  ;;  %v3792_v6 = vpop.permute.xlu1 %3791 }
  0xf4   : > { %v2532_v39 = vor.u32 %v2531_v29, %v2528_v13  ;;  %3078 = vrot.lane.b32.xlu0 %v5135_v12, %s5473_s26  ;;  %v3330_v28 = vld [vmem:[#allocation2 + $0x7c] sm:$0xf]  ;;  %v3546_v34 = vshrl.u32 %v3329_v48, 16  ;;  %v3549_v44 = vshll.u32 %v3329_v48, 16  ;;  %v3874_v54 = vld [vmem:[#allocation2 + $0x78] sm:$0xe]  ;;  %v959_v57 = vsel %vm5528_vm2, %v746_v63, %v958_v36 }
  0xf5   : > { %v2542_v18 = vor.u32 %v2541_v5, %v6262_v42  ;;  %3837 = vst.msk [vmem:[#allocation3 + $0x18] sm:$0xff] %vm3833_vm12, %v3792_v6  ;;  %v2969_v49 = vrot.slane %v2967_v32, 4  ;;  %956 = vst [vmem:[#allocation2 + $0x84] sm:$0xf] %v955_v47  ;;  %v3555_v38 = vshll.u32 %v3330_v28, 16  ;;  %v3559_v45 = vshrl.u32 %v3330_v28, 16 }
  0xf6   : > { %v2533_v35 = vrot.slane %v2532_v39, 4  ;;  %957 = vst.msk [vmem:[#allocation2 + $0x88] sm:$0xf] %vm881_vm6, %v745_v30  ;;  %v3875_v24 = vld [vmem:[#allocation2 + $0x7c] sm:$0xf]  ;;  %v2028_v40 = vpop.permute.xlu0 %2027  ;;  %v3548_v37 = vrot.slane %v3546_v34, 4  ;;  %v2968_v52 = vsel %vm5624_vm11, %v5120_v15, %v2967_v32 }
  0xf7   : > { %4158 = vst.msk [vmem:[#allocation3 + $0x18] sm:$0xff] %vm4154_vm13, %v4113_v55  ;;  %v2290_v53 = vld [vmem:[#allocation2 + $0x80] sm:$0x1]  ;;  %v2543_v33 = vrot.slane %v2542_v18, 4  ;;  %960 = vst [vmem:[#allocation2 + $0x8c] sm:$0x1] %v959_v57  ;;  %v1704_v60 = vpop.permute.xlu1 %1703 }
  0xf8   : > { %v2835_v46 = vld [vmem:[#allocation2 + $0x80] sm:$0x1]  ;;  %v2545_v59 = vshll.u32 %v2290_v53, 16  ;;  %3256 = vrot.lane.b32.xlu0 %v5418_v20, %s5472_s25  ;;  %v3551_v43 = vrot.slane %v3549_v44, 5  ;;  %v3557_v22 = vrot.slane %v3555_v38, 5  ;;  %v3561_v50 = vrot.slane %v3559_v45, 4 }
  0xf9   : > { %v3331_v26 = vld [vmem:[#allocation2 + $0x80] sm:$0x1]  ;;  %v2970_v9 = vrot.slane %v2835_v46, 5  ;;  %1748 = vst.msk [vmem:[#allocation3 + $0x20] sm:$0xff] %vm1743_vm0, %v1704_v60  ;;  %v2538_v21 = vsel %vm5695_vm14, %v2533_v35, %v6262_v42  ;;  %v5183_v16 = vrot.slane %v3874_v54, 9  ;;  %v4004_v51 = vrot.slane %v3875_v24, 5 }
  0xfa   : > { %v3565_v41 = vshll.u32 %v3331_v26, 16  ;;  %v3876_v56 = vld [vmem:[#allocation2 + $0x80] sm:$0x1]  ;;  %v2547_v58 = vrot.slane %v2545_v59, 5  ;;  %2072 = vst.msk [vmem:[#allocation3 + $0x20] sm:$0xff] %vm2067_vm1, %v2028_v40  ;;  %v2205_v4 = vpop.permute.xlu0 %2204  ;;  %v3552_v7 = vor.u32 %v3551_v43, %v3548_v37  ;;  %v3562_v61 = vor.u32 %v3561_v50, %v3557_v22  ;;  %v4171_v0 = vld [vmem:[#allocation3] sm:$0xff] }
  0xfb   : > { %v2971_v27 = vsel %vm5624_vm11, %v2969_v49, %v2970_v9  ;;  %2249 = vst.msk [vmem:[#allocation3 + $0x20] sm:$0xff] %vm7170_vm3, %v2205_v4  ;;  %v4006_v42 = vrot.slane %v4004_v51, 4  ;;  %v4007_v23 = vrot.slane %v3876_v56, 5  ;;  %v1706_v11 = vpop.permute.xlu1 %1705  ;;  %v6291_v5 = vsel %vm5624_vm11, %v5183_v16, %v4004_v51  ;;  %v1242_v32 = vld [vmem:[#allocation2 + $0x78] sm:$0xf]  ;;  %v4173_v55 = vld [vmem:[#allocation3 + $0x10] sm:$0xff]  ;;  %5322 = vmatprep.mubr.msk.bf16.mxu0 %vm4207_vm15, %v4171_v0 }
  0xfc   : > { %v2548_v12 = vsel %vm5695_vm14, %v2543_v33, %v2547_v58  ;;  %v3567_v14 = vrot.slane %v3565_v41, 5  ;;  %v3553_v29 = vrot.slane %v3552_v7, 4  ;;  %1749 = vst.msk [vmem:[#allocation3 + $0x28] sm:$0xff] %vm1743_vm0, %v1706_v11  ;;  %v5136_v17 = vcombine.low %v2968_v52, %v2971_v27  ;;  %v3332_v62 = vld [vmem:[#allocation2 + $0x84] sm:$0xf] }
  0xfd   : > { %v5104_v13 = vcombine.low %v2538_v21, %v2548_v12  ;;  %v3563_v63 = vrot.slane %v3562_v61, 4  ;;  %v3333_v48 = vld [vmem:[#allocation2 + $0x88] sm:$0xf]  ;;  %v4008_v39 = vsel %vm5624_vm11, %v4006_v42, %v4007_v23  ;;  %v3570_v20 = vshrl.u32 %v3332_v62, 16  ;;  %v4172_v6 = vld [vmem:[#allocation3 + $0x8] sm:$0xff] }
  0xfe   : > { %v3558_v18 = vsel %vm5695_vm14, %v3553_v29, %v3557_v22  ;;  %v3334_v15 = vld [vmem:[#allocation2 + $0x8c] sm:$0x1]  ;;  %v3573_v28 = vshll.u32 %v3332_v62, 16  ;;  %v3579_v36 = vshll.u32 %v3333_v48, 16  ;;  %v3583_v47 = vshrl.u32 %v3333_v48, 16  ;;  %5323 = vmatmul.mubr.msk.bf16.vlgmr.msra.gmra.mrb[0].mxu0 %vm4207_vm15, %v4172_v6  ;;  %v2750_v46 = vpop.permute.xlu0 %2749  ;;  %v5420_v37 = vld [vmem:[#allocation2 + $0x84] sm:$0xff]  }
  0xff   : > { %2759 = vrot.lane.b32.xlu1 %v5104_v13, %s5477_s30  ;;  %v3568_v30 = vsel %vm5695_vm14, %v3563_v63, %v3567_v14  ;;  %v3589_v34 = vshll.u32 %v3334_v15, 16  ;;  %v5199_v44 = vcombine.low %v6291_v5, %v4008_v39  ;;  %v1243_v54 = vld [vmem:[#allocation2 + $0x7c] sm:$0xf]  ;;  %v1244_v35 = vld [vmem:[#allocation2 + $0x80] sm:$0x1]  ;;  %v2030_v49 = vpop.permute.xlu1 %2029  ;;  %v3572_v45 = vrot.slane %v3570_v20, 4  ;;  %5326 = vmatprep.mubr.msk.bf16.mxu0 %vm4207_vm15, %v4173_v55 }
 0x100   : > { %v5167_v38 = vcombine.low %v3558_v18, %v3568_v30  ;;  %v3575_v24 = vrot.slane %v3573_v28, 5  ;;  %v3581_v40 = vrot.slane %v3579_v36, 5  ;;  %v3877_v53 = vld [vmem:[#allocation2 + $0x84] sm:$0xe]  ;;  %2073 = vst.msk [vmem:[#allocation3 + $0x28] sm:$0xff] %vm2067_vm1, %v2030_v49  ;;  %v3585_v26 = vrot.slane %v3583_v47, 4 }
 0x101   : > { %v3591_v57 = vrot.slane %v3589_v34, 5  ;;  %v1504_v33 = vshrl.u32 %v1242_v32, 16  ;;  %v1507_v59 = vshll.u32 %v1242_v32, 16  ;;  %v3878_v9 = vld [vmem:[#allocation2 + $0x88] sm:$0xf]  ;;  %2794 = vst.msk [vmem:[#allocation3 + $0x20] sm:$0xff] %vm2789_vm5, %v2750_v46 }
 0x102   : > { %3801 = vrot.lane.b32.xlu0 %v5167_v38, %s5478_s6  ;;  %v3576_v60 = vor.u32 %v3575_v24, %v3572_v45  ;;  %v1513_v43 = vshll.u32 %v1243_v54, 16  ;;  %v1517_v22 = vshrl.u32 %v1243_v54, 16  ;;  %v1523_v50 = vshll.u32 %v1244_v35, 16  ;;  %v3879_v41 = vld [vmem:[#allocation2 + $0x8c] sm:$0x1]  ;;  %v4174_v12 = vld [vmem:[#allocation3 + $0x18] sm:$0xff]  ;;  %v3071_v14 = vpop.permute.xlu0 %3070 }
 0x103   : > { %3080 = vrot.lane.b32.xlu1 %v5136_v17, %s5473_s26  ;;  %v3586_v56 = vor.u32 %v3585_v26, %v3581_v40  ;;  %v1506_v21 = vrot.slane %v1504_v33, 4  ;;  %v1509_v58 = vrot.slane %v1507_v59, 5  ;;  %v5184_v16 = vrot.slane %v3877_v53, 9  ;;  %v1245_v51 = vld [vmem:[#allocation2 + $0x84] sm:$0xf]  ;;  %v2207_v61 = vpop.permute.xlu1 %2206  ;;  %3115 = vst.msk [vmem:[#allocation3 + $0x20] sm:$0xff] %vm3110_vm9, %v3071_v14 }
 0x104   : > { %v3577_v4 = vrot.slane %v3576_v60, 4  ;;  %v1515_v52 = vrot.slane %v1513_v43, 5  ;;  %v1519_v27 = vrot.slane %v1517_v22, 4  ;;  %v1525_v7 = vrot.slane %v1523_v50, 5  ;;  %2250 = vst.msk [vmem:[#allocation3 + $0x28] sm:$0xff] %vm7170_vm3, %v2207_v61 }
 0x105   : > { %v3587_v42 = vrot.slane %v3586_v56, 4  ;;  %v1510_v23 = vor.u32 %v1509_v58, %v1506_v21  ;;  %v4011_v0 = vrot.slane %v3878_v9, 5  ;;  %v4014_v11 = vrot.slane %v3879_v41, 5  ;;  %v1246_v5 = vld [vmem:[#allocation2 + $0x88] sm:$0xf] }
 0x106   : > { %v3582_v13 = vsel %vm5695_vm14, %v3577_v4, %v3581_v40  ;;  %4122 = vrot.lane.b32.xlu0 %v5199_v44, %s5475_s28  ;;  %v1520_v29 = vor.u32 %v1519_v27, %v1515_v52  ;;  %v1528_v32 = vshrl.u32 %v1245_v51, 16  ;;  %v1531_v55 = vshll.u32 %v1245_v51, 16  ;;  %v1790_v17 = vld [vmem:[#allocation2 + $0x78] sm:$0xe]  ;;  %v1247_v18 = vld [vmem:[#allocation2 + $0x8c] sm:$0x1]  ;;  %5327 = vmatmul.mubr.msk.bf16.gmra.mrb[4].mxu0 %vm4207_vm15, %v4174_v12  ;;  %v3249_v30 = vpop.permute.xlu0 %3248 }
 0x107   : > { %3258 = vrot.lane.b32.xlu1 %v5420_v37, %s5472_s25  ;;  %v3592_v63 = vsel %vm5695_vm14, %v3587_v42, %v3591_v57  ;;  %v1511_v62 = vrot.slane %v1510_v23, 4  ;;  %v4012_v48 = vsel %vm5624_vm11, %v5184_v16, %v4011_v0  ;;  %v4013_v39 = vrot.slane %v4011_v0, 4  ;;  %v1791_v6 = vld [vmem:[#allocation2 + $0x7c] sm:$0xf]  ;;  %v1792_v35 = vld [vmem:[#allocation2 + $0x80] sm:$0x1] }
 0x108   : > { %v5168_v15 = vcombine.low %v3582_v13, %v3592_v63  ;;  %v1521_v20 = vrot.slane %v1520_v29, 4  ;;  %v1530_v28 = vrot.slane %v1528_v32, 4  ;;  %v1533_v36 = vrot.slane %v1531_v55, 5  ;;  %v1793_v49 = vld [vmem:[#allocation2 + $0x84] sm:$0xe]  ;;  %3293 = vst.msk [vmem:[#allocation3 + $0x20] sm:$0xff] %vm7171_vm10, %v3249_v30 }
 0x109   : > { %v1516_v47 = vsel %vm5695_vm14, %v1511_v62, %v1515_v52  ;;  %v4015_v34 = vsel %vm5624_vm11, %v4013_v39, %v4014_v11  ;;  %v1537_v44 = vshll.u32 %v1246_v5, 16  ;;  %v1541_v54 = vshrl.u32 %v1246_v5, 16  ;;  %v1794_v53 = vld [vmem:[#allocation2 + $0x88] sm:$0xf]  ;;  %v1795_v46 = vld [vmem:[#allocation2 + $0x8c] sm:$0x1] }
 0x10a   : > { %v1526_v38 = vsel %vm5695_vm14, %v1521_v20, %v1525_v7  ;;  %v5200_v45 = vcombine.low %v4012_v48, %v4015_v34  ;;  %v1534_v24 = vor.u32 %v1533_v36, %v1530_v28  ;;  %v1547_v40 = vshll.u32 %v1247_v18, 16  ;;  %v452_v9 = vld [vmem:[#allocation2 + $0x90] sm:$0x1]  ;;  %v5436_v37 = vld [vmem:[#allocation2 + $0x60] sm:$0xff]   ;;  %v548_v41 = vld [vmem:[%s5553_s23 + $0x58] sm:$0xf] }
 0x10b   : > { %3803 = vrot.lane.b32.xlu1 %v5168_v15, %s5478_s6  ;;  %v5041_v26 = vcombine.low %v1516_v47, %v1526_v38  ;;  %v1539_v57 = vrot.slane %v1537_v44, 5  ;;  %v1543_v33 = vrot.slane %v1541_v54, 4  ;;  %v5057_v59 = vrot.slane %v1790_v17, 9  ;;  %v549_v51 = vld [vmem:[%s5553_s23 + $0x5c] sm:$0xf]  ;;  %v5437_v11 = vld [vmem:[#allocation2 + $0x6c] sm:$0xff]  }
 0x10c   : > { %4124 = vrot.lane.b32.xlu0 %v5200_v45, %s5475_s28  ;;  %v1535_v60 = vrot.slane %v1534_v24, 4  ;;  %v1549_v43 = vrot.slane %v1547_v40, 5  ;;  %v1931_v22 = vrot.slane %v1791_v6, 5  ;;  %v1934_v50 = vrot.slane %v1792_v35, 5  ;;  %v2291_v61 = vld [vmem:[#allocation2 + $0x84] sm:$0xf] }
 0x10d   : > { %v1544_v56 = vor.u32 %v1543_v33, %v1539_v57  ;;  %v5058_v21 = vrot.slane %v1793_v49, 9  ;;  %v1938_v58 = vrot.slane %v1794_v53, 5  ;;  %v1941_v16 = vrot.slane %v1795_v46, 5  ;;  %v2292_v12 = vld [vmem:[#allocation2 + $0x88] sm:$0xf] }
 0x10e   : > { %vm7184_vm3 = vcmask 31744   ;;  %v1540_v4 = vsel %vm5695_vm14, %v1535_v60, %v1539_v57  ;;  %v1932_v52 = vsel %vm5624_vm11, %v5057_v59, %v1931_v22  ;;  %v1933_v27 = vrot.slane %v1931_v22, 4  ;;  %v508_v55 = vld [vmem:[#allocation2 + $0x98] sm:$0x1]  ;;  %v2293_v20 = vld [vmem:[#allocation2 + $0x8c] sm:$0x1] }
 0x10f   : > { %1204 = vst.msk [vmem:[#allocation3 + $0x40] sm:$0xff] %vm7184_vm3, %v5436_v37  ;;  %1715 = vrot.lane.b32.xlu1 %v5041_v26, %s5476_s29  ;;  %v453_v7 = vsel %vm5528_vm2, 0, %v452_v9  ;;  %v1545_v14 = vrot.slane %v1544_v56, 4  ;;  %v1939_v42 = vsel %vm5624_vm11, %v5058_v21, %v1938_v58  ;;  %v1940_v23 = vrot.slane %v1938_v58, 4  ;;  %v2752_v39 = vpop.permute.xlu1 %2751  ;;  %1205 = vst.msk [vmem:[#allocation3 + $0x48] sm:$0xff] %vm7184_vm3, %v5437_v11  ;;  %v5422_v6 = vld [vmem:[#allocation2 + $0x84] sm:$0xff]  }
 0x110   : > { %454 = vst [vmem:[#allocation2 + $0x90] sm:$0x1] %v453_v7  ;;  %v748_v0 = vshrl.u32 %v548_v41, 16  ;;  %v1935_v13 = vsel %vm5624_vm11, %v1933_v27, %v1934_v50  ;;  %v751_v29 = vshll.u32 %v548_v41, 16  ;;  %v756_v5 = vshrl.u32 %v549_v51, 16  ;;  %2795 = vst.msk [vmem:[#allocation3 + $0x28] sm:$0xff] %vm2789_vm5, %v2752_v39 }
 0x111   : > { %v759_v32 = vshll.u32 %v549_v51, 16  ;;  %v1550_v17 = vsel %vm5695_vm14, %v1545_v14, %v1549_v43  ;;  %v5073_v63 = vcombine.low %v1932_v52, %v1935_v13  ;;  %v1942_v62 = vsel %vm5624_vm11, %v1940_v23, %v1941_v16  ;;  %v2836_v36 = vld [vmem:[#allocation2 + $0x84] sm:$0xe]  ;;  %v2837_v54 = vld [vmem:[#allocation2 + $0x88] sm:$0xf]  ;;  %v3794_v46 = vpop.permute.xlu0 %3793 }
 0x112   : > { %v750_v48 = vrot.slane %v748_v0, 7  ;;  %v5042_v18 = vcombine.low %v1540_v4, %v1550_v17  ;;  %v6348_v15 = vrot.slane %v756_v5, 7  ;;  %v2550_v28 = vshrl.u32 %v2291_v61, 16  ;;  %v455_v35 = vld [vmem:[#allocation2 + $0x9c] sm:$0x1]  ;;  %3838 = vst.msk [vmem:[#allocation3 + $0x20] sm:$0xff] %vm3833_vm12, %v3794_v46 }
 0x113   : > { %2039 = vrot.lane.b32.xlu0 %v5073_v63, %s5474_s27  ;;  %v2553_v34 = vshll.u32 %v2291_v61, 16  ;;  %v2559_v44 = vshll.u32 %v2292_v12, 16  ;;  %v5074_v49 = vcombine.low %v1939_v42, %v1942_v62  ;;  %v2563_v24 = vshrl.u32 %v2292_v12, 16  ;;  %v6355_v40 = vld [vmem:[%s5553_s23 + $0x60] sm:$0xf]  ;;  %v3073_v37 = vpop.permute.xlu1 %3072  ;;  %v5441_v39 = vld [vmem:[#allocation2 + $0x84] sm:$0xff]  }
 0x114   : > { %v753_v30 = vor.u32 %v751_v29, %v750_v48  ;;  %v754_v47 = vrot.slane %v750_v48, 4  ;;  %1717 = vrot.lane.b32.xlu1 %v5042_v18, %s5476_s29  ;;  %v761_v38 = vor.u32 %v759_v32, %v6348_v15  ;;  %v2552_v45 = vrot.slane %v2550_v28, 4  ;;  %v551_v53 = vld [vmem:[%s5553_s23 + $0x64] sm:$0xf]  ;;  %v2838_v9 = vld [vmem:[#allocation2 + $0x8c] sm:$0x1] }
 0x115   : > { %v2555_v26 = vrot.slane %v2553_v34, 5  ;;  %v2561_v57 = vrot.slane %v2559_v44, 5  ;;  %v2569_v33 = vshll.u32 %v2293_v20, 16  ;;  %v509_v59 = vsel %vm5537_vm4, 0, %v508_v55  ;;  %3116 = vst.msk [vmem:[#allocation3 + $0x28] sm:$0xff] %vm3110_vm9, %v3073_v37  ;;  %v4115_v61 = vpop.permute.xlu0 %4114  ;;  %v5440_v48 = vld [vmem:[#allocation2 + $0x78] sm:$0xff]  }
 0x116   : > { %v762_v60 = vsel %vm5564_vm7, %v754_v47, %v761_v38  ;;  %v2565_v22 = vrot.slane %v2563_v24, 4  ;;  %510 = vst [vmem:[#allocation2 + $0x98] sm:$0x1] %v509_v59  ;;  %v5121_v50 = vrot.slane %v2836_v36, 9  ;;  %v2974_v41 = vrot.slane %v2837_v54, 5  ;;  %4159 = vst.msk [vmem:[#allocation3 + $0x20] sm:$0xff] %vm4154_vm13, %v4115_v61 }
 0x117   : > { %v961_v43 = vld [vmem:[#allocation2 + $0x90] sm:$0xf]  ;;  %2216 = vrot.lane.b32.xlu0 %v5422_v6, %s5471_s24  ;;  %964 = vst.msk [vmem:[#allocation2 + $0x94] sm:$0xf] %vm881_vm6, %v762_v60  ;;  %v2556_v21 = vor.u32 %v2555_v26, %v2552_v45  ;;  %v2571_v58 = vrot.slane %v2569_v33, 5  ;;  %v2977_v52 = vrot.slane %v2838_v9, 5  ;;  %v3251_v0 = vpop.permute.xlu1 %3250 }
 0x118   : > { %v962_v56 = vsel %vm5571_vm8, %v753_v30, %v961_v43  ;;  %v511_v16 = vld [vmem:[#allocation2 + $0xa4] sm:$0x1]  ;;  %2041 = vrot.lane.b32.xlu1 %v5074_v49, %s5474_s27  ;;  %v2566_v51 = vor.u32 %v2565_v22, %v2561_v57  ;;  %v2976_v4 = vrot.slane %v2974_v41, 4  ;;  %v456_v27 = vsel %vm5528_vm2, 0, %v455_v35  ;;  %v458_v7 = vld [vmem:[#allocation2 + $0xa8] sm:$0x1] }
 0x119   : > { %963 = vst [vmem:[#allocation2 + $0x90] sm:$0xf] %v962_v56  ;;  %v763_v12 = vrot.slane %v6348_v15, 4  ;;  %v2557_v14 = vrot.slane %v2556_v21, 4  ;;  %457 = vst [vmem:[#allocation2 + $0x9c] sm:$0x1] %v456_v27  ;;  %v2975_v29 = vsel %vm5624_vm11, %v5121_v50, %v2974_v41 }
 0x11a   : > { %v765_v42 = vshrl.u32 %v6355_v40, 16  ;;  %v773_v23 = vshrl.u32 %v551_v53, 16  ;;  %v6374_v11 = vld [vmem:[%s5553_s23 + $0x68] sm:$0xf]  ;;  %v2567_v13 = vrot.slane %v2566_v51, 4  ;;  %v776_v5 = vshll.u32 %v551_v53, 16 }
 0x11b   : > { %v512_v32 = vsel %vm5537_vm4, 0, %v511_v16  ;;  %3294 = vst.msk [vmem:[#allocation3 + $0x28] sm:$0xff] %vm7171_vm10, %v3251_v0  ;;  %v2562_v55 = vsel %vm5695_vm14, %v2557_v14, %v2561_v57  ;;  %v768_v63 = vshll.u32 %v6355_v40, 16  ;;  %v2978_v15 = vsel %vm5624_vm11, %v2976_v4, %v2977_v52  ;;  %v3796_v44 = vpop.permute.xlu1 %3795  ;;  %vm7185_vm10 = vmmov %vm7184_vm3 }
 0x11c   : > { %v767_v17 = vrot.slane %v765_v42, 7  ;;  %v6385_v62 = vrot.slane %v773_v23, 7  ;;  %513 = vst [vmem:[#allocation2 + $0xa4] sm:$0x1] %v512_v32  ;;  %v2572_v18 = vsel %vm5695_vm14, %v2567_v13, %v2571_v58  ;;  %v459_v20 = vsel %vm5528_vm2, 0, %v458_v7  ;;  %1206 = vst.msk [vmem:[#allocation3 + $0x50] sm:$0xff] %vm7184_vm3, %v5440_v48  ;;  %v4117_v38 = vpop.permute.xlu0 %4116 }
 0x11d   : > { %v782_v28 = vshrl.u32 %v6374_v11, 16  ;;  %v5105_v36 = vcombine.low %v2562_v55, %v2572_v18  ;;  %v965_v6 = vld [vmem:[#allocation2 + $0x98] sm:$0x1]  ;;  %460 = vst [vmem:[#allocation2 + $0xa8] sm:$0x1] %v459_v20  ;;  %v785_v34 = vshll.u32 %v6374_v11, 16  ;;  %v5137_v53 = vcombine.low %v2975_v29, %v2978_v15 }
 0x11e   : > { %v771_v30 = vrot.slane %v767_v17, 4  ;;  %v778_v47 = vor.u32 %v776_v5, %v6385_v62  ;;  %1207 = vst.msk [vmem:[#allocation3 + $0x58] sm:$0xff] %vm7185_vm10, %v5441_v39  ;;  %v966_v54 = vsel %vm5528_vm2, %v763_v12, %v965_v6  ;;  %v2295_v35 = vld [vmem:[#allocation2 + $0x94] sm:$0xf]  ;;  %v770_v46 = vor.u32 %v768_v63, %v767_v17  ;;  %v4175_v16 = vld [vmem:[#allocation3 + $0x20] sm:$0xff] }
 0x11f   : > { %v2840_v49 = vld [vmem:[#allocation2 + $0x94] sm:$0xf]  ;;  %3839 = vst.msk [vmem:[#allocation3 + $0x28] sm:$0xff] %vm3833_vm12, %v3796_v44  ;;  %2761 = vrot.lane.b32.xlu0 %v5105_v36, %s5477_s30  ;;  %967 = vst [vmem:[#allocation2 + $0x98] sm:$0x1] %v966_v54  ;;  %v2583_v40 = vshll.u32 %v2295_v35, 16  ;;  %v1708_v22 = vpop.permute.xlu1 %1707  ;;  %5330 = vmatprep.mubr.msk.bf16.mxu0 %vm4207_vm15, %v4175_v16 }
 0x120   : > { %v5423_v45 = vld [vmem:[#allocation2 + $0x90] sm:$0xff]   ;;  %v779_v26 = vsel %vm5564_vm7, %v771_v30, %v778_v47  ;;  %4160 = vst.msk [vmem:[#allocation3 + $0x28] sm:$0xff] %vm4154_vm13, %v4117_v38  ;;  %v2587_v59 = vshrl.u32 %v2295_v35, 16  ;;  %v2981_v37 = vrot.slane %v2840_v49, 5  ;;  %v780_v51 = vrot.slane %v6385_v62, 4 }
 0x121   : > { %v2294_v24 = vld [vmem:[#allocation2 + $0x90] sm:$0xf]  ;;  %971 = vst.msk [vmem:[#allocation2 + $0xa0] sm:$0xf] %vm881_vm6, %v779_v26  ;;  %2218 = vrot.lane.b32.xlu1 %v5423_v45, %s5471_s24  ;;  %v6407_v60 = vrot.slane %v2583_v40, 5  ;;  %v6412_v27 = vrot.slane %v782_v28, 7 }
 0x122   : > { %v2574_v57 = vshrl.u32 %v2294_v24, 16  ;;  %v2577_v33 = vshll.u32 %v2294_v24, 16  ;;  %v2839_v9 = vld [vmem:[#allocation2 + $0x90] sm:$0xe]  ;;  %v2589_v56 = vrot.slane %v2587_v59, 4  ;;  %v2983_v21 = vrot.slane %v2981_v37, 4 }
 0x123   : > { %v5122_v43 = vrot.slane %v2839_v9, 9  ;;  %v5426_v58 = vld [vmem:[#allocation2 + $0x90] sm:$0xff]   ;;  %1750 = vst.msk [vmem:[#allocation3 + $0x30] sm:$0xff] %vm1743_vm0, %v1708_v22  ;;  %3082 = vrot.lane.b32.xlu0 %v5137_v53, %s5473_s26  ;;  %v968_v4 = vld [vmem:[#allocation2 + $0x9c] sm:$0xf]  ;;  %v1710_v32 = vpop.permute.xlu1 %1709  ;;  %v2032_v55 = vpop.permute.xlu0 %2031  ;;  %vm7186_vm10 = vcmask 130144  }
 0x124   : > { %v2576_v50 = vrot.slane %v2574_v57, 4  ;;  %v2579_v41 = vrot.slane %v2577_v33, 5  ;;  %v3335_v52 = vld [vmem:[#allocation2 + $0x90] sm:$0xf]  ;;  %v2590_v61 = vor.u32 %v2589_v56, %v6407_v60  ;;  %v969_v12 = vsel %vm5571_vm8, %v770_v46, %v968_v4  ;;  %v3336_v14 = vld [vmem:[#allocation2 + $0x94] sm:$0xf]  ;;  %vm7187_vm3 = vmmov %vm7186_vm10 }
 0x125   : > { %v3594_v42 = vshrl.u32 %v3335_v52, 16  ;;  %v972_v23 = vld [vmem:[#allocation2 + $0xa4] sm:$0x1]  ;;  %970 = vst [vmem:[#allocation2 + $0x9c] sm:$0xf] %v969_v12  ;;  %v3597_v0 = vshll.u32 %v3335_v52, 16  ;;  %v6424_v18 = vsel %vm5624_vm11, %v5122_v43, %v2981_v37 }
 0x126   : > { %v2580_v7 = vor.u32 %v2579_v41, %v2576_v50  ;;  %v3603_v13 = vshll.u32 %v3336_v14, 16  ;;  %v3607_v29 = vshrl.u32 %v3336_v14, 16  ;;  %v973_v5 = vsel %vm5528_vm2, %v780_v51, %v972_v23  ;;  %v2296_v17 = vld [vmem:[#allocation2 + $0x98] sm:$0x1]  ;;  %1751 = vst.msk [vmem:[#allocation3 + $0x38] sm:$0xff] %vm1743_vm0, %v1710_v32 }
 0x127   : > { %v2591_v62 = vrot.slane %v2590_v61, 4  ;;  %v2841_v48 = vld [vmem:[#allocation2 + $0x98] sm:$0x1]  ;;  %974 = vst [vmem:[#allocation2 + $0xa4] sm:$0x1] %v973_v5  ;;  %2074 = vst.msk [vmem:[#allocation3 + $0x30] sm:$0xff] %vm2067_vm1, %v2032_v55  ;;  %3260 = vrot.lane.b32.xlu0 %v5426_v58, %s5472_s25  ;;  %v2034_v24 = vpop.permute.xlu1 %2033  ;;  %v2209_v40 = vpop.permute.xlu0 %2208 }
 0x128   : > { %v2581_v63 = vrot.slane %v2580_v7, 4  ;;  %v2593_v39 = vshll.u32 %v2296_v17, 16  ;;  %v2984_v15 = vrot.slane %v2841_v48, 5  ;;  %v3337_v20 = vld [vmem:[#allocation2 + $0x98] sm:$0x1]  ;;  %v3596_v36 = vrot.slane %v3594_v42, 4 }
 0x129   : > { %v3599_v6 = vrot.slane %v3597_v0, 5  ;;  %v3605_v30 = vrot.slane %v3603_v13, 5  ;;  %v3339_v47 = vld [vmem:[#allocation2 + $0xa0] sm:$0xf]  ;;  %v3609_v49 = vrot.slane %v3607_v29, 4  ;;  %v3613_v38 = vshll.u32 %v3337_v20, 16 }
 0x12a   : > { %v2586_v28 = vsel %vm5695_vm14, %v2581_v63, %v6407_v60  ;;  %v4176_v44 = vld [vmem:[#allocation3 + $0x28] sm:$0xff]  ;;  %v2595_v54 = vrot.slane %v2593_v39, 5  ;;  %v2985_v35 = vsel %vm5624_vm11, %v2983_v21, %v2984_v15  ;;  %v3880_v45 = vld [vmem:[#allocation2 + $0x90] sm:$0xe]  ;;  %v3627_v46 = vshll.u32 %v3339_v47, 16  ;;  %2075 = vst.msk [vmem:[#allocation3 + $0x38] sm:$0xff] %vm2067_vm1, %v2034_v24 }
 0x12b   : > { %5331 = vmatmul.mubr.msk.bf16.gmra.mrb[8].mxu0 %vm4207_vm15, %v4176_v44  ;;  %v3600_v53 = vor.u32 %v3599_v6, %v3596_v36  ;;  %v3631_v26 = vshrl.u32 %v3339_v47, 16  ;;  %2251 = vst.msk [vmem:[#allocation3 + $0x30] sm:$0xff] %vm7186_vm10, %v2209_v40  ;;  %v3610_v33 = vor.u32 %v3609_v49, %v3605_v30  ;;  %v3615_v59 = vrot.slane %v3613_v38, 5  ;;  %v3881_v9 = vld [vmem:[#allocation2 + $0x94] sm:$0xf] }
 0x12c   : > { %v2596_v57 = vsel %vm5695_vm14, %v2591_v62, %v2595_v54  ;;  %v3882_v37 = vld [vmem:[#allocation2 + $0x98] sm:$0x1]  ;;  %v6440_v60 = vor.u32 %v785_v34, %v6412_v27  ;;  %v5138_v22 = vcombine.low %v6424_v18, %v2985_v35  ;;  %v3338_v41 = vld [vmem:[#allocation2 + $0x9c] sm:$0xf]  ;;  %v5185_v56 = vrot.slane %v3880_v45, 9  ;;  %v5442_v29 = vld [vmem:[#allocation2 + $0x90] sm:$0xff]  }
 0x12d   : > { %v5106_v43 = vcombine.low %v2586_v28, %v2596_v57  ;;  %v3601_v50 = vrot.slane %v3600_v53, 4  ;;  %v1248_v21 = vld [vmem:[#allocation2 + $0x90] sm:$0xf]  ;;  %v3611_v58 = vrot.slane %v3610_v33, 4  ;;  %v3618_v51 = vshrl.u32 %v3338_v41, 16  ;;  %v5427_v5 = vld [vmem:[#allocation2 + $0x9c] sm:$0xff]   ;;  %v2211_v62 = vpop.permute.xlu1 %2210 }
 0x12e   : > { %v3340_v16 = vld [vmem:[#allocation2 + $0xa4] sm:$0x1]  ;;  %v3621_v4 = vshll.u32 %v3338_v41, 16  ;;  %v3629_v52 = vrot.slane %v3627_v46, 5  ;;  %v3633_v11 = vrot.slane %v3631_v26, 4  ;;  %v4018_v61 = vrot.slane %v3881_v9, 5  ;;  %v2754_v48 = vpop.permute.xlu0 %2753 }
 0x12f   : > { %2763 = vrot.lane.b32.xlu1 %v5106_v43, %s5477_s30  ;;  %v3606_v7 = vsel %vm5695_vm14, %v3601_v50, %v3605_v30  ;;  %v3637_v34 = vshll.u32 %v3340_v16, 16  ;;  %v1249_v12 = vld [vmem:[#allocation2 + $0x94] sm:$0xf]  ;;  %v3616_v14 = vsel %vm5695_vm14, %v3611_v58, %v3615_v59  ;;  %v3620_v42 = vrot.slane %v3618_v51, 4  ;;  %v1250_v13 = vld [vmem:[#allocation2 + $0x98] sm:$0x1] }
 0x130   : > { %v3623_v23 = vrot.slane %v3621_v4, 5  ;;  %v4021_v0 = vrot.slane %v3882_v37, 5  ;;  %v5169_v32 = vcombine.low %v3606_v7, %v3616_v14  ;;  %v3634_v55 = vor.u32 %v3633_v11, %v3629_v52  ;;  %v3883_v28 = vld [vmem:[#allocation2 + $0x9c] sm:$0xe]  ;;  %2252 = vst.msk [vmem:[#allocation3 + $0x38] sm:$0xff] %vm7187_vm3, %v2211_v62 }
 0x131   : > { %v3639_v17 = vrot.slane %v3637_v34, 5  ;;  %v4019_v63 = vsel %vm5624_vm11, %v5185_v56, %v4018_v61  ;;  %v4020_v18 = vrot.slane %v4018_v61, 4  ;;  %v1552_v15 = vshrl.u32 %v1248_v21, 16  ;;  %2796 = vst.msk [vmem:[#allocation3 + $0x30] sm:$0xff] %vm2789_vm5, %v2754_v48  ;;  %v5443_v36 = vld [vmem:[#allocation2 + $0x9c] sm:$0xff]  }
 0x132   : > { %v3624_v39 = vor.u32 %v3623_v23, %v3620_v42  ;;  %v1555_v20 = vshll.u32 %v1248_v21, 16  ;;  %vm7188_vm10 = vcmask 31744   ;;  %3805 = vrot.lane.b32.xlu0 %v5169_v32, %s5478_s6  ;;  %v3635_v6 = vrot.slane %v3634_v55, 4  ;;  %v3884_v54 = vld [vmem:[#allocation2 + $0xa0] sm:$0xf]  ;;  %v3075_v59 = vpop.permute.xlu0 %3074 }
 0x133   : > { %1208 = vst.msk [vmem:[#allocation3 + $0x60] sm:$0xff] %vm7188_vm10, %v5442_v29  ;;  %3084 = vrot.lane.b32.xlu1 %v5138_v22, %s5473_s26  ;;  %v1561_v30 = vshll.u32 %v1249_v12, 16  ;;  %v1565_v47 = vshrl.u32 %v1249_v12, 16  ;;  %v1571_v44 = vshll.u32 %v1250_v13, 16  ;;  %v4022_v49 = vsel %vm5624_vm11, %v4020_v18, %v4021_v0  ;;  %v3885_v24 = vld [vmem:[#allocation2 + $0xa4] sm:$0x1]  ;;  %vm7189_vm3 = vmmov %vm7188_vm10 }
 0x134   : > { %v3625_v35 = vrot.slane %v3624_v39, 4  ;;  %v1554_v38 = vrot.slane %v1552_v15, 4  ;;  %v1557_v45 = vrot.slane %v1555_v20, 5  ;;  %1209 = vst.msk [vmem:[#allocation3 + $0x68] sm:$0xff] %vm7189_vm3, %v5443_v36  ;;  %v3640_v40 = vsel %vm5695_vm14, %v3635_v6, %v3639_v17  ;;  %v1251_v57 = vld [vmem:[#allocation2 + $0x9c] sm:$0xf] }
 0x135   : > { %v5201_v53 = vcombine.low %v4019_v63, %v4022_v49  ;;  %v1563_v46 = vrot.slane %v1561_v30, 5  ;;  %v1567_v26 = vrot.slane %v1565_v47, 4  ;;  %v1252_v33 = vld [vmem:[#allocation2 + $0xa0] sm:$0xf]  ;;  %v1573_v43 = vrot.slane %v1571_v44, 5  ;;  %3117 = vst.msk [vmem:[#allocation3 + $0x30] sm:$0xff] %vm3110_vm9, %v3075_v59 }
 0x136   : > { %v3630_v9 = vsel %vm5695_vm14, %v3625_v35, %v3629_v52  ;;  %v1558_v37 = vor.u32 %v1557_v45, %v1554_v38  ;;  %v5186_v22 = vrot.slane %v3883_v28, 9  ;;  %v1253_v50 = vld [vmem:[#allocation2 + $0xa4] sm:$0x1]  ;;  %v4025_v21 = vrot.slane %v3884_v54, 5  ;;  %v1796_v16 = vld [vmem:[#allocation2 + $0x90] sm:$0xe]  ;;  %v3253_v23 = vpop.permute.xlu0 %3252 }
 0x137   : > { %3262 = vrot.lane.b32.xlu1 %v5427_v5, %s5472_s25  ;;  %v5170_v41 = vcombine.low %v3630_v9, %v3640_v40  ;;  %4126 = vrot.lane.b32.xlu0 %v5201_v53, %s5475_s28  ;;  %v1568_v56 = vor.u32 %v1567_v26, %v1563_v46  ;;  %v4028_v58 = vrot.slane %v3885_v24, 5  ;;  %v1576_v4 = vshrl.u32 %v1251_v57, 16  ;;  %v1797_v52 = vld [vmem:[#allocation2 + $0x94] sm:$0xf]  ;;  %v1798_v42 = vld [vmem:[#allocation2 + $0x98] sm:$0x1] }
 0x138   : > { %v1559_v51 = vrot.slane %v1558_v37, 4  ;;  %v1579_v7 = vshll.u32 %v1251_v57, 16  ;;  %v1585_v11 = vshll.u32 %v1252_v33, 16  ;;  %v4026_v61 = vsel %vm5624_vm11, %v5186_v22, %v4025_v21  ;;  %v1799_v32 = vld [vmem:[#allocation2 + $0x9c] sm:$0xe] }
 0x139   : > { %v1569_v34 = vrot.slane %v1568_v56, 4  ;;  %v4027_v12 = vrot.slane %v4025_v21, 4  ;;  %v1589_v14 = vshrl.u32 %v1252_v33, 16  ;;  %v1578_v13 = vrot.slane %v1576_v4, 4  ;;  %v1800_v48 = vld [vmem:[#allocation2 + $0xa0] sm:$0xf] }
 0x13a   : > { %v1564_v0 = vsel %vm5695_vm14, %v1559_v51, %v1563_v46  ;;  %v1581_v29 = vrot.slane %v1579_v7, 5  ;;  %v1587_v5 = vrot.slane %v1585_v11, 5  ;;  %vm7190_vm10 = vcmask 228544   ;;  %v1801_v39 = vld [vmem:[#allocation2 + $0xa4] sm:$0x1] }
 0x13b   : > { %3295 = vst.msk [vmem:[#allocation3 + $0x30] sm:$0xff] %vm7190_vm10, %v3253_v23  ;;  %3807 = vrot.lane.b32.xlu1 %v5170_v41, %s5478_s6  ;;  %v1574_v55 = vsel %vm5695_vm14, %v1569_v34, %v1573_v43  ;;  %v4029_v17 = vsel %vm5624_vm11, %v4027_v12, %v4028_v58  ;;  %v1591_v63 = vrot.slane %v1589_v14, 4  ;;  %v1595_v62 = vshll.u32 %v1253_v50, 16  ;;  %v553_v36 = vld [vmem:[%s5553_s23 + $0x6c] sm:$0xf]  ;;  %v5428_v23 = vld [vmem:[#allocation2 + $0x9c] sm:$0xff]   ;;  %vm7191_vm3 = vmmov %vm7190_vm10 }
 0x13c   : > { %v5043_v18 = vcombine.low %v1564_v0, %v1574_v55  ;;  %v5202_v15 = vcombine.low %v4026_v61, %v4029_v17  ;;  %v1582_v20 = vor.u32 %v1581_v29, %v1578_v13  ;;  %v5059_v28 = vrot.slane %v1796_v16, 9  ;;  %v975_v54 = vld [vmem:[#allocation2 + $0xa8] sm:$0xf]  ;;  %v2297_v24 = vld [vmem:[#allocation2 + $0x9c] sm:$0xf]  ;;  %v2756_v43 = vpop.permute.xlu1 %2755 }
 0x13d   : > { %v1592_v6 = vor.u32 %v1591_v63, %v1587_v5  ;;  %v1597_v30 = vrot.slane %v1595_v62, 5  ;;  %v1945_v47 = vrot.slane %v1797_v52, 5  ;;  %v1948_v44 = vrot.slane %v1798_v42, 5  ;;  %v2298_v40 = vld [vmem:[#allocation2 + $0xa0] sm:$0xf]  ;;  %2797 = vst.msk [vmem:[#allocation3 + $0x38] sm:$0xff] %vm2789_vm5, %v2756_v43 }
 0x13e   : > { %4128 = vrot.lane.b32.xlu0 %v5202_v15, %s5475_s28  ;;  %v1583_v35 = vrot.slane %v1582_v20, 4  ;;  %v5060_v49 = vrot.slane %v1799_v32, 9  ;;  %v1952_v38 = vrot.slane %v1800_v48, 5  ;;  %v1955_v45 = vrot.slane %v1801_v39, 5  ;;  %v2299_v56 = vld [vmem:[#allocation2 + $0xa4] sm:$0x1]  ;;  %v3798_v52 = vpop.permute.xlu0 %3797 }
 0x13f   : > { %1719 = vrot.lane.b32.xlu1 %v5043_v18, %s5476_s29  ;;  %v1593_v53 = vrot.slane %v1592_v6, 4  ;;  %v1946_v46 = vsel %vm5624_vm11, %v5059_v28, %v1945_v47  ;;  %v1947_v26 = vrot.slane %v1945_v47, 4  ;;  %v788_v57 = vrot.slane %v6412_v27, 4  ;;  %v514_v21 = vld [vmem:[#allocation2 + $0xb0] sm:$0x1]  ;;  %3840 = vst.msk [vmem:[#allocation3 + $0x30] sm:$0xff] %vm3833_vm12, %v3798_v52 }
 0x140   : > { %v1588_v33 = vsel %vm5695_vm14, %v1583_v35, %v1587_v5  ;;  %v1953_v59 = vsel %vm5624_vm11, %v5060_v49, %v1952_v38  ;;  %v1954_v9 = vrot.slane %v1952_v38, 4  ;;  %v790_v37 = vshrl.u32 %v553_v36, 16  ;;  %v2842_v7 = vld [vmem:[#allocation2 + $0x9c] sm:$0xe]  ;;  %v461_v11 = vld [vmem:[#allocation2 + $0xb4] sm:$0x1]  ;;  %v3077_v55 = vpop.permute.xlu1 %3076 }
 0x141   : > { %v1598_v22 = vsel %vm5695_vm14, %v1593_v53, %v1597_v30  ;;  %v1949_v50 = vsel %vm5624_vm11, %v1947_v26, %v1948_v44  ;;  %v793_v41 = vshll.u32 %v553_v36, 16  ;;  %v976_v27 = vsel %vm5571_vm8, %v6440_v60, %v975_v54  ;;  %v2843_v14 = vld [vmem:[#allocation2 + $0xa0] sm:$0xf]  ;;  %v554_v42 = vld [vmem:[%s5553_s23 + $0x70] sm:$0xf]  ;;  %3118 = vst.msk [vmem:[#allocation3 + $0x38] sm:$0xff] %vm3110_vm9, %v3077_v55 }
 0x142   : > { %v5044_v58 = vcombine.low %v1588_v33, %v1598_v22  ;;  %v5075_v16 = vcombine.low %v1946_v46, %v1949_v50  ;;  %v1956_v51 = vsel %vm5624_vm11, %v1954_v9, %v1955_v45  ;;  %v6495_v4 = vrot.slane %v790_v37, 7  ;;  %977 = vst [vmem:[#allocation2 + $0xa8] sm:$0xf] %v976_v27  ;;  %v2844_v32 = vld [vmem:[#allocation2 + $0xa4] sm:$0x1]  ;;  %v4119_v36 = vpop.permute.xlu0 %4118 }
 0x143   : > { %v5076_v34 = vcombine.low %v1953_v59, %v1956_v51  ;;  %v2598_v61 = vshrl.u32 %v2297_v24, 16  ;;  %v2601_v12 = vshll.u32 %v2297_v24, 16  ;;  %v2607_v60 = vshll.u32 %v2298_v40, 16  ;;  %v555_v39 = vld [vmem:[%s5553_s23 + $0x74] sm:$0xf]  ;;  %4161 = vst.msk [vmem:[#allocation3 + $0x30] sm:$0xff] %vm4154_vm13, %v4119_v36 }
 0x144   : > { %1721 = vrot.lane.b32.xlu1 %v5044_v58, %s5476_s29  ;;  %2043 = vrot.lane.b32.xlu0 %v5075_v16, %s5474_s27  ;;  %v795_v0 = vor.u32 %v793_v41, %v6495_v4  ;;  %v797_v13 = vrot.slane %v6495_v4, 4  ;;  %v2611_v29 = vshrl.u32 %v2298_v40, 16  ;;  %v2617_v5 = vshll.u32 %v2299_v56, 16  ;;  %v3255_v45 = vpop.permute.xlu1 %3254 }
 0x145   : > { %v2600_v17 = vrot.slane %v2598_v61, 4  ;;  %v2603_v63 = vrot.slane %v2601_v12, 5  ;;  %v2609_v62 = vrot.slane %v2607_v60, 5  ;;  %v515_v48 = vsel %vm5537_vm4, 0, %v514_v21  ;;  %3296 = vst.msk [vmem:[#allocation3 + $0x38] sm:$0xff] %vm7191_vm3, %v3255_v45 }
 0x146   : > { %v796_v18 = vsel %vm5564_vm7, %v788_v57, %v795_v0  ;;  %v2613_v15 = vrot.slane %v2611_v29, 4  ;;  %v2619_v20 = vrot.slane %v2617_v5, 5  ;;  %516 = vst [vmem:[#allocation2 + $0xb0] sm:$0x1] %v515_v48  ;;  %v5123_v28 = vrot.slane %v2842_v7, 9 }
 0x147   : > { %978 = vst.msk [vmem:[#allocation2 + $0xac] sm:$0xf] %vm881_vm6, %v796_v18  ;;  %v2604_v6 = vor.u32 %v2603_v63, %v2600_v17  ;;  %v2988_v30 = vrot.slane %v2843_v14, 5  ;;  %v2991_v47 = vrot.slane %v2844_v32, 5  ;;  %v462_v44 = vsel %vm5528_vm2, 0, %v461_v11 }
 0x148   : > { %2045 = vrot.lane.b32.xlu1 %v5076_v34, %s5474_s27  ;;  %2220 = vrot.lane.b32.xlu0 %v5428_v23, %s5471_s24  ;;  %v2614_v54 = vor.u32 %v2613_v15, %v2609_v62  ;;  %463 = vst [vmem:[#allocation2 + $0xb4] sm:$0x1] %v462_v44  ;;  %v799_v35 = vshrl.u32 %v554_v42, 16  ;;  %v802_v49 = vshll.u32 %v554_v42, 16  ;;  %v807_v38 = vshrl.u32 %v555_v39, 16 }
 0x149   : > { %v2605_v24 = vrot.slane %v2604_v6, 4  ;;  %v2300_v40 = vld [vmem:[#allocation2 + $0xa8] sm:$0xf]  ;;  %v2990_v53 = vrot.slane %v2988_v30, 4  ;;  %v2989_v9 = vsel %vm5624_vm11, %v5123_v28, %v2988_v30  ;;  %v810_v51 = vshll.u32 %v555_v39, 16 }
 0x14a   : > { %v2615_v46 = vrot.slane %v2614_v54, 4  ;;  %v2622_v26 = vshrl.u32 %v2300_v40, 16  ;;  %v2625_v57 = vshll.u32 %v2300_v40, 16  ;;  %v801_v33 = vrot.slane %v799_v35, 7  ;;  %v6520_v37 = vld [vmem:[#allocation2 + $0xa8] sm:$0xe]  ;;  %v4121_v7 = vpop.permute.xlu0 %4120 }
 0x14b   : > { %v2610_v59 = vsel %vm5695_vm14, %v2605_v24, %v2609_v62  ;;  %v6522_v43 = vrot.slane %v807_v38, 7  ;;  %v2992_v27 = vsel %vm5624_vm11, %v2990_v53, %v2991_v47  ;;  %v3341_v4 = vld [vmem:[#allocation2 + $0xa8] sm:$0xf]  ;;  %v5124_v12 = vrot.slane %v6520_v37, 9  ;;  %v517_v29 = vld [vmem:[#allocation2 + $0xbc] sm:$0x1]  ;;  %v3800_v32 = vpop.permute.xlu1 %3799 }
 0x14c   : > { %v2620_v22 = vsel %vm5695_vm14, %v2615_v46, %v2619_v20  ;;  %v2624_v50 = vrot.slane %v2622_v26, 4  ;;  %v2627_v41 = vrot.slane %v2625_v57, 5  ;;  %v804_v58 = vor.u32 %v802_v49, %v801_v33  ;;  %v6533_v5 = vld [vmem:[#allocation2 + $0xa8] sm:$0xe]  ;;  %3841 = vst.msk [vmem:[#allocation3 + $0x38] sm:$0xff] %vm3833_vm12, %v3800_v32 }
 0x14d   : > { %v5107_v56 = vcombine.low %v2610_v59, %v2620_v22  ;;  %v979_v21 = vld [vmem:[#allocation2 + $0xb0] sm:$0x1]  ;;  %v805_v16 = vrot.slane %v801_v33, 4  ;;  %v5139_v42 = vcombine.low %v2989_v9, %v2992_v27  ;;  %v812_v0 = vor.u32 %v810_v51, %v6522_v43  ;;  %v6536_v63 = vld [vmem:[#allocation2 + $0xa8] sm:$0xf]  ;;  %4162 = vst.msk [vmem:[#allocation3 + $0x38] sm:$0xff] %vm4154_vm13, %v4121_v7 }
 0x14e   : > { %v5429_v11 = vld [vmem:[#allocation2 + $0xa8] sm:$0xff]   ;;  %v980_v52 = vsel %vm5528_vm2, %v797_v13, %v979_v21  ;;  %v2628_v61 = vor.u32 %v2627_v41, %v2624_v50  ;;  %v3642_v17 = vshrl.u32 %v3341_v4, 16  ;;  %v814_v36 = vrot.slane %v6522_v43, 4  ;;  %v2036_v24 = vpop.permute.xlu0 %2035 }
 0x14f   : > { %v2301_v34 = vld [vmem:[#allocation2 + $0xac] sm:$0xf]  ;;  %2765 = vrot.lane.b32.xlu0 %v5107_v56, %s5477_s30  ;;  %981 = vst [vmem:[#allocation2 + $0xb0] sm:$0x1] %v980_v52  ;;  %2222 = vrot.lane.b32.xlu1 %v5429_v11, %s5471_s24  ;;  %v982_v55 = vld [vmem:[#allocation2 + $0xb4] sm:$0xf]  ;;  %v813_v39 = vsel %vm5564_vm7, %v805_v16, %v812_v0  ;;  %v1712_v45 = vpop.permute.xlu1 %1711 }
 0x150   : > { %v2631_v60 = vshll.u32 %v2301_v34, 16  ;;  %v2635_v14 = vshrl.u32 %v2301_v34, 16  ;;  %v2846_v23 = vld [vmem:[#allocation2 + $0xac] sm:$0xf]  ;;  %v983_v18 = vsel %vm5571_vm8, %v804_v58, %v982_v55  ;;  %v6546_v28 = vrot.slane %v2628_v61, 4  ;;  %1752 = vst.msk [vmem:[#allocation3 + $0x40] sm:$0xff] %vm1743_vm0, %v1712_v45 }
 0x151   : > { %v2995_v13 = vrot.slane %v2846_v23, 5  ;;  %v3342_v15 = vld [vmem:[#allocation2 + $0xac] sm:$0xf]  ;;  %984 = vst [vmem:[#allocation2 + $0xb4] sm:$0xf] %v983_v18  ;;  %v3644_v6 = vrot.slane %v3642_v17, 4 }
 0x152   : > { %v6539_v62 = vrot.slane %v2631_v60, 5  ;;  %v2637_v48 = vrot.slane %v2635_v14, 4  ;;  %v3887_v20 = vld [vmem:[#allocation2 + $0xac] sm:$0xf]  ;;  %985 = vst.msk [vmem:[#allocation2 + $0xb8] sm:$0xf] %vm881_vm6, %v813_v39  ;;  %v2213_v7 = vpop.permute.xlu0 %2212 }
 0x153   : > { %v3645_v30 = vshll.u32 %v3341_v4, 16  ;;  %v4177_v47 = vld [vmem:[#allocation3 + $0x30] sm:$0xff]  ;;  %3086 = vrot.lane.b32.xlu0 %v5139_v42, %s5473_s26  ;;  %v2997_v54 = vrot.slane %v2995_v13, 4  ;;  %v3651_v49 = vshll.u32 %v3342_v15, 16  ;;  %v3655_v38 = vshrl.u32 %v3342_v15, 16  ;;  %2076 = vst.msk [vmem:[#allocation3 + $0x40] sm:$0xff] %vm2067_vm1, %v2036_v24  ;;  %v1714_v4 = vpop.permute.xlu1 %1713 }
 0x154   : > { %v2638_v44 = vor.u32 %v2637_v48, %v6539_v62  ;;  %v5432_v35 = vld [vmem:[#allocation2 + $0xa8] sm:$0xff]   ;;  %5334 = vmatprep.mubr.msk.bf16.mxu0 %vm4207_vm15, %v4177_v47  ;;  %v518_v53 = vsel %vm5537_vm4, 0, %v517_v29  ;;  %v5187_v46 = vrot.slane %v6533_v5, 9  ;;  %v4032_v26 = vrot.slane %v3887_v20, 5  ;;  %1753 = vst.msk [vmem:[#allocation3 + $0x48] sm:$0xff] %vm1743_vm0, %v1714_v4 }
 0x155   : > { %v3647_v40 = vrot.slane %v3645_v30, 5  ;;  %v3653_v33 = vrot.slane %v3651_v49, 5  ;;  %v3657_v59 = vrot.slane %v3655_v38, 4  ;;  %519 = vst [vmem:[#allocation2 + $0xbc] sm:$0x1] %v518_v53  ;;  %v1600_v9 = vshrl.u32 %v6536_v63, 16 }
 0x156   : > { %v2639_v57 = vrot.slane %v2638_v44, 4  ;;  %v2302_v37 = vld [vmem:[#allocation2 + $0xb0] sm:$0x1]  ;;  %v6561_v50 = vsel %vm5624_vm11, %v5124_v12, %v2995_v13  ;;  %v2634_v11 = vsel %vm5695_vm14, %v6546_v28, %v6539_v62  ;;  %v4034_v34 = vrot.slane %v4032_v26, 4  ;;  %v1255_v39 = vld [vmem:[#allocation2 + $0xac] sm:$0xf] }
 0x157   : > { %v2847_v22 = vld [vmem:[#allocation2 + $0xb0] sm:$0x1]  ;;  %v3648_v27 = vor.u32 %v3647_v40, %v3644_v6  ;;  %v2641_v56 = vshll.u32 %v2302_v37, 16  ;;  %3264 = vrot.lane.b32.xlu0 %v5432_v35, %s5472_s25  ;;  %v3658_v58 = vor.u32 %v3657_v59, %v3653_v33  ;;  %vm7192_vm10 = vcmask 130144   ;;  %v2038_v18 = vpop.permute.xlu1 %2037 }
 0x158   : > { %v3343_v41 = vld [vmem:[#allocation2 + $0xb0] sm:$0x1]  ;;  %v2998_v21 = vrot.slane %v2847_v22, 5  ;;  %2253 = vst.msk [vmem:[#allocation3 + $0x40] sm:$0xff] %vm7192_vm10, %v2213_v7  ;;  %v4033_v14 = vsel %vm5624_vm11, %v5187_v46, %v4032_v26  ;;  %v6574_v42 = vrot.slane %v1600_v9, 4  ;;  %v1603_v46 = vshll.u32 %v6536_v63, 16 }
 0x159   : > { %v3661_v16 = vshll.u32 %v3343_v41, 16  ;;  %v3888_v51 = vld [vmem:[#allocation2 + $0xb0] sm:$0x1]  ;;  %v3649_v52 = vrot.slane %v3648_v27, 4  ;;  %v2643_v12 = vrot.slane %v2641_v56, 5  ;;  %v3659_v29 = vrot.slane %v3658_v58, 4 }
 0x15a   : > { %v4035_v61 = vrot.slane %v3888_v51, 5  ;;  %v2999_v60 = vsel %vm5624_vm11, %v2997_v54, %v2998_v21  ;;  %v3344_v32 = vld [vmem:[#allocation2 + $0xb4] sm:$0xf]  ;;  %v3345_v13 = vld [vmem:[#allocation2 + $0xb8] sm:$0xf]  ;;  %2077 = vst.msk [vmem:[#allocation3 + $0x48] sm:$0xff] %vm2067_vm1, %v2038_v18 }
 0x15b   : > { %v5140_v23 = vcombine.low %v6561_v50, %v2999_v60  ;;  %v3654_v0 = vsel %vm5695_vm14, %v3649_v52, %v3653_v33  ;;  %v3663_v5 = vrot.slane %v3661_v16, 5  ;;  %v2644_v55 = vsel %vm5695_vm14, %v2639_v57, %v2643_v12  ;;  %v1256_v47 = vld [vmem:[#allocation2 + $0xb0] sm:$0x1]  ;;  %v3890_v45 = vld [vmem:[#allocation2 + $0xb8] sm:$0xf]  ;;  %v5444_v27 = vld [vmem:[#allocation2 + $0xa8] sm:$0xff]  }
 0x15c   : > { %v3666_v17 = vshrl.u32 %v3344_v32, 16  ;;  %v3669_v62 = vshll.u32 %v3344_v32, 16  ;;  %v3675_v48 = vshll.u32 %v3345_v13, 16  ;;  %v5108_v15 = vcombine.low %v2634_v11, %v2644_v55  ;;  %v986_v28 = vld [vmem:[#allocation2 + $0xbc] sm:$0x1]  ;;  %v4178_v44 = vld [vmem:[#allocation3 + $0x38] sm:$0xff] }
 0x15d   : > { %v3664_v20 = vsel %vm5695_vm14, %v3659_v29, %v3663_v5  ;;  %v3679_v6 = vshrl.u32 %v3345_v13, 16  ;;  %v4036_v30 = vsel %vm5624_vm11, %v4034_v34, %v4035_v61  ;;  %v987_v35 = vsel %vm5528_vm2, %v814_v36, %v986_v28  ;;  %5335 = vmatmul.mubr.msk.bf16.gmra.mrb[12].mxu0 %vm4207_vm15, %v4178_v44  ;;  %v3889_v26 = vld [vmem:[#allocation2 + $0xb4] sm:$0xe]  ;;  %v6596_v9 = vld [vmem:[#allocation2 + $0xa8] sm:$0xe] }
 0x15e   : > { %v5171_v54 = vcombine.low %v3654_v0, %v3664_v20  ;;  %v3668_v49 = vrot.slane %v3666_v17, 4  ;;  %v3671_v38 = vrot.slane %v3669_v62, 5  ;;  %2767 = vrot.lane.b32.xlu1 %v5108_v15, %s5477_s30  ;;  %988 = vst [vmem:[#allocation2 + $0xbc] sm:$0x1] %v987_v35  ;;  %v6592_v24 = vrot.slane %v3675_v48, 5  ;;  %v5433_v58 = vld [vmem:[#allocation2 + $0xb4] sm:$0xff]  }
 0x15f   : > { %v3681_v40 = vrot.slane %v3679_v6, 4  ;;  %v5203_v53 = vcombine.low %v4033_v14, %v4036_v30  ;;  %v1609_v57 = vshll.u32 %v1255_v39, 16  ;;  %v1613_v36 = vshrl.u32 %v1255_v39, 16  ;;  %v1257_v59 = vld [vmem:[#allocation2 + $0xb4] sm:$0xf] }
 0x160   : > { %3809 = vrot.lane.b32.xlu0 %v5171_v54, %s5478_s6  ;;  %v3672_v43 = vor.u32 %v3671_v38, %v3668_v49  ;;  %v1619_v33 = vshll.u32 %v1256_v47, 16  ;;  %v1605_v22 = vrot.slane %v1603_v46, 5  ;;  %v4039_v50 = vrot.slane %v3890_v45, 5  ;;  %v1258_v41 = vld [vmem:[#allocation2 + $0xb8] sm:$0xf] }
 0x161   : > { %v3682_v37 = vor.u32 %v3681_v40, %v6592_v24  ;;  %v6599_v56 = vrot.slane %v1609_v57, 5  ;;  %v1615_v21 = vrot.slane %v1613_v36, 4  ;;  %v5188_v63 = vrot.slane %v3889_v26, 9  ;;  %v1803_v29 = vld [vmem:[#allocation2 + $0xac] sm:$0xf]  ;;  %v5445_v6 = vld [vmem:[#allocation2 + $0xb4] sm:$0xff]  }
 0x162   : > { %3088 = vrot.lane.b32.xlu1 %v5140_v23, %s5473_s26  ;;  %v3673_v16 = vrot.slane %v3672_v43, 4  ;;  %v1606_v4 = vor.u32 %v1605_v22, %v6574_v42  ;;  %v1621_v7 = vrot.slane %v1619_v33, 5  ;;  %v2758_v11 = vpop.permute.xlu0 %2757  ;;  %vm7193_vm3 = vcmask 31744   ;;  %v1804_v62 = vld [vmem:[#allocation2 + $0xb0] sm:$0x1] }
 0x163   : > { %v3683_v51 = vrot.slane %v3682_v37, 4  ;;  %1210 = vst.msk [vmem:[#allocation3 + $0x70] sm:$0xff] %vm7193_vm3, %v5444_v27  ;;  %v1616_v52 = vor.u32 %v1615_v21, %v6599_v56  ;;  %v4041_v34 = vrot.slane %v4039_v50, 4  ;;  %v1624_v61 = vshrl.u32 %v1257_v59, 16  ;;  %v1805_v35 = vld [vmem:[#allocation2 + $0xb4] sm:$0xe] }
 0x164   : > { %4130 = vrot.lane.b32.xlu0 %v5203_v53, %s5475_s28  ;;  %v1627_v12 = vshll.u32 %v1257_v59, 16  ;;  %v2215_v60 = vpop.permute.xlu1 %2214  ;;  %2798 = vst.msk [vmem:[#allocation3 + $0x40] sm:$0xff] %vm2789_vm5, %v2758_v11  ;;  %v1607_v14 = vrot.slane %v1606_v4, 4  ;;  %v1633_v23 = vshll.u32 %v1258_v41, 16  ;;  %v1637_v0 = vshrl.u32 %v1258_v41, 16 }
 0x165   : > { %v5061_v42 = vrot.slane %v6596_v9, 9  ;;  %2254 = vst.msk [vmem:[#allocation3 + $0x48] sm:$0xff] %vm7192_vm10, %v2215_v60  ;;  %v3346_v5 = vld [vmem:[#allocation2 + $0xbc] sm:$0x1]  ;;  %v1617_v32 = vrot.slane %v1616_v52, 4  ;;  %v4040_v55 = vsel %vm5624_vm11, %v5188_v63, %v4039_v50  ;;  %v1626_v17 = vrot.slane %v1624_v61, 4 }
 0x166   : > { %v3891_v13 = vld [vmem:[#allocation2 + $0xbc] sm:$0x1]  ;;  %3266 = vrot.lane.b32.xlu1 %v5433_v58, %s5472_s25  ;;  %v3678_v48 = vsel %vm5695_vm14, %v3673_v16, %v6592_v24  ;;  %v3685_v39 = vshll.u32 %v3346_v5, 16  ;;  %v1629_v20 = vrot.slane %v1627_v12, 5  ;;  %v3079_v28 = vpop.permute.xlu0 %3078  ;;  %v1612_v30 = vsel %vm5695_vm14, %v1607_v14, %v6599_v56  ;;  %v464_v49 = vld [vmem:[#allocation2 + $0xc0] sm:$0x1] }
 0x167   : > { %v4042_v18 = vrot.slane %v3891_v13, 5  ;;  %v1259_v15 = vld [vmem:[#allocation2 + $0xbc] sm:$0x1]  ;;  %v1635_v47 = vrot.slane %v1633_v23, 5  ;;  %v1639_v44 = vrot.slane %v1637_v0, 4  ;;  %3119 = vst.msk [vmem:[#allocation3 + $0x40] sm:$0xff] %vm3110_vm9, %v3079_v28  ;;  %v1622_v45 = vsel %vm5695_vm14, %v1617_v32, %v1621_v7 }
 0x168   : > { %v1643_v54 = vshll.u32 %v1259_v15, 16  ;;  %v3687_v38 = vrot.slane %v3685_v39, 5  ;;  %v1630_v40 = vor.u32 %v1629_v20, %v1626_v17  ;;  %v1806_v53 = vld [vmem:[#allocation2 + $0xb8] sm:$0xf]  ;;  %v1807_v46 = vld [vmem:[#allocation2 + $0xbc] sm:$0x1]  ;;  %v5045_v58 = vcombine.low %v1612_v30, %v1622_v45 }
 0x169   : > { %v4043_v24 = vsel %vm5624_vm11, %v4041_v34, %v4042_v18  ;;  %1211 = vst.msk [vmem:[#allocation3 + $0x78] sm:$0xff] %vm7193_vm3, %v5445_v6  ;;  %v1640_v43 = vor.u32 %v1639_v44, %v1635_v47  ;;  %v1959_v36 = vrot.slane %v1803_v29, 5  ;;  %v1962_v9 = vrot.slane %v1804_v62, 5  ;;  %v556_v22 = vld [vmem:[%s5553_s23 + $0x78] sm:$0xf] }
 0x16a   : > { %v5204_v26 = vcombine.low %v4040_v55, %v4043_v24  ;;  %v1645_v57 = vrot.slane %v1643_v54, 5  ;;  %v3688_v33 = vsel %vm5695_vm14, %v3683_v51, %v3687_v38  ;;  %v1631_v59 = vrot.slane %v1630_v40, 4  ;;  %v3257_v50 = vpop.permute.xlu0 %3256  ;;  %v557_v63 = vld [vmem:[%s5553_s23 + $0x7c] sm:$0xf]  ;;  %v2303_v7 = vld [vmem:[#allocation2 + $0xb4] sm:$0xf] }
 0x16b   : > { %v5062_v37 = vrot.slane %v1805_v35, 9  ;;  %v5172_v41 = vcombine.low %v3678_v48, %v3688_v33  ;;  %v1641_v27 = vrot.slane %v1640_v43, 4  ;;  %v1960_v56 = vsel %vm5624_vm11, %v5061_v42, %v1959_v36  ;;  %v2304_v12 = vld [vmem:[#allocation2 + $0xb8] sm:$0xf]  ;;  %v520_v13 = vld [vmem:[#allocation2 + $0xc8] sm:$0x1] }
 0x16c   : > { %4132 = vrot.lane.b32.xlu0 %v5204_v26, %s5475_s28  ;;  %v1961_v21 = vrot.slane %v1959_v36, 4  ;;  %vm7194_vm10 = vcmask 228544   ;;  %v1966_v16 = vrot.slane %v1806_v53, 5  ;;  %v1969_v4 = vrot.slane %v1807_v46, 5  ;;  %v5434_v17 = vld [vmem:[#allocation2 + $0xb4] sm:$0xff]  }
 0x16d   : > { %3297 = vst.msk [vmem:[#allocation3 + $0x40] sm:$0xff] %vm7194_vm10, %v3257_v50  ;;  %v465_v51 = vsel %vm5528_vm2, 0, %v464_v49  ;;  %3811 = vrot.lane.b32.xlu1 %v5172_v41, %s5478_s6  ;;  %v1636_v11 = vsel %vm5695_vm14, %v1631_v59, %v1635_v47  ;;  %v816_v34 = vshrl.u32 %v556_v22, 16  ;;  %v819_v61 = vshll.u32 %v556_v22, 16  ;;  %v2305_v62 = vld [vmem:[#allocation2 + $0xbc] sm:$0x1] }
 0x16e   : > { %v1963_v52 = vsel %vm5624_vm11, %v1961_v21, %v1962_v9  ;;  %466 = vst [vmem:[#allocation2 + $0xc0] sm:$0x1] %v465_v51  ;;  %v1646_v60 = vsel %vm5695_vm14, %v1641_v27, %v1645_v57  ;;  %v6643_v23 = vsel %vm5624_vm11, %v5062_v37, %v1966_v16  ;;  %v1968_v0 = vrot.slane %v1966_v16, 4  ;;  %v2848_v30 = vld [vmem:[#allocation2 + $0xb4] sm:$0xe] }
 0x16f   : > { %v5077_v14 = vcombine.low %v1960_v56, %v1963_v52  ;;  %v818_v29 = vrot.slane %v816_v34, 7  ;;  %v824_v42 = vshrl.u32 %v557_v63, 16  ;;  %v827_v5 = vshll.u32 %v557_v63, 16  ;;  %v2849_v47 = vld [vmem:[#allocation2 + $0xb8] sm:$0xf] }
 0x170   : > { %v2646_v32 = vshrl.u32 %v2303_v7, 16  ;;  %v1970_v55 = vsel %vm5624_vm11, %v1968_v0, %v1969_v4  ;;  %v2649_v48 = vshll.u32 %v2303_v7, 16  ;;  %v2655_v39 = vshll.u32 %v2304_v12, 16  ;;  %v2850_v45 = vld [vmem:[#allocation2 + $0xbc] sm:$0x1] }
 0x171   : > { %2047 = vrot.lane.b32.xlu0 %v5077_v14, %s5474_s27  ;;  %v2659_v18 = vshrl.u32 %v2304_v12, 16  ;;  %1723 = vrot.lane.b32.xlu1 %v5045_v58, %s5476_s29  ;;  %v5046_v15 = vcombine.low %v1636_v11, %v1646_v60  ;;  %v821_v20 = vor.u32 %v819_v61, %v818_v29  ;;  %v822_v28 = vrot.slane %v818_v29, 4  ;;  %v2760_v44 = vpop.permute.xlu1 %2759  ;;  %v467_v26 = vld [vmem:[#allocation2 + $0xcc] sm:$0x1]  ;;  %v523_v9 = vld [vmem:[#allocation2 + $0xd4] sm:$0x1] }
 0x172   : > { %v826_v6 = vrot.slane %v824_v42, 7  ;;  %v2648_v54 = vrot.slane %v2646_v32, 4  ;;  %v2651_v35 = vrot.slane %v2649_v48, 5  ;;  %v2657_v49 = vrot.slane %v2655_v39, 5  ;;  %2799 = vst.msk [vmem:[#allocation3 + $0x48] sm:$0xff] %vm2789_vm5, %v2760_v44 }
 0x173   : > { %v2661_v38 = vrot.slane %v2659_v18, 4  ;;  %v5078_v24 = vcombine.low %v6643_v23, %v1970_v55  ;;  %v2665_v53 = vshll.u32 %v2305_v62, 16  ;;  %v521_v46 = vsel %vm5537_vm4, 0, %v520_v13  ;;  %v3351_v16 = vld [vmem:[#allocation2 + $0xd0] sm:$0xf] }
 0x174   : > { %v829_v40 = vor.u32 %v827_v5, %v826_v6  ;;  %v2652_v57 = vor.u32 %v2651_v35, %v2648_v54  ;;  %522 = vst [vmem:[#allocation2 + $0xc8] sm:$0x1] %v521_v46  ;;  %v5125_v33 = vrot.slane %v2848_v30, 9  ;;  %v3002_v59 = vrot.slane %v2849_v47, 5  ;;  %v3802_v56 = vpop.permute.xlu0 %3801 }
 0x175   : > { %2224 = vrot.lane.b32.xlu0 %v5434_v17, %s5471_s24  ;;  %v989_v43 = vld [vmem:[#allocation2 + $0xc0] sm:$0xf]  ;;  %v2662_v36 = vor.u32 %v2661_v38, %v2657_v49  ;;  %1725 = vrot.lane.b32.xlu1 %v5046_v15, %s5476_s29  ;;  %v2667_v50 = vrot.slane %v2665_v53, 5  ;;  %v3005_v41 = vrot.slane %v2850_v45, 5  ;;  %v3081_v27 = vpop.permute.xlu1 %3080  ;;  %3842 = vst.msk [vmem:[#allocation3 + $0x40] sm:$0xff] %vm3833_vm12, %v3802_v56  ;;  %v831_v25 = vrot.slane %v826_v6, 4 }
 0x176   : > { %v830_v37 = vsel %vm5564_vm7, %v822_v28, %v829_v40  ;;  %v990_v22 = vsel %vm5571_vm8, %v821_v20, %v989_v43  ;;  %v2653_v21 = vrot.slane %v2652_v57, 4  ;;  %v3004_v58 = vrot.slane %v3002_v59, 4  ;;  %3120 = vst.msk [vmem:[#allocation3 + $0x48] sm:$0xff] %vm3110_vm9, %v3081_v27 }
 0x177   : > { %991 = vst [vmem:[#allocation2 + $0xc0] sm:$0xf] %v990_v22  ;;  %992 = vst.msk [vmem:[#allocation2 + $0xc4] sm:$0xf] %vm881_vm6, %v830_v37  ;;  %v2663_v63 = vrot.slane %v2662_v36, 4  ;;  %v468_v4 = vsel %vm5528_vm2, 0, %v467_v26  ;;  %v3003_v52 = vsel %vm5624_vm11, %v5125_v33, %v3002_v59 }
 0x178   : > { %v524_v51 = vsel %vm5537_vm4, 0, %v523_v9  ;;  %v2658_v7 = vsel %vm5695_vm14, %v2653_v21, %v2657_v49  ;;  %v3006_v34 = vsel %vm5624_vm11, %v3004_v58, %v3005_v41  ;;  %469 = vst [vmem:[#allocation2 + $0xcc] sm:$0x1] %v468_v4  ;;  %v3723_v12 = vshll.u32 %v3351_v16, 16  ;;  %v4123_v60 = vpop.permute.xlu0 %4122  ;;  %vm7195_vm4 = vmmov %vm7194_vm10 }
 0x179   : > { %v2668_v11 = vsel %vm5695_vm14, %v2663_v63, %v2667_v50  ;;  %525 = vst [vmem:[#allocation2 + $0xd4] sm:$0x1] %v524_v51  ;;  %2049 = vrot.lane.b32.xlu1 %v5078_v24, %s5474_s27  ;;  %v3259_v3 = vpop.permute.xlu1 %3258  ;;  %4163 = vst.msk [vmem:[#allocation3 + $0x40] sm:$0xff] %vm4154_vm13, %v4123_v60  ;;  %v5141_v23 = vcombine.low %v3003_v52, %v3006_v34  ;;  %v3727_v29 = vshrl.u32 %v3351_v16, 16  ;;  %vm4549_vm10 = vcmask 60416  }
 0x17a   : > { %v5109_v61 = vcombine.low %v2658_v7, %v2668_v11  ;;  %3298 = vst.msk [vmem:[#allocation3 + $0x48] sm:$0xff] %vm7195_vm4, %v3259_v3  ;;  %v6680_v5 = vrot.slane %v3723_v12, 5  ;;  %vm7198_vm7 = vmmov %vm7195_vm4 }
 0x17b   : > { %v993_v14 = vld [vmem:[#allocation2 + $0xc8] sm:$0x1]  ;;  %v6685_v6 = vrot.slane %v3727_v29, 4  ;;  %vm7202_vm3 = vmmov %vm7195_vm4 }
 0x17c   : > { %2769 = vrot.lane.b32.xlu0 %v5109_v61, %s5477_s30  ;;  %v994_v0 = vsel %vm5528_vm2, %v831_v25, %v993_v14  ;;  %v3896_v14 = vld [vmem:[#allocation2 + $0xd0] sm:$0xf] }
 0x17d   : > { %995 = vst [vmem:[#allocation2 + $0xc8] sm:$0x1] %v994_v0  ;;  %v3804_v32 = vpop.permute.xlu1 %3803  ;;  %v3730_v50 = vor.u32 %v6685_v6, %v6680_v5 }
 0x17e   : > { %v5435_v42 = vld [vmem:[#allocation2 + $0xc0] sm:$0xff]   ;;  %3843 = vst.msk [vmem:[#allocation3 + $0x48] sm:$0xff] %vm3833_vm12, %v3804_v32  ;;  %v4125_v20 = vpop.permute.xlu0 %4124 }
 0x17f   : > { %v2306_v13 = vld [vmem:[#allocation2 + $0xc0] sm:$0xf]  ;;  %v2307_v55 = vld [vmem:[#allocation2 + $0xc4] sm:$0xf]  ;;  %2226 = vrot.lane.b32.xlu1 %v5435_v42, %s5471_s24  ;;  %4164 = vst.msk [vmem:[#allocation3 + $0x48] sm:$0xff] %vm4154_vm13, %v4125_v20 }
 0x180   : > { %v2851_v17 = vld [vmem:[#allocation2 + $0xc0] sm:$0xe]  ;;  %v2670_v62 = vshrl.u32 %v2306_v13, 16  ;;  %v2673_v48 = vshll.u32 %v2306_v13, 16  ;;  %v2679_v39 = vshll.u32 %v2307_v55, 16  ;;  %v2683_v18 = vshrl.u32 %v2307_v55, 16  ;;  %3090 = vrot.lane.b32.xlu0 %v5141_v23, %s5473_s26 }
 0x181   : > { %v2852_v15 = vld [vmem:[#allocation2 + $0xc4] sm:$0xf]  ;;  %v1716_v49 = vpop.permute.xlu1 %1715  ;;  %v4179_v38 = vld [vmem:[#allocation3 + $0x40] sm:$0xff]  ;;  %v5126_v45 = vrot.slane %v2851_v17, 9  ;;  %v1060_v40 = vld [vmem:[#allocation2 + $0xcc] sm:$0xf] }
 0x182   : > { %v3009_v28 = vrot.slane %v2852_v15, 5  ;;  %v2672_v30 = vrot.slane %v2670_v62, 4  ;;  %v2675_v47 = vrot.slane %v2673_v48, 5  ;;  %v2681_v44 = vrot.slane %v2679_v39, 5  ;;  %v5438_v35 = vld [vmem:[#allocation2 + $0xc0] sm:$0xff]   ;;  %1754 = vst.msk [vmem:[#allocation3 + $0x50] sm:$0xff] %vm1743_vm0, %v1716_v49  ;;  %5338 = vmatprep.mubr.msk.bf16.mxu1 %vm4207_vm15, %v4179_v38 }
 0x183   : > { %v2685_v54 = vrot.slane %v2683_v18, 4  ;;  %v3347_v53 = vld [vmem:[#allocation2 + $0xc0] sm:$0xf]  ;;  %v1061_v43 = vsel %vm5571_vm8, %v5598_v2, %v1060_v40  ;;  %v3348_v57 = vld [vmem:[#allocation2 + $0xc4] sm:$0xf]  ;;  %v4053_v15 = vrot.slane %v3896_v14, 5  ;;  %vm7199_vm8 = vmmov %vm7195_vm4 }
 0x184   : > { %v3011_v24 = vrot.slane %v3009_v28, 4  ;;  %v2676_v46 = vor.u32 %v2675_v47, %v2672_v30  ;;  %3268 = vrot.lane.b32.xlu0 %v5438_v35, %s5472_s25  ;;  %v3690_v36 = vshrl.u32 %v3347_v53, 16  ;;  %v1064_v33 = vld [vmem:[#allocation2 + $0xd4] sm:$0x1]  ;;  %v2308_v59 = vld [vmem:[#allocation2 + $0xc8] sm:$0x1]  ;;  %vm7203_vm4 = vmmov %vm7202_vm3 }
 0x185   : > { %v2686_v26 = vor.u32 %v2685_v54, %v2681_v44  ;;  %v2853_v9 = vld [vmem:[#allocation2 + $0xc8] sm:$0x1]  ;;  %1062 = vst [vmem:[#allocation2 + $0xcc] sm:$0xf] %v1061_v43  ;;  %v1065_v22 = vsel %vm5528_vm2, %v5613_v10, %v1064_v33  ;;  %v2689_v56 = vshll.u32 %v2308_v59, 16  ;;  %v3693_v63 = vshll.u32 %v3347_v53, 16  ;;  %v2040_v4 = vpop.permute.xlu0 %2039 }
 0x186   : > { %v3349_v37 = vld [vmem:[#allocation2 + $0xc8] sm:$0x1]  ;;  %v2677_v41 = vrot.slane %v2676_v46, 4  ;;  %v3012_v21 = vrot.slane %v2853_v9, 5  ;;  %1066 = vst [vmem:[#allocation2 + $0xd4] sm:$0x1] %v1065_v22  ;;  %v3010_v10 = vsel %vm5624_vm11, %v5126_v45, %v3009_v28  ;;  %v1718_v52 = vpop.permute.xlu1 %1717 }
 0x187   : > { %v2687_v27 = vrot.slane %v2686_v26, 4  ;;  %v3892_v31 = vld [vmem:[#allocation2 + $0xc0] sm:$0xe]  ;;  %v3692_v2 = vrot.slane %v3690_v36, 4  ;;  %v3699_v58 = vshll.u32 %v3348_v57, 16  ;;  %v3703_v16 = vshrl.u32 %v3348_v57, 16 }
 0x188   : > { %v3893_v25 = vld [vmem:[#allocation2 + $0xc4] sm:$0xf]  ;;  %v2682_v51 = vsel %vm5695_vm14, %v2677_v41, %v2681_v44  ;;  %v2691_v1 = vrot.slane %v2689_v56, 5  ;;  %v3709_v7 = vshll.u32 %v3349_v37, 16  ;;  %v3894_v11 = vld [vmem:[#allocation2 + $0xc8] sm:$0x1]  ;;  %v3013_v61 = vsel %vm5624_vm11, %v3011_v24, %v3012_v21 }
 0x189   : > { %2078 = vst.msk [vmem:[#allocation3 + $0x50] sm:$0xff] %vm2067_vm1, %v2040_v4  ;;  %v4180_v34 = vld [vmem:[#allocation3 + $0x48] sm:$0xff]  ;;  %v3695_v12 = vrot.slane %v3693_v63, 5  ;;  %v3701_v3 = vrot.slane %v3699_v58, 5  ;;  %v3705_v60 = vrot.slane %v3703_v16, 4  ;;  %v5189_v29 = vrot.slane %v3892_v31, 9  ;;  %v2217_v62 = vpop.permute.xlu0 %2216 }
 0x18a   : > { %1755 = vst.msk [vmem:[#allocation3 + $0x58] sm:$0xff] %vm1743_vm0, %v1718_v52  ;;  %5339 = vmatmul.mubr.msk.bf16.vlgmr.msra.gmra.mrb[0].mxu1 %vm4207_vm15, %v4180_v34  ;;  %v2692_v23 = vsel %vm5695_vm14, %v2687_v27, %v2691_v1  ;;  %v3711_v0 = vrot.slane %v3709_v7, 5  ;;  %v4046_v42 = vrot.slane %v3893_v25, 5  ;;  %v4049_v17 = vrot.slane %v3894_v11, 5  ;;  %v2042_v20 = vpop.permute.xlu1 %2041 }
 0x18b   : > { %v5110_v32 = vcombine.low %v2682_v51, %v2692_v23  ;;  %v3696_v13 = vor.u32 %v3695_v12, %v3692_v2  ;;  %v3706_v55 = vor.u32 %v3705_v60, %v3701_v3  ;;  %v5142_v48 = vcombine.low %v3010_v10, %v3013_v61  ;;  %2079 = vst.msk [vmem:[#allocation3 + $0x58] sm:$0xff] %vm2067_vm1, %v2042_v20 }
 0x18c   : > { %v3350_v39 = vld [vmem:[#allocation2 + $0xcc] sm:$0xf]  ;;  %v4048_v18 = vrot.slane %v4046_v42, 4  ;;  %vm7196_vm2 = vcmask 130144   ;;  %v3731_v54 = vrot.slane %v3730_v50, 4  ;;  %v4047_v49 = vsel %vm5624_vm11, %v5189_v29, %v4046_v42 }
 0x18d   : > { %2255 = vst.msk [vmem:[#allocation3 + $0x50] sm:$0xff] %vm7196_vm2, %v2217_v62  ;;  %2771 = vrot.lane.b32.xlu1 %v5110_v32, %s5477_s30  ;;  %v3697_v28 = vrot.slane %v3696_v13, 4  ;;  %v3707_v6 = vrot.slane %v3706_v55, 4  ;;  %v3352_v30 = vld [vmem:[#allocation2 + $0xd4] sm:$0x1]  ;;  %v3714_v47 = vshrl.u32 %v3350_v39, 16  ;;  %vm7197_vm6 = vmmov %vm7196_vm2 }
 0x18e   : > { %v3717_v44 = vshll.u32 %v3350_v39, 16  ;;  %v3733_v35 = vshll.u32 %v3352_v30, 16  ;;  %v4050_v38 = vsel %vm5624_vm11, %v4048_v18, %v4049_v17  ;;  %v3895_v46 = vld [vmem:[#allocation2 + $0xcc] sm:$0xe]  ;;  %v3897_v26 = vld [vmem:[#allocation2 + $0xd4] sm:$0x1] }
 0x18f   : > { %v3702_v45 = vsel %vm5695_vm14, %v3697_v28, %v3701_v3  ;;  %v3712_v24 = vsel %vm5695_vm14, %v3707_v6, %v3711_v0  ;;  %v3716_v40 = vrot.slane %v3714_v47, 4  ;;  %v5439_v36 = vld [vmem:[#allocation2 + $0xcc] sm:$0xff]   ;;  %v5205_v59 = vcombine.low %v4047_v49, %v4050_v38 }
 0x190   : > { %v3719_v53 = vrot.slane %v3717_v44, 5  ;;  %v5173_v43 = vcombine.low %v3702_v45, %v3712_v24  ;;  %v3735_v57 = vrot.slane %v3733_v35, 5  ;;  %v5190_v9 = vrot.slane %v3895_v46, 9 }
 0x191   : > { %3092 = vrot.lane.b32.xlu1 %v5142_v48, %s5473_s26  ;;  %v4055_v37 = vrot.slane %v4053_v15, 4  ;;  %v4056_v22 = vrot.slane %v3897_v26, 5  ;;  %v2762_v27 = vpop.permute.xlu0 %2761 }
 0x192   : > { %v3720_v33 = vor.u32 %v3719_v53, %v3716_v40  ;;  %3813 = vrot.lane.b32.xlu0 %v5173_v43, %s5478_s6  ;;  %v3736_v41 = vsel %vm5695_vm14, %v3731_v54, %v3735_v57  ;;  %2800 = vst.msk [vmem:[#allocation3 + $0x50] sm:$0xff] %vm2789_vm5, %v2762_v27  ;;  %v4054_v2 = vsel %vm5624_vm11, %v5190_v9, %v4053_v15 }
 0x193   : > { %v2219_v21 = vpop.permute.xlu1 %2218  ;;  %v4057_v63 = vsel %vm5624_vm11, %v4055_v37, %v4056_v22  ;;  %vm7200_vm11 = vmmov %vm7196_vm2 }
 0x194   : > { %v3721_v50 = vrot.slane %v3720_v33, 4  ;;  %2256 = vst.msk [vmem:[#allocation3 + $0x58] sm:$0xff] %vm7197_vm6, %v2219_v21  ;;  %v5206_v16 = vcombine.low %v4054_v2, %v4057_v63  ;;  %vm7204_vm6 = vmmov %vm7196_vm2 }
 0x195   : > { %3270 = vrot.lane.b32.xlu1 %v5439_v36, %s5472_s25  ;;  %v3083_v58 = vpop.permute.xlu0 %3082 }
 0x196   : > { %v3726_v56 = vsel %vm5695_vm14, %v3721_v50, %v6680_v5  ;;  %4134 = vrot.lane.b32.xlu0 %v5205_v59, %s5475_s28  ;;  %3121 = vst.msk [vmem:[#allocation3 + $0x50] sm:$0xff] %vm3110_vm9, %v3083_v58  ;;  %vm7201_vm14 = vmmov %vm7196_vm2 }
 0x197   : > { %v5174_v31 = vcombine.low %v3726_v56, %v3736_v41 }
 0x199   : > { %3815 = vrot.lane.b32.xlu1 %v5174_v31, %s5478_s6  ;;  %v3261_v8 = vpop.permute.xlu0 %3260 }
 0x19a   : > { %3299 = vst.msk [vmem:[#allocation3 + $0x50] sm:$0xff] %vm7198_vm7, %v3261_v8  ;;  %vm7205_vm7 = vmmov %vm7202_vm3 }
 0x19d   : > { %4136 = vrot.lane.b32.xlu1 %v5206_v16, %s5475_s28 }
 0x1a1   : > { %v2764_v5 = vpop.permute.xlu1 %2763 }
 0x1a2   : > { %2801 = vst.msk [vmem:[#allocation3 + $0x58] sm:$0xff] %vm2789_vm5, %v2764_v5 }
 0x1a4   : > { %v3806_v4 = vpop.permute.xlu0 %3805 }
 0x1a5   : > { %v3085_v25 = vpop.permute.xlu1 %3084  ;;  %3844 = vst.msk [vmem:[#allocation3 + $0x50] sm:$0xff] %vm3833_vm12, %v3806_v4 }
 0x1a6   : > { %3122 = vst.msk [vmem:[#allocation3 + $0x58] sm:$0xff] %vm3110_vm9, %v3085_v25 }
 0x1a9   : > { %v3263_v19 = vpop.permute.xlu1 %3262  ;;  %v4127_v51 = vpop.permute.xlu0 %4126 }
 0x1aa   : > { %3300 = vst.msk [vmem:[#allocation3 + $0x58] sm:$0xff] %vm7199_vm8, %v3263_v19 }
 0x1ab   : > { %4165 = vst.msk [vmem:[#allocation3 + $0x50] sm:$0xff] %vm4154_vm13, %v4127_v51 }
 0x1ad   : > { %v3808_v1 = vpop.permute.xlu1 %3807 }
 0x1ae   : > { %3845 = vst.msk [vmem:[#allocation3 + $0x58] sm:$0xff] %vm3833_vm12, %v3808_v1 }
 0x1b0   : > { %v4129_v10 = vpop.permute.xlu0 %4128 }
 0x1b1   : > { %v1720_v7 = vpop.permute.xlu1 %1719  ;;  %4166 = vst.msk [vmem:[#allocation3 + $0x58] sm:$0xff] %vm4154_vm13, %v4129_v10 }
 0x1b2   : > { %v4181_v11 = vld [vmem:[#allocation3 + $0x50] sm:$0xff]  ;;  %1756 = vst.msk [vmem:[#allocation3 + $0x60] sm:$0xff] %vm1743_vm0, %v1720_v7 }
 0x1b3   : > { %5342 = vmatprep.mubr.msk.bf16.mxu1 %vm4207_vm15, %v4181_v11 }
 0x1b6   : > { %v1722_v52 = vpop.permute.xlu1 %1721  ;;  %v2044_v34 = vpop.permute.xlu0 %2043 }
 0x1b7   : > { %1757 = vst.msk [vmem:[#allocation3 + $0x68] sm:$0xff] %vm1743_vm0, %v1722_v52 }
 0x1b8   : > { %2080 = vst.msk [vmem:[#allocation3 + $0x60] sm:$0xff] %vm2067_vm1, %v2044_v34  ;;  %v4182_v61 = vld [vmem:[#allocation3 + $0x58] sm:$0xff] }
 0x1b9   : > { %5343 = vmatmul.mubr.msk.bf16.gmra.mrb[4].mxu1 %vm4207_vm15, %v4182_v61 }
 0x1ba   : > { %v2046_v12 = vpop.permute.xlu1 %2045  ;;  %v2221_v3 = vpop.permute.xlu0 %2220 }
 0x1bb   : > { %2081 = vst.msk [vmem:[#allocation3 + $0x68] sm:$0xff] %vm2067_vm1, %v2046_v12 }
 0x1bc   : > { %2257 = vst.msk [vmem:[#allocation3 + $0x60] sm:$0xff] %vm7200_vm11, %v2221_v3 }
 0x1c1   : > { %v2766_v60 = vpop.permute.xlu0 %2765  ;;  %v2223_v14 = vpop.permute.xlu1 %2222 }
 0x1c2   : > { %2802 = vst.msk [vmem:[#allocation3 + $0x60] sm:$0xff] %vm2789_vm5, %v2766_v60 }
 0x1c3   : > { %2258 = vst.msk [vmem:[#allocation3 + $0x68] sm:$0xff] %vm7201_vm14, %v2223_v14 }
 0x1c5   : > { %v3087_v23 = vpop.permute.xlu0 %3086 }
 0x1c6   : > { %3123 = vst.msk [vmem:[#allocation3 + $0x60] sm:$0xff] %vm3110_vm9, %v3087_v23 }
 0x1c9   : > { %v3265_v0 = vpop.permute.xlu0 %3264 }
 0x1ca   : > { %3301 = vst.msk [vmem:[#allocation3 + $0x60] sm:$0xff] %vm7202_vm3, %v3265_v0 }
 0x1d0   : > { %v2768_v29 = vpop.permute.xlu1 %2767 }
 0x1d1   : > { %2803 = vst.msk [vmem:[#allocation3 + $0x68] sm:$0xff] %vm2789_vm5, %v2768_v29  ;;  %v5324_v32 = vpop.f32.mrb[0].mxu0 }
 0x1d2   : > { %v3810_v42 = vpop.permute.xlu0 %3809  ;;  %v5267_v55 = vpack.c.bf16 %v5324_v32, %v5324_v32  ;;  %v4294_v17 = vpop.f32.mrb[1].mxu0 }
 0x1d3   : > { %3846 = vst.msk [vmem:[#allocation3 + $0x60] sm:$0xff] %vm3833_vm12, %v3810_v42  ;;  %v5265_v48 = vpack.c.bf16 %v4294_v17, %v4294_v17  ;;  %v5325_v39 = vpop.f32.mrb[2].mxu0 }
 0x1d4   : > { %v3089_v13 = vpop.permute.xlu1 %3088  ;;  %4552 = vst.msk [vmem:[%s6765_s15 + $0x8] sm:$0xf] %vm4549_vm10, %v5267_v55  ;;  %v6771_v18 = vpack.c.bf16 %v5325_v39, %v5324_v32  ;;  %v5268_v15 = vpack.c.bf16 %v5325_v39, %v5325_v39  ;;  %v4297_v20 = vpop.f32.mrb[3].mxu0 }
 0x1d5   : > { %3124 = vst.msk [vmem:[#allocation3 + $0x68] sm:$0xff] %vm3110_vm9, %v3089_v13  ;;  %v6775_v28 = vpack.c.bf16 %v4297_v20, %v4294_v17  ;;  %v5266_v6 = vpack.c.bf16 %v4297_v20, %v4297_v20 }
 0x1d6   : > { %v4131_v62 = vpop.permute.xlu0 %4130  ;;  %4550 = vst.msk [vmem:[%s6765_s15] sm:$0xf] %vm4549_vm10, %v5265_v48  ;;  %4553 = vst.msk [vmem:[%s6765_s15 + $0xc] sm:$0xf] %vm4549_vm10, %v5268_v15 }
 0x1d7   : > { %4167 = vst.msk [vmem:[#allocation3 + $0x60] sm:$0xff] %vm4154_vm13, %v4131_v62 }
 0x1d8   : > { %v3267_v30 = vpop.permute.xlu1 %3266  ;;  %4551 = vst.msk [vmem:[%s6765_s15 + $0x4] sm:$0xf] %vm4549_vm10, %v5266_v6 }
 0x1d9   : > { %3302 = vst.msk [vmem:[#allocation3 + $0x68] sm:$0xff] %vm7203_vm4, %v3267_v30  ;;  %v5328_v47 = vpop.f32.mrb[4].mxu0 }
 0x1da   : > { %v5271_v44 = vpack.c.bf16 %v5328_v47, %v5328_v47  ;;  %v4310_v54 = vpop.f32.mrb[5].mxu0 }
 0x1db   : > { %v5269_v38 = vpack.c.bf16 %v4310_v54, %v4310_v54  ;;  %v5329_v45 = vpop.f32.mrb[6].mxu0 }
 0x1dc   : > { %4556 = vst.msk [vmem:[%s6765_s15 + $0x18] sm:$0xf] %vm4549_vm10, %v5271_v44  ;;  %v6785_v24 = vpack.c.bf16 %v5329_v45, %v5328_v47  ;;  %v5272_v40 = vpack.c.bf16 %v5329_v45, %v5329_v45  ;;  %v4313_v53 = vpop.f32.mrb[7].mxu0 }
 0x1dd   : > { %4554 = vst.msk [vmem:[%s6765_s15 + $0x10] sm:$0xf] %vm4549_vm10, %v5269_v38  ;;  %v6789_v26 = vpack.c.bf16 %v4313_v53, %v4310_v54  ;;  %v5270_v43 = vpack.c.bf16 %v4313_v53, %v4313_v53 }
 0x1de   : > { %v4133_v35 = vpop.permute.xlu0 %4132  ;;  %v4183_v49 = vld [vmem:[#allocation3 + $0x60] sm:$0xff]  ;;  %4557 = vst.msk [vmem:[%s6765_s15 + $0x1c] sm:$0xf] %vm4549_vm10, %v5272_v40 }
 0x1df   : > { %5346 = vmatprep.mubr.msk.bf16.mxu1 %vm4207_vm15, %v4183_v49  ;;  %v3812_v46 = vpop.permute.xlu1 %3811  ;;  %4555 = vst.msk [vmem:[%s6765_s15 + $0x14] sm:$0xf] %vm4549_vm10, %v5270_v43  ;;  %v4583_v49 = vunpack.c.h.bf16 %v6775_v28 }
 0x1e0   : > { %3847 = vst.msk [vmem:[#allocation3 + $0x68] sm:$0xff] %vm3833_vm12, %v3812_v46 }
 0x1e1   : > { %4168 = vst.msk [vmem:[#allocation3 + $0x68] sm:$0xff] %vm4154_vm13, %v4133_v35  ;;  %v4582_v35 = vunpack.c.l.bf16 %v6775_v28 }
 0x1e3   : > { %v2048_v57 = vpop.permute.xlu0 %2047  ;;  %v1724_v36 = vpop.permute.xlu1 %1723 }
 0x1e4   : > { %1758 = vst.msk [vmem:[#allocation3 + $0x70] sm:$0xff] %vm1743_vm0, %v1724_v36 }
 0x1e5   : > { %2082 = vst.msk [vmem:[#allocation3 + $0x70] sm:$0xff] %vm2067_vm1, %v2048_v57 }
 0x1e7   : > { %v2225_v33 = vpop.permute.xlu0 %2224  ;;  %v1726_v59 = vpop.permute.xlu1 %1725 }
 0x1e8   : > { %2259 = vst.msk [vmem:[#allocation3 + $0x70] sm:$0xff] %vm7196_vm2, %v2225_v33  ;;  %v4184_v9 = vld [vmem:[#allocation3 + $0x68] sm:$0xff] }
 0x1e9   : > { %1759 = vst.msk [vmem:[#allocation3 + $0x78] sm:$0xff] %vm1743_vm0, %v1726_v59  ;;  %5347 = vmatmul.mubr.msk.bf16.gmra.mrb[8].mxu1 %vm4207_vm15, %v4184_v9  ;;  %vm7206_vm0 = vmmov %vm7202_vm3  ;;  %v4584_v59 = vunpack.c.l.bf16 %v6771_v18 }
 0x1eb   : > { %v2050_v37 = vpop.permute.xlu1 %2049 }
 0x1ec   : > { %2083 = vst.msk [vmem:[#allocation3 + $0x78] sm:$0xff] %vm2067_vm1, %v2050_v37  ;;  %vm4614_vm1 = vcmask 64512   ;;  %v4585_v37 = vunpack.c.h.bf16 %v6771_v18 }
 0x1ed   : > { %v4615_v36 = vsel %vm4614_vm1, %v4582_v35, 0.0  ;;  %v4616_v33 = vsel %vm4614_vm1, %v4583_v49, 0.0 }
 0x1ee   : > { %v2770_v22 = vpop.permute.xlu0 %2769  ;;  %v4617_v9 = vadd.f32 %v4616_v33, %v4615_v36 }
 0x1ef   : > { %2804 = vst.msk [vmem:[#allocation3 + $0x70] sm:$0xff] %vm2789_vm5, %v2770_v22  ;;  %v4618_v22 = vsel %vm4614_vm1, %v4584_v59, 0.0 }
 0x1f1   : > { %v2227_v50 = vpop.permute.xlu1 %2226 }
 0x1f2   : > { %v3091_v41 = vpop.permute.xlu0 %3090  ;;  %2260 = vst.msk [vmem:[#allocation3 + $0x78] sm:$0xff] %vm7204_vm6, %v2227_v50  ;;  %v4586_v50 = vunpack.c.l.bf16 %v6789_v26 }
 0x1f3   : > { %3125 = vst.msk [vmem:[#allocation3 + $0x70] sm:$0xff] %vm3110_vm9, %v3091_v41  ;;  %v4619_v41 = vadd.f32 %v4618_v22, %v4617_v9 }
 0x1f6   : > { %v3269_v27 = vpop.permute.xlu0 %3268 }
 0x1f7   : > { %3303 = vst.msk [vmem:[#allocation3 + $0x70] sm:$0xff] %vm7205_vm7, %v3269_v27  ;;  %v4620_v27 = vsel %vm4614_vm1, %v4585_v37, 0.0 }
 0x1fe   : > { %v5332_v56 = vpop.f32.mrb[8].mxu0 }
 0x1ff   : > { %v2772_v21 = vpop.permute.xlu1 %2771  ;;  %v5275_v31 = vpack.c.bf16 %v5332_v56, %v5332_v56  ;;  %v4326_v2 = vpop.f32.mrb[9].mxu0 }
 0x200   : > { %2805 = vst.msk [vmem:[#allocation3 + $0x78] sm:$0xff] %vm2789_vm5, %v2772_v21  ;;  %v5273_v63 = vpack.c.bf16 %v4326_v2, %v4326_v2  ;;  %v5333_v58 = vpop.f32.mrb[10].mxu0  ;;  %v4621_v21 = vadd.f32 %v4620_v27, %v4619_v41  ;;  %vm4818_vm5 = vcmask 1040384  }
 0x201   : > { %4560 = vst.msk [vmem:[%s6765_s15 + $0x28] sm:$0xf] %vm4549_vm10, %v5275_v31  ;;  %v6810_v16 = vpack.c.bf16 %v5333_v58, %v5332_v56  ;;  %v5276_v8 = vpack.c.bf16 %v5333_v58, %v5333_v58  ;;  %v4329_v5 = vpop.f32.mrb[11].mxu0  ;;  %v4622_v56 = vsel %vm4614_vm1, %v4586_v50, 0.0  ;;  %v4587_v31 = vunpack.c.h.bf16 %v6789_v26 }
 0x202   : > { %4558 = vst.msk [vmem:[%s6765_s15 + $0x20] sm:$0xf] %vm4549_vm10, %v5273_v63  ;;  %v6814_v25 = vpack.c.bf16 %v4329_v5, %v4326_v2  ;;  %v5274_v4 = vpack.c.bf16 %v4329_v5, %v4329_v5  ;;  %v4623_v2 = vadd.f32 %v4622_v56, %v4621_v21  ;;  %v4588_v63 = vunpack.c.l.bf16 %v6785_v24 }
 0x203   : > { %v3093_v19 = vpop.permute.xlu1 %3092  ;;  %4561 = vst.msk [vmem:[%s6765_s15 + $0x2c] sm:$0xf] %vm4549_vm10, %v5276_v8  ;;  %v4624_v58 = vsel %vm4614_vm1, %v4587_v31, 0.0  ;;  %v4589_v5 = vunpack.c.h.bf16 %v6785_v24 }
 0x204   : > { %3126 = vst.msk [vmem:[#allocation3 + $0x78] sm:$0xff] %vm3110_vm9, %v3093_v19  ;;  %v3814_v51 = vpop.permute.xlu0 %3813  ;;  %v4625_v8 = vadd.f32 %v4624_v58, %v4623_v2  ;;  %v4590_v19 = vunpack.c.l.bf16 %v6814_v25  ;;  %vm4820_vm9 = vcmask 58368  }
 0x205   : > { %4559 = vst.msk [vmem:[%s6765_s15 + $0x24] sm:$0xf] %vm4549_vm10, %v5274_v4  ;;  %v4626_v4 = vsel %vm4614_vm1, %v4588_v63, 0.0 }
 0x206   : > { %3848 = vst.msk [vmem:[#allocation3 + $0x70] sm:$0xff] %vm3833_vm12, %v3814_v51  ;;  %v4627_v51 = vadd.f32 %v4626_v4, %v4625_v8 }
 0x207   : > { %v3271_v1 = vpop.permute.xlu1 %3270 }
 0x208   : > { %3304 = vst.msk [vmem:[#allocation3 + $0x78] sm:$0xff] %vm7206_vm0, %v3271_v1  ;;  %v4135_v10 = vpop.permute.xlu0 %4134  ;;  %v4628_v1 = vsel %vm4614_vm1, %v4589_v5, 0.0 }
 0x209   : > { %4169 = vst.msk [vmem:[#allocation3 + $0x70] sm:$0xff] %vm4154_vm13, %v4135_v10  ;;  %v4630_v10 = vsel %vm4614_vm1, %v4590_v19, 0.0 }
 0x20b   : > { %v3816_v7 = vpop.permute.xlu1 %3815 }
 0x20c   : > { %3849 = vst.msk [vmem:[#allocation3 + $0x78] sm:$0xff] %vm3833_vm12, %v3816_v7  ;;  %v4629_v7 = vadd.f32 %v4628_v1, %v4627_v51 }
 0x20f   : > { %v4137_v11 = vpop.permute.xlu1 %4136 }
 0x210   : > { %4170 = vst.msk [vmem:[#allocation3 + $0x78] sm:$0xff] %vm4154_vm13, %v4137_v11  ;;  %v4185_v52 = vld [vmem:[#allocation3 + $0x70] sm:$0xff]  ;;  %v4591_v11 = vunpack.c.h.bf16 %v6814_v25 }
 0x211   : > { %5350 = vmatprep.mubr.msk.bf16.mxu1 %vm4207_vm15, %v4185_v52  ;;  %v4631_v52 = vadd.f32 %v4630_v10, %v4629_v7 }
 0x217   : > { %v4186_v34 = vld [vmem:[#allocation3 + $0x78] sm:$0xff] }
 0x218   : > { %5351 = vmatmul.mubr.msk.bf16.gmra.mrb[12].mxu1 %vm4207_vm15, %v4186_v34  ;;  %v4592_v34 = vunpack.c.l.bf16 %v6810_v16 }
 0x230   : > { %v5336_v61 = vpop.f32.mrb[12].mxu0 }
 0x231   : > { %v5279_v12 = vpack.c.bf16 %v5336_v61, %v5336_v61  ;;  %v4342_v3 = vpop.f32.mrb[13].mxu0 }
 0x232   : > { %v5277_v60 = vpack.c.bf16 %v4342_v3, %v4342_v3  ;;  %v5337_v14 = vpop.f32.mrb[14].mxu0 }
 0x233   : > { %4564 = vst.msk [vmem:[%s6765_s15 + $0x38] sm:$0xf] %vm4549_vm10, %v5279_v12  ;;  %v6830_v23 = vpack.c.bf16 %v5337_v14, %v5336_v61  ;;  %v5280_v0 = vpack.c.bf16 %v5337_v14, %v5337_v14  ;;  %v4345_v29 = vpop.f32.mrb[15].mxu0  ;;  %v4632_v61 = vsel %vm4614_vm1, %v4591_v11, 0.0 }
 0x234   : > { %4562 = vst.msk [vmem:[%s6765_s15 + $0x30] sm:$0xf] %vm4549_vm10, %v5277_v60  ;;  %v6834_v42 = vpack.c.bf16 %v4345_v29, %v4342_v3  ;;  %v5278_v32 = vpack.c.bf16 %v4345_v29, %v4345_v29  ;;  %v4633_v12 = vadd.f32 %v4632_v61, %v4631_v52  ;;  %v4593_v3 = vunpack.c.h.bf16 %v6810_v16 }
 0x235   : > { %4565 = vst.msk [vmem:[%s6765_s15 + $0x3c] sm:$0xf] %vm4549_vm10, %v5280_v0  ;;  %v4634_v60 = vsel %vm4614_vm1, %v4592_v34, 0.0  ;;  %v4597_v36 = vunpack.c.h.bf16 %v6830_v23 }
 0x236   : > { %4563 = vst.msk [vmem:[%s6765_s15 + $0x34] sm:$0xf] %vm4549_vm10, %v5278_v32  ;;  %v4594_v14 = vunpack.c.l.bf16 %v6834_v42  ;;  %v4635_v0 = vadd.f32 %v4634_v60, %v4633_v12  ;;  %v4636_v29 = vsel %vm4614_vm1, %v4593_v3, 0.0 }
 0x237   : > { %v4644_v41 = vsel %vm4614_vm1, %v4597_v36, 0.0 }
 0x238   : > { %v4638_v32 = vsel %vm4614_vm1, %v4594_v14, 0.0 }
 0x25d   : > { %v5340_v13 = vpop.f32.mrb[0].mxu1 }
 0x25e   : > { %v5283_v55 = vpack.c.bf16 %v5340_v13, %v5340_v13  ;;  %v4358_v17 = vpop.f32.mrb[1].mxu1 }
 0x25f   : > { %v5281_v62 = vpack.c.bf16 %v4358_v17, %v4358_v17  ;;  %v5341_v48 = vpop.f32.mrb[2].mxu1 }
 0x260   : > { %4568 = vst.msk [vmem:[%s6765_s15 + $0x48] sm:$0xf] %vm4549_vm10, %v5283_v55  ;;  %v6842_v39 = vpack.c.bf16 %v5341_v48, %v5340_v13  ;;  %v5284_v15 = vpack.c.bf16 %v5341_v48, %v5341_v48  ;;  %v4361_v20 = vpop.f32.mrb[3].mxu1  ;;  %v4637_v13 = vadd.f32 %v4636_v29, %v4635_v0  ;;  %v4595_v55 = vunpack.c.h.bf16 %v6834_v42 }
 0x261   : > { %4566 = vst.msk [vmem:[%s6765_s15 + $0x40] sm:$0xf] %vm4549_vm10, %v5281_v62  ;;  %v6846_v6 = vpack.c.bf16 %v4361_v20, %v4358_v17  ;;  %v5282_v30 = vpack.c.bf16 %v4361_v20, %v4361_v20  ;;  %v4596_v20 = vunpack.c.l.bf16 %v6830_v23 }
 0x262   : > { %4569 = vst.msk [vmem:[%s6765_s15 + $0x4c] sm:$0xf] %vm4549_vm10, %v5284_v15  ;;  %v4639_v17 = vadd.f32 %v4638_v32, %v4637_v13  ;;  %v4600_v58 = vunpack.c.l.bf16 %v6842_v39  ;;  %v4601_v51 = vunpack.c.h.bf16 %v6842_v39 }
 0x263   : > { %4567 = vst.msk [vmem:[%s6765_s15 + $0x44] sm:$0xf] %vm4549_vm10, %v5282_v30  ;;  %v4640_v30 = vsel %vm4614_vm1, %v4595_v55, 0.0  ;;  %v4642_v33 = vsel %vm4614_vm1, %v4596_v20, 0.0  ;;  %v4598_v9 = vunpack.c.l.bf16 %v6846_v6  ;;  %v4599_v21 = vunpack.c.h.bf16 %v6846_v6 }
 0x264   : > { %v4650_v1 = vsel %vm4614_vm1, %v4600_v58, 0.0  ;;  %v4652_v52 = vsel %vm4614_vm1, %v4601_v51, 0.0 }
 0x265   : > { %v4646_v27 = vsel %vm4614_vm1, %v4598_v9, 0.0  ;;  %v4648_v8 = vsel %vm4614_vm1, %v4599_v21, 0.0 }
 0x28c   : > { %v5344_v47 = vpop.f32.mrb[4].mxu1 }
 0x28d   : > { %v5287_v44 = vpack.c.bf16 %v5344_v47, %v5344_v47  ;;  %v4374_v54 = vpop.f32.mrb[5].mxu1 }
 0x28e   : > { %v5285_v38 = vpack.c.bf16 %v4374_v54, %v4374_v54  ;;  %v5345_v45 = vpop.f32.mrb[6].mxu1 }
 0x28f   : > { %4572 = vst.msk [vmem:[%s6765_s15 + $0x58] sm:$0xf] %vm4549_vm10, %v5287_v44  ;;  %v6856_v40 = vpack.c.bf16 %v5345_v45, %v5344_v47  ;;  %v5288_v53 = vpack.c.bf16 %v5345_v45, %v5345_v45  ;;  %v4377_v46 = vpop.f32.mrb[7].mxu1 }
 0x290   : > { %4570 = vst.msk [vmem:[%s6765_s15 + $0x50] sm:$0xf] %vm4549_vm10, %v5285_v38  ;;  %v6860_v43 = vpack.c.bf16 %v4377_v46, %v4374_v54  ;;  %v5286_v57 = vpack.c.bf16 %v4377_v46, %v4377_v46  ;;  %v4641_v54 = vadd.f32 %v4640_v30, %v4639_v17 }
 0x291   : > { %4573 = vst.msk [vmem:[%s6765_s15 + $0x5c] sm:$0xf] %vm4549_vm10, %v5288_v53  ;;  %v4604_v29 = vunpack.c.l.bf16 %v6856_v40  ;;  %v4605_v17 = vunpack.c.h.bf16 %v6856_v40 }
 0x292   : > { %4571 = vst.msk [vmem:[%s6765_s15 + $0x54] sm:$0xf] %vm4549_vm10, %v5286_v57  ;;  %v4643_v22 = vadd.f32 %v4642_v33, %v4641_v54  ;;  %v4602_v10 = vunpack.c.l.bf16 %v6860_v43  ;;  %v4603_v60 = vunpack.c.h.bf16 %v6860_v43 }
 0x293   : > { %v4660_v30 = vsel %vm4614_vm1, %v4605_v17, 0.0 }
 0x294   : > { %v4645_v56 = vadd.f32 %v4644_v41, %v4643_v22  ;;  %v4654_v61 = vsel %vm4614_vm1, %v4602_v10, 0.0  ;;  %v4656_v32 = vsel %vm4614_vm1, %v4603_v60, 0.0 }
 0x296   : > { %v4647_v2 = vadd.f32 %v4646_v27, %v4645_v56 }
 0x298   : > { %v4649_v4 = vadd.f32 %v4648_v8, %v4647_v2 }
 0x29a   : > { %v4651_v7 = vadd.f32 %v4650_v1, %v4649_v4 }
 0x29c   : > { %v4653_v12 = vadd.f32 %v4652_v52, %v4651_v7 }
 0x29e   : > { %v4655_v0 = vadd.f32 %v4654_v61, %v4653_v12 }
 0x2a0   : > { %v4657_v13 = vadd.f32 %v4656_v32, %v4655_v0 }
 0x2bc   : > { %v5348_v62 = vpop.f32.mrb[8].mxu1 }
 0x2bd   : > { %v5291_v48 = vpack.c.bf16 %v5348_v62, %v5348_v62  ;;  %v4390_v15 = vpop.f32.mrb[9].mxu1 }
 0x2be   : > { %v5289_v47 = vpack.c.bf16 %v4390_v15, %v4390_v15  ;;  %v5349_v44 = vpop.f32.mrb[10].mxu1 }
 0x2bf   : > { %4576 = vst.msk [vmem:[%s6765_s15 + $0x68] sm:$0xf] %vm4549_vm10, %v5291_v48  ;;  %v6923_v38 = vpack.c.bf16 %v5349_v44, %v5348_v62  ;;  %v5292_v45 = vpack.c.bf16 %v5349_v44, %v5349_v44  ;;  %v4393_v53 = vpop.f32.mrb[11].mxu1  ;;  %v4658_v62 = vsel %vm4614_vm1, %v4604_v29, 0.0 }
 0x2c0   : > { %4574 = vst.msk [vmem:[%s6765_s15 + $0x60] sm:$0xf] %vm4549_vm10, %v5289_v47  ;;  %v6927_v46 = vpack.c.bf16 %v4393_v53, %v4390_v15  ;;  %v5290_v57 = vpack.c.bf16 %v4393_v53, %v4393_v53  ;;  %v4659_v15 = vadd.f32 %v4658_v62, %v4657_v13 }
 0x2c1   : > { %4577 = vst.msk [vmem:[%s6765_s15 + $0x6c] sm:$0xf] %vm4549_vm10, %v5292_v45  ;;  %v4608_v53 = vunpack.c.l.bf16 %v6923_v38  ;;  %v4609_v56 = vunpack.c.h.bf16 %v6923_v38 }
 0x2c2   : > { %4575 = vst.msk [vmem:[%s6765_s15 + $0x64] sm:$0xf] %vm4549_vm10, %v5290_v57  ;;  %v4606_v48 = vunpack.c.l.bf16 %v6927_v46  ;;  %v4661_v44 = vadd.f32 %v4660_v30, %v4659_v15  ;;  %v4607_v54 = vunpack.c.h.bf16 %v6927_v46 }
 0x2c3   : > { %v4666_v2 = vsel %vm4614_vm1, %v4608_v53, 0.0  ;;  %v4668_v32 = vsel %vm4614_vm1, %v4609_v56, 0.0 }
 0x2c4   : > { %v4662_v47 = vsel %vm4614_vm1, %v4606_v48, 0.0  ;;  %v4664_v57 = vsel %vm4614_vm1, %v4607_v54, 0.0 }
 0x2c5   : > { %v4663_v45 = vadd.f32 %v4662_v47, %v4661_v44 }
 0x2c7   : > { %v4665_v33 = vadd.f32 %v4664_v57, %v4663_v45 }
 0x2c9   : > { %v4667_v1 = vadd.f32 %v4666_v2, %v4665_v33 }
 0x2cb   : > { %v4669_v15 = vadd.f32 %v4668_v32, %v4667_v1 }
 0x2eb   : > { %v5352_v22 = vpop.f32.mrb[12].mxu1 }
 0x2ec   : > { %v5295_v41 = vpack.c.bf16 %v5352_v22, %v5352_v22  ;;  %v4406_v27 = vpop.f32.mrb[13].mxu1 }
 0x2ed   : > { %v5293_v8 = vpack.c.bf16 %v4406_v27, %v4406_v27  ;;  %v5353_v4 = vpop.f32.mrb[14].mxu1 }
 0x2ee   : > { %4580 = vst.msk [vmem:[%s6765_s15 + $0x78] sm:$0xf] %vm4549_vm10, %v5295_v41  ;;  %v6987_v7 = vpack.c.bf16 %v5353_v4, %v5352_v22  ;;  %v5296_v52 = vpack.c.bf16 %v5353_v4, %v5353_v4  ;;  %v4409_v61 = vpop.f32.mrb[15].mxu1 }
 0x2ef   : > { %4578 = vst.msk [vmem:[%s6765_s15 + $0x70] sm:$0xf] %vm4549_vm10, %v5293_v8  ;;  %v6991_v12 = vpack.c.bf16 %v4409_v61, %v4406_v27  ;;  %v5294_v0 = vpack.c.bf16 %v4409_v61, %v4409_v61 }
 0x2f0   : > { %4581 = vst.msk [vmem:[%s6765_s15 + $0x7c] sm:$0xf] %vm4549_vm10, %v5296_v52  ;;  %v4612_v30 = vunpack.c.l.bf16 %v6987_v7  ;;  %v4613_v45 = vunpack.c.h.bf16 %v6987_v7 }
 0x2f1   : > { %4579 = vst.msk [vmem:[%s6765_s15 + $0x74] sm:$0xf] %vm4549_vm10, %v5294_v0  ;;  %v4610_v13 = vunpack.c.l.bf16 %v6991_v12  ;;  %v4611_v62 = vunpack.c.h.bf16 %v6991_v12 }
 0x2f2   : > { %v4674_v22 = vsel %vm4614_vm1, %v4612_v30, 0.0  ;;  %v4676_v27 = vsel %vm4614_vm1, %v4613_v45, 0.0 }
 0x2f3   : > { %v4670_v47 = vsel %vm4614_vm1, %v4610_v13, 0.0  ;;  %v4672_v57 = vsel %vm4614_vm1, %v4611_v62, 0.0 }
 0x2f4   : > { %v4671_v44 = vadd.f32 %v4670_v47, %v4669_v15 }
 0x2f6   : > { %v4673_v33 = vadd.f32 %v4672_v57, %v4671_v44 }
 0x2f8   : > { %v4675_v41 = vadd.f32 %v4674_v22, %v4673_v33 }
 0x2fa   : > { %v4677_v2 = vadd.f32 %v4676_v27, %v4675_v41 }
 0x2fc   : > { %v4678_v8 = vrot.slane %v4677_v2, 4 }
 0x2fe   : > { %v4679_v4 = vadd.f32 %v4678_v8, %v4677_v2 }
 0x300   : > { %v4680_v1 = vrot.slane %v4679_v4, 2 }
 0x302   : > { %v4681_v52 = vadd.f32 %v4680_v1, %v4679_v4 }
 0x304   : > { %v4682_v61 = vrot.slane %v4681_v52, 1 }
 0x306   : > { %v7016_v0 = vadd.f32 %v4682_v61, %v4681_v52 }
 0x308   : > { %v7019_v32 = vmul.f32 0.00390625, %v7016_v0 }
 0x30a   : > { %v4685_v15 = vsub.f32 %v4582_v35, %v7019_v32  ;;  %v4686_v47 = vsub.f32 %v4583_v49, %v7019_v32  ;;  %v4687_v44 = vsub.f32 %v4584_v59, %v7019_v32  ;;  %v4688_v57 = vsub.f32 %v4585_v37, %v7019_v32 }
 0x30b   : > { %v4689_v41 = vsub.f32 %v4586_v50, %v7019_v32  ;;  %v4690_v28 = vsub.f32 %v4587_v31, %v7019_v32  ;;  %v4691_v18 = vsub.f32 %v4588_v63, %v7019_v32  ;;  %v4692_v50 = vsub.f32 %v4589_v5, %v7019_v32 }
 0x30c   : > { %v4717_v33 = vmul.f32 %v4685_v15, %v4685_v15  ;;  %v4718_v22 = vmul.f32 %v4686_v47, %v4686_v47  ;;  %v4719_v27 = vmul.f32 %v4687_v44, %v4687_v44  ;;  %v4720_v35 = vmul.f32 %v4688_v57, %v4688_v57 }
 0x30d   : > { %v4721_v37 = vmul.f32 %v4689_v41, %v4689_v41  ;;  %v4722_v26 = vmul.f32 %v4690_v28, %v4690_v28  ;;  %v4693_v52 = vsub.f32 %v4590_v19, %v7019_v32  ;;  %v4723_v61 = vmul.f32 %v4691_v18, %v4691_v18 }
 0x30e   : > { %v4749_v49 = vsel %vm4614_vm1, %v4717_v33, 0.0  ;;  %v4750_v59 = vsel %vm4614_vm1, %v4718_v22, 0.0  ;;  %v4752_v8 = vsel %vm4614_vm1, %v4719_v27, 0.0  ;;  %v4754_v31 = vsel %vm4614_vm1, %v4720_v35, 0.0 }
 0x30f   : > { %v4751_v2 = vadd.f32 %v4750_v59, %v4749_v49  ;;  %v4756_v15 = vsel %vm4614_vm1, %v4721_v37, 0.0  ;;  %v4694_v47 = vsub.f32 %v4591_v11, %v7019_v32  ;;  %v4724_v44 = vmul.f32 %v4692_v50, %v4692_v50 }
 0x310   : > { %v4758_v24 = vsel %vm4614_vm1, %v4722_v26, 0.0  ;;  %v4695_v57 = vsub.f32 %v4592_v34, %v7019_v32  ;;  %v4725_v33 = vmul.f32 %v4693_v52, %v4693_v52  ;;  %v4760_v22 = vsel %vm4614_vm1, %v4723_v61, 0.0 }
 0x311   : > { %v4753_v4 = vadd.f32 %v4752_v8, %v4751_v2  ;;  %v4696_v41 = vsub.f32 %v4593_v3, %v7019_v32  ;;  %v4726_v27 = vmul.f32 %v4694_v47, %v4694_v47  ;;  %v4762_v25 = vsel %vm4614_vm1, %v4724_v44, 0.0 }
 0x312   : > { %v4697_v28 = vsub.f32 %v4594_v14, %v7019_v32  ;;  %v4727_v35 = vmul.f32 %v4695_v57, %v4695_v57  ;;  %v4764_v49 = vsel %vm4614_vm1, %v4725_v33, 0.0  ;;  %v4698_v59 = vsub.f32 %v4595_v55, %v7019_v32 }
 0x313   : > { %v4755_v1 = vadd.f32 %v4754_v31, %v4753_v4  ;;  %v4728_v2 = vmul.f32 %v4696_v41, %v4696_v41  ;;  %v4766_v16 = vsel %vm4614_vm1, %v4726_v27, 0.0  ;;  %v4699_v18 = vsub.f32 %v4596_v20, %v7019_v32 }
 0x314   : > { %v4729_v37 = vmul.f32 %v4697_v28, %v4697_v28  ;;  %v4768_v8 = vsel %vm4614_vm1, %v4727_v35, 0.0  ;;  %v4700_v4 = vsub.f32 %v4597_v36, %v7019_v32  ;;  %v4730_v50 = vmul.f32 %v4698_v59, %v4698_v59 }
 0x315   : > { %v4757_v63 = vadd.f32 %v4756_v15, %v4755_v1  ;;  %v4770_v42 = vsel %vm4614_vm1, %v4728_v2, 0.0  ;;  %v4701_v26 = vsub.f32 %v4598_v9, %v7019_v32  ;;  %v4731_v31 = vmul.f32 %v4699_v18, %v4699_v18 }
 0x316   : > { %v4772_v1 = vsel %vm4614_vm1, %v4729_v37, 0.0  ;;  %v4702_v52 = vsub.f32 %v4599_v21, %v7019_v32  ;;  %v4732_v61 = vmul.f32 %v4700_v4, %v4700_v4  ;;  %v4774_v23 = vsel %vm4614_vm1, %v4730_v50, 0.0 }
 0x317   : > { %v4759_v5 = vadd.f32 %v4758_v24, %v4757_v63  ;;  %v4703_v15 = vsub.f32 %v4600_v58, %v7019_v32  ;;  %v4733_v63 = vmul.f32 %v4701_v26, %v4701_v26  ;;  %v4776_v47 = vsel %vm4614_vm1, %v4731_v31, 0.0 }
 0x318   : > { %v4704_v44 = vsub.f32 %v4601_v51, %v7019_v32  ;;  %v4734_v24 = vmul.f32 %v4702_v52, %v4702_v52  ;;  %v4778_v6 = vsel %vm4614_vm1, %v4732_v61, 0.0  ;;  %v4707_v41 = vsub.f32 %v4604_v29, %v7019_v32 }
 0x319   : > { %v4761_v19 = vadd.f32 %v4760_v22, %v4759_v5  ;;  %v4705_v5 = vsub.f32 %v4602_v10, %v7019_v32  ;;  %v4735_v57 = vmul.f32 %v4703_v15, %v4703_v15  ;;  %v4780_v33 = vsel %vm4614_vm1, %v4733_v63, 0.0 }
 0x31a   : > { %v4706_v22 = vsub.f32 %v4603_v60, %v7019_v32  ;;  %v4782_v39 = vsel %vm4614_vm1, %v4734_v24, 0.0  ;;  %v4709_v35 = vsub.f32 %v4606_v48, %v7019_v32  ;;  %v4710_v59 = vsub.f32 %v4607_v54, %v7019_v32 }
 0x31b   : > { %v4763_v11 = vadd.f32 %v4762_v25, %v4761_v19  ;;  %v4736_v19 = vmul.f32 %v4704_v44, %v4704_v44  ;;  %v4737_v27 = vmul.f32 %v4705_v5, %v4705_v5  ;;  %v4784_v25 = vsel %vm4614_vm1, %v4735_v57, 0.0 }
 0x31c   : > { %v4738_v28 = vmul.f32 %v4706_v22, %v4706_v22  ;;  %v4712_v37 = vsub.f32 %v4609_v56, %v7019_v32  ;;  %v4715_v26 = vsub.f32 %v4612_v30, %v7019_v32 }
 0x31d   : > { %v4765_v34 = vadd.f32 %v4764_v49, %v4763_v11  ;;  %v4708_v11 = vsub.f32 %v4605_v17, %v7019_v32  ;;  %v4786_v43 = vsel %vm4614_vm1, %v4736_v19, 0.0  ;;  %v4739_v49 = vmul.f32 %v4707_v41, %v4707_v41 }
 0x31e   : > { %v4790_v40 = vsel %vm4614_vm1, %v4738_v28, 0.0  ;;  %v4747_v61 = vmul.f32 %v4715_v26, %v4715_v26 }
 0x31f   : > { %v4767_v3 = vadd.f32 %v4766_v16, %v4765_v34  ;;  %v4788_v34 = vsel %vm4614_vm1, %v4737_v27, 0.0  ;;  %v4740_v2 = vmul.f32 %v4708_v11, %v4708_v11  ;;  %v4711_v16 = vsub.f32 %v4608_v53, %v7019_v32 }
 0x320   : > { %v4792_v18 = vsel %vm4614_vm1, %v4739_v49, 0.0 }
 0x321   : > { %v4769_v14 = vadd.f32 %v4768_v8, %v4767_v3  ;;  %v4741_v3 = vmul.f32 %v4709_v35, %v4709_v35  ;;  %v4742_v8 = vmul.f32 %v4710_v59, %v4710_v59  ;;  %v4794_v46 = vsel %vm4614_vm1, %v4740_v2, 0.0 }
 0x322   : > { %v4743_v4 = vmul.f32 %v4711_v16, %v4711_v16 }
 0x323   : > { %v4771_v55 = vadd.f32 %v4770_v42, %v4769_v14  ;;  %v4713_v14 = vsub.f32 %v4610_v13, %v7019_v32  ;;  %v4796_v50 = vsel %vm4614_vm1, %v4741_v3, 0.0  ;;  %v4714_v42 = vsub.f32 %v4611_v62, %v7019_v32 }
 0x324   : > { %v4798_v38 = vsel %vm4614_vm1, %v4742_v8, 0.0 }
 0x325   : > { %v4773_v20 = vadd.f32 %v4772_v1, %v4771_v55  ;;  %v4744_v55 = vmul.f32 %v4712_v37, %v4712_v37  ;;  %v4745_v31 = vmul.f32 %v4713_v14, %v4713_v14  ;;  %v4800_v1 = vsel %vm4614_vm1, %v4743_v4, 0.0 }
 0x326   : > { %v4746_v52 = vmul.f32 %v4714_v42, %v4714_v42 }
 0x327   : > { %v4775_v36 = vadd.f32 %v4774_v23, %v4773_v20  ;;  %v4716_v20 = vsub.f32 %v4613_v45, %v7019_v32  ;;  %v4802_v12 = vsel %vm4614_vm1, %v4744_v55, 0.0  ;;  %v4804_v23 = vsel %vm4614_vm1, %v4745_v31, 0.0 }
 0x328   : > { %v4806_v30 = vsel %vm4614_vm1, %v4746_v52, 0.0 }
 0x329   : > { %v4777_v9 = vadd.f32 %v4776_v47, %v4775_v36  ;;  %v4748_v15 = vmul.f32 %v4716_v20, %v4716_v20  ;;  %v4808_v47 = vsel %vm4614_vm1, %v4747_v61, 0.0 }
 0x32b   : > { %v4779_v21 = vadd.f32 %v4778_v6, %v4777_v9  ;;  %v4810_v44 = vsel %vm4614_vm1, %v4748_v15, 0.0 }
 0x32d   : > { %v4781_v58 = vadd.f32 %v4780_v33, %v4779_v21 }
 0x32f   : > { %v4783_v51 = vadd.f32 %v4782_v39, %v4781_v58 }
 0x331   : > { %v4785_v10 = vadd.f32 %v4784_v25, %v4783_v51 }
 0x333   : > { %v4787_v60 = vadd.f32 %v4786_v43, %v4785_v10 }
 0x335   : > { %v4789_v29 = vadd.f32 %v4788_v34, %v4787_v60 }
 0x337   : > { %v4791_v17 = vadd.f32 %v4790_v40, %v4789_v29 }
 0x339   : > { %v4793_v48 = vadd.f32 %v4792_v18, %v4791_v17 }
 0x33b   : > { %v4795_v54 = vadd.f32 %v4794_v46, %v4793_v48 }
 0x33d   : > { %v4797_v53 = vadd.f32 %v4796_v50, %v4795_v54 }
 0x33f   : > { %v4799_v56 = vadd.f32 %v4798_v38, %v4797_v53 }
 0x341   : > { %v4801_v13 = vadd.f32 %v4800_v1, %v4799_v56 }
 0x343   : > { %v4803_v62 = vadd.f32 %v4802_v12, %v4801_v13 }
 0x345   : > { %v4805_v36 = vadd.f32 %v4804_v23, %v4803_v62 }
 0x347   : > { %v4807_v63 = vadd.f32 %v4806_v30, %v4805_v36 }
 0x349   : > { %v4809_v9 = vadd.f32 %v4808_v47, %v4807_v63 }
 0x34b   : > { %v4811_v7 = vadd.f32 %v4810_v44, %v4809_v9 }
 0x34d   : > { %v4812_v45 = vrot.slane %v4811_v7, 4 }
 0x34f   : > { %v4813_v32 = vadd.f32 %v4812_v45, %v4811_v7 }
 0x351   : > { %v4814_v24 = vrot.slane %v4813_v32, 2 }
 0x353   : > { %v4815_v6 = vadd.f32 %v4814_v24, %v4813_v32 }
 0x355   : > { %v4816_v21 = vrot.slane %v4815_v6, 1 }
 0x357   : > { %v4817_v5 = vadd.f32 %v4816_v21, %v4815_v6 }
 0x359   : > { %v4819_v57 = vsel %vm4818_vm5, %v7016_v0, %v4817_v5 }
 0x35a   : > { %4821 = vst.msk [vmem:[%s411_s21] sm:$0x3] %vm4820_vm9, %v4819_v57 }
 0x35b PF: > { %s16_s20 = sadd.s32 1, %s5468_s20   ;;  %s7207_s18 = smov %s5464_s19 }
 0x35c   : > { %p13_p5 = scmp.ge.s32.totalorder %s16_s20, 4   ;;  %s7208_s19 = smov %s7210_s1 }
 0x35e   :  { %15 = sbr.rel (!%p13_p5) target bundleno = 2 (0x2), region = 87 }

</bundles_post_ra>
